<compile_context>
chip_gen: v6e
topology: v6e:2x2x1
jax: 0.10.0
libtpu: 0.0.40
codegen_flags: <defaults>
</compile_context>

<pallas_src>
import numpy as np
import jax
import jax.numpy as jnp
from jax.experimental import pallas as pl
from jax.experimental.pallas import tpu as pltpu

N_CONVS = 9               # initial conv + 2 convs per ConvBlock * 4 blocks
CIN_PAD = 8               # input channels padded to 8 for aligned im2col blocks
CANVAS_DTYPE = jnp.bfloat16


# ----------------------------- static plan helpers ---------------------------

def _plane(h, w, pad, k_reader):
    """A zero-padded activation canvas: (h+2p, w+2p) slab plus right slack that
    covers the largest static tap offset of the conv that reads it."""
    hp, wp = h + 2 * pad, w + 2 * pad
    return dict(h=h, w=w, hp=hp, wp=wp, pad=pad,
                length=hp * wp + (k_reader - 1) * (wp + 1))


def _valid_mask(hp, wp, hv, wv):
    """1.0 at slab positions q=r*wp+c holding a valid conv output (r<hv, c<wv)."""
    m = np.zeros((1, hp * wp), np.float32)
    for r in range(hv):
        m[0, r * wp:r * wp + wv] = 1.0
    return m


def _pool_matrix(src, hc, wc, stride, pad_pool, wp_dst, pad_dst, n_cols):
    """AvgPool2d(kernel=2, stride, pad, count_include_pad=True) as a matrix from
    the conv-output slab (row q = r*wp_src + c) to destination-canvas columns
    ((i+pad_dst)*wp_dst + (j+pad_dst)); all other columns stay zero so storing the
    pooled result also writes the destination's zero padding border."""
    ho = (hc + 2 * pad_pool - 2) // stride + 1
    wo = (wc + 2 * pad_pool - 2) // stride + 1
    P = np.zeros((src["hp"] * src["wp"], n_cols), np.float32)
    for i in range(ho):
        for j in range(wo):
            col = (i + pad_dst) * wp_dst + (j + pad_dst)
            for di in range(2):
                for dj in range(2):
                    r = i * stride - pad_pool + di
                    c = j * stride - pad_pool + dj
                    if 0 <= r < hc and 0 <= c < wc:
                        P[r * src["wp"] + c, col] += 0.25
    return P, ho, wo


# ------------------------------- kernel --------------------------------------

def _build_kernel(convs, hid, n_masks, n_pools):
    n_in = 1 + N_CONVS + 1 + n_masks + n_pools + 3

    def kernel(*refs):
        x_ref = refs[0]
        w_refs = refs[1:1 + N_CONVS]
        bias_ref = refs[1 + N_CONVS]
        idx = 2 + N_CONVS
        mask_refs = refs[idx:idx + n_masks]
        idx += n_masks
        pool_refs = refs[idx:idx + n_pools]
        idx += n_pools
        comb_ref, wf_ref, bout_ref = refs[idx:idx + 3]
        o_ref = refs[n_in]
        canvases = refs[n_in + 1:n_in + 1 + (N_CONVS - 1)]
        col_ref = refs[n_in + 1 + (N_CONVS - 1)]

        bufs = (x_ref,) + tuple(canvases)   # conv i reads bufs[i], writes bufs[i+1]

        for i, cfg in enumerate(convs):
            src = bufs[i]
            K, blk, wp, hpwp = cfg["K"], cfg["blk"], cfg["wp"], cfg["hpwp"]

            # --- im2col gather: K*K statically shifted slabs -> one contiguous operand
            for kh in range(K):
                for kw in range(K):
                    r0 = (kh * K + kw) * blk
                    off = kh * wp + kw
                    col_ref[r0:r0 + blk, :hpwp] = src[:, off:off + hpwp]
            rows = K * K * blk

            # --- ONE MXU matmul per conv (BN scale pre-folded into bf16 weights)
            acc = jnp.dot(w_refs[i][...], col_ref[:rows, :hpwp],
                          preferred_element_type=jnp.float32)      # (hid, hpwp) f32
            y = jnp.maximum(acc + bias_ref[i], 0.0)
            # Squash garbage columns (taps that wrapped into the next row / read the
            # never-written slack) to exact zeros.  jnp.where -- not multiply -- so
            # NaN/Inf from uninitialized slack cannot leak into valid positions.
            y = jnp.where(mask_refs[cfg["mask"]][...] != 0.0, y, 0.0)

            if cfg["kind"] == "same":
                # Source and destination slabs have identical (Hp, Wp): one constant-
                # offset whole-slab write (masked zeros become the border), plus a
                # tiny top/left-border prefix zero store.
                dst = bufs[i + 1]
                sh = cfg["shift"]
                dst[:, :sh] = jnp.zeros((hid, sh), CANVAS_DTYPE)
                dst[:, sh:sh + hpwp] = y.astype(CANVAS_DTYPE)
            elif cfg["kind"] == "pool":
                # Pool matrix is in destination-canvas coordinates: one matmul, one
                # whole-canvas write (border + slack come out as zeros).
                dst = bufs[i + 1]
                pn = cfg["pn"]                                      # trimmed rows
                pooled = jnp.dot(y[:, :pn].astype(CANVAS_DTYPE),
                                 pool_refs[cfg["pool"]][...],
                                 preferred_element_type=jnp.float32)
                dst[...] = pooled.astype(CANVAS_DTYPE)
            else:  # readout: final AvgPool folded into comb = P4 @ Wspatial_norm
                h_sp = jnp.dot(y, comb_ref[...],
                               preferred_element_type=jnp.float32)  # (hid, N)
                o_ref[...] = (jnp.sum(h_sp * wf_ref[...], axis=0, keepdims=True)
                              + bout_ref[...])

    return kernel


# ------------------------------- wrapper --------------------------------------

def convnet_forward(x_nchw, params):
    """Fused forward pass. x_nchw: (B, 3, H, W) float32 (PyTorch NCHW layout)."""
    x = x_nchw.astype(jnp.float32)
    B, cin, H, W = x.shape
    hid = params["w_init"].shape[2]
    N = params["b_out"].shape[-1]

    # Spatial sizes through the network (PyTorch conv/pool arithmetic).
    H1, W1 = H - 2, W - 2                                  # initial conv: k=5, p=1
    H2, W2 = (H1 - 2) // 2 + 1, (W1 - 2) // 2 + 1          # block1 + pool 2/2
    H3, W3 = (H2 - 2) // 2 + 1, (W2 - 2) // 2 + 1          # block2 + pool 2/2
    H4, W4 = (H3 - 2) // 2 + 1, (W3 - 2) // 2 + 1          # block3 + pool 2/2
    H5, W5 = H4 + 1, W4 + 1                                # block4 + pool k=2,s=1,p=1
    S = H5 * W5
    assert params["W_spatial"].shape[0] == S, (params["W_spatial"].shape, S)

    planes = [
        _plane(H, W, 1, 5),      # 0: padded input image (read by the k=5 init conv)
        _plane(H1, W1, 2, 5),    # 1
        _plane(H1, W1, 2, 5),    # 2
        _plane(H2, W2, 1, 3),    # 3
        _plane(H2, W2, 1, 3),    # 4
        _plane(H3, W3, 1, 3),    # 5
        _plane(H3, W3, 1, 3),    # 6
        _plane(H4, W4, 1, 3),    # 7
        _plane(H4, W4, 1, 3),    # 8
    ]
    kernel_sizes = [5, 5, 5, 3, 3, 3, 3, 3, 3]
    blks = [CIN_PAD] + [hid] * 8
    pool_at = {2: (2, 0), 4: (2, 0), 6: (2, 0), 8: (1, 1)}   # conv idx -> (stride, pad)

    mask_key_to_idx, mask_list = {}, []
    pool_mats, convs = [], []
    P4 = None
    for i in range(N_CONVS):
        sp = planes[i]
        K = kernel_sizes[i]
        hv, wv = sp["hp"] - K + 1, sp["wp"] - K + 1          # valid conv output size
        key = (sp["hp"], sp["wp"], hv, wv)
        if key not in mask_key_to_idx:
            mask_key_to_idx[key] = len(mask_list)
            mask_list.append(jnp.asarray(_valid_mask(*key)))
        cfg = dict(K=K, blk=blks[i], wp=sp["wp"], hpwp=sp["hp"] * sp["wp"],
                   mask=mask_key_to_idx[key])
        if i == N_CONVS - 1:
            stride, pad_pool = pool_at[i]
            P4, ho, wo = _pool_matrix(sp, hv, wv, stride, pad_pool, W5, 0, S)
            assert (ho, wo) == (H5, W5)
            cfg["kind"] = "readout"
        elif i in pool_at:
            stride, pad_pool = pool_at[i]
            dp = planes[i + 1]
            P, ho, wo = _pool_matrix(sp, hv, wv, stride, pad_pool,
                                     dp["wp"], dp["pad"], dp["length"])
            assert (ho, wo) == (dp["h"], dp["w"])
            pn = (hv - 1) * sp["wp"] + wv                    # last non-zero row + 1
            cfg.update(kind="pool", pool=len(pool_mats), pn=pn)
            pool_mats.append(jnp.asarray(P[:pn]).astype(CANVAS_DTYPE))
        else:
            dp = planes[i + 1]
            assert dp["wp"] == sp["wp"]                      # constant-offset slab write
            cfg.update(kind="same", shift=dp["pad"] * (dp["wp"] + 1))
        convs.append(cfg)

    # ---- constant operand prep (once per call, outside the kernel) ----
    # Fold eval-mode BN scale into the conv weights; reshape to the im2col layout
    # (Cout, K*K*blk) with tap order (kh, kw, cin); cast to bf16 MXU operands.
    def prep_w(w, scale, blk):
        K = w.shape[0]
        cout, cin = w.shape[2], w.shape[3]
        w = w * scale[None, None, :, None]
        if blk != cin:
            w = jnp.pad(w, ((0, 0), (0, 0), (0, 0), (0, blk - cin)))
        return jnp.transpose(w, (2, 0, 1, 3)).reshape(cout, K * K * blk).astype(CANVAS_DTYPE)

    w_raw = [params["w_init"], params["w1a"], params["w1b"], params["w2a"],
             params["w2b"], params["w3a"], params["w3b"], params["w4a"], params["w4b"]]
    w_list = [prep_w(w, params["bn_scale"][i], blks[i]) for i, w in enumerate(w_raw)]
    bias = params["bn_bias"].reshape(N_CONVS, hid, 1).astype(jnp.float32)

    # W_spatial |.| / column-L2-norm is identical for every image; the final
    # AvgPool(k=2,s=1,p=1) is folded in:  comb = P4 @ Wsp_norm.
    # TODO(synk): no epsilon in the norm, matching the PyTorch forward; an
    # all-zero W_spatial column would produce NaN there too.
    wsp = jnp.abs(params["W_spatial"])
    wsp = wsp / jnp.linalg.norm(wsp, ord=2, axis=0, keepdims=True)
    comb = (jnp.asarray(P4) @ wsp).astype(jnp.float32)                # (hpwp8, N)

    # Zero-padded input canvas built once in the wrapper: channels padded to
    # CIN_PAD, spatial padded by 1, lanes padded with the tap-overreach slack.
    L0 = planes[0]["length"]
    xp = jnp.pad(x, ((0, 0), (0, CIN_PAD - cin), (1, 1), (1, 1)))
    xp = xp.reshape(B, CIN_PAD, planes[0]["hp"] * planes[0]["wp"])
    xp = jnp.pad(xp, ((0, 0), (0, 0), (0, L0 - xp.shape[-1]))).astype(CANVAS_DTYPE)

    rows_max = max(c["K"] * c["K"] * c["blk"] for c in convs)
    cols_max = max(c["hpwp"] for c in convs)

    zero2 = lambda b: (0, 0)
    zero3 = lambda b: (0, 0, 0)
    in_specs = [pl.BlockSpec((None, CIN_PAD, L0), lambda b: (b, 0, 0))]
    in_specs += [pl.BlockSpec(w.shape, zero2) for w in w_list]
    in_specs += [pl.BlockSpec((N_CONVS, hid, 1), zero3)]
    in_specs += [pl.BlockSpec(m.shape, zero2) for m in mask_list]
    in_specs += [pl.BlockSpec(p.shape, zero2) for p in pool_mats]
    in_specs += [pl.BlockSpec(comb.shape, zero2),
                 pl.BlockSpec((hid, N), zero2),
                 pl.BlockSpec((1, N), zero2)]

    scratch = [pltpu.VMEM((hid, planes[i]["length"]), CANVAS_DTYPE)
               for i in range(1, N_CONVS)]                            # canvases 1..8
    scratch.append(pltpu.VMEM((rows_max, cols_max), CANVAS_DTYPE))    # shared im2col

    # TODO(synk): on v5e/v6e, processing several images per grid step (canvases
    # widened to (hid, Bt*len)) would fill more of the 128-lane vreg in the later
    # 81/25/9-lane layers; kept at one image/step so the parallel grid stays a
    # multiple of v7x's two TensorCores at small batch sizes.
    out = pl.pallas_call(
        _build_kernel(convs, hid, len(mask_list), len(pool_mats)),
        out_shape=jax.ShapeDtypeStruct((B, 1, N), jnp.float32),
        grid=(B,),
        in_specs=in_specs,
        out_specs=pl.BlockSpec((None, 1, N), lambda b: (b, 0, 0)),
        scratch_shapes=scratch,
        compiler_params=pltpu.CompilerParams(
            dimension_semantics=("parallel",)),
    )(xp, *w_list, bias, *mask_list, *pool_mats,
      comb, params["W_features"].astype(jnp.float32),
      params["b_out"].reshape(1, N).astype(jnp.float32))
    return out.reshape(B, N)


# ------------------------------- params ---------------------------------------

def init_params(key, hid, num_voxels, W, H):
    keys = jax.random.split(key, 11)

    def conv_w(k, kh, kw, cin, cout):
        fan_in = kh * kw * cin
        # Stored as (KH, KW, Cout, Cin); a PyTorch checkpoint (Cout, Cin, KH, KW)
        # would map via w.transpose(2, 3, 0, 1).
        return jax.random.normal(k, (kh, kw, cout, cin), jnp.float32) / jnp.sqrt(fan_in)

    S = int(W / 2 ** 3) * int(H / 2 ** 3)
    eps = 1e-5
    # TODO(synk): BatchNorm is folded in eval mode with freshly initialized
    # statistics (gamma=1, beta=0, running_mean=0, running_var=1); training-mode
    # batch statistics are not reproduced.  Per-layer scale/bias slots are kept
    # so real per-layer BN parameters could be folded in.
    return dict(
        w_init=conv_w(keys[0], 5, 5, 3, hid),
        w1a=conv_w(keys[1], 5, 5, hid, hid), w1b=conv_w(keys[2], 5, 5, hid, hid),
        w2a=conv_w(keys[3], 3, 3, hid, hid), w2b=conv_w(keys[4], 3, 3, hid, hid),
        w3a=conv_w(keys[5], 3, 3, hid, hid), w3b=conv_w(keys[6], 3, 3, hid, hid),
        w4a=conv_w(keys[7], 3, 3, hid, hid), w4b=conv_w(keys[8], 3, 3, hid, hid),
        bn_scale=jnp.full((N_CONVS, hid), 1.0 / np.sqrt(1.0 + eps), jnp.float32),
        bn_bias=jnp.zeros((N_CONVS, hid), jnp.float32),
        W_spatial=jax.random.truncated_normal(
            keys[9], -2.0, 2.0, (S, num_voxels), jnp.float32) * 0.01,
        W_features=jax.random.truncated_normal(
            keys[10], -2.0, 2.0, (hid, num_voxels), jnp.float32) * 0.01,
        b_out=jnp.zeros((num_voxels,), jnp.float32),
    )


# --------------------------------- main ----------------------------------------

if __name__ == "__main__":
    key = jax.random.PRNGKey(0)
    pkey, xkey = jax.random.split(key)

    B, Himg, Wimg = 2, 16, 16
    hid_channels = 16
    num_voxels = 8

    params = init_params(pkey, hid_channels, num_voxels, Wimg, Himg)
    x = jax.random.normal(xkey, (B, 3, Himg, Wimg), jnp.float32)   # NCHW, like PyTorch

    fwd = jax.jit(convnet_forward)
    out = jax.block_until_ready(fwd(x, params))
    assert out.shape == (B, num_voxels), out.shape
    assert bool(jnp.all(jnp.isfinite(out)))
    print("KERNEL_OK")
</pallas_src>

<mosaic_0001>
module attributes {stable_mosaic.version = 11 : i64} {
  func.func @kernel(%arg0: i32, %arg1: memref<1x8x400xbf16, #tpu.memory_space<vmem>>, %arg2: memref<16x200xbf16, #tpu.memory_space<vmem>>, %arg3: memref<16x400xbf16, #tpu.memory_space<vmem>>, %arg4: memref<16x400xbf16, #tpu.memory_space<vmem>>, %arg5: memref<16x144xbf16, #tpu.memory_space<vmem>>, %arg6: memref<16x144xbf16, #tpu.memory_space<vmem>>, %arg7: memref<16x144xbf16, #tpu.memory_space<vmem>>, %arg8: memref<16x144xbf16, #tpu.memory_space<vmem>>, %arg9: memref<16x144xbf16, #tpu.memory_space<vmem>>, %arg10: memref<16x144xbf16, #tpu.memory_space<vmem>>, %arg11: memref<9x16x1xf32, #tpu.memory_space<vmem>>, %arg12: memref<1x324xf32, #tpu.memory_space<vmem>>, %arg13: memref<1x81xf32, #tpu.memory_space<vmem>>, %arg14: memref<1x25xf32, #tpu.memory_space<vmem>>, %arg15: memref<1x9xf32, #tpu.memory_space<vmem>>, %arg16: memref<248x101xbf16, #tpu.memory_space<vmem>>, %arg17: memref<61x37xbf16, #tpu.memory_space<vmem>>, %arg18: memref<13x17xbf16, #tpu.memory_space<vmem>>, %arg19: memref<9x8xf32, #tpu.memory_space<vmem>>, %arg20: memref<16x8xf32, #tpu.memory_space<vmem>>, %arg21: memref<1x8xf32, #tpu.memory_space<vmem>>, %arg22: memref<1x1x8xf32, #tpu.memory_space<vmem>>, %arg23: memref<16x400xbf16, #tpu.memory_space<vmem>>, %arg24: memref<16x400xbf16, #tpu.memory_space<vmem>>, %arg25: memref<16x101xbf16, #tpu.memory_space<vmem>>, %arg26: memref<16x101xbf16, #tpu.memory_space<vmem>>, %arg27: memref<16x37xbf16, #tpu.memory_space<vmem>>, %arg28: memref<16x37xbf16, #tpu.memory_space<vmem>>, %arg29: memref<16x17xbf16, #tpu.memory_space<vmem>>, %arg30: memref<16x17xbf16, #tpu.memory_space<vmem>>, %arg31: memref<400x324xbf16, #tpu.memory_space<vmem>>) attributes {dimension_semantics = [#tpu.dimension_semantics<parallel>], iteration_bounds = array<i64: 2>, scalar_prefetch = 0 : i64, scratch_operands = 9 : i64, tpu.core_type = #tpu.core_type<tc>, window_params = [{transform_indices = @transform_0, window_bounds = array<i64: 1, 8, 400>}, {pipeline_mode = #tpu.pipeline_mode<synchronous>, transform_indices = @transform_1, window_bounds = array<i64: 16, 200>}, {pipeline_mode = #tpu.pipeline_mode<synchronous>, transform_indices = @transform_2, window_bounds = array<i64: 16, 400>}, {pipeline_mode = #tpu.pipeline_mode<synchronous>, transform_indices = @transform_3, window_bounds = array<i64: 16, 400>}, {pipeline_mode = #tpu.pipeline_mode<synchronous>, transform_indices = @transform_4, window_bounds = array<i64: 16, 144>}, {pipeline_mode = #tpu.pipeline_mode<synchronous>, transform_indices = @transform_5, window_bounds = array<i64: 16, 144>}, {pipeline_mode = #tpu.pipeline_mode<synchronous>, transform_indices = @transform_6, window_bounds = array<i64: 16, 144>}, {pipeline_mode = #tpu.pipeline_mode<synchronous>, transform_indices = @transform_7, window_bounds = array<i64: 16, 144>}, {pipeline_mode = #tpu.pipeline_mode<synchronous>, transform_indices = @transform_8, window_bounds = array<i64: 16, 144>}, {pipeline_mode = #tpu.pipeline_mode<synchronous>, transform_indices = @transform_9, window_bounds = array<i64: 16, 144>}, {pipeline_mode = #tpu.pipeline_mode<synchronous>, transform_indices = @transform_10, window_bounds = array<i64: 9, 16, 1>}, {pipeline_mode = #tpu.pipeline_mode<synchronous>, transform_indices = @transform_11, window_bounds = array<i64: 1, 324>}, {pipeline_mode = #tpu.pipeline_mode<synchronous>, transform_indices = @transform_12, window_bounds = array<i64: 1, 81>}, {pipeline_mode = #tpu.pipeline_mode<synchronous>, transform_indices = @transform_13, window_bounds = array<i64: 1, 25>}, {pipeline_mode = #tpu.pipeline_mode<synchronous>, transform_indices = @transform_14, window_bounds = array<i64: 1, 9>}, {pipeline_mode = #tpu.pipeline_mode<synchronous>, transform_indices = @transform_15, window_bounds = array<i64: 248, 101>}, {pipeline_mode = #tpu.pipeline_mode<synchronous>, transform_indices = @transform_16, window_bounds = array<i64: 61, 37>}, {pipeline_mode = #tpu.pipeline_mode<synchronous>, transform_indices = @transform_17, window_bounds = array<i64: 13, 17>}, {pipeline_mode = #tpu.pipeline_mode<synchronous>, transform_indices = @transform_18, window_bounds = array<i64: 9, 8>}, {pipeline_mode = #tpu.pipeline_mode<synchronous>, transform_indices = @transform_19, window_bounds = array<i64: 16, 8>}, {pipeline_mode = #tpu.pipeline_mode<synchronous>, transform_indices = @transform_20, window_bounds = array<i64: 1, 8>}, {transform_indices = @transform_21, window_bounds = array<i64: 1, 1, 8>}]} {
    %c0 = arith.constant 0 : index
    %c0_0 = arith.constant 0 : index
    %c0_1 = arith.constant 0 : index
    %0 = vector.load %arg1[%c0, %c0_0, %c0_1] : memref<1x8x400xbf16, #tpu.memory_space<vmem>>, vector<1x8x324xbf16>
    %1 = vector.shape_cast %0 : vector<1x8x324xbf16> to vector<8x324xbf16>
    %c0_2 = arith.constant 0 : index
    %c0_3 = arith.constant 0 : index
    %2 = vector.load %arg31[%c0_2, %c0_3] : memref<400x324xbf16, #tpu.memory_space<vmem>>, vector<8x324xbf16>
    tpu.vector_store %arg31[%c0_2, %c0_3], %1 {strides = array<i32>} : memref<400x324xbf16, #tpu.memory_space<vmem>>, vector<8x324xbf16>,
    %c0_4 = arith.constant 0 : index
    %c0_5 = arith.constant 0 : index
    %c1 = arith.constant 1 : index
    %3 = vector.load %arg1[%c0_4, %c0_5, %c1] : memref<1x8x400xbf16, #tpu.memory_space<vmem>>, vector<1x8x324xbf16>
    %4 = vector.shape_cast %3 : vector<1x8x324xbf16> to vector<8x324xbf16>
    %c8 = arith.constant 8 : index
    %c0_6 = arith.constant 0 : index
    %5 = vector.load %arg31[%c8, %c0_6] : memref<400x324xbf16, #tpu.memory_space<vmem>>, vector<8x324xbf16>
    tpu.vector_store %arg31[%c8, %c0_6], %4 {strides = array<i32>} : memref<400x324xbf16, #tpu.memory_space<vmem>>, vector<8x324xbf16>,
    %c0_7 = arith.constant 0 : index
    %c0_8 = arith.constant 0 : index
    %c2 = arith.constant 2 : index
    %6 = vector.load %arg1[%c0_7, %c0_8, %c2] : memref<1x8x400xbf16, #tpu.memory_space<vmem>>, vector<1x8x324xbf16>
    %7 = vector.shape_cast %6 : vector<1x8x324xbf16> to vector<8x324xbf16>
    %c16 = arith.constant 16 : index
    %c0_9 = arith.constant 0 : index
    %8 = vector.load %arg31[%c16, %c0_9] : memref<400x324xbf16, #tpu.memory_space<vmem>>, vector<8x324xbf16>
    tpu.vector_store %arg31[%c16, %c0_9], %7 {strides = array<i32>} : memref<400x324xbf16, #tpu.memory_space<vmem>>, vector<8x324xbf16>,
    %c0_10 = arith.constant 0 : index
    %c0_11 = arith.constant 0 : index
    %c3 = arith.constant 3 : index
    %9 = vector.load %arg1[%c0_10, %c0_11, %c3] : memref<1x8x400xbf16, #tpu.memory_space<vmem>>, vector<1x8x324xbf16>
    %10 = vector.shape_cast %9 : vector<1x8x324xbf16> to vector<8x324xbf16>
    %c24 = arith.constant 24 : index
    %c0_12 = arith.constant 0 : index
    %11 = vector.load %arg31[%c24, %c0_12] : memref<400x324xbf16, #tpu.memory_space<vmem>>, vector<8x324xbf16>
    tpu.vector_store %arg31[%c24, %c0_12], %10 {strides = array<i32>} : memref<400x324xbf16, #tpu.memory_space<vmem>>, vector<8x324xbf16>,
    %c0_13 = arith.constant 0 : index
    %c0_14 = arith.constant 0 : index
    %c4 = arith.constant 4 : index
    %12 = vector.load %arg1[%c0_13, %c0_14, %c4] : memref<1x8x400xbf16, #tpu.memory_space<vmem>>, vector<1x8x324xbf16>
    %13 = vector.shape_cast %12 : vector<1x8x324xbf16> to vector<8x324xbf16>
    %c32 = arith.constant 32 : index
    %c0_15 = arith.constant 0 : index
    %14 = vector.load %arg31[%c32, %c0_15] : memref<400x324xbf16, #tpu.memory_space<vmem>>, vector<8x324xbf16>
    tpu.vector_store %arg31[%c32, %c0_15], %13 {strides = array<i32>} : memref<400x324xbf16, #tpu.memory_space<vmem>>, vector<8x324xbf16>,
    %c0_16 = arith.constant 0 : index
    %c0_17 = arith.constant 0 : index
    %c18 = arith.constant 18 : index
    %15 = vector.load %arg1[%c0_16, %c0_17, %c18] : memref<1x8x400xbf16, #tpu.memory_space<vmem>>, vector<1x8x324xbf16>
    %16 = vector.shape_cast %15 : vector<1x8x324xbf16> to vector<8x324xbf16>
    %c40 = arith.constant 40 : index
    %c0_18 = arith.constant 0 : index
    %17 = vector.load %arg31[%c40, %c0_18] : memref<400x324xbf16, #tpu.memory_space<vmem>>, vector<8x324xbf16>
    tpu.vector_store %arg31[%c40, %c0_18], %16 {strides = array<i32>} : memref<400x324xbf16, #tpu.memory_space<vmem>>, vector<8x324xbf16>,
    %c0_19 = arith.constant 0 : index
    %c0_20 = arith.constant 0 : index
    %c19 = arith.constant 19 : index
    %18 = vector.load %arg1[%c0_19, %c0_20, %c19] : memref<1x8x400xbf16, #tpu.memory_space<vmem>>, vector<1x8x324xbf16>
    %19 = vector.shape_cast %18 : vector<1x8x324xbf16> to vector<8x324xbf16>
    %c48 = arith.constant 48 : index
    %c0_21 = arith.constant 0 : index
    %20 = vector.load %arg31[%c48, %c0_21] : memref<400x324xbf16, #tpu.memory_space<vmem>>, vector<8x324xbf16>
    tpu.vector_store %arg31[%c48, %c0_21], %19 {strides = array<i32>} : memref<400x324xbf16, #tpu.memory_space<vmem>>, vector<8x324xbf16>,
    %c0_22 = arith.constant 0 : index
    %c0_23 = arith.constant 0 : index
    %c20 = arith.constant 20 : index
    %21 = vector.load %arg1[%c0_22, %c0_23, %c20] : memref<1x8x400xbf16, #tpu.memory_space<vmem>>, vector<1x8x324xbf16>
    %22 = vector.shape_cast %21 : vector<1x8x324xbf16> to vector<8x324xbf16>
    %c56 = arith.constant 56 : index
    %c0_24 = arith.constant 0 : index
    %23 = vector.load %arg31[%c56, %c0_24] : memref<400x324xbf16, #tpu.memory_space<vmem>>, vector<8x324xbf16>
    tpu.vector_store %arg31[%c56, %c0_24], %22 {strides = array<i32>} : memref<400x324xbf16, #tpu.memory_space<vmem>>, vector<8x324xbf16>,
    %c0_25 = arith.constant 0 : index
    %c0_26 = arith.constant 0 : index
    %c21 = arith.constant 21 : index
    %24 = vector.load %arg1[%c0_25, %c0_26, %c21] : memref<1x8x400xbf16, #tpu.memory_space<vmem>>, vector<1x8x324xbf16>
    %25 = vector.shape_cast %24 : vector<1x8x324xbf16> to vector<8x324xbf16>
    %c64 = arith.constant 64 : index
    %c0_27 = arith.constant 0 : index
    %26 = vector.load %arg31[%c64, %c0_27] : memref<400x324xbf16, #tpu.memory_space<vmem>>, vector<8x324xbf16>
    tpu.vector_store %arg31[%c64, %c0_27], %25 {strides = array<i32>} : memref<400x324xbf16, #tpu.memory_space<vmem>>, vector<8x324xbf16>,
    %c0_28 = arith.constant 0 : index
    %c0_29 = arith.constant 0 : index
    %c22 = arith.constant 22 : index
    %27 = vector.load %arg1[%c0_28, %c0_29, %c22] : memref<1x8x400xbf16, #tpu.memory_space<vmem>>, vector<1x8x324xbf16>
    %28 = vector.shape_cast %27 : vector<1x8x324xbf16> to vector<8x324xbf16>
    %c72 = arith.constant 72 : index
    %c0_30 = arith.constant 0 : index
    %29 = vector.load %arg31[%c72, %c0_30] : memref<400x324xbf16, #tpu.memory_space<vmem>>, vector<8x324xbf16>
    tpu.vector_store %arg31[%c72, %c0_30], %28 {strides = array<i32>} : memref<400x324xbf16, #tpu.memory_space<vmem>>, vector<8x324xbf16>,
    %c0_31 = arith.constant 0 : index
    %c0_32 = arith.constant 0 : index
    %c36 = arith.constant 36 : index
    %30 = vector.load %arg1[%c0_31, %c0_32, %c36] : memref<1x8x400xbf16, #tpu.memory_space<vmem>>, vector<1x8x324xbf16>
    %31 = vector.shape_cast %30 : vector<1x8x324xbf16> to vector<8x324xbf16>
    %c80 = arith.constant 80 : index
    %c0_33 = arith.constant 0 : index
    %32 = vector.load %arg31[%c80, %c0_33] : memref<400x324xbf16, #tpu.memory_space<vmem>>, vector<8x324xbf16>
    tpu.vector_store %arg31[%c80, %c0_33], %31 {strides = array<i32>} : memref<400x324xbf16, #tpu.memory_space<vmem>>, vector<8x324xbf16>,
    %c0_34 = arith.constant 0 : index
    %c0_35 = arith.constant 0 : index
    %c37 = arith.constant 37 : index
    %33 = vector.load %arg1[%c0_34, %c0_35, %c37] : memref<1x8x400xbf16, #tpu.memory_space<vmem>>, vector<1x8x324xbf16>
    %34 = vector.shape_cast %33 : vector<1x8x324xbf16> to vector<8x324xbf16>
    %c88 = arith.constant 88 : index
    %c0_36 = arith.constant 0 : index
    %35 = vector.load %arg31[%c88, %c0_36] : memref<400x324xbf16, #tpu.memory_space<vmem>>, vector<8x324xbf16>
    tpu.vector_store %arg31[%c88, %c0_36], %34 {strides = array<i32>} : memref<400x324xbf16, #tpu.memory_space<vmem>>, vector<8x324xbf16>,
    %c0_37 = arith.constant 0 : index
    %c0_38 = arith.constant 0 : index
    %c38 = arith.constant 38 : index
    %36 = vector.load %arg1[%c0_37, %c0_38, %c38] : memref<1x8x400xbf16, #tpu.memory_space<vmem>>, vector<1x8x324xbf16>
    %37 = vector.shape_cast %36 : vector<1x8x324xbf16> to vector<8x324xbf16>
    %c96 = arith.constant 96 : index
    %c0_39 = arith.constant 0 : index
    %38 = vector.load %arg31[%c96, %c0_39] : memref<400x324xbf16, #tpu.memory_space<vmem>>, vector<8x324xbf16>
    tpu.vector_store %arg31[%c96, %c0_39], %37 {strides = array<i32>} : memref<400x324xbf16, #tpu.memory_space<vmem>>, vector<8x324xbf16>,
    %c0_40 = arith.constant 0 : index
    %c0_41 = arith.constant 0 : index
    %c39 = arith.constant 39 : index
    %39 = vector.load %arg1[%c0_40, %c0_41, %c39] : memref<1x8x400xbf16, #tpu.memory_space<vmem>>, vector<1x8x324xbf16>
    %40 = vector.shape_cast %39 : vector<1x8x324xbf16> to vector<8x324xbf16>
    %c104 = arith.constant 104 : index
    %c0_42 = arith.constant 0 : index
    %41 = vector.load %arg31[%c104, %c0_42] : memref<400x324xbf16, #tpu.memory_space<vmem>>, vector<8x324xbf16>
    tpu.vector_store %arg31[%c104, %c0_42], %40 {strides = array<i32>} : memref<400x324xbf16, #tpu.memory_space<vmem>>, vector<8x324xbf16>,
    %c0_43 = arith.constant 0 : index
    %c0_44 = arith.constant 0 : index
    %c40_45 = arith.constant 40 : index
    %42 = vector.load %arg1[%c0_43, %c0_44, %c40_45] : memref<1x8x400xbf16, #tpu.memory_space<vmem>>, vector<1x8x324xbf16>
    %43 = vector.shape_cast %42 : vector<1x8x324xbf16> to vector<8x324xbf16>
    %c112 = arith.constant 112 : index
    %c0_46 = arith.constant 0 : index
    %44 = vector.load %arg31[%c112, %c0_46] : memref<400x324xbf16, #tpu.memory_space<vmem>>, vector<8x324xbf16>
    tpu.vector_store %arg31[%c112, %c0_46], %43 {strides = array<i32>} : memref<400x324xbf16, #tpu.memory_space<vmem>>, vector<8x324xbf16>,
    %c0_47 = arith.constant 0 : index
    %c0_48 = arith.constant 0 : index
    %c54 = arith.constant 54 : index
    %45 = vector.load %arg1[%c0_47, %c0_48, %c54] : memref<1x8x400xbf16, #tpu.memory_space<vmem>>, vector<1x8x324xbf16>
    %46 = vector.shape_cast %45 : vector<1x8x324xbf16> to vector<8x324xbf16>
    %c120 = arith.constant 120 : index
    %c0_49 = arith.constant 0 : index
    %47 = vector.load %arg31[%c120, %c0_49] : memref<400x324xbf16, #tpu.memory_space<vmem>>, vector<8x324xbf16>
    tpu.vector_store %arg31[%c120, %c0_49], %46 {strides = array<i32>} : memref<400x324xbf16, #tpu.memory_space<vmem>>, vector<8x324xbf16>,
    %c0_50 = arith.constant 0 : index
    %c0_51 = arith.constant 0 : index
    %c55 = arith.constant 55 : index
    %48 = vector.load %arg1[%c0_50, %c0_51, %c55] : memref<1x8x400xbf16, #tpu.memory_space<vmem>>, vector<1x8x324xbf16>
    %49 = vector.shape_cast %48 : vector<1x8x324xbf16> to vector<8x324xbf16>
    %c128 = arith.constant 128 : index
    %c0_52 = arith.constant 0 : index
    %50 = vector.load %arg31[%c128, %c0_52] : memref<400x324xbf16, #tpu.memory_space<vmem>>, vector<8x324xbf16>
    tpu.vector_store %arg31[%c128, %c0_52], %49 {strides = array<i32>} : memref<400x324xbf16, #tpu.memory_space<vmem>>, vector<8x324xbf16>,
    %c0_53 = arith.constant 0 : index
    %c0_54 = arith.constant 0 : index
    %c56_55 = arith.constant 56 : index
    %51 = vector.load %arg1[%c0_53, %c0_54, %c56_55] : memref<1x8x400xbf16, #tpu.memory_space<vmem>>, vector<1x8x324xbf16>
    %52 = vector.shape_cast %51 : vector<1x8x324xbf16> to vector<8x324xbf16>
    %c136 = arith.constant 136 : index
    %c0_56 = arith.constant 0 : index
    %53 = vector.load %arg31[%c136, %c0_56] : memref<400x324xbf16, #tpu.memory_space<vmem>>, vector<8x324xbf16>
    tpu.vector_store %arg31[%c136, %c0_56], %52 {strides = array<i32>} : memref<400x324xbf16, #tpu.memory_space<vmem>>, vector<8x324xbf16>,
    %c0_57 = arith.constant 0 : index
    %c0_58 = arith.constant 0 : index
    %c57 = arith.constant 57 : index
    %54 = vector.load %arg1[%c0_57, %c0_58, %c57] : memref<1x8x400xbf16, #tpu.memory_space<vmem>>, vector<1x8x324xbf16>
    %55 = vector.shape_cast %54 : vector<1x8x324xbf16> to vector<8x324xbf16>
    %c144 = arith.constant 144 : index
    %c0_59 = arith.constant 0 : index
    %56 = vector.load %arg31[%c144, %c0_59] : memref<400x324xbf16, #tpu.memory_space<vmem>>, vector<8x324xbf16>
    tpu.vector_store %arg31[%c144, %c0_59], %55 {strides = array<i32>} : memref<400x324xbf16, #tpu.memory_space<vmem>>, vector<8x324xbf16>,
    %c0_60 = arith.constant 0 : index
    %c0_61 = arith.constant 0 : index
    %c58 = arith.constant 58 : index
    %57 = vector.load %arg1[%c0_60, %c0_61, %c58] : memref<1x8x400xbf16, #tpu.memory_space<vmem>>, vector<1x8x324xbf16>
    %58 = vector.shape_cast %57 : vector<1x8x324xbf16> to vector<8x324xbf16>
    %c152 = arith.constant 152 : index
    %c0_62 = arith.constant 0 : index
    %59 = vector.load %arg31[%c152, %c0_62] : memref<400x324xbf16, #tpu.memory_space<vmem>>, vector<8x324xbf16>
    tpu.vector_store %arg31[%c152, %c0_62], %58 {strides = array<i32>} : memref<400x324xbf16, #tpu.memory_space<vmem>>, vector<8x324xbf16>,
    %c0_63 = arith.constant 0 : index
    %c0_64 = arith.constant 0 : index
    %c72_65 = arith.constant 72 : index
    %60 = vector.load %arg1[%c0_63, %c0_64, %c72_65] : memref<1x8x400xbf16, #tpu.memory_space<vmem>>, vector<1x8x324xbf16>
    %61 = vector.shape_cast %60 : vector<1x8x324xbf16> to vector<8x324xbf16>
    %c160 = arith.constant 160 : index
    %c0_66 = arith.constant 0 : index
    %62 = vector.load %arg31[%c160, %c0_66] : memref<400x324xbf16, #tpu.memory_space<vmem>>, vector<8x324xbf16>
    tpu.vector_store %arg31[%c160, %c0_66], %61 {strides = array<i32>} : memref<400x324xbf16, #tpu.memory_space<vmem>>, vector<8x324xbf16>,
    %c0_67 = arith.constant 0 : index
    %c0_68 = arith.constant 0 : index
    %c73 = arith.constant 73 : index
    %63 = vector.load %arg1[%c0_67, %c0_68, %c73] : memref<1x8x400xbf16, #tpu.memory_space<vmem>>, vector<1x8x324xbf16>
    %64 = vector.shape_cast %63 : vector<1x8x324xbf16> to vector<8x324xbf16>
    %c168 = arith.constant 168 : index
    %c0_69 = arith.constant 0 : index
    %65 = vector.load %arg31[%c168, %c0_69] : memref<400x324xbf16, #tpu.memory_space<vmem>>, vector<8x324xbf16>
    tpu.vector_store %arg31[%c168, %c0_69], %64 {strides = array<i32>} : memref<400x324xbf16, #tpu.memory_space<vmem>>, vector<8x324xbf16>,
    %c0_70 = arith.constant 0 : index
    %c0_71 = arith.constant 0 : index
    %c74 = arith.constant 74 : index
    %66 = vector.load %arg1[%c0_70, %c0_71, %c74] : memref<1x8x400xbf16, #tpu.memory_space<vmem>>, vector<1x8x324xbf16>
    %67 = vector.shape_cast %66 : vector<1x8x324xbf16> to vector<8x324xbf16>
    %c176 = arith.constant 176 : index
    %c0_72 = arith.constant 0 : index
    %68 = vector.load %arg31[%c176, %c0_72] : memref<400x324xbf16, #tpu.memory_space<vmem>>, vector<8x324xbf16>
    tpu.vector_store %arg31[%c176, %c0_72], %67 {strides = array<i32>} : memref<400x324xbf16, #tpu.memory_space<vmem>>, vector<8x324xbf16>,
    %c0_73 = arith.constant 0 : index
    %c0_74 = arith.constant 0 : index
    %c75 = arith.constant 75 : index
    %69 = vector.load %arg1[%c0_73, %c0_74, %c75] : memref<1x8x400xbf16, #tpu.memory_space<vmem>>, vector<1x8x324xbf16>
    %70 = vector.shape_cast %69 : vector<1x8x324xbf16> to vector<8x324xbf16>
    %c184 = arith.constant 184 : index
    %c0_75 = arith.constant 0 : index
    %71 = vector.load %arg31[%c184, %c0_75] : memref<400x324xbf16, #tpu.memory_space<vmem>>, vector<8x324xbf16>
    tpu.vector_store %arg31[%c184, %c0_75], %70 {strides = array<i32>} : memref<400x324xbf16, #tpu.memory_space<vmem>>, vector<8x324xbf16>,
    %c0_76 = arith.constant 0 : index
    %c0_77 = arith.constant 0 : index
    %c76 = arith.constant 76 : index
    %72 = vector.load %arg1[%c0_76, %c0_77, %c76] : memref<1x8x400xbf16, #tpu.memory_space<vmem>>, vector<1x8x324xbf16>
    %73 = vector.shape_cast %72 : vector<1x8x324xbf16> to vector<8x324xbf16>
    %c192 = arith.constant 192 : index
    %c0_78 = arith.constant 0 : index
    %74 = vector.load %arg31[%c192, %c0_78] : memref<400x324xbf16, #tpu.memory_space<vmem>>, vector<8x324xbf16>
    tpu.vector_store %arg31[%c192, %c0_78], %73 {strides = array<i32>} : memref<400x324xbf16, #tpu.memory_space<vmem>>, vector<8x324xbf16>,
    %c0_79 = arith.constant 0 : index
    %c0_80 = arith.constant 0 : index
    %75 = vector.load %arg2[%c0_79, %c0_80] : memref<16x200xbf16, #tpu.memory_space<vmem>>, vector<16x200xbf16>
    %c0_81 = arith.constant 0 : index
    %c0_82 = arith.constant 0 : index
    %76 = vector.load %arg31[%c0_81, %c0_82] : memref<400x324xbf16, #tpu.memory_space<vmem>>, vector<200x324xbf16>
    %cst = arith.constant dense<0.000000e+00> : vector<16x324xf32>
    %77 = tpu.matmul %75, %76, %cst {dimension_numbers = #tpu.dot_dimension_numbers<[1], [0], [0], [1], [0, 0, 1, 1], [], []>} : vector<16x200xbf16>, vector<200x324xbf16>, vector<16x324xf32> -> vector<16x324xf32>
    %c0_83 = arith.constant 0 : index
    %c0_84 = arith.constant 0 : index
    %c0_85 = arith.constant 0 : index
    %78 = vector.load %arg11[%c0_83, %c0_84, %c0_85] : memref<9x16x1xf32, #tpu.memory_space<vmem>>, vector<1x16x1xf32>
    %79 = vector.shape_cast %78 : vector<1x16x1xf32> to vector<16x1xf32>
    %80 = vector.broadcast %79 : vector<16x1xf32> to vector<16x324xf32>
    %81 = arith.addf %77, %80 : vector<16x324xf32>
    %cst_86 = arith.constant 0.000000e+00 : f32
    %82 = vector.broadcast %cst_86 : f32 to vector<16x324xf32>
    %83 = arith.maximumf %81, %82 : vector<16x324xf32>
    %c0_87 = arith.constant 0 : index
    %c0_88 = arith.constant 0 : index
    %84 = vector.load %arg12[%c0_87, %c0_88] : memref<1x324xf32, #tpu.memory_space<vmem>>, vector<1x324xf32>
    %cst_89 = arith.constant 0.000000e+00 : f32
    %85 = vector.broadcast %cst_89 : f32 to vector<1x324xf32>
    %86 = arith.cmpf one, %84, %85 : vector<1x324xf32>
    %cst_90 = arith.constant 0.000000e+00 : f32
    %87 = vector.shape_cast %86 : vector<1x324xi1> to vector<1x324xi1>
    %88 = vector.broadcast %87 : vector<1x324xi1> to vector<16x324xi1>
    %89 = vector.broadcast %cst_90 : f32 to vector<16x324xf32>
    %90 = arith.select %88, %83, %89 : vector<16x324xi1>, vector<16x324xf32>
    %cst_91 = arith.constant 0.000000e+00 : bf16
    %91 = vector.broadcast %cst_91 : bf16 to vector<16x38xbf16>
    %c0_92 = arith.constant 0 : index
    %c0_93 = arith.constant 0 : index
    %92 = vector.load %arg23[%c0_92, %c0_93] : memref<16x400xbf16, #tpu.memory_space<vmem>>, vector<16x38xbf16>
    tpu.vector_store %arg23[%c0_92, %c0_93], %91 {strides = array<i32>} : memref<16x400xbf16, #tpu.memory_space<vmem>>, vector<16x38xbf16>,
    %93 = arith.truncf %90 : vector<16x324xf32> to vector<16x324xbf16>
    %c0_94 = arith.constant 0 : index
    %c38_95 = arith.constant 38 : index
    %94 = vector.load %arg23[%c0_94, %c38_95] : memref<16x400xbf16, #tpu.memory_space<vmem>>, vector<16x324xbf16>
    tpu.vector_store %arg23[%c0_94, %c38_95], %93 {strides = array<i32>} : memref<16x400xbf16, #tpu.memory_space<vmem>>, vector<16x324xbf16>,
    %c0_96 = arith.constant 0 : index
    %c0_97 = arith.constant 0 : index
    %95 = vector.load %arg23[%c0_96, %c0_97] : memref<16x400xbf16, #tpu.memory_space<vmem>>, vector<16x324xbf16>
    %c0_98 = arith.constant 0 : index
    %c0_99 = arith.constant 0 : index
    %96 = vector.load %arg31[%c0_98, %c0_99] : memref<400x324xbf16, #tpu.memory_space<vmem>>, vector<16x324xbf16>
    tpu.vector_store %arg31[%c0_98, %c0_99], %95 {strides = array<i32>} : memref<400x324xbf16, #tpu.memory_space<vmem>>, vector<16x324xbf16>,
    %c0_100 = arith.constant 0 : index
    %c1_101 = arith.constant 1 : index
    %97 = vector.load %arg23[%c0_100, %c1_101] : memref<16x400xbf16, #tpu.memory_space<vmem>>, vector<16x324xbf16>
    %c16_102 = arith.constant 16 : index
    %c0_103 = arith.constant 0 : index
    %98 = vector.load %arg31[%c16_102, %c0_103] : memref<400x324xbf16, #tpu.memory_space<vmem>>, vector<16x324xbf16>
    tpu.vector_store %arg31[%c16_102, %c0_103], %97 {strides = array<i32>} : memref<400x324xbf16, #tpu.memory_space<vmem>>, vector<16x324xbf16>,
    %c0_104 = arith.constant 0 : index
    %c2_105 = arith.constant 2 : index
    %99 = vector.load %arg23[%c0_104, %c2_105] : memref<16x400xbf16, #tpu.memory_space<vmem>>, vector<16x324xbf16>
    %c32_106 = arith.constant 32 : index
    %c0_107 = arith.constant 0 : index
    %100 = vector.load %arg31[%c32_106, %c0_107] : memref<400x324xbf16, #tpu.memory_space<vmem>>, vector<16x324xbf16>
    tpu.vector_store %arg31[%c32_106, %c0_107], %99 {strides = array<i32>} : memref<400x324xbf16, #tpu.memory_space<vmem>>, vector<16x324xbf16>,
    %c0_108 = arith.constant 0 : index
    %c3_109 = arith.constant 3 : index
    %101 = vector.load %arg23[%c0_108, %c3_109] : memref<16x400xbf16, #tpu.memory_space<vmem>>, vector<16x324xbf16>
    %c48_110 = arith.constant 48 : index
    %c0_111 = arith.constant 0 : index
    %102 = vector.load %arg31[%c48_110, %c0_111] : memref<400x324xbf16, #tpu.memory_space<vmem>>, vector<16x324xbf16>
    tpu.vector_store %arg31[%c48_110, %c0_111], %101 {strides = array<i32>} : memref<400x324xbf16, #tpu.memory_space<vmem>>, vector<16x324xbf16>,
    %c0_112 = arith.constant 0 : index
    %c4_113 = arith.constant 4 : index
    %103 = vector.load %arg23[%c0_112, %c4_113] : memref<16x400xbf16, #tpu.memory_space<vmem>>, vector<16x324xbf16>
    %c64_114 = arith.constant 64 : index
    %c0_115 = arith.constant 0 : index
    %104 = vector.load %arg31[%c64_114, %c0_115] : memref<400x324xbf16, #tpu.memory_space<vmem>>, vector<16x324xbf16>
    tpu.vector_store %arg31[%c64_114, %c0_115], %103 {strides = array<i32>} : memref<400x324xbf16, #tpu.memory_space<vmem>>, vector<16x324xbf16>,
    %c0_116 = arith.constant 0 : index
    %c18_117 = arith.constant 18 : index
    %105 = vector.load %arg23[%c0_116, %c18_117] : memref<16x400xbf16, #tpu.memory_space<vmem>>, vector<16x324xbf16>
    %c80_118 = arith.constant 80 : index
    %c0_119 = arith.constant 0 : index
    %106 = vector.load %arg31[%c80_118, %c0_119] : memref<400x324xbf16, #tpu.memory_space<vmem>>, vector<16x324xbf16>
    tpu.vector_store %arg31[%c80_118, %c0_119], %105 {strides = array<i32>} : memref<400x324xbf16, #tpu.memory_space<vmem>>, vector<16x324xbf16>,
    %c0_120 = arith.constant 0 : index
    %c19_121 = arith.constant 19 : index
    %107 = vector.load %arg23[%c0_120, %c19_121] : memref<16x400xbf16, #tpu.memory_space<vmem>>, vector<16x324xbf16>
    %c96_122 = arith.constant 96 : index
    %c0_123 = arith.constant 0 : index
    %108 = vector.load %arg31[%c96_122, %c0_123] : memref<400x324xbf16, #tpu.memory_space<vmem>>, vector<16x324xbf16>
    tpu.vector_store %arg31[%c96_122, %c0_123], %107 {strides = array<i32>} : memref<400x324xbf16, #tpu.memory_space<vmem>>, vector<16x324xbf16>,
    %c0_124 = arith.constant 0 : index
    %c20_125 = arith.constant 20 : index
    %109 = vector.load %arg23[%c0_124, %c20_125] : memref<16x400xbf16, #tpu.memory_space<vmem>>, vector<16x324xbf16>
    %c112_126 = arith.constant 112 : index
    %c0_127 = arith.constant 0 : index
    %110 = vector.load %arg31[%c112_126, %c0_127] : memref<400x324xbf16, #tpu.memory_space<vmem>>, vector<16x324xbf16>
    tpu.vector_store %arg31[%c112_126, %c0_127], %109 {strides = array<i32>} : memref<400x324xbf16, #tpu.memory_space<vmem>>, vector<16x324xbf16>,
    %c0_128 = arith.constant 0 : index
    %c21_129 = arith.constant 21 : index
    %111 = vector.load %arg23[%c0_128, %c21_129] : memref<16x400xbf16, #tpu.memory_space<vmem>>, vector<16x324xbf16>
    %c128_130 = arith.constant 128 : index
    %c0_131 = arith.constant 0 : index
    %112 = vector.load %arg31[%c128_130, %c0_131] : memref<400x324xbf16, #tpu.memory_space<vmem>>, vector<16x324xbf16>
    tpu.vector_store %arg31[%c128_130, %c0_131], %111 {strides = array<i32>} : memref<400x324xbf16, #tpu.memory_space<vmem>>, vector<16x324xbf16>,
    %c0_132 = arith.constant 0 : index
    %c22_133 = arith.constant 22 : index
    %113 = vector.load %arg23[%c0_132, %c22_133] : memref<16x400xbf16, #tpu.memory_space<vmem>>, vector<16x324xbf16>
    %c144_134 = arith.constant 144 : index
    %c0_135 = arith.constant 0 : index
    %114 = vector.load %arg31[%c144_134, %c0_135] : memref<400x324xbf16, #tpu.memory_space<vmem>>, vector<16x324xbf16>
    tpu.vector_store %arg31[%c144_134, %c0_135], %113 {strides = array<i32>} : memref<400x324xbf16, #tpu.memory_space<vmem>>, vector<16x324xbf16>,
    %c0_136 = arith.constant 0 : index
    %c36_137 = arith.constant 36 : index
    %115 = vector.load %arg23[%c0_136, %c36_137] : memref<16x400xbf16, #tpu.memory_space<vmem>>, vector<16x324xbf16>
    %c160_138 = arith.constant 160 : index
    %c0_139 = arith.constant 0 : index
    %116 = vector.load %arg31[%c160_138, %c0_139] : memref<400x324xbf16, #tpu.memory_space<vmem>>, vector<16x324xbf16>
    tpu.vector_store %arg31[%c160_138, %c0_139], %115 {strides = array<i32>} : memref<400x324xbf16, #tpu.memory_space<vmem>>, vector<16x324xbf16>,
    %c0_140 = arith.constant 0 : index
    %c37_141 = arith.constant 37 : index
    %117 = vector.load %arg23[%c0_140, %c37_141] : memref<16x400xbf16, #tpu.memory_space<vmem>>, vector<16x324xbf16>
    %c176_142 = arith.constant 176 : index
    %c0_143 = arith.constant 0 : index
    %118 = vector.load %arg31[%c176_142, %c0_143] : memref<400x324xbf16, #tpu.memory_space<vmem>>, vector<16x324xbf16>
    tpu.vector_store %arg31[%c176_142, %c0_143], %117 {strides = array<i32>} : memref<400x324xbf16, #tpu.memory_space<vmem>>, vector<16x324xbf16>,
    %c0_144 = arith.constant 0 : index
    %c38_145 = arith.constant 38 : index
    %119 = vector.load %arg23[%c0_144, %c38_145] : memref<16x400xbf16, #tpu.memory_space<vmem>>, vector<16x324xbf16>
    %c192_146 = arith.constant 192 : index
    %c0_147 = arith.constant 0 : index
    %120 = vector.load %arg31[%c192_146, %c0_147] : memref<400x324xbf16, #tpu.memory_space<vmem>>, vector<16x324xbf16>
    tpu.vector_store %arg31[%c192_146, %c0_147], %119 {strides = array<i32>} : memref<400x324xbf16, #tpu.memory_space<vmem>>, vector<16x324xbf16>,
    %c0_148 = arith.constant 0 : index
    %c39_149 = arith.constant 39 : index
    %121 = vector.load %arg23[%c0_148, %c39_149] : memref<16x400xbf16, #tpu.memory_space<vmem>>, vector<16x324xbf16>
    %c208 = arith.constant 208 : index
    %c0_150 = arith.constant 0 : index
    %122 = vector.load %arg31[%c208, %c0_150] : memref<400x324xbf16, #tpu.memory_space<vmem>>, vector<16x324xbf16>
    tpu.vector_store %arg31[%c208, %c0_150], %121 {strides = array<i32>} : memref<400x324xbf16, #tpu.memory_space<vmem>>, vector<16x324xbf16>,
    %c0_151 = arith.constant 0 : index
    %c40_152 = arith.constant 40 : index
    %123 = vector.load %arg23[%c0_151, %c40_152] : memref<16x400xbf16, #tpu.memory_space<vmem>>, vector<16x324xbf16>
    %c224 = arith.constant 224 : index
    %c0_153 = arith.constant 0 : index
    %124 = vector.load %arg31[%c224, %c0_153] : memref<400x324xbf16, #tpu.memory_space<vmem>>, vector<16x324xbf16>
    tpu.vector_store %arg31[%c224, %c0_153], %123 {strides = array<i32>} : memref<400x324xbf16, #tpu.memory_space<vmem>>, vector<16x324xbf16>,
    %c0_154 = arith.constant 0 : index
    %c54_155 = arith.constant 54 : index
    %125 = vector.load %arg23[%c0_154, %c54_155] : memref<16x400xbf16, #tpu.memory_space<vmem>>, vector<16x324xbf16>
    %c240 = arith.constant 240 : index
    %c0_156 = arith.constant 0 : index
    %126 = vector.load %arg31[%c240, %c0_156] : memref<400x324xbf16, #tpu.memory_space<vmem>>, vector<16x324xbf16>
    tpu.vector_store %arg31[%c240, %c0_156], %125 {strides = array<i32>} : memref<400x324xbf16, #tpu.memory_space<vmem>>, vector<16x324xbf16>,
    %c0_157 = arith.constant 0 : index
    %c55_158 = arith.constant 55 : index
    %127 = vector.load %arg23[%c0_157, %c55_158] : memref<16x400xbf16, #tpu.memory_space<vmem>>, vector<16x324xbf16>
    %c256 = arith.constant 256 : index
    %c0_159 = arith.constant 0 : index
    %128 = vector.load %arg31[%c256, %c0_159] : memref<400x324xbf16, #tpu.memory_space<vmem>>, vector<16x324xbf16>
    tpu.vector_store %arg31[%c256, %c0_159], %127 {strides = array<i32>} : memref<400x324xbf16, #tpu.memory_space<vmem>>, vector<16x324xbf16>,
    %c0_160 = arith.constant 0 : index
    %c56_161 = arith.constant 56 : index
    %129 = vector.load %arg23[%c0_160, %c56_161] : memref<16x400xbf16, #tpu.memory_space<vmem>>, vector<16x324xbf16>
    %c272 = arith.constant 272 : index
    %c0_162 = arith.constant 0 : index
    %130 = vector.load %arg31[%c272, %c0_162] : memref<400x324xbf16, #tpu.memory_space<vmem>>, vector<16x324xbf16>
    tpu.vector_store %arg31[%c272, %c0_162], %129 {strides = array<i32>} : memref<400x324xbf16, #tpu.memory_space<vmem>>, vector<16x324xbf16>,
    %c0_163 = arith.constant 0 : index
    %c57_164 = arith.constant 57 : index
    %131 = vector.load %arg23[%c0_163, %c57_164] : memref<16x400xbf16, #tpu.memory_space<vmem>>, vector<16x324xbf16>
    %c288 = arith.constant 288 : index
    %c0_165 = arith.constant 0 : index
    %132 = vector.load %arg31[%c288, %c0_165] : memref<400x324xbf16, #tpu.memory_space<vmem>>, vector<16x324xbf16>
    tpu.vector_store %arg31[%c288, %c0_165], %131 {strides = array<i32>} : memref<400x324xbf16, #tpu.memory_space<vmem>>, vector<16x324xbf16>,
    %c0_166 = arith.constant 0 : index
    %c58_167 = arith.constant 58 : index
    %133 = vector.load %arg23[%c0_166, %c58_167] : memref<16x400xbf16, #tpu.memory_space<vmem>>, vector<16x324xbf16>
    %c304 = arith.constant 304 : index
    %c0_168 = arith.constant 0 : index
    %134 = vector.load %arg31[%c304, %c0_168] : memref<400x324xbf16, #tpu.memory_space<vmem>>, vector<16x324xbf16>
    tpu.vector_store %arg31[%c304, %c0_168], %133 {strides = array<i32>} : memref<400x324xbf16, #tpu.memory_space<vmem>>, vector<16x324xbf16>,
    %c0_169 = arith.constant 0 : index
    %c72_170 = arith.constant 72 : index
    %135 = vector.load %arg23[%c0_169, %c72_170] : memref<16x400xbf16, #tpu.memory_space<vmem>>, vector<16x324xbf16>
    %c320 = arith.constant 320 : index
    %c0_171 = arith.constant 0 : index
    %136 = vector.load %arg31[%c320, %c0_171] : memref<400x324xbf16, #tpu.memory_space<vmem>>, vector<16x324xbf16>
    tpu.vector_store %arg31[%c320, %c0_171], %135 {strides = array<i32>} : memref<400x324xbf16, #tpu.memory_space<vmem>>, vector<16x324xbf16>,
    %c0_172 = arith.constant 0 : index
    %c73_173 = arith.constant 73 : index
    %137 = vector.load %arg23[%c0_172, %c73_173] : memref<16x400xbf16, #tpu.memory_space<vmem>>, vector<16x324xbf16>
    %c336 = arith.constant 336 : index
    %c0_174 = arith.constant 0 : index
    %138 = vector.load %arg31[%c336, %c0_174] : memref<400x324xbf16, #tpu.memory_space<vmem>>, vector<16x324xbf16>
    tpu.vector_store %arg31[%c336, %c0_174], %137 {strides = array<i32>} : memref<400x324xbf16, #tpu.memory_space<vmem>>, vector<16x324xbf16>,
    %c0_175 = arith.constant 0 : index
    %c74_176 = arith.constant 74 : index
    %139 = vector.load %arg23[%c0_175, %c74_176] : memref<16x400xbf16, #tpu.memory_space<vmem>>, vector<16x324xbf16>
    %c352 = arith.constant 352 : index
    %c0_177 = arith.constant 0 : index
    %140 = vector.load %arg31[%c352, %c0_177] : memref<400x324xbf16, #tpu.memory_space<vmem>>, vector<16x324xbf16>
    tpu.vector_store %arg31[%c352, %c0_177], %139 {strides = array<i32>} : memref<400x324xbf16, #tpu.memory_space<vmem>>, vector<16x324xbf16>,
    %c0_178 = arith.constant 0 : index
    %c75_179 = arith.constant 75 : index
    %141 = vector.load %arg23[%c0_178, %c75_179] : memref<16x400xbf16, #tpu.memory_space<vmem>>, vector<16x324xbf16>
    %c368 = arith.constant 368 : index
    %c0_180 = arith.constant 0 : index
    %142 = vector.load %arg31[%c368, %c0_180] : memref<400x324xbf16, #tpu.memory_space<vmem>>, vector<16x324xbf16>
    tpu.vector_store %arg31[%c368, %c0_180], %141 {strides = array<i32>} : memref<400x324xbf16, #tpu.memory_space<vmem>>, vector<16x324xbf16>,
    %c0_181 = arith.constant 0 : index
    %c76_182 = arith.constant 76 : index
    %143 = vector.load %arg23[%c0_181, %c76_182] : memref<16x400xbf16, #tpu.memory_space<vmem>>, vector<16x324xbf16>
    %c384 = arith.constant 384 : index
    %c0_183 = arith.constant 0 : index
    %144 = vector.load %arg31[%c384, %c0_183] : memref<400x324xbf16, #tpu.memory_space<vmem>>, vector<16x324xbf16>
    tpu.vector_store %arg31[%c384, %c0_183], %143 {strides = array<i32>} : memref<400x324xbf16, #tpu.memory_space<vmem>>, vector<16x324xbf16>,
    %c0_184 = arith.constant 0 : index
    %c0_185 = arith.constant 0 : index
    %145 = vector.load %arg3[%c0_184, %c0_185] : memref<16x400xbf16, #tpu.memory_space<vmem>>, vector<16x400xbf16>
    %c0_186 = arith.constant 0 : index
    %c0_187 = arith.constant 0 : index
    %146 = vector.load %arg31[%c0_186, %c0_187] : memref<400x324xbf16, #tpu.memory_space<vmem>>, vector<400x324xbf16>
    %cst_188 = arith.constant dense<0.000000e+00> : vector<16x324xf32>
    %147 = tpu.matmul %145, %146, %cst_188 {dimension_numbers = #tpu.dot_dimension_numbers<[1], [0], [0], [1], [0, 0, 1, 1], [], []>} : vector<16x400xbf16>, vector<400x324xbf16>, vector<16x324xf32> -> vector<16x324xf32>
    %c1_189 = arith.constant 1 : index
    %c0_190 = arith.constant 0 : index
    %c0_191 = arith.constant 0 : index
    %148 = vector.load %arg11[%c1_189, %c0_190, %c0_191] : memref<9x16x1xf32, #tpu.memory_space<vmem>>, vector<1x16x1xf32>
    %149 = vector.shape_cast %148 : vector<1x16x1xf32> to vector<16x1xf32>
    %150 = vector.broadcast %149 : vector<16x1xf32> to vector<16x324xf32>
    %151 = arith.addf %147, %150 : vector<16x324xf32>
    %cst_192 = arith.constant 0.000000e+00 : f32
    %152 = vector.broadcast %cst_192 : f32 to vector<16x324xf32>
    %153 = arith.maximumf %151, %152 : vector<16x324xf32>
    %c0_193 = arith.constant 0 : index
    %c0_194 = arith.constant 0 : index
    %154 = vector.load %arg12[%c0_193, %c0_194] : memref<1x324xf32, #tpu.memory_space<vmem>>, vector<1x324xf32>
    %cst_195 = arith.constant 0.000000e+00 : f32
    %155 = vector.broadcast %cst_195 : f32 to vector<1x324xf32>
    %156 = arith.cmpf one, %154, %155 : vector<1x324xf32>
    %cst_196 = arith.constant 0.000000e+00 : f32
    %157 = vector.shape_cast %156 : vector<1x324xi1> to vector<1x324xi1>
    %158 = vector.broadcast %157 : vector<1x324xi1> to vector<16x324xi1>
    %159 = vector.broadcast %cst_196 : f32 to vector<16x324xf32>
    %160 = arith.select %158, %153, %159 : vector<16x324xi1>, vector<16x324xf32>
    %cst_197 = arith.constant 0.000000e+00 : bf16
    %161 = vector.broadcast %cst_197 : bf16 to vector<16x38xbf16>
    %c0_198 = arith.constant 0 : index
    %c0_199 = arith.constant 0 : index
    %162 = vector.load %arg24[%c0_198, %c0_199] : memref<16x400xbf16, #tpu.memory_space<vmem>>, vector<16x38xbf16>
    tpu.vector_store %arg24[%c0_198, %c0_199], %161 {strides = array<i32>} : memref<16x400xbf16, #tpu.memory_space<vmem>>, vector<16x38xbf16>,
    %163 = arith.truncf %160 : vector<16x324xf32> to vector<16x324xbf16>
    %c0_200 = arith.constant 0 : index
    %c38_201 = arith.constant 38 : index
    %164 = vector.load %arg24[%c0_200, %c38_201] : memref<16x400xbf16, #tpu.memory_space<vmem>>, vector<16x324xbf16>
    tpu.vector_store %arg24[%c0_200, %c38_201], %163 {strides = array<i32>} : memref<16x400xbf16, #tpu.memory_space<vmem>>, vector<16x324xbf16>,
    %c0_202 = arith.constant 0 : index
    %c0_203 = arith.constant 0 : index
    %165 = vector.load %arg24[%c0_202, %c0_203] : memref<16x400xbf16, #tpu.memory_space<vmem>>, vector<16x324xbf16>
    %c0_204 = arith.constant 0 : index
    %c0_205 = arith.constant 0 : index
    %166 = vector.load %arg31[%c0_204, %c0_205] : memref<400x324xbf16, #tpu.memory_space<vmem>>, vector<16x324xbf16>
    tpu.vector_store %arg31[%c0_204, %c0_205], %165 {strides = array<i32>} : memref<400x324xbf16, #tpu.memory_space<vmem>>, vector<16x324xbf16>,
    %c0_206 = arith.constant 0 : index
    %c1_207 = arith.constant 1 : index
    %167 = vector.load %arg24[%c0_206, %c1_207] : memref<16x400xbf16, #tpu.memory_space<vmem>>, vector<16x324xbf16>
    %c16_208 = arith.constant 16 : index
    %c0_209 = arith.constant 0 : index
    %168 = vector.load %arg31[%c16_208, %c0_209] : memref<400x324xbf16, #tpu.memory_space<vmem>>, vector<16x324xbf16>
    tpu.vector_store %arg31[%c16_208, %c0_209], %167 {strides = array<i32>} : memref<400x324xbf16, #tpu.memory_space<vmem>>, vector<16x324xbf16>,
    %c0_210 = arith.constant 0 : index
    %c2_211 = arith.constant 2 : index
    %169 = vector.load %arg24[%c0_210, %c2_211] : memref<16x400xbf16, #tpu.memory_space<vmem>>, vector<16x324xbf16>
    %c32_212 = arith.constant 32 : index
    %c0_213 = arith.constant 0 : index
    %170 = vector.load %arg31[%c32_212, %c0_213] : memref<400x324xbf16, #tpu.memory_space<vmem>>, vector<16x324xbf16>
    tpu.vector_store %arg31[%c32_212, %c0_213], %169 {strides = array<i32>} : memref<400x324xbf16, #tpu.memory_space<vmem>>, vector<16x324xbf16>,
    %c0_214 = arith.constant 0 : index
    %c3_215 = arith.constant 3 : index
    %171 = vector.load %arg24[%c0_214, %c3_215] : memref<16x400xbf16, #tpu.memory_space<vmem>>, vector<16x324xbf16>
    %c48_216 = arith.constant 48 : index
    %c0_217 = arith.constant 0 : index
    %172 = vector.load %arg31[%c48_216, %c0_217] : memref<400x324xbf16, #tpu.memory_space<vmem>>, vector<16x324xbf16>
    tpu.vector_store %arg31[%c48_216, %c0_217], %171 {strides = array<i32>} : memref<400x324xbf16, #tpu.memory_space<vmem>>, vector<16x324xbf16>,
    %c0_218 = arith.constant 0 : index
    %c4_219 = arith.constant 4 : index
    %173 = vector.load %arg24[%c0_218, %c4_219] : memref<16x400xbf16, #tpu.memory_space<vmem>>, vector<16x324xbf16>
    %c64_220 = arith.constant 64 : index
    %c0_221 = arith.constant 0 : index
    %174 = vector.load %arg31[%c64_220, %c0_221] : memref<400x324xbf16, #tpu.memory_space<vmem>>, vector<16x324xbf16>
    tpu.vector_store %arg31[%c64_220, %c0_221], %173 {strides = array<i32>} : memref<400x324xbf16, #tpu.memory_space<vmem>>, vector<16x324xbf16>,
    %c0_222 = arith.constant 0 : index
    %c18_223 = arith.constant 18 : index
    %175 = vector.load %arg24[%c0_222, %c18_223] : memref<16x400xbf16, #tpu.memory_space<vmem>>, vector<16x324xbf16>
    %c80_224 = arith.constant 80 : index
    %c0_225 = arith.constant 0 : index
    %176 = vector.load %arg31[%c80_224, %c0_225] : memref<400x324xbf16, #tpu.memory_space<vmem>>, vector<16x324xbf16>
    tpu.vector_store %arg31[%c80_224, %c0_225], %175 {strides = array<i32>} : memref<400x324xbf16, #tpu.memory_space<vmem>>, vector<16x324xbf16>,
    %c0_226 = arith.constant 0 : index
    %c19_227 = arith.constant 19 : index
    %177 = vector.load %arg24[%c0_226, %c19_227] : memref<16x400xbf16, #tpu.memory_space<vmem>>, vector<16x324xbf16>
    %c96_228 = arith.constant 96 : index
    %c0_229 = arith.constant 0 : index
    %178 = vector.load %arg31[%c96_228, %c0_229] : memref<400x324xbf16, #tpu.memory_space<vmem>>, vector<16x324xbf16>
    tpu.vector_store %arg31[%c96_228, %c0_229], %177 {strides = array<i32>} : memref<400x324xbf16, #tpu.memory_space<vmem>>, vector<16x324xbf16>,
    %c0_230 = arith.constant 0 : index
    %c20_231 = arith.constant 20 : index
    %179 = vector.load %arg24[%c0_230, %c20_231] : memref<16x400xbf16, #tpu.memory_space<vmem>>, vector<16x324xbf16>
    %c112_232 = arith.constant 112 : index
    %c0_233 = arith.constant 0 : index
    %180 = vector.load %arg31[%c112_232, %c0_233] : memref<400x324xbf16, #tpu.memory_space<vmem>>, vector<16x324xbf16>
    tpu.vector_store %arg31[%c112_232, %c0_233], %179 {strides = array<i32>} : memref<400x324xbf16, #tpu.memory_space<vmem>>, vector<16x324xbf16>,
    %c0_234 = arith.constant 0 : index
    %c21_235 = arith.constant 21 : index
    %181 = vector.load %arg24[%c0_234, %c21_235] : memref<16x400xbf16, #tpu.memory_space<vmem>>, vector<16x324xbf16>
    %c128_236 = arith.constant 128 : index
    %c0_237 = arith.constant 0 : index
    %182 = vector.load %arg31[%c128_236, %c0_237] : memref<400x324xbf16, #tpu.memory_space<vmem>>, vector<16x324xbf16>
    tpu.vector_store %arg31[%c128_236, %c0_237], %181 {strides = array<i32>} : memref<400x324xbf16, #tpu.memory_space<vmem>>, vector<16x324xbf16>,
    %c0_238 = arith.constant 0 : index
    %c22_239 = arith.constant 22 : index
    %183 = vector.load %arg24[%c0_238, %c22_239] : memref<16x400xbf16, #tpu.memory_space<vmem>>, vector<16x324xbf16>
    %c144_240 = arith.constant 144 : index
    %c0_241 = arith.constant 0 : index
    %184 = vector.load %arg31[%c144_240, %c0_241] : memref<400x324xbf16, #tpu.memory_space<vmem>>, vector<16x324xbf16>
    tpu.vector_store %arg31[%c144_240, %c0_241], %183 {strides = array<i32>} : memref<400x324xbf16, #tpu.memory_space<vmem>>, vector<16x324xbf16>,
    %c0_242 = arith.constant 0 : index
    %c36_243 = arith.constant 36 : index
    %185 = vector.load %arg24[%c0_242, %c36_243] : memref<16x400xbf16, #tpu.memory_space<vmem>>, vector<16x324xbf16>
    %c160_244 = arith.constant 160 : index
    %c0_245 = arith.constant 0 : index
    %186 = vector.load %arg31[%c160_244, %c0_245] : memref<400x324xbf16, #tpu.memory_space<vmem>>, vector<16x324xbf16>
    tpu.vector_store %arg31[%c160_244, %c0_245], %185 {strides = array<i32>} : memref<400x324xbf16, #tpu.memory_space<vmem>>, vector<16x324xbf16>,
    %c0_246 = arith.constant 0 : index
    %c37_247 = arith.constant 37 : index
    %187 = vector.load %arg24[%c0_246, %c37_247] : memref<16x400xbf16, #tpu.memory_space<vmem>>, vector<16x324xbf16>
    %c176_248 = arith.constant 176 : index
    %c0_249 = arith.constant 0 : index
    %188 = vector.load %arg31[%c176_248, %c0_249] : memref<400x324xbf16, #tpu.memory_space<vmem>>, vector<16x324xbf16>
    tpu.vector_store %arg31[%c176_248, %c0_249], %187 {strides = array<i32>} : memref<400x324xbf16, #tpu.memory_space<vmem>>, vector<16x324xbf16>,
    %c0_250 = arith.constant 0 : index
    %c38_251 = arith.constant 38 : index
    %189 = vector.load %arg24[%c0_250, %c38_251] : memref<16x400xbf16, #tpu.memory_space<vmem>>, vector<16x324xbf16>
    %c192_252 = arith.constant 192 : index
    %c0_253 = arith.constant 0 : index
    %190 = vector.load %arg31[%c192_252, %c0_253] : memref<400x324xbf16, #tpu.memory_space<vmem>>, vector<16x324xbf16>
    tpu.vector_store %arg31[%c192_252, %c0_253], %189 {strides = array<i32>} : memref<400x324xbf16, #tpu.memory_space<vmem>>, vector<16x324xbf16>,
    %c0_254 = arith.constant 0 : index
    %c39_255 = arith.constant 39 : index
    %191 = vector.load %arg24[%c0_254, %c39_255] : memref<16x400xbf16, #tpu.memory_space<vmem>>, vector<16x324xbf16>
    %c208_256 = arith.constant 208 : index
    %c0_257 = arith.constant 0 : index
    %192 = vector.load %arg31[%c208_256, %c0_257] : memref<400x324xbf16, #tpu.memory_space<vmem>>, vector<16x324xbf16>
    tpu.vector_store %arg31[%c208_256, %c0_257], %191 {strides = array<i32>} : memref<400x324xbf16, #tpu.memory_space<vmem>>, vector<16x324xbf16>,
    %c0_258 = arith.constant 0 : index
    %c40_259 = arith.constant 40 : index
    %193 = vector.load %arg24[%c0_258, %c40_259] : memref<16x400xbf16, #tpu.memory_space<vmem>>, vector<16x324xbf16>
    %c224_260 = arith.constant 224 : index
    %c0_261 = arith.constant 0 : index
    %194 = vector.load %arg31[%c224_260, %c0_261] : memref<400x324xbf16, #tpu.memory_space<vmem>>, vector<16x324xbf16>
    tpu.vector_store %arg31[%c224_260, %c0_261], %193 {strides = array<i32>} : memref<400x324xbf16, #tpu.memory_space<vmem>>, vector<16x324xbf16>,
    %c0_262 = arith.constant 0 : index
    %c54_263 = arith.constant 54 : index
    %195 = vector.load %arg24[%c0_262, %c54_263] : memref<16x400xbf16, #tpu.memory_space<vmem>>, vector<16x324xbf16>
    %c240_264 = arith.constant 240 : index
    %c0_265 = arith.constant 0 : index
    %196 = vector.load %arg31[%c240_264, %c0_265] : memref<400x324xbf16, #tpu.memory_space<vmem>>, vector<16x324xbf16>
    tpu.vector_store %arg31[%c240_264, %c0_265], %195 {strides = array<i32>} : memref<400x324xbf16, #tpu.memory_space<vmem>>, vector<16x324xbf16>,
    %c0_266 = arith.constant 0 : index
    %c55_267 = arith.constant 55 : index
    %197 = vector.load %arg24[%c0_266, %c55_267] : memref<16x400xbf16, #tpu.memory_space<vmem>>, vector<16x324xbf16>
    %c256_268 = arith.constant 256 : index
    %c0_269 = arith.constant 0 : index
    %198 = vector.load %arg31[%c256_268, %c0_269] : memref<400x324xbf16, #tpu.memory_space<vmem>>, vector<16x324xbf16>
    tpu.vector_store %arg31[%c256_268, %c0_269], %197 {strides = array<i32>} : memref<400x324xbf16, #tpu.memory_space<vmem>>, vector<16x324xbf16>,
    %c0_270 = arith.constant 0 : index
    %c56_271 = arith.constant 56 : index
    %199 = vector.load %arg24[%c0_270, %c56_271] : memref<16x400xbf16, #tpu.memory_space<vmem>>, vector<16x324xbf16>
    %c272_272 = arith.constant 272 : index
    %c0_273 = arith.constant 0 : index
    %200 = vector.load %arg31[%c272_272, %c0_273] : memref<400x324xbf16, #tpu.memory_space<vmem>>, vector<16x324xbf16>
    tpu.vector_store %arg31[%c272_272, %c0_273], %199 {strides = array<i32>} : memref<400x324xbf16, #tpu.memory_space<vmem>>, vector<16x324xbf16>,
    %c0_274 = arith.constant 0 : index
    %c57_275 = arith.constant 57 : index
    %201 = vector.load %arg24[%c0_274, %c57_275] : memref<16x400xbf16, #tpu.memory_space<vmem>>, vector<16x324xbf16>
    %c288_276 = arith.constant 288 : index
    %c0_277 = arith.constant 0 : index
    %202 = vector.load %arg31[%c288_276, %c0_277] : memref<400x324xbf16, #tpu.memory_space<vmem>>, vector<16x324xbf16>
    tpu.vector_store %arg31[%c288_276, %c0_277], %201 {strides = array<i32>} : memref<400x324xbf16, #tpu.memory_space<vmem>>, vector<16x324xbf16>,
    %c0_278 = arith.constant 0 : index
    %c58_279 = arith.constant 58 : index
    %203 = vector.load %arg24[%c0_278, %c58_279] : memref<16x400xbf16, #tpu.memory_space<vmem>>, vector<16x324xbf16>
    %c304_280 = arith.constant 304 : index
    %c0_281 = arith.constant 0 : index
    %204 = vector.load %arg31[%c304_280, %c0_281] : memref<400x324xbf16, #tpu.memory_space<vmem>>, vector<16x324xbf16>
    tpu.vector_store %arg31[%c304_280, %c0_281], %203 {strides = array<i32>} : memref<400x324xbf16, #tpu.memory_space<vmem>>, vector<16x324xbf16>,
    %c0_282 = arith.constant 0 : index
    %c72_283 = arith.constant 72 : index
    %205 = vector.load %arg24[%c0_282, %c72_283] : memref<16x400xbf16, #tpu.memory_space<vmem>>, vector<16x324xbf16>
    %c320_284 = arith.constant 320 : index
    %c0_285 = arith.constant 0 : index
    %206 = vector.load %arg31[%c320_284, %c0_285] : memref<400x324xbf16, #tpu.memory_space<vmem>>, vector<16x324xbf16>
    tpu.vector_store %arg31[%c320_284, %c0_285], %205 {strides = array<i32>} : memref<400x324xbf16, #tpu.memory_space<vmem>>, vector<16x324xbf16>,
    %c0_286 = arith.constant 0 : index
    %c73_287 = arith.constant 73 : index
    %207 = vector.load %arg24[%c0_286, %c73_287] : memref<16x400xbf16, #tpu.memory_space<vmem>>, vector<16x324xbf16>
    %c336_288 = arith.constant 336 : index
    %c0_289 = arith.constant 0 : index
    %208 = vector.load %arg31[%c336_288, %c0_289] : memref<400x324xbf16, #tpu.memory_space<vmem>>, vector<16x324xbf16>
    tpu.vector_store %arg31[%c336_288, %c0_289], %207 {strides = array<i32>} : memref<400x324xbf16, #tpu.memory_space<vmem>>, vector<16x324xbf16>,
    %c0_290 = arith.constant 0 : index
    %c74_291 = arith.constant 74 : index
    %209 = vector.load %arg24[%c0_290, %c74_291] : memref<16x400xbf16, #tpu.memory_space<vmem>>, vector<16x324xbf16>
    %c352_292 = arith.constant 352 : index
    %c0_293 = arith.constant 0 : index
    %210 = vector.load %arg31[%c352_292, %c0_293] : memref<400x324xbf16, #tpu.memory_space<vmem>>, vector<16x324xbf16>
    tpu.vector_store %arg31[%c352_292, %c0_293], %209 {strides = array<i32>} : memref<400x324xbf16, #tpu.memory_space<vmem>>, vector<16x324xbf16>,
    %c0_294 = arith.constant 0 : index
    %c75_295 = arith.constant 75 : index
    %211 = vector.load %arg24[%c0_294, %c75_295] : memref<16x400xbf16, #tpu.memory_space<vmem>>, vector<16x324xbf16>
    %c368_296 = arith.constant 368 : index
    %c0_297 = arith.constant 0 : index
    %212 = vector.load %arg31[%c368_296, %c0_297] : memref<400x324xbf16, #tpu.memory_space<vmem>>, vector<16x324xbf16>
    tpu.vector_store %arg31[%c368_296, %c0_297], %211 {strides = array<i32>} : memref<400x324xbf16, #tpu.memory_space<vmem>>, vector<16x324xbf16>,
    %c0_298 = arith.constant 0 : index
    %c76_299 = arith.constant 76 : index
    %213 = vector.load %arg24[%c0_298, %c76_299] : memref<16x400xbf16, #tpu.memory_space<vmem>>, vector<16x324xbf16>
    %c384_300 = arith.constant 384 : index
    %c0_301 = arith.constant 0 : index
    %214 = vector.load %arg31[%c384_300, %c0_301] : memref<400x324xbf16, #tpu.memory_space<vmem>>, vector<16x324xbf16>
    tpu.vector_store %arg31[%c384_300, %c0_301], %213 {strides = array<i32>} : memref<400x324xbf16, #tpu.memory_space<vmem>>, vector<16x324xbf16>,
    %c0_302 = arith.constant 0 : index
    %c0_303 = arith.constant 0 : index
    %215 = vector.load %arg4[%c0_302, %c0_303] : memref<16x400xbf16, #tpu.memory_space<vmem>>, vector<16x400xbf16>
    %c0_304 = arith.constant 0 : index
    %c0_305 = arith.constant 0 : index
    %216 = vector.load %arg31[%c0_304, %c0_305] : memref<400x324xbf16, #tpu.memory_space<vmem>>, vector<400x324xbf16>
    %cst_306 = arith.constant dense<0.000000e+00> : vector<16x324xf32>
    %217 = tpu.matmul %215, %216, %cst_306 {dimension_numbers = #tpu.dot_dimension_numbers<[1], [0], [0], [1], [0, 0, 1, 1], [], []>} : vector<16x400xbf16>, vector<400x324xbf16>, vector<16x324xf32> -> vector<16x324xf32>
    %c2_307 = arith.constant 2 : index
    %c0_308 = arith.constant 0 : index
    %c0_309 = arith.constant 0 : index
    %218 = vector.load %arg11[%c2_307, %c0_308, %c0_309] : memref<9x16x1xf32, #tpu.memory_space<vmem>>, vector<1x16x1xf32>
    %219 = vector.shape_cast %218 : vector<1x16x1xf32> to vector<16x1xf32>
    %220 = vector.broadcast %219 : vector<16x1xf32> to vector<16x324xf32>
    %221 = arith.addf %217, %220 : vector<16x324xf32>
    %cst_310 = arith.constant 0.000000e+00 : f32
    %222 = vector.broadcast %cst_310 : f32 to vector<16x324xf32>
    %223 = arith.maximumf %221, %222 : vector<16x324xf32>
    %c0_311 = arith.constant 0 : index
    %c0_312 = arith.constant 0 : index
    %224 = vector.load %arg12[%c0_311, %c0_312] : memref<1x324xf32, #tpu.memory_space<vmem>>, vector<1x324xf32>
    %cst_313 = arith.constant 0.000000e+00 : f32
    %225 = vector.broadcast %cst_313 : f32 to vector<1x324xf32>
    %226 = arith.cmpf one, %224, %225 : vector<1x324xf32>
    %cst_314 = arith.constant 0.000000e+00 : f32
    %227 = vector.shape_cast %226 : vector<1x324xi1> to vector<1x324xi1>
    %228 = vector.broadcast %227 : vector<1x324xi1> to vector<16x324xi1>
    %229 = vector.broadcast %cst_314 : f32 to vector<16x324xf32>
    %230 = arith.select %228, %223, %229 : vector<16x324xi1>, vector<16x324xf32>
    %231 = vector.extract_strided_slice %230 {offsets = [0, 0], sizes = [16, 248], strides = [1, 1]} : vector<16x324xf32> to vector<16x248xf32>
    %232 = arith.truncf %231 : vector<16x248xf32> to vector<16x248xbf16>
    %c0_315 = arith.constant 0 : index
    %c0_316 = arith.constant 0 : index
    %233 = vector.load %arg16[%c0_315, %c0_316] : memref<248x101xbf16, #tpu.memory_space<vmem>>, vector<248x101xbf16>
    %cst_317 = arith.constant dense<0.000000e+00> : vector<16x101xf32>
    %234 = tpu.matmul %232, %233, %cst_317 {dimension_numbers = #tpu.dot_dimension_numbers<[1], [0], [0], [1], [0, 0, 1, 1], [], []>} : vector<16x248xbf16>, vector<248x101xbf16>, vector<16x101xf32> -> vector<16x101xf32>
    %235 = arith.truncf %234 : vector<16x101xf32> to vector<16x101xbf16>
    %c0_318 = arith.constant 0 : index
    %c0_319 = arith.constant 0 : index
    %236 = vector.load %arg25[%c0_318, %c0_319] : memref<16x101xbf16, #tpu.memory_space<vmem>>, vector<16x101xbf16>
    tpu.vector_store %arg25[%c0_318, %c0_319], %235 {strides = array<i32>} : memref<16x101xbf16, #tpu.memory_space<vmem>>, vector<16x101xbf16>,
    %c0_320 = arith.constant 0 : index
    %c0_321 = arith.constant 0 : index
    %237 = vector.load %arg25[%c0_320, %c0_321] : memref<16x101xbf16, #tpu.memory_space<vmem>>, vector<16x81xbf16>
    %c0_322 = arith.constant 0 : index
    %c0_323 = arith.constant 0 : index
    %238 = vector.load %arg31[%c0_322, %c0_323] : memref<400x324xbf16, #tpu.memory_space<vmem>>, vector<16x81xbf16>
    tpu.vector_store %arg31[%c0_322, %c0_323], %237 {strides = array<i32>} : memref<400x324xbf16, #tpu.memory_space<vmem>>, vector<16x81xbf16>,
    %c0_324 = arith.constant 0 : index
    %c1_325 = arith.constant 1 : index
    %239 = vector.load %arg25[%c0_324, %c1_325] : memref<16x101xbf16, #tpu.memory_space<vmem>>, vector<16x81xbf16>
    %c16_326 = arith.constant 16 : index
    %c0_327 = arith.constant 0 : index
    %240 = vector.load %arg31[%c16_326, %c0_327] : memref<400x324xbf16, #tpu.memory_space<vmem>>, vector<16x81xbf16>
    tpu.vector_store %arg31[%c16_326, %c0_327], %239 {strides = array<i32>} : memref<400x324xbf16, #tpu.memory_space<vmem>>, vector<16x81xbf16>,
    %c0_328 = arith.constant 0 : index
    %c2_329 = arith.constant 2 : index
    %241 = vector.load %arg25[%c0_328, %c2_329] : memref<16x101xbf16, #tpu.memory_space<vmem>>, vector<16x81xbf16>
    %c32_330 = arith.constant 32 : index
    %c0_331 = arith.constant 0 : index
    %242 = vector.load %arg31[%c32_330, %c0_331] : memref<400x324xbf16, #tpu.memory_space<vmem>>, vector<16x81xbf16>
    tpu.vector_store %arg31[%c32_330, %c0_331], %241 {strides = array<i32>} : memref<400x324xbf16, #tpu.memory_space<vmem>>, vector<16x81xbf16>,
    %c0_332 = arith.constant 0 : index
    %c9 = arith.constant 9 : index
    %243 = vector.load %arg25[%c0_332, %c9] : memref<16x101xbf16, #tpu.memory_space<vmem>>, vector<16x81xbf16>
    %c48_333 = arith.constant 48 : index
    %c0_334 = arith.constant 0 : index
    %244 = vector.load %arg31[%c48_333, %c0_334] : memref<400x324xbf16, #tpu.memory_space<vmem>>, vector<16x81xbf16>
    tpu.vector_store %arg31[%c48_333, %c0_334], %243 {strides = array<i32>} : memref<400x324xbf16, #tpu.memory_space<vmem>>, vector<16x81xbf16>,
    %c0_335 = arith.constant 0 : index
    %c10 = arith.constant 10 : index
    %245 = vector.load %arg25[%c0_335, %c10] : memref<16x101xbf16, #tpu.memory_space<vmem>>, vector<16x81xbf16>
    %c64_336 = arith.constant 64 : index
    %c0_337 = arith.constant 0 : index
    %246 = vector.load %arg31[%c64_336, %c0_337] : memref<400x324xbf16, #tpu.memory_space<vmem>>, vector<16x81xbf16>
    tpu.vector_store %arg31[%c64_336, %c0_337], %245 {strides = array<i32>} : memref<400x324xbf16, #tpu.memory_space<vmem>>, vector<16x81xbf16>,
    %c0_338 = arith.constant 0 : index
    %c11 = arith.constant 11 : index
    %247 = vector.load %arg25[%c0_338, %c11] : memref<16x101xbf16, #tpu.memory_space<vmem>>, vector<16x81xbf16>
    %c80_339 = arith.constant 80 : index
    %c0_340 = arith.constant 0 : index
    %248 = vector.load %arg31[%c80_339, %c0_340] : memref<400x324xbf16, #tpu.memory_space<vmem>>, vector<16x81xbf16>
    tpu.vector_store %arg31[%c80_339, %c0_340], %247 {strides = array<i32>} : memref<400x324xbf16, #tpu.memory_space<vmem>>, vector<16x81xbf16>,
    %c0_341 = arith.constant 0 : index
    %c18_342 = arith.constant 18 : index
    %249 = vector.load %arg25[%c0_341, %c18_342] : memref<16x101xbf16, #tpu.memory_space<vmem>>, vector<16x81xbf16>
    %c96_343 = arith.constant 96 : index
    %c0_344 = arith.constant 0 : index
    %250 = vector.load %arg31[%c96_343, %c0_344] : memref<400x324xbf16, #tpu.memory_space<vmem>>, vector<16x81xbf16>
    tpu.vector_store %arg31[%c96_343, %c0_344], %249 {strides = array<i32>} : memref<400x324xbf16, #tpu.memory_space<vmem>>, vector<16x81xbf16>,
    %c0_345 = arith.constant 0 : index
    %c19_346 = arith.constant 19 : index
    %251 = vector.load %arg25[%c0_345, %c19_346] : memref<16x101xbf16, #tpu.memory_space<vmem>>, vector<16x81xbf16>
    %c112_347 = arith.constant 112 : index
    %c0_348 = arith.constant 0 : index
    %252 = vector.load %arg31[%c112_347, %c0_348] : memref<400x324xbf16, #tpu.memory_space<vmem>>, vector<16x81xbf16>
    tpu.vector_store %arg31[%c112_347, %c0_348], %251 {strides = array<i32>} : memref<400x324xbf16, #tpu.memory_space<vmem>>, vector<16x81xbf16>,
    %c0_349 = arith.constant 0 : index
    %c20_350 = arith.constant 20 : index
    %253 = vector.load %arg25[%c0_349, %c20_350] : memref<16x101xbf16, #tpu.memory_space<vmem>>, vector<16x81xbf16>
    %c128_351 = arith.constant 128 : index
    %c0_352 = arith.constant 0 : index
    %254 = vector.load %arg31[%c128_351, %c0_352] : memref<400x324xbf16, #tpu.memory_space<vmem>>, vector<16x81xbf16>
    tpu.vector_store %arg31[%c128_351, %c0_352], %253 {strides = array<i32>} : memref<400x324xbf16, #tpu.memory_space<vmem>>, vector<16x81xbf16>,
    %c0_353 = arith.constant 0 : index
    %c0_354 = arith.constant 0 : index
    %255 = vector.load %arg5[%c0_353, %c0_354] : memref<16x144xbf16, #tpu.memory_space<vmem>>, vector<16x144xbf16>
    %c0_355 = arith.constant 0 : index
    %c0_356 = arith.constant 0 : index
    %256 = vector.load %arg31[%c0_355, %c0_356] : memref<400x324xbf16, #tpu.memory_space<vmem>>, vector<144x81xbf16>
    %cst_357 = arith.constant dense<0.000000e+00> : vector<16x81xf32>
    %257 = tpu.matmul %255, %256, %cst_357 {dimension_numbers = #tpu.dot_dimension_numbers<[1], [0], [0], [1], [0, 0, 1, 1], [], []>} : vector<16x144xbf16>, vector<144x81xbf16>, vector<16x81xf32> -> vector<16x81xf32>
    %c3_358 = arith.constant 3 : index
    %c0_359 = arith.constant 0 : index
    %c0_360 = arith.constant 0 : index
    %258 = vector.load %arg11[%c3_358, %c0_359, %c0_360] : memref<9x16x1xf32, #tpu.memory_space<vmem>>, vector<1x16x1xf32>
    %259 = vector.shape_cast %258 : vector<1x16x1xf32> to vector<16x1xf32>
    %260 = vector.broadcast %259 : vector<16x1xf32> to vector<16x81xf32>
    %261 = arith.addf %257, %260 : vector<16x81xf32>
    %cst_361 = arith.constant 0.000000e+00 : f32
    %262 = vector.broadcast %cst_361 : f32 to vector<16x81xf32>
    %263 = arith.maximumf %261, %262 : vector<16x81xf32>
    %c0_362 = arith.constant 0 : index
    %c0_363 = arith.constant 0 : index
    %264 = vector.load %arg13[%c0_362, %c0_363] : memref<1x81xf32, #tpu.memory_space<vmem>>, vector<1x81xf32>
    %cst_364 = arith.constant 0.000000e+00 : f32
    %265 = vector.broadcast %cst_364 : f32 to vector<1x81xf32>
    %266 = arith.cmpf one, %264, %265 : vector<1x81xf32>
    %cst_365 = arith.constant 0.000000e+00 : f32
    %267 = vector.shape_cast %266 : vector<1x81xi1> to vector<1x81xi1>
    %268 = vector.broadcast %267 : vector<1x81xi1> to vector<16x81xi1>
    %269 = vector.broadcast %cst_365 : f32 to vector<16x81xf32>
    %270 = arith.select %268, %263, %269 : vector<16x81xi1>, vector<16x81xf32>
    %cst_366 = arith.constant 0.000000e+00 : bf16
    %271 = vector.broadcast %cst_366 : bf16 to vector<16x10xbf16>
    %c0_367 = arith.constant 0 : index
    %c0_368 = arith.constant 0 : index
    %272 = vector.load %arg26[%c0_367, %c0_368] : memref<16x101xbf16, #tpu.memory_space<vmem>>, vector<16x10xbf16>
    tpu.vector_store %arg26[%c0_367, %c0_368], %271 {strides = array<i32>} : memref<16x101xbf16, #tpu.memory_space<vmem>>, vector<16x10xbf16>,
    %273 = arith.truncf %270 : vector<16x81xf32> to vector<16x81xbf16>
    %c0_369 = arith.constant 0 : index
    %c10_370 = arith.constant 10 : index
    %274 = vector.load %arg26[%c0_369, %c10_370] : memref<16x101xbf16, #tpu.memory_space<vmem>>, vector<16x81xbf16>
    tpu.vector_store %arg26[%c0_369, %c10_370], %273 {strides = array<i32>} : memref<16x101xbf16, #tpu.memory_space<vmem>>, vector<16x81xbf16>,
    %c0_371 = arith.constant 0 : index
    %c0_372 = arith.constant 0 : index
    %275 = vector.load %arg26[%c0_371, %c0_372] : memref<16x101xbf16, #tpu.memory_space<vmem>>, vector<16x81xbf16>
    %c0_373 = arith.constant 0 : index
    %c0_374 = arith.constant 0 : index
    %276 = vector.load %arg31[%c0_373, %c0_374] : memref<400x324xbf16, #tpu.memory_space<vmem>>, vector<16x81xbf16>
    tpu.vector_store %arg31[%c0_373, %c0_374], %275 {strides = array<i32>} : memref<400x324xbf16, #tpu.memory_space<vmem>>, vector<16x81xbf16>,
    %c0_375 = arith.constant 0 : index
    %c1_376 = arith.constant 1 : index
    %277 = vector.load %arg26[%c0_375, %c1_376] : memref<16x101xbf16, #tpu.memory_space<vmem>>, vector<16x81xbf16>
    %c16_377 = arith.constant 16 : index
    %c0_378 = arith.constant 0 : index
    %278 = vector.load %arg31[%c16_377, %c0_378] : memref<400x324xbf16, #tpu.memory_space<vmem>>, vector<16x81xbf16>
    tpu.vector_store %arg31[%c16_377, %c0_378], %277 {strides = array<i32>} : memref<400x324xbf16, #tpu.memory_space<vmem>>, vector<16x81xbf16>,
    %c0_379 = arith.constant 0 : index
    %c2_380 = arith.constant 2 : index
    %279 = vector.load %arg26[%c0_379, %c2_380] : memref<16x101xbf16, #tpu.memory_space<vmem>>, vector<16x81xbf16>
    %c32_381 = arith.constant 32 : index
    %c0_382 = arith.constant 0 : index
    %280 = vector.load %arg31[%c32_381, %c0_382] : memref<400x324xbf16, #tpu.memory_space<vmem>>, vector<16x81xbf16>
    tpu.vector_store %arg31[%c32_381, %c0_382], %279 {strides = array<i32>} : memref<400x324xbf16, #tpu.memory_space<vmem>>, vector<16x81xbf16>,
    %c0_383 = arith.constant 0 : index
    %c9_384 = arith.constant 9 : index
    %281 = vector.load %arg26[%c0_383, %c9_384] : memref<16x101xbf16, #tpu.memory_space<vmem>>, vector<16x81xbf16>
    %c48_385 = arith.constant 48 : index
    %c0_386 = arith.constant 0 : index
    %282 = vector.load %arg31[%c48_385, %c0_386] : memref<400x324xbf16, #tpu.memory_space<vmem>>, vector<16x81xbf16>
    tpu.vector_store %arg31[%c48_385, %c0_386], %281 {strides = array<i32>} : memref<400x324xbf16, #tpu.memory_space<vmem>>, vector<16x81xbf16>,
    %c0_387 = arith.constant 0 : index
    %c10_388 = arith.constant 10 : index
    %283 = vector.load %arg26[%c0_387, %c10_388] : memref<16x101xbf16, #tpu.memory_space<vmem>>, vector<16x81xbf16>
    %c64_389 = arith.constant 64 : index
    %c0_390 = arith.constant 0 : index
    %284 = vector.load %arg31[%c64_389, %c0_390] : memref<400x324xbf16, #tpu.memory_space<vmem>>, vector<16x81xbf16>
    tpu.vector_store %arg31[%c64_389, %c0_390], %283 {strides = array<i32>} : memref<400x324xbf16, #tpu.memory_space<vmem>>, vector<16x81xbf16>,
    %c0_391 = arith.constant 0 : index
    %c11_392 = arith.constant 11 : index
    %285 = vector.load %arg26[%c0_391, %c11_392] : memref<16x101xbf16, #tpu.memory_space<vmem>>, vector<16x81xbf16>
    %c80_393 = arith.constant 80 : index
    %c0_394 = arith.constant 0 : index
    %286 = vector.load %arg31[%c80_393, %c0_394] : memref<400x324xbf16, #tpu.memory_space<vmem>>, vector<16x81xbf16>
    tpu.vector_store %arg31[%c80_393, %c0_394], %285 {strides = array<i32>} : memref<400x324xbf16, #tpu.memory_space<vmem>>, vector<16x81xbf16>,
    %c0_395 = arith.constant 0 : index
    %c18_396 = arith.constant 18 : index
    %287 = vector.load %arg26[%c0_395, %c18_396] : memref<16x101xbf16, #tpu.memory_space<vmem>>, vector<16x81xbf16>
    %c96_397 = arith.constant 96 : index
    %c0_398 = arith.constant 0 : index
    %288 = vector.load %arg31[%c96_397, %c0_398] : memref<400x324xbf16, #tpu.memory_space<vmem>>, vector<16x81xbf16>
    tpu.vector_store %arg31[%c96_397, %c0_398], %287 {strides = array<i32>} : memref<400x324xbf16, #tpu.memory_space<vmem>>, vector<16x81xbf16>,
    %c0_399 = arith.constant 0 : index
    %c19_400 = arith.constant 19 : index
    %289 = vector.load %arg26[%c0_399, %c19_400] : memref<16x101xbf16, #tpu.memory_space<vmem>>, vector<16x81xbf16>
    %c112_401 = arith.constant 112 : index
    %c0_402 = arith.constant 0 : index
    %290 = vector.load %arg31[%c112_401, %c0_402] : memref<400x324xbf16, #tpu.memory_space<vmem>>, vector<16x81xbf16>
    tpu.vector_store %arg31[%c112_401, %c0_402], %289 {strides = array<i32>} : memref<400x324xbf16, #tpu.memory_space<vmem>>, vector<16x81xbf16>,
    %c0_403 = arith.constant 0 : index
    %c20_404 = arith.constant 20 : index
    %291 = vector.load %arg26[%c0_403, %c20_404] : memref<16x101xbf16, #tpu.memory_space<vmem>>, vector<16x81xbf16>
    %c128_405 = arith.constant 128 : index
    %c0_406 = arith.constant 0 : index
    %292 = vector.load %arg31[%c128_405, %c0_406] : memref<400x324xbf16, #tpu.memory_space<vmem>>, vector<16x81xbf16>
    tpu.vector_store %arg31[%c128_405, %c0_406], %291 {strides = array<i32>} : memref<400x324xbf16, #tpu.memory_space<vmem>>, vector<16x81xbf16>,
    %c0_407 = arith.constant 0 : index
    %c0_408 = arith.constant 0 : index
    %293 = vector.load %arg6[%c0_407, %c0_408] : memref<16x144xbf16, #tpu.memory_space<vmem>>, vector<16x144xbf16>
    %c0_409 = arith.constant 0 : index
    %c0_410 = arith.constant 0 : index
    %294 = vector.load %arg31[%c0_409, %c0_410] : memref<400x324xbf16, #tpu.memory_space<vmem>>, vector<144x81xbf16>
    %cst_411 = arith.constant dense<0.000000e+00> : vector<16x81xf32>
    %295 = tpu.matmul %293, %294, %cst_411 {dimension_numbers = #tpu.dot_dimension_numbers<[1], [0], [0], [1], [0, 0, 1, 1], [], []>} : vector<16x144xbf16>, vector<144x81xbf16>, vector<16x81xf32> -> vector<16x81xf32>
    %c4_412 = arith.constant 4 : index
    %c0_413 = arith.constant 0 : index
    %c0_414 = arith.constant 0 : index
    %296 = vector.load %arg11[%c4_412, %c0_413, %c0_414] : memref<9x16x1xf32, #tpu.memory_space<vmem>>, vector<1x16x1xf32>
    %297 = vector.shape_cast %296 : vector<1x16x1xf32> to vector<16x1xf32>
    %298 = vector.broadcast %297 : vector<16x1xf32> to vector<16x81xf32>
    %299 = arith.addf %295, %298 : vector<16x81xf32>
    %cst_415 = arith.constant 0.000000e+00 : f32
    %300 = vector.broadcast %cst_415 : f32 to vector<16x81xf32>
    %301 = arith.maximumf %299, %300 : vector<16x81xf32>
    %c0_416 = arith.constant 0 : index
    %c0_417 = arith.constant 0 : index
    %302 = vector.load %arg13[%c0_416, %c0_417] : memref<1x81xf32, #tpu.memory_space<vmem>>, vector<1x81xf32>
    %cst_418 = arith.constant 0.000000e+00 : f32
    %303 = vector.broadcast %cst_418 : f32 to vector<1x81xf32>
    %304 = arith.cmpf one, %302, %303 : vector<1x81xf32>
    %cst_419 = arith.constant 0.000000e+00 : f32
    %305 = vector.shape_cast %304 : vector<1x81xi1> to vector<1x81xi1>
    %306 = vector.broadcast %305 : vector<1x81xi1> to vector<16x81xi1>
    %307 = vector.broadcast %cst_419 : f32 to vector<16x81xf32>
    %308 = arith.select %306, %301, %307 : vector<16x81xi1>, vector<16x81xf32>
    %309 = vector.extract_strided_slice %308 {offsets = [0, 0], sizes = [16, 61], strides = [1, 1]} : vector<16x81xf32> to vector<16x61xf32>
    %310 = arith.truncf %309 : vector<16x61xf32> to vector<16x61xbf16>
    %c0_420 = arith.constant 0 : index
    %c0_421 = arith.constant 0 : index
    %311 = vector.load %arg17[%c0_420, %c0_421] : memref<61x37xbf16, #tpu.memory_space<vmem>>, vector<61x37xbf16>
    %cst_422 = arith.constant dense<0.000000e+00> : vector<16x37xf32>
    %312 = tpu.matmul %310, %311, %cst_422 {dimension_numbers = #tpu.dot_dimension_numbers<[1], [0], [0], [1], [0, 0, 1, 1], [], []>} : vector<16x61xbf16>, vector<61x37xbf16>, vector<16x37xf32> -> vector<16x37xf32>
    %313 = arith.truncf %312 : vector<16x37xf32> to vector<16x37xbf16>
    %c0_423 = arith.constant 0 : index
    %c0_424 = arith.constant 0 : index
    %314 = vector.load %arg27[%c0_423, %c0_424] : memref<16x37xbf16, #tpu.memory_space<vmem>>, vector<16x37xbf16>
    tpu.vector_store %arg27[%c0_423, %c0_424], %313 {strides = array<i32>} : memref<16x37xbf16, #tpu.memory_space<vmem>>, vector<16x37xbf16>,
    %c0_425 = arith.constant 0 : index
    %c0_426 = arith.constant 0 : index
    %315 = vector.load %arg27[%c0_425, %c0_426] : memref<16x37xbf16, #tpu.memory_space<vmem>>, vector<16x25xbf16>
    %c0_427 = arith.constant 0 : index
    %c0_428 = arith.constant 0 : index
    %316 = vector.load %arg31[%c0_427, %c0_428] : memref<400x324xbf16, #tpu.memory_space<vmem>>, vector<16x25xbf16>
    tpu.vector_store %arg31[%c0_427, %c0_428], %315 {strides = array<i32>} : memref<400x324xbf16, #tpu.memory_space<vmem>>, vector<16x25xbf16>,
    %c0_429 = arith.constant 0 : index
    %c1_430 = arith.constant 1 : index
    %317 = vector.load %arg27[%c0_429, %c1_430] : memref<16x37xbf16, #tpu.memory_space<vmem>>, vector<16x25xbf16>
    %c16_431 = arith.constant 16 : index
    %c0_432 = arith.constant 0 : index
    %318 = vector.load %arg31[%c16_431, %c0_432] : memref<400x324xbf16, #tpu.memory_space<vmem>>, vector<16x25xbf16>
    tpu.vector_store %arg31[%c16_431, %c0_432], %317 {strides = array<i32>} : memref<400x324xbf16, #tpu.memory_space<vmem>>, vector<16x25xbf16>,
    %c0_433 = arith.constant 0 : index
    %c2_434 = arith.constant 2 : index
    %319 = vector.load %arg27[%c0_433, %c2_434] : memref<16x37xbf16, #tpu.memory_space<vmem>>, vector<16x25xbf16>
    %c32_435 = arith.constant 32 : index
    %c0_436 = arith.constant 0 : index
    %320 = vector.load %arg31[%c32_435, %c0_436] : memref<400x324xbf16, #tpu.memory_space<vmem>>, vector<16x25xbf16>
    tpu.vector_store %arg31[%c32_435, %c0_436], %319 {strides = array<i32>} : memref<400x324xbf16, #tpu.memory_space<vmem>>, vector<16x25xbf16>,
    %c0_437 = arith.constant 0 : index
    %c5 = arith.constant 5 : index
    %321 = vector.load %arg27[%c0_437, %c5] : memref<16x37xbf16, #tpu.memory_space<vmem>>, vector<16x25xbf16>
    %c48_438 = arith.constant 48 : index
    %c0_439 = arith.constant 0 : index
    %322 = vector.load %arg31[%c48_438, %c0_439] : memref<400x324xbf16, #tpu.memory_space<vmem>>, vector<16x25xbf16>
    tpu.vector_store %arg31[%c48_438, %c0_439], %321 {strides = array<i32>} : memref<400x324xbf16, #tpu.memory_space<vmem>>, vector<16x25xbf16>,
    %c0_440 = arith.constant 0 : index
    %c6 = arith.constant 6 : index
    %323 = vector.load %arg27[%c0_440, %c6] : memref<16x37xbf16, #tpu.memory_space<vmem>>, vector<16x25xbf16>
    %c64_441 = arith.constant 64 : index
    %c0_442 = arith.constant 0 : index
    %324 = vector.load %arg31[%c64_441, %c0_442] : memref<400x324xbf16, #tpu.memory_space<vmem>>, vector<16x25xbf16>
    tpu.vector_store %arg31[%c64_441, %c0_442], %323 {strides = array<i32>} : memref<400x324xbf16, #tpu.memory_space<vmem>>, vector<16x25xbf16>,
    %c0_443 = arith.constant 0 : index
    %c7 = arith.constant 7 : index
    %325 = vector.load %arg27[%c0_443, %c7] : memref<16x37xbf16, #tpu.memory_space<vmem>>, vector<16x25xbf16>
    %c80_444 = arith.constant 80 : index
    %c0_445 = arith.constant 0 : index
    %326 = vector.load %arg31[%c80_444, %c0_445] : memref<400x324xbf16, #tpu.memory_space<vmem>>, vector<16x25xbf16>
    tpu.vector_store %arg31[%c80_444, %c0_445], %325 {strides = array<i32>} : memref<400x324xbf16, #tpu.memory_space<vmem>>, vector<16x25xbf16>,
    %c0_446 = arith.constant 0 : index
    %c10_447 = arith.constant 10 : index
    %327 = vector.load %arg27[%c0_446, %c10_447] : memref<16x37xbf16, #tpu.memory_space<vmem>>, vector<16x25xbf16>
    %c96_448 = arith.constant 96 : index
    %c0_449 = arith.constant 0 : index
    %328 = vector.load %arg31[%c96_448, %c0_449] : memref<400x324xbf16, #tpu.memory_space<vmem>>, vector<16x25xbf16>
    tpu.vector_store %arg31[%c96_448, %c0_449], %327 {strides = array<i32>} : memref<400x324xbf16, #tpu.memory_space<vmem>>, vector<16x25xbf16>,
    %c0_450 = arith.constant 0 : index
    %c11_451 = arith.constant 11 : index
    %329 = vector.load %arg27[%c0_450, %c11_451] : memref<16x37xbf16, #tpu.memory_space<vmem>>, vector<16x25xbf16>
    %c112_452 = arith.constant 112 : index
    %c0_453 = arith.constant 0 : index
    %330 = vector.load %arg31[%c112_452, %c0_453] : memref<400x324xbf16, #tpu.memory_space<vmem>>, vector<16x25xbf16>
    tpu.vector_store %arg31[%c112_452, %c0_453], %329 {strides = array<i32>} : memref<400x324xbf16, #tpu.memory_space<vmem>>, vector<16x25xbf16>,
    %c0_454 = arith.constant 0 : index
    %c12 = arith.constant 12 : index
    %331 = vector.load %arg27[%c0_454, %c12] : memref<16x37xbf16, #tpu.memory_space<vmem>>, vector<16x25xbf16>
    %c128_455 = arith.constant 128 : index
    %c0_456 = arith.constant 0 : index
    %332 = vector.load %arg31[%c128_455, %c0_456] : memref<400x324xbf16, #tpu.memory_space<vmem>>, vector<16x25xbf16>
    tpu.vector_store %arg31[%c128_455, %c0_456], %331 {strides = array<i32>} : memref<400x324xbf16, #tpu.memory_space<vmem>>, vector<16x25xbf16>,
    %c0_457 = arith.constant 0 : index
    %c0_458 = arith.constant 0 : index
    %333 = vector.load %arg7[%c0_457, %c0_458] : memref<16x144xbf16, #tpu.memory_space<vmem>>, vector<16x144xbf16>
    %c0_459 = arith.constant 0 : index
    %c0_460 = arith.constant 0 : index
    %334 = vector.load %arg31[%c0_459, %c0_460] : memref<400x324xbf16, #tpu.memory_space<vmem>>, vector<144x25xbf16>
    %cst_461 = arith.constant dense<0.000000e+00> : vector<16x25xf32>
    %335 = tpu.matmul %333, %334, %cst_461 {dimension_numbers = #tpu.dot_dimension_numbers<[1], [0], [0], [1], [0, 0, 1, 1], [], []>} : vector<16x144xbf16>, vector<144x25xbf16>, vector<16x25xf32> -> vector<16x25xf32>
    %c5_462 = arith.constant 5 : index
    %c0_463 = arith.constant 0 : index
    %c0_464 = arith.constant 0 : index
    %336 = vector.load %arg11[%c5_462, %c0_463, %c0_464] : memref<9x16x1xf32, #tpu.memory_space<vmem>>, vector<1x16x1xf32>
    %337 = vector.shape_cast %336 : vector<1x16x1xf32> to vector<16x1xf32>
    %338 = vector.broadcast %337 : vector<16x1xf32> to vector<16x25xf32>
    %339 = arith.addf %335, %338 : vector<16x25xf32>
    %cst_465 = arith.constant 0.000000e+00 : f32
    %340 = vector.broadcast %cst_465 : f32 to vector<16x25xf32>
    %341 = arith.maximumf %339, %340 : vector<16x25xf32>
    %c0_466 = arith.constant 0 : index
    %c0_467 = arith.constant 0 : index
    %342 = vector.load %arg14[%c0_466, %c0_467] : memref<1x25xf32, #tpu.memory_space<vmem>>, vector<1x25xf32>
    %cst_468 = arith.constant 0.000000e+00 : f32
    %343 = vector.broadcast %cst_468 : f32 to vector<1x25xf32>
    %344 = arith.cmpf one, %342, %343 : vector<1x25xf32>
    %cst_469 = arith.constant 0.000000e+00 : f32
    %345 = vector.shape_cast %344 : vector<1x25xi1> to vector<1x25xi1>
    %346 = vector.broadcast %345 : vector<1x25xi1> to vector<16x25xi1>
    %347 = vector.broadcast %cst_469 : f32 to vector<16x25xf32>
    %348 = arith.select %346, %341, %347 : vector<16x25xi1>, vector<16x25xf32>
    %cst_470 = arith.constant 0.000000e+00 : bf16
    %349 = vector.broadcast %cst_470 : bf16 to vector<16x6xbf16>
    %c0_471 = arith.constant 0 : index
    %c0_472 = arith.constant 0 : index
    %350 = vector.load %arg28[%c0_471, %c0_472] : memref<16x37xbf16, #tpu.memory_space<vmem>>, vector<16x6xbf16>
    tpu.vector_store %arg28[%c0_471, %c0_472], %349 {strides = array<i32>} : memref<16x37xbf16, #tpu.memory_space<vmem>>, vector<16x6xbf16>,
    %351 = arith.truncf %348 : vector<16x25xf32> to vector<16x25xbf16>
    %c0_473 = arith.constant 0 : index
    %c6_474 = arith.constant 6 : index
    %352 = vector.load %arg28[%c0_473, %c6_474] : memref<16x37xbf16, #tpu.memory_space<vmem>>, vector<16x25xbf16>
    tpu.vector_store %arg28[%c0_473, %c6_474], %351 {strides = array<i32>} : memref<16x37xbf16, #tpu.memory_space<vmem>>, vector<16x25xbf16>,
    %c0_475 = arith.constant 0 : index
    %c0_476 = arith.constant 0 : index
    %353 = vector.load %arg28[%c0_475, %c0_476] : memref<16x37xbf16, #tpu.memory_space<vmem>>, vector<16x25xbf16>
    %c0_477 = arith.constant 0 : index
    %c0_478 = arith.constant 0 : index
    %354 = vector.load %arg31[%c0_477, %c0_478] : memref<400x324xbf16, #tpu.memory_space<vmem>>, vector<16x25xbf16>
    tpu.vector_store %arg31[%c0_477, %c0_478], %353 {strides = array<i32>} : memref<400x324xbf16, #tpu.memory_space<vmem>>, vector<16x25xbf16>,
    %c0_479 = arith.constant 0 : index
    %c1_480 = arith.constant 1 : index
    %355 = vector.load %arg28[%c0_479, %c1_480] : memref<16x37xbf16, #tpu.memory_space<vmem>>, vector<16x25xbf16>
    %c16_481 = arith.constant 16 : index
    %c0_482 = arith.constant 0 : index
    %356 = vector.load %arg31[%c16_481, %c0_482] : memref<400x324xbf16, #tpu.memory_space<vmem>>, vector<16x25xbf16>
    tpu.vector_store %arg31[%c16_481, %c0_482], %355 {strides = array<i32>} : memref<400x324xbf16, #tpu.memory_space<vmem>>, vector<16x25xbf16>,
    %c0_483 = arith.constant 0 : index
    %c2_484 = arith.constant 2 : index
    %357 = vector.load %arg28[%c0_483, %c2_484] : memref<16x37xbf16, #tpu.memory_space<vmem>>, vector<16x25xbf16>
    %c32_485 = arith.constant 32 : index
    %c0_486 = arith.constant 0 : index
    %358 = vector.load %arg31[%c32_485, %c0_486] : memref<400x324xbf16, #tpu.memory_space<vmem>>, vector<16x25xbf16>
    tpu.vector_store %arg31[%c32_485, %c0_486], %357 {strides = array<i32>} : memref<400x324xbf16, #tpu.memory_space<vmem>>, vector<16x25xbf16>,
    %c0_487 = arith.constant 0 : index
    %c5_488 = arith.constant 5 : index
    %359 = vector.load %arg28[%c0_487, %c5_488] : memref<16x37xbf16, #tpu.memory_space<vmem>>, vector<16x25xbf16>
    %c48_489 = arith.constant 48 : index
    %c0_490 = arith.constant 0 : index
    %360 = vector.load %arg31[%c48_489, %c0_490] : memref<400x324xbf16, #tpu.memory_space<vmem>>, vector<16x25xbf16>
    tpu.vector_store %arg31[%c48_489, %c0_490], %359 {strides = array<i32>} : memref<400x324xbf16, #tpu.memory_space<vmem>>, vector<16x25xbf16>,
    %c0_491 = arith.constant 0 : index
    %c6_492 = arith.constant 6 : index
    %361 = vector.load %arg28[%c0_491, %c6_492] : memref<16x37xbf16, #tpu.memory_space<vmem>>, vector<16x25xbf16>
    %c64_493 = arith.constant 64 : index
    %c0_494 = arith.constant 0 : index
    %362 = vector.load %arg31[%c64_493, %c0_494] : memref<400x324xbf16, #tpu.memory_space<vmem>>, vector<16x25xbf16>
    tpu.vector_store %arg31[%c64_493, %c0_494], %361 {strides = array<i32>} : memref<400x324xbf16, #tpu.memory_space<vmem>>, vector<16x25xbf16>,
    %c0_495 = arith.constant 0 : index
    %c7_496 = arith.constant 7 : index
    %363 = vector.load %arg28[%c0_495, %c7_496] : memref<16x37xbf16, #tpu.memory_space<vmem>>, vector<16x25xbf16>
    %c80_497 = arith.constant 80 : index
    %c0_498 = arith.constant 0 : index
    %364 = vector.load %arg31[%c80_497, %c0_498] : memref<400x324xbf16, #tpu.memory_space<vmem>>, vector<16x25xbf16>
    tpu.vector_store %arg31[%c80_497, %c0_498], %363 {strides = array<i32>} : memref<400x324xbf16, #tpu.memory_space<vmem>>, vector<16x25xbf16>,
    %c0_499 = arith.constant 0 : index
    %c10_500 = arith.constant 10 : index
    %365 = vector.load %arg28[%c0_499, %c10_500] : memref<16x37xbf16, #tpu.memory_space<vmem>>, vector<16x25xbf16>
    %c96_501 = arith.constant 96 : index
    %c0_502 = arith.constant 0 : index
    %366 = vector.load %arg31[%c96_501, %c0_502] : memref<400x324xbf16, #tpu.memory_space<vmem>>, vector<16x25xbf16>
    tpu.vector_store %arg31[%c96_501, %c0_502], %365 {strides = array<i32>} : memref<400x324xbf16, #tpu.memory_space<vmem>>, vector<16x25xbf16>,
    %c0_503 = arith.constant 0 : index
    %c11_504 = arith.constant 11 : index
    %367 = vector.load %arg28[%c0_503, %c11_504] : memref<16x37xbf16, #tpu.memory_space<vmem>>, vector<16x25xbf16>
    %c112_505 = arith.constant 112 : index
    %c0_506 = arith.constant 0 : index
    %368 = vector.load %arg31[%c112_505, %c0_506] : memref<400x324xbf16, #tpu.memory_space<vmem>>, vector<16x25xbf16>
    tpu.vector_store %arg31[%c112_505, %c0_506], %367 {strides = array<i32>} : memref<400x324xbf16, #tpu.memory_space<vmem>>, vector<16x25xbf16>,
    %c0_507 = arith.constant 0 : index
    %c12_508 = arith.constant 12 : index
    %369 = vector.load %arg28[%c0_507, %c12_508] : memref<16x37xbf16, #tpu.memory_space<vmem>>, vector<16x25xbf16>
    %c128_509 = arith.constant 128 : index
    %c0_510 = arith.constant 0 : index
    %370 = vector.load %arg31[%c128_509, %c0_510] : memref<400x324xbf16, #tpu.memory_space<vmem>>, vector<16x25xbf16>
    tpu.vector_store %arg31[%c128_509, %c0_510], %369 {strides = array<i32>} : memref<400x324xbf16, #tpu.memory_space<vmem>>, vector<16x25xbf16>,
    %c0_511 = arith.constant 0 : index
    %c0_512 = arith.constant 0 : index
    %371 = vector.load %arg8[%c0_511, %c0_512] : memref<16x144xbf16, #tpu.memory_space<vmem>>, vector<16x144xbf16>
    %c0_513 = arith.constant 0 : index
    %c0_514 = arith.constant 0 : index
    %372 = vector.load %arg31[%c0_513, %c0_514] : memref<400x324xbf16, #tpu.memory_space<vmem>>, vector<144x25xbf16>
    %cst_515 = arith.constant dense<0.000000e+00> : vector<16x25xf32>
    %373 = tpu.matmul %371, %372, %cst_515 {dimension_numbers = #tpu.dot_dimension_numbers<[1], [0], [0], [1], [0, 0, 1, 1], [], []>} : vector<16x144xbf16>, vector<144x25xbf16>, vector<16x25xf32> -> vector<16x25xf32>
    %c6_516 = arith.constant 6 : index
    %c0_517 = arith.constant 0 : index
    %c0_518 = arith.constant 0 : index
    %374 = vector.load %arg11[%c6_516, %c0_517, %c0_518] : memref<9x16x1xf32, #tpu.memory_space<vmem>>, vector<1x16x1xf32>
    %375 = vector.shape_cast %374 : vector<1x16x1xf32> to vector<16x1xf32>
    %376 = vector.broadcast %375 : vector<16x1xf32> to vector<16x25xf32>
    %377 = arith.addf %373, %376 : vector<16x25xf32>
    %cst_519 = arith.constant 0.000000e+00 : f32
    %378 = vector.broadcast %cst_519 : f32 to vector<16x25xf32>
    %379 = arith.maximumf %377, %378 : vector<16x25xf32>
    %c0_520 = arith.constant 0 : index
    %c0_521 = arith.constant 0 : index
    %380 = vector.load %arg14[%c0_520, %c0_521] : memref<1x25xf32, #tpu.memory_space<vmem>>, vector<1x25xf32>
    %cst_522 = arith.constant 0.000000e+00 : f32
    %381 = vector.broadcast %cst_522 : f32 to vector<1x25xf32>
    %382 = arith.cmpf one, %380, %381 : vector<1x25xf32>
    %cst_523 = arith.constant 0.000000e+00 : f32
    %383 = vector.shape_cast %382 : vector<1x25xi1> to vector<1x25xi1>
    %384 = vector.broadcast %383 : vector<1x25xi1> to vector<16x25xi1>
    %385 = vector.broadcast %cst_523 : f32 to vector<16x25xf32>
    %386 = arith.select %384, %379, %385 : vector<16x25xi1>, vector<16x25xf32>
    %387 = vector.extract_strided_slice %386 {offsets = [0, 0], sizes = [16, 13], strides = [1, 1]} : vector<16x25xf32> to vector<16x13xf32>
    %388 = arith.truncf %387 : vector<16x13xf32> to vector<16x13xbf16>
    %c0_524 = arith.constant 0 : index
    %c0_525 = arith.constant 0 : index
    %389 = vector.load %arg18[%c0_524, %c0_525] : memref<13x17xbf16, #tpu.memory_space<vmem>>, vector<13x17xbf16>
    %cst_526 = arith.constant dense<0.000000e+00> : vector<16x17xf32>
    %390 = tpu.matmul %388, %389, %cst_526 {dimension_numbers = #tpu.dot_dimension_numbers<[1], [0], [0], [1], [0, 0, 1, 1], [], []>} : vector<16x13xbf16>, vector<13x17xbf16>, vector<16x17xf32> -> vector<16x17xf32>
    %391 = arith.truncf %390 : vector<16x17xf32> to vector<16x17xbf16>
    %c0_527 = arith.constant 0 : index
    %c0_528 = arith.constant 0 : index
    %392 = vector.load %arg29[%c0_527, %c0_528] : memref<16x17xbf16, #tpu.memory_space<vmem>>, vector<16x17xbf16>
    tpu.vector_store %arg29[%c0_527, %c0_528], %391 {strides = array<i32>} : memref<16x17xbf16, #tpu.memory_space<vmem>>, vector<16x17xbf16>,
    %c0_529 = arith.constant 0 : index
    %c0_530 = arith.constant 0 : index
    %393 = vector.load %arg29[%c0_529, %c0_530] : memref<16x17xbf16, #tpu.memory_space<vmem>>, vector<16x9xbf16>
    %c0_531 = arith.constant 0 : index
    %c0_532 = arith.constant 0 : index
    %394 = vector.load %arg31[%c0_531, %c0_532] : memref<400x324xbf16, #tpu.memory_space<vmem>>, vector<16x9xbf16>
    tpu.vector_store %arg31[%c0_531, %c0_532], %393 {strides = array<i32>} : memref<400x324xbf16, #tpu.memory_space<vmem>>, vector<16x9xbf16>,
    %c0_533 = arith.constant 0 : index
    %c1_534 = arith.constant 1 : index
    %395 = vector.load %arg29[%c0_533, %c1_534] : memref<16x17xbf16, #tpu.memory_space<vmem>>, vector<16x9xbf16>
    %c16_535 = arith.constant 16 : index
    %c0_536 = arith.constant 0 : index
    %396 = vector.load %arg31[%c16_535, %c0_536] : memref<400x324xbf16, #tpu.memory_space<vmem>>, vector<16x9xbf16>
    tpu.vector_store %arg31[%c16_535, %c0_536], %395 {strides = array<i32>} : memref<400x324xbf16, #tpu.memory_space<vmem>>, vector<16x9xbf16>,
    %c0_537 = arith.constant 0 : index
    %c2_538 = arith.constant 2 : index
    %397 = vector.load %arg29[%c0_537, %c2_538] : memref<16x17xbf16, #tpu.memory_space<vmem>>, vector<16x9xbf16>
    %c32_539 = arith.constant 32 : index
    %c0_540 = arith.constant 0 : index
    %398 = vector.load %arg31[%c32_539, %c0_540] : memref<400x324xbf16, #tpu.memory_space<vmem>>, vector<16x9xbf16>
    tpu.vector_store %arg31[%c32_539, %c0_540], %397 {strides = array<i32>} : memref<400x324xbf16, #tpu.memory_space<vmem>>, vector<16x9xbf16>,
    %c0_541 = arith.constant 0 : index
    %c3_542 = arith.constant 3 : index
    %399 = vector.load %arg29[%c0_541, %c3_542] : memref<16x17xbf16, #tpu.memory_space<vmem>>, vector<16x9xbf16>
    %c48_543 = arith.constant 48 : index
    %c0_544 = arith.constant 0 : index
    %400 = vector.load %arg31[%c48_543, %c0_544] : memref<400x324xbf16, #tpu.memory_space<vmem>>, vector<16x9xbf16>
    tpu.vector_store %arg31[%c48_543, %c0_544], %399 {strides = array<i32>} : memref<400x324xbf16, #tpu.memory_space<vmem>>, vector<16x9xbf16>,
    %c0_545 = arith.constant 0 : index
    %c4_546 = arith.constant 4 : index
    %401 = vector.load %arg29[%c0_545, %c4_546] : memref<16x17xbf16, #tpu.memory_space<vmem>>, vector<16x9xbf16>
    %c64_547 = arith.constant 64 : index
    %c0_548 = arith.constant 0 : index
    %402 = vector.load %arg31[%c64_547, %c0_548] : memref<400x324xbf16, #tpu.memory_space<vmem>>, vector<16x9xbf16>
    tpu.vector_store %arg31[%c64_547, %c0_548], %401 {strides = array<i32>} : memref<400x324xbf16, #tpu.memory_space<vmem>>, vector<16x9xbf16>,
    %c0_549 = arith.constant 0 : index
    %c5_550 = arith.constant 5 : index
    %403 = vector.load %arg29[%c0_549, %c5_550] : memref<16x17xbf16, #tpu.memory_space<vmem>>, vector<16x9xbf16>
    %c80_551 = arith.constant 80 : index
    %c0_552 = arith.constant 0 : index
    %404 = vector.load %arg31[%c80_551, %c0_552] : memref<400x324xbf16, #tpu.memory_space<vmem>>, vector<16x9xbf16>
    tpu.vector_store %arg31[%c80_551, %c0_552], %403 {strides = array<i32>} : memref<400x324xbf16, #tpu.memory_space<vmem>>, vector<16x9xbf16>,
    %c0_553 = arith.constant 0 : index
    %c6_554 = arith.constant 6 : index
    %405 = vector.load %arg29[%c0_553, %c6_554] : memref<16x17xbf16, #tpu.memory_space<vmem>>, vector<16x9xbf16>
    %c96_555 = arith.constant 96 : index
    %c0_556 = arith.constant 0 : index
    %406 = vector.load %arg31[%c96_555, %c0_556] : memref<400x324xbf16, #tpu.memory_space<vmem>>, vector<16x9xbf16>
    tpu.vector_store %arg31[%c96_555, %c0_556], %405 {strides = array<i32>} : memref<400x324xbf16, #tpu.memory_space<vmem>>, vector<16x9xbf16>,
    %c0_557 = arith.constant 0 : index
    %c7_558 = arith.constant 7 : index
    %407 = vector.load %arg29[%c0_557, %c7_558] : memref<16x17xbf16, #tpu.memory_space<vmem>>, vector<16x9xbf16>
    %c112_559 = arith.constant 112 : index
    %c0_560 = arith.constant 0 : index
    %408 = vector.load %arg31[%c112_559, %c0_560] : memref<400x324xbf16, #tpu.memory_space<vmem>>, vector<16x9xbf16>
    tpu.vector_store %arg31[%c112_559, %c0_560], %407 {strides = array<i32>} : memref<400x324xbf16, #tpu.memory_space<vmem>>, vector<16x9xbf16>,
    %c0_561 = arith.constant 0 : index
    %c8_562 = arith.constant 8 : index
    %409 = vector.load %arg29[%c0_561, %c8_562] : memref<16x17xbf16, #tpu.memory_space<vmem>>, vector<16x9xbf16>
    %c128_563 = arith.constant 128 : index
    %c0_564 = arith.constant 0 : index
    %410 = vector.load %arg31[%c128_563, %c0_564] : memref<400x324xbf16, #tpu.memory_space<vmem>>, vector<16x9xbf16>
    tpu.vector_store %arg31[%c128_563, %c0_564], %409 {strides = array<i32>} : memref<400x324xbf16, #tpu.memory_space<vmem>>, vector<16x9xbf16>,
    %c0_565 = arith.constant 0 : index
    %c0_566 = arith.constant 0 : index
    %411 = vector.load %arg9[%c0_565, %c0_566] : memref<16x144xbf16, #tpu.memory_space<vmem>>, vector<16x144xbf16>
    %c0_567 = arith.constant 0 : index
    %c0_568 = arith.constant 0 : index
    %412 = vector.load %arg31[%c0_567, %c0_568] : memref<400x324xbf16, #tpu.memory_space<vmem>>, vector<144x9xbf16>
    %cst_569 = arith.constant dense<0.000000e+00> : vector<16x9xf32>
    %413 = tpu.matmul %411, %412, %cst_569 {dimension_numbers = #tpu.dot_dimension_numbers<[1], [0], [0], [1], [0, 0, 1, 1], [], []>} : vector<16x144xbf16>, vector<144x9xbf16>, vector<16x9xf32> -> vector<16x9xf32>
    %c7_570 = arith.constant 7 : index
    %c0_571 = arith.constant 0 : index
    %c0_572 = arith.constant 0 : index
    %414 = vector.load %arg11[%c7_570, %c0_571, %c0_572] : memref<9x16x1xf32, #tpu.memory_space<vmem>>, vector<1x16x1xf32>
    %415 = vector.shape_cast %414 : vector<1x16x1xf32> to vector<16x1xf32>
    %416 = vector.broadcast %415 : vector<16x1xf32> to vector<16x9xf32>
    %417 = arith.addf %413, %416 : vector<16x9xf32>
    %cst_573 = arith.constant 0.000000e+00 : f32
    %418 = vector.broadcast %cst_573 : f32 to vector<16x9xf32>
    %419 = arith.maximumf %417, %418 : vector<16x9xf32>
    %c0_574 = arith.constant 0 : index
    %c0_575 = arith.constant 0 : index
    %420 = vector.load %arg15[%c0_574, %c0_575] : memref<1x9xf32, #tpu.memory_space<vmem>>, vector<1x9xf32>
    %cst_576 = arith.constant 0.000000e+00 : f32
    %421 = vector.broadcast %cst_576 : f32 to vector<1x9xf32>
    %422 = arith.cmpf one, %420, %421 : vector<1x9xf32>
    %cst_577 = arith.constant 0.000000e+00 : f32
    %423 = vector.shape_cast %422 : vector<1x9xi1> to vector<1x9xi1>
    %424 = vector.broadcast %423 : vector<1x9xi1> to vector<16x9xi1>
    %425 = vector.broadcast %cst_577 : f32 to vector<16x9xf32>
    %426 = arith.select %424, %419, %425 : vector<16x9xi1>, vector<16x9xf32>
    %cst_578 = arith.constant 0.000000e+00 : bf16
    %427 = vector.broadcast %cst_578 : bf16 to vector<16x4xbf16>
    %c0_579 = arith.constant 0 : index
    %c0_580 = arith.constant 0 : index
    %428 = vector.load %arg30[%c0_579, %c0_580] : memref<16x17xbf16, #tpu.memory_space<vmem>>, vector<16x4xbf16>
    tpu.vector_store %arg30[%c0_579, %c0_580], %427 {strides = array<i32>} : memref<16x17xbf16, #tpu.memory_space<vmem>>, vector<16x4xbf16>,
    %429 = arith.truncf %426 : vector<16x9xf32> to vector<16x9xbf16>
    %c0_581 = arith.constant 0 : index
    %c4_582 = arith.constant 4 : index
    %430 = vector.load %arg30[%c0_581, %c4_582] : memref<16x17xbf16, #tpu.memory_space<vmem>>, vector<16x9xbf16>
    tpu.vector_store %arg30[%c0_581, %c4_582], %429 {strides = array<i32>} : memref<16x17xbf16, #tpu.memory_space<vmem>>, vector<16x9xbf16>,
    %c0_583 = arith.constant 0 : index
    %c0_584 = arith.constant 0 : index
    %431 = vector.load %arg30[%c0_583, %c0_584] : memref<16x17xbf16, #tpu.memory_space<vmem>>, vector<16x9xbf16>
    %c0_585 = arith.constant 0 : index
    %c0_586 = arith.constant 0 : index
    %432 = vector.load %arg31[%c0_585, %c0_586] : memref<400x324xbf16, #tpu.memory_space<vmem>>, vector<16x9xbf16>
    tpu.vector_store %arg31[%c0_585, %c0_586], %431 {strides = array<i32>} : memref<400x324xbf16, #tpu.memory_space<vmem>>, vector<16x9xbf16>,
    %c0_587 = arith.constant 0 : index
    %c1_588 = arith.constant 1 : index
    %433 = vector.load %arg30[%c0_587, %c1_588] : memref<16x17xbf16, #tpu.memory_space<vmem>>, vector<16x9xbf16>
    %c16_589 = arith.constant 16 : index
    %c0_590 = arith.constant 0 : index
    %434 = vector.load %arg31[%c16_589, %c0_590] : memref<400x324xbf16, #tpu.memory_space<vmem>>, vector<16x9xbf16>
    tpu.vector_store %arg31[%c16_589, %c0_590], %433 {strides = array<i32>} : memref<400x324xbf16, #tpu.memory_space<vmem>>, vector<16x9xbf16>,
    %c0_591 = arith.constant 0 : index
    %c2_592 = arith.constant 2 : index
    %435 = vector.load %arg30[%c0_591, %c2_592] : memref<16x17xbf16, #tpu.memory_space<vmem>>, vector<16x9xbf16>
    %c32_593 = arith.constant 32 : index
    %c0_594 = arith.constant 0 : index
    %436 = vector.load %arg31[%c32_593, %c0_594] : memref<400x324xbf16, #tpu.memory_space<vmem>>, vector<16x9xbf16>
    tpu.vector_store %arg31[%c32_593, %c0_594], %435 {strides = array<i32>} : memref<400x324xbf16, #tpu.memory_space<vmem>>, vector<16x9xbf16>,
    %c0_595 = arith.constant 0 : index
    %c3_596 = arith.constant 3 : index
    %437 = vector.load %arg30[%c0_595, %c3_596] : memref<16x17xbf16, #tpu.memory_space<vmem>>, vector<16x9xbf16>
    %c48_597 = arith.constant 48 : index
    %c0_598 = arith.constant 0 : index
    %438 = vector.load %arg31[%c48_597, %c0_598] : memref<400x324xbf16, #tpu.memory_space<vmem>>, vector<16x9xbf16>
    tpu.vector_store %arg31[%c48_597, %c0_598], %437 {strides = array<i32>} : memref<400x324xbf16, #tpu.memory_space<vmem>>, vector<16x9xbf16>,
    %c0_599 = arith.constant 0 : index
    %c4_600 = arith.constant 4 : index
    %439 = vector.load %arg30[%c0_599, %c4_600] : memref<16x17xbf16, #tpu.memory_space<vmem>>, vector<16x9xbf16>
    %c64_601 = arith.constant 64 : index
    %c0_602 = arith.constant 0 : index
    %440 = vector.load %arg31[%c64_601, %c0_602] : memref<400x324xbf16, #tpu.memory_space<vmem>>, vector<16x9xbf16>
    tpu.vector_store %arg31[%c64_601, %c0_602], %439 {strides = array<i32>} : memref<400x324xbf16, #tpu.memory_space<vmem>>, vector<16x9xbf16>,
    %c0_603 = arith.constant 0 : index
    %c5_604 = arith.constant 5 : index
    %441 = vector.load %arg30[%c0_603, %c5_604] : memref<16x17xbf16, #tpu.memory_space<vmem>>, vector<16x9xbf16>
    %c80_605 = arith.constant 80 : index
    %c0_606 = arith.constant 0 : index
    %442 = vector.load %arg31[%c80_605, %c0_606] : memref<400x324xbf16, #tpu.memory_space<vmem>>, vector<16x9xbf16>
    tpu.vector_store %arg31[%c80_605, %c0_606], %441 {strides = array<i32>} : memref<400x324xbf16, #tpu.memory_space<vmem>>, vector<16x9xbf16>,
    %c0_607 = arith.constant 0 : index
    %c6_608 = arith.constant 6 : index
    %443 = vector.load %arg30[%c0_607, %c6_608] : memref<16x17xbf16, #tpu.memory_space<vmem>>, vector<16x9xbf16>
    %c96_609 = arith.constant 96 : index
    %c0_610 = arith.constant 0 : index
    %444 = vector.load %arg31[%c96_609, %c0_610] : memref<400x324xbf16, #tpu.memory_space<vmem>>, vector<16x9xbf16>
    tpu.vector_store %arg31[%c96_609, %c0_610], %443 {strides = array<i32>} : memref<400x324xbf16, #tpu.memory_space<vmem>>, vector<16x9xbf16>,
    %c0_611 = arith.constant 0 : index
    %c7_612 = arith.constant 7 : index
    %445 = vector.load %arg30[%c0_611, %c7_612] : memref<16x17xbf16, #tpu.memory_space<vmem>>, vector<16x9xbf16>
    %c112_613 = arith.constant 112 : index
    %c0_614 = arith.constant 0 : index
    %446 = vector.load %arg31[%c112_613, %c0_614] : memref<400x324xbf16, #tpu.memory_space<vmem>>, vector<16x9xbf16>
    tpu.vector_store %arg31[%c112_613, %c0_614], %445 {strides = array<i32>} : memref<400x324xbf16, #tpu.memory_space<vmem>>, vector<16x9xbf16>,
    %c0_615 = arith.constant 0 : index
    %c8_616 = arith.constant 8 : index
    %447 = vector.load %arg30[%c0_615, %c8_616] : memref<16x17xbf16, #tpu.memory_space<vmem>>, vector<16x9xbf16>
    %c128_617 = arith.constant 128 : index
    %c0_618 = arith.constant 0 : index
    %448 = vector.load %arg31[%c128_617, %c0_618] : memref<400x324xbf16, #tpu.memory_space<vmem>>, vector<16x9xbf16>
    tpu.vector_store %arg31[%c128_617, %c0_618], %447 {strides = array<i32>} : memref<400x324xbf16, #tpu.memory_space<vmem>>, vector<16x9xbf16>,
    %c0_619 = arith.constant 0 : index
    %c0_620 = arith.constant 0 : index
    %449 = vector.load %arg10[%c0_619, %c0_620] : memref<16x144xbf16, #tpu.memory_space<vmem>>, vector<16x144xbf16>
    %c0_621 = arith.constant 0 : index
    %c0_622 = arith.constant 0 : index
    %450 = vector.load %arg31[%c0_621, %c0_622] : memref<400x324xbf16, #tpu.memory_space<vmem>>, vector<144x9xbf16>
    %cst_623 = arith.constant dense<0.000000e+00> : vector<16x9xf32>
    %451 = tpu.matmul %449, %450, %cst_623 {dimension_numbers = #tpu.dot_dimension_numbers<[1], [0], [0], [1], [0, 0, 1, 1], [], []>} : vector<16x144xbf16>, vector<144x9xbf16>, vector<16x9xf32> -> vector<16x9xf32>
    %c8_624 = arith.constant 8 : index
    %c0_625 = arith.constant 0 : index
    %c0_626 = arith.constant 0 : index
    %452 = vector.load %arg11[%c8_624, %c0_625, %c0_626] : memref<9x16x1xf32, #tpu.memory_space<vmem>>, vector<1x16x1xf32>
    %453 = vector.shape_cast %452 : vector<1x16x1xf32> to vector<16x1xf32>
    %454 = vector.broadcast %453 : vector<16x1xf32> to vector<16x9xf32>
    %455 = arith.addf %451, %454 : vector<16x9xf32>
    %cst_627 = arith.constant 0.000000e+00 : f32
    %456 = vector.broadcast %cst_627 : f32 to vector<16x9xf32>
    %457 = arith.maximumf %455, %456 : vector<16x9xf32>
    %c0_628 = arith.constant 0 : index
    %c0_629 = arith.constant 0 : index
    %458 = vector.load %arg15[%c0_628, %c0_629] : memref<1x9xf32, #tpu.memory_space<vmem>>, vector<1x9xf32>
    %cst_630 = arith.constant 0.000000e+00 : f32
    %459 = vector.broadcast %cst_630 : f32 to vector<1x9xf32>
    %460 = arith.cmpf one, %458, %459 : vector<1x9xf32>
    %cst_631 = arith.constant 0.000000e+00 : f32
    %461 = vector.shape_cast %460 : vector<1x9xi1> to vector<1x9xi1>
    %462 = vector.broadcast %461 : vector<1x9xi1> to vector<16x9xi1>
    %463 = vector.broadcast %cst_631 : f32 to vector<16x9xf32>
    %464 = arith.select %462, %457, %463 : vector<16x9xi1>, vector<16x9xf32>
    %c0_632 = arith.constant 0 : index
    %c0_633 = arith.constant 0 : index
    %465 = vector.load %arg19[%c0_632, %c0_633] : memref<9x8xf32, #tpu.memory_space<vmem>>, vector<9x8xf32>
    %cst_634 = arith.constant dense<0.000000e+00> : vector<16x8xf32>
    %466 = tpu.matmul %464, %465, %cst_634 {dimension_numbers = #tpu.dot_dimension_numbers<[1], [0], [0], [1], [0, 0, 1, 1], [], []>} : vector<16x9xf32>, vector<9x8xf32>, vector<16x8xf32> -> vector<16x8xf32>
    %c0_635 = arith.constant 0 : index
    %c0_636 = arith.constant 0 : index
    %467 = vector.load %arg20[%c0_635, %c0_636] : memref<16x8xf32, #tpu.memory_space<vmem>>, vector<16x8xf32>
    %468 = arith.mulf %466, %467 : vector<16x8xf32>
    %cst_637 = arith.constant dense<0.000000e+00> : vector<8xf32>
    %469 = vector.multi_reduction <add>, %468, %cst_637 [0] : vector<16x8xf32> to vector<8xf32>
    %470 = vector.shape_cast %469 : vector<8xf32> to vector<1x8xf32>
    %c0_638 = arith.constant 0 : index
    %c0_639 = arith.constant 0 : index
    %471 = vector.load %arg21[%c0_638, %c0_639] : memref<1x8xf32, #tpu.memory_space<vmem>>, vector<1x8xf32>
    %472 = arith.addf %470, %471 : vector<1x8xf32>
    %c0_640 = arith.constant 0 : index
    %c0_641 = arith.constant 0 : index
    %c0_642 = arith.constant 0 : index
    %473 = vector.load %arg22[%c0_640, %c0_641, %c0_642] : memref<1x1x8xf32, #tpu.memory_space<vmem>>, vector<1x1x8xf32>
    %474 = vector.shape_cast %473 : vector<1x1x8xf32> to vector<1x8xf32>
    %475 = vector.shape_cast %472 : vector<1x8xf32> to vector<1x1x8xf32>
    tpu.vector_store %arg22[%c0_640, %c0_641, %c0_642], %475 {strides = array<i32>} : memref<1x1x8xf32, #tpu.memory_space<vmem>>, vector<1x1x8xf32>,
    return
  }
  func.func @transform_0(%arg0: i32) -> (i32, i32, i32) {
    %c0_i32 = arith.constant 0 : i32
    %c0_i32_0 = arith.constant 0 : i32
    %c0_i32_1 = arith.constant 0 : i32
    return %arg0, %c0_i32, %c0_i32_0 : i32, i32, i32
  }
  func.func @transform_1(%arg0: i32) -> (i32, i32) {
    %c0_i32 = arith.constant 0 : i32
    %c0_i32_0 = arith.constant 0 : i32
    %c0_i32_1 = arith.constant 0 : i32
    return %c0_i32, %c0_i32_0 : i32, i32
  }
  func.func @transform_2(%arg0: i32) -> (i32, i32) {
    %c0_i32 = arith.constant 0 : i32
    %c0_i32_0 = arith.constant 0 : i32
    %c0_i32_1 = arith.constant 0 : i32
    return %c0_i32, %c0_i32_0 : i32, i32
  }
  func.func @transform_3(%arg0: i32) -> (i32, i32) {
    %c0_i32 = arith.constant 0 : i32
    %c0_i32_0 = arith.constant 0 : i32
    %c0_i32_1 = arith.constant 0 : i32
    return %c0_i32, %c0_i32_0 : i32, i32
  }
  func.func @transform_4(%arg0: i32) -> (i32, i32) {
    %c0_i32 = arith.constant 0 : i32
    %c0_i32_0 = arith.constant 0 : i32
    %c0_i32_1 = arith.constant 0 : i32
    return %c0_i32, %c0_i32_0 : i32, i32
  }
  func.func @transform_5(%arg0: i32) -> (i32, i32) {
    %c0_i32 = arith.constant 0 : i32
    %c0_i32_0 = arith.constant 0 : i32
    %c0_i32_1 = arith.constant 0 : i32
    return %c0_i32, %c0_i32_0 : i32, i32
  }
  func.func @transform_6(%arg0: i32) -> (i32, i32) {
    %c0_i32 = arith.constant 0 : i32
    %c0_i32_0 = arith.constant 0 : i32
    %c0_i32_1 = arith.constant 0 : i32
    return %c0_i32, %c0_i32_0 : i32, i32
  }
  func.func @transform_7(%arg0: i32) -> (i32, i32) {
    %c0_i32 = arith.constant 0 : i32
    %c0_i32_0 = arith.constant 0 : i32
    %c0_i32_1 = arith.constant 0 : i32
    return %c0_i32, %c0_i32_0 : i32, i32
  }
  func.func @transform_8(%arg0: i32) -> (i32, i32) {
    %c0_i32 = arith.constant 0 : i32
    %c0_i32_0 = arith.constant 0 : i32
    %c0_i32_1 = arith.constant 0 : i32
    return %c0_i32, %c0_i32_0 : i32, i32
  }
  func.func @transform_9(%arg0: i32) -> (i32, i32) {
    %c0_i32 = arith.constant 0 : i32
    %c0_i32_0 = arith.constant 0 : i32
    %c0_i32_1 = arith.constant 0 : i32
    return %c0_i32, %c0_i32_0 : i32, i32
  }
  func.func @transform_10(%arg0: i32) -> (i32, i32, i32) {
    %c0_i32 = arith.constant 0 : i32
    %c0_i32_0 = arith.constant 0 : i32
    %c0_i32_1 = arith.constant 0 : i32
    %c0_i32_2 = arith.constant 0 : i32
    return %c0_i32, %c0_i32_0, %c0_i32_1 : i32, i32, i32
  }
  func.func @transform_11(%arg0: i32) -> (i32, i32) {
    %c0_i32 = arith.constant 0 : i32
    %c0_i32_0 = arith.constant 0 : i32
    %c0_i32_1 = arith.constant 0 : i32
    return %c0_i32, %c0_i32_0 : i32, i32
  }
  func.func @transform_12(%arg0: i32) -> (i32, i32) {
    %c0_i32 = arith.constant 0 : i32
    %c0_i32_0 = arith.constant 0 : i32
    %c0_i32_1 = arith.constant 0 : i32
    return %c0_i32, %c0_i32_0 : i32, i32
  }
  func.func @transform_13(%arg0: i32) -> (i32, i32) {
    %c0_i32 = arith.constant 0 : i32
    %c0_i32_0 = arith.constant 0 : i32
    %c0_i32_1 = arith.constant 0 : i32
    return %c0_i32, %c0_i32_0 : i32, i32
  }
  func.func @transform_14(%arg0: i32) -> (i32, i32) {
    %c0_i32 = arith.constant 0 : i32
    %c0_i32_0 = arith.constant 0 : i32
    %c0_i32_1 = arith.constant 0 : i32
    return %c0_i32, %c0_i32_0 : i32, i32
  }
  func.func @transform_15(%arg0: i32) -> (i32, i32) {
    %c0_i32 = arith.constant 0 : i32
    %c0_i32_0 = arith.constant 0 : i32
    %c0_i32_1 = arith.constant 0 : i32
    return %c0_i32, %c0_i32_0 : i32, i32
  }
  func.func @transform_16(%arg0: i32) -> (i32, i32) {
    %c0_i32 = arith.constant 0 : i32
    %c0_i32_0 = arith.constant 0 : i32
    %c0_i32_1 = arith.constant 0 : i32
    return %c0_i32, %c0_i32_0 : i32, i32
  }
  func.func @transform_17(%arg0: i32) -> (i32, i32) {
    %c0_i32 = arith.constant 0 : i32
    %c0_i32_0 = arith.constant 0 : i32
    %c0_i32_1 = arith.constant 0 : i32
    return %c0_i32, %c0_i32_0 : i32, i32
  }
  func.func @transform_18(%arg0: i32) -> (i32, i32) {
    %c0_i32 = arith.constant 0 : i32
    %c0_i32_0 = arith.constant 0 : i32
    %c0_i32_1 = arith.constant 0 : i32
    return %c0_i32, %c0_i32_0 : i32, i32
  }
  func.func @transform_19(%arg0: i32) -> (i32, i32) {
    %c0_i32 = arith.constant 0 : i32
    %c0_i32_0 = arith.constant 0 : i32
    %c0_i32_1 = arith.constant 0 : i32
    return %c0_i32, %c0_i32_0 : i32, i32
  }
  func.func @transform_20(%arg0: i32) -> (i32, i32) {
    %c0_i32 = arith.constant 0 : i32
    %c0_i32_0 = arith.constant 0 : i32
    %c0_i32_1 = arith.constant 0 : i32
    return %c0_i32, %c0_i32_0 : i32, i32
  }
  func.func @transform_21(%arg0: i32) -> (i32, i32, i32) {
    %c0_i32 = arith.constant 0 : i32
    %c0_i32_0 = arith.constant 0 : i32
    %c0_i32_1 = arith.constant 0 : i32
    return %arg0, %c0_i32, %c0_i32_0 : i32, i32, i32
  }
}

</mosaic_0001>

<bundles_post_ra>
// kernel: convnet_forward.1
= control target key start
LH: loop header
LB: loop body
LE: loop exit
PB: predicated region body
PF: predicated region fallthrough
CT: control target
= control target key end

     0   :  { %s9268_s0 = inlined_call_operand.vmem [shape: bf16[2,8,400], index: 0, kind: input, shape index: {}]   ;;  %s9269_s1 = inlined_call_operand.vmem [shape: bf16[16,200], index: 1, kind: input, shape index: {}]   ;;  %s9270_s2 = inlined_call_operand.vmem [shape: bf16[16,400], index: 2, kind: input, shape index: {}]   ;;  %s9271_s3 = inlined_call_operand.vmem [shape: bf16[16,400], index: 3, kind: input, shape index: {}]   ;;  %s9272_s4 = inlined_call_operand.vmem [shape: bf16[16,144], index: 4, kind: input, shape index: {}]   ;;  %s9273_s5 = inlined_call_operand.vmem [shape: bf16[16,144], index: 5, kind: input, shape index: {}]   ;;  %s9274_s6 = inlined_call_operand.vmem [shape: bf16[16,144], index: 6, kind: input, shape index: {}]   ;;  %s9275_s7 = inlined_call_operand.vmem [shape: bf16[16,144], index: 7, kind: input, shape index: {}]   ;;  %s9276_s8 = inlined_call_operand.vmem [shape: bf16[16,144], index: 8, kind: input, shape index: {}]   ;;  %s9277_s9 = inlined_call_operand.vmem [shape: bf16[16,144], index: 9, kind: input, shape index: {}]   ;;  %s9278_s10 = inlined_call_operand.vmem [shape: f32[9,16,1], index: 10, kind: input, shape index: {}]   ;;  %s9279_s11 = inlined_call_operand.vmem [shape: f32[1,324], index: 11, kind: input, shape index: {}]   ;;  %s9280_s12 = inlined_call_operand.vmem [shape: f32[1,81], index: 12, kind: input, shape index: {}]   ;;  %s9281_s13 = inlined_call_operand.vmem [shape: f32[1,25], index: 13, kind: input, shape index: {}]   ;;  %s9282_s14 = inlined_call_operand.vmem [shape: f32[1,9], index: 14, kind: input, shape index: {}]   ;;  %s9283_s15 = inlined_call_operand.vmem [shape: bf16[248,101], index: 15, kind: input, shape index: {}]   ;;  %s9284_s16 = inlined_call_operand.vmem [shape: bf16[61,37], index: 16, kind: input, shape index: {}]   ;;  %s9285_s17 = inlined_call_operand.vmem [shape: bf16[13,17], index: 17, kind: input, shape index: {}]   ;;  %s9286_s18 = inlined_call_operand.vmem [shape: f32[9,8], index: 18, kind: input, shape index: {}]   ;;  %s9287_s19 = inlined_call_operand.vmem [shape: f32[16,8], index: 19, kind: input, shape index: {}]   ;;  %s9288_s20 = inlined_call_operand.vmem [shape: f32[1,8], index: 20, kind: input, shape index: {}]   ;;  %s9289_s21 = inlined_call_operand.hbm [shape: f32[2,1,8], index: 21, kind: output, shape index: {}]  }
   0x1   :  { %9406 = sst [smem:[#allocation29_spill]] %s9268_s0 }
   0x2   :  { %9407 = sst [smem:[#allocation30_spill]] %s9269_s1 }
   0x3   :  { %9408 = sst [smem:[#allocation31_spill]] %s9270_s2 }
   0x4   :  { %9409 = sst [smem:[#allocation32_spill]] %s9271_s3 }
   0x5   :  { %9410 = sst [smem:[#allocation33_spill]] %s9272_s4 }
   0x6   :  { %9411 = sst [smem:[#allocation34_spill]] %s9273_s5 }
   0x7   :  { %9412 = sst [smem:[#allocation35_spill]] %s9274_s6 }
   0x8   :  { %9413 = sst [smem:[#allocation36_spill]] %s9275_s7 }
   0x9   :  { %9414 = sst [smem:[#allocation37_spill]] %s9276_s8 }
   0xa   :  { %9415 = sst [smem:[#allocation38_spill]] %s9277_s9 }
   0xb   :  { %9416 = sst [smem:[#allocation39_spill]] %s9280_s12 }
   0xc   :  { %9417 = sst [smem:[#allocation40_spill]] %s9281_s13 }
   0xd   :  { %9418 = sst [smem:[#allocation41_spill]] %s9282_s14 }
   0xe   :  { %9419 = sst [smem:[#allocation42_spill]] %s9283_s15 }
   0xf   :  { %9420 = sst [smem:[#allocation43_spill]] %s9284_s16 }
  0x10   :  { %9421 = sst [smem:[#allocation44_spill]] %s9285_s17 }
  0x11   :  { %9422 = sst [smem:[#allocation45_spill]] %s9286_s18 }
  0x12   :  { %9423 = sst [smem:[#allocation46_spill]] %s9287_s19 }
  0x13   :  { %9424 = sst [smem:[#allocation47_spill]] %s9288_s20 }
  0x14   :  { %9425 = sst [smem:[#allocation48_spill]] %s9289_s21 }
  0x15   :  { %26 = vsyncpa [#allocation12], 0 }
  0x16   :  { %28 = vsyncpa [#allocation12 + $0x1], 0  ;;  %s7280_s2 = smov 0   ;;  %s7282_s25 = smov 0  }
  0x17   :  { %s7284_s26 = smov 0   ;;  %s7286_s27 = smov 0  }
  0x18 LB: > { %9426 = sst [smem:[#allocation14_spill]] %s7115_s2  ;;  %s7301_s3 = sadd.s32 4294967295, %s7127_s27   ;;  %s7127_s27 = sphi %s7286_s27, %s9585_s27   ;;  %s7123_s26 = sphi %s7284_s26, %s9588_s26   ;;  %s7119_s25 = sphi %s7282_s25, %s9587_s25   ;;  %s7115_s2 = sphi %s7280_s2, %s9586_s2  }
  0x19   : > { %9427 = sst [smem:[#allocation15_spill]] %s7119_s25  ;;  %s6407_s28 = sadd.s32 4294967294, %s7127_s27  }
  0x1a   : > { %9428 = sst [smem:[#allocation16_spill]] %s7123_s26  ;;  %s7305_s29 = sadd.s32 1, %s7127_s27  }
  0x1b   : > { %9429 = sst [smem:[#allocation17_spill]] %s7127_s27  ;;  %s487_s0 = sadd.s32 1, %s7123_s26 }
  0x1c   : > { %9430 = sst [smem:[#allocation18_spill]] %s7301_s3  ;;  %s484_s4 = ssub.s32 %s7127_s27, %s7305_s29 }
  0x1d   : > { %9431 = sst [smem:[#allocation19_spill]] %s7305_s29  ;;  %p497_p0 = scmp.ne.s32.totalorder %s7123_s26, %s7119_s25 }
  0x1e   : > { %p485_p1 = scmp.eq.s32.totalorder %s484_s4, 0  ;;  %p498_p2 = scmp.eq.s32.totalorder %s7301_s3, 1 }
  0x1f   : > { %p503_p3 = scmp.ne.s32.totalorder %s7119_s25, %s7115_s2  ;;  %p504_p4 = scmp.eq.s32.totalorder %s6407_s28, 1 }
  0x20   : > { %s7316_s30 = scalar_select %p485_p1, %s7123_s26, %s487_s0  }
  0x21   : > { %p7318_p5 = por %p498_p2, %p497_p0  ;;  %p7322_p6 = por %p504_p4, %p503_p3 }
  0x22   : > { %9432 = sst [smem:[#allocation20_spill]] %s7316_s30  ;;  %p6410_p7 = scmp.ge.s32.totalorder %s7127_s27, 1 }
  0x23   : > { %s9433_s5 = scalar_select %p7318_p5, 1, 0 }
  0x24   : > { %s9435_s22 = scalar_select %p7322_p6, 1, 0 }
  0x25   : > { %9434 = sst [smem:[#allocation21_spill]] %s9433_s5  ;;  %p590_p8 = scmp.lt.s32.totalorder %s7127_s27, 3 }
  0x26   : > { %9436 = sst [smem:[#allocation22_spill]] %s9435_s22 }
  0x27   : > { %p591_p9 = pnand %p6410_p7, %p590_p8 }
  0x29   : > { %594 = sbr.rel (%p591_p9) target bundleno = 5195 (0x144b), region = 104 }
  0x2e   : > { %p649_p10 = scmp.lt.s32.totalorder %s7301_s3, 1  ;;  %s9437_s0 = sld [smem:[#allocation29_spill]]  ;;  %v9387_v1 = vmov 0   ;;  %vm658_vm0 = vcmask 551936   ;;  %vm9351_vm1 = vcmask 588800   ;;  %v1126_v24 = vld [vmem:[%s9278_s10] sm:$0xff] }
  0x2f   : > { %1404 = vmatprep.subr.bf16.mxu1 %v9387_v1  ;;  %6915 = vset.pattern.permute.xlu0 %v9387_v1  ;;  %s9309_s30 = smov 74   ;;  %s9297_s24 = smov 89   ;;  %v1127_v25 = vld [vmem:[%s9278_s10 + $0x8] sm:$0xff]  ;;  %vm670_vm2 = vcmask 1043456   ;;  %vm9347_vm3 = vcmask 605184   ;;  %vm9346_vm4 = vcmask 719872  }
  0x30   : > { %s650_s23 = scalar_select %p649_p10, %s7301_s3, 1  ;;  %6916 = vset.pattern.permute.xlu1 %v9387_v1  ;;  %vm9344_vm5 = vcmask 736256   ;;  %vm9345_vm6 = vcmask 728064   ;;  %vm9342_vm7 = vcmask 752640   ;;  %vm9343_vm8 = vcmask 744448  }
  0x31   : > { %s9299_s28 = smov 92   ;;  %vm9340_vm9 = vcmask 875520   ;;  %vm9341_vm10 = vcmask 867328   ;;  %vm757_vm11 = vcmask 891904   ;;  %vm774_vm12 = vcmask 883712   ;;  %s9449_s26 = smov 108  }
  0x32   : > { %s6734_s1 = sshll.u32 %s650_s23, 4  ;;  %s9307_s23 = smov 88   ;;  %vm9355_vm13 = vcmask 1014784   ;;  %vm740_vm14 = vcmask 900096   ;;  %vm9349_vm15 = vcmask 1031168  }
  0x33   : > { %s9457_s29 = smov 54   ;;  %s9458_s22 = smov 74  }
  0x34   : > { %s7333_s4 = scalar_lea.vmem %s9437_s0, %s6734_s1  ;;  %s9295_s1 = smov 90  }
  0x35   : > { %v7336_v0 = vld [vmem:[%s7333_s4] sm:$0xff]  ;;  %v900_v2 = vld [vmem:[%s7333_s4 + $0x8] sm:$0xf]  ;;  %s9301_s0 = smov 91   ;;  %s9459_s2 = smov 55  }
  0x36   : > { %903 = vrot.lane.b32.xlu1 %v7336_v0, %s9309_s30  ;;  %886 = vrot.lane.b32.xlu0 %v7336_v0, %s9307_s23  ;;  %v883_v3 = vld [vmem:[%s7333_s4 + $0x8] sm:$0xf]  ;;  %s9460_s27 = smov 88   ;;  %s9461_s21 = smov 56  }
  0x37   : > { %v849_v4 = vld [vmem:[%s7333_s4 + $0x8] sm:$0xf]  ;;  %s9462_s20 = smov 89   ;;  %s9463_s5 = smov 70  }
  0x38   : > { %v866_v5 = vld [vmem:[%s7333_s4 + $0x8] sm:$0xf]  ;;  %s9464_s3 = smov 90   ;;  %s9465_s19 = smov 71  }
  0x39   : > { %v815_v6 = vld [vmem:[%s7333_s4 + $0x8] sm:$0xf]  ;;  %s9466_s25 = smov 91   ;;  %s9467_s18 = smov 72  }
  0x3a   : > { %905 = vrot.lane.b32.xlu1 %v900_v2, %s9309_s30  ;;  %888 = vrot.lane.b32.xlu0 %v883_v3, %s9307_s23  ;;  %v832_v7 = vld [vmem:[%s7333_s4 + $0x8] sm:$0xf]  ;;  %s9315_s23 = smov 126   ;;  %s9317_s30 = smov 125  }
  0x3b   : > { %v781_v8 = vld [vmem:[%s7333_s4 + $0x8] sm:$0xf]  ;;  %s9468_s9 = smov 92   ;;  %s9469_s14 = smov 73  }
  0x3c   : > { %v798_v9 = vld [vmem:[%s7333_s4 + $0x8] sm:$0xf]  ;;  %s9470_s8 = smov 106   ;;  %s9471_s17 = smov 52  }
  0x3d   : > { %v747_v10 = vld [vmem:[%s7333_s4 + $0x8] sm:$0xf]  ;;  %s9472_s7 = smov 107   ;;  %s9473_s16 = sld [smem:[#allocation31_spill]] }
  0x3e   : > { %854 = vrot.lane.b32.xlu1 %v849_v4, %s9295_s1  ;;  %852 = vrot.lane.b32.xlu0 %v7336_v0, %s9295_s1  ;;  %s9303_s1 = smov 107   ;;  %v764_v11 = vld [vmem:[%s7333_s4 + $0x8] sm:$0xf]  ;;  %s9518_s12 = smov 38  }
  0x3f   : > { %v713_v12 = vld [vmem:[%s7333_s4 + $0x8] sm:$0xf]  ;;  %s9523_s15 = smov 52   ;;  %s9562_s13 = sld [smem:[#allocation33_spill]] }
  0x40   : > { %v730_v13 = vld [vmem:[%s7333_s4 + $0x8] sm:$0xf]  ;;  %s9572_s6 = sld [smem:[#allocation41_spill]] }
  0x41   : > { %v656_v14 = vld [vmem:[%s7333_s4 + $0x8] sm:$0xf] }
  0x42   : > { %871 = vrot.lane.b32.xlu1 %v866_v5, %s9297_s24  ;;  %869 = vrot.lane.b32.xlu0 %v7336_v0, %s9297_s24  ;;  %s9305_s24 = smov 106   ;;  %659 = vst.msk [vmem:[#allocation10 + $0x8] sm:$0xf] %vm658_vm0, %v656_v14  ;;  %v679_v15 = vld [vmem:[%s7333_s4 + $0x8] sm:$0xf] }
  0x43   : > { %v696_v16 = vld [vmem:[%s7333_s4 + $0x8] sm:$0xf] }
  0x44   : > { %v661_v17 = vld [vmem:[%s7333_s4 + $0x8] sm:$0xf] }
  0x45   : > { %v1057_v18 = vld [vmem:[%s7333_s4 + $0x8] sm:$0xff] }
  0x46   : > { %820 = vrot.lane.b32.xlu1 %v815_v6, %s9299_s28  ;;  %818 = vrot.lane.b32.xlu0 %v7336_v0, %s9299_s28  ;;  %s9329_s28 = smov 109   ;;  %v951_v19 = vld [vmem:[%s7333_s4 + $0x8] sm:$0xf] }
  0x47   : > { %v968_v20 = vld [vmem:[%s7333_s4 + $0x8] sm:$0xf] }
  0x48   : > { %v917_v21 = vld [vmem:[%s7333_s4 + $0x8] sm:$0xf] }
  0x49   : > { %v934_v23 = vld [vmem:[%s7333_s4 + $0x8] sm:$0xf]  ;;  %s9451_s4 = smov 110  }
  0x4a   : > { %837 = vrot.lane.b32.xlu1 %v832_v7, %s9301_s0  ;;  %835 = vrot.lane.b32.xlu0 %v7336_v0, %s9301_s0  ;;  %s9331_s0 = smov 108  }
  0x4e   : > { %786 = vrot.lane.b32.xlu1 %v781_v8, %s9303_s1  ;;  %784 = vrot.lane.b32.xlu0 %v7336_v0, %s9303_s1  ;;  %s9311_s1 = smov 124  }
  0x52   : > { %803 = vrot.lane.b32.xlu1 %v798_v9, %s9305_s24  ;;  %801 = vrot.lane.b32.xlu0 %v7336_v0, %s9305_s24  ;;  %s9313_s24 = smov 110  }
  0x56   : > { %752 = vrot.lane.b32.xlu1 %v747_v10, %s9329_s28  ;;  %750 = vrot.lane.b32.xlu0 %v7336_v0, %s9329_s28  ;;  %s9356_s28 = smov 38  }
  0x5a   : > { %769 = vrot.lane.b32.xlu1 %v764_v11, %s9331_s0  ;;  %767 = vrot.lane.b32.xlu0 %v7336_v0, %s9331_s0  ;;  %s9438_s0 = sld [smem:[#allocation30_spill]] }
  0x5e   : > { %718 = vrot.lane.b32.xlu1 %v713_v12, %s9311_s1  ;;  %716 = vrot.lane.b32.xlu0 %v7336_v0, %s9311_s1  ;;  %s9319_s1 = smov 127  }
  0x60   : > { %v6932_v22 = vld [vmem:[%s9438_s0 + $0x4] ss:$8 sps:$4 sm:$0xff]  }
  0x61   : > { %6456 = vmatprep.mubr.msk.bf16.mxu1 %vm9351_vm1, %v6932_v22  ;;  %6455 = vmatprep.mubr.msk.bf16.mxu0 %vm9351_vm1, %v6932_v22 }
  0x62   : > { %735 = vrot.lane.b32.xlu1 %v730_v13, %s9313_s24  ;;  %733 = vrot.lane.b32.xlu0 %v7336_v0, %s9313_s24  ;;  %s9321_s24 = smov 52  }
  0x66   : > { %684 = vrot.lane.b32.xlu1 %v679_v15, %s9315_s23  ;;  %682 = vrot.lane.b32.xlu0 %v7336_v0, %s9315_s23  ;;  %s9323_s23 = smov 54  }
  0x6a   : > { %701 = vrot.lane.b32.xlu1 %v696_v16, %s9317_s30  ;;  %699 = vrot.lane.b32.xlu0 %v7336_v0, %s9317_s30  ;;  %s9325_s30 = smov 53  }
  0x6e   : > { %666 = vrot.lane.b32.xlu1 %v661_v17, %s9319_s1  ;;  %664 = vrot.lane.b32.xlu0 %v7336_v0, %s9319_s1  ;;  %s9327_s1 = smov 56  }
  0x72   : > { %1062 = vrot.lane.b32.xlu1 %v1057_v18, %s9321_s24  ;;  %1060 = vrot.lane.b32.xlu0 %v7336_v0, %s9321_s24  ;;  %s9333_s24 = smov 55  }
  0x76   : > { %1026 = vrot.lane.b32.xlu1 %v1057_v18, %s9323_s23  ;;  %1024 = vrot.lane.b32.xlu0 %v7336_v0, %s9323_s23  ;;  %s9335_s23 = smov 71  }
  0x7a   : > { %1044 = vrot.lane.b32.xlu1 %v1057_v18, %s9325_s30  ;;  %1042 = vrot.lane.b32.xlu0 %v7336_v0, %s9325_s30  ;;  %s9337_s30 = smov 70  }
  0x7e   : > { %990 = vrot.lane.b32.xlu1 %v1057_v18, %s9327_s1  ;;  %988 = vrot.lane.b32.xlu0 %v7336_v0, %s9327_s1  ;;  %s9452_s1 = smov 124  }
  0x82   : > { %1008 = vrot.lane.b32.xlu1 %v1057_v18, %s9333_s24  ;;  %1006 = vrot.lane.b32.xlu0 %v7336_v0, %s9333_s24  ;;  %s9358_s24 = smov 73  }
  0x86   : > { %956 = vrot.lane.b32.xlu1 %v951_v19, %s9335_s23  ;;  %954 = vrot.lane.b32.xlu0 %v7336_v0, %s9335_s23  ;;  %s9360_s23 = smov 72  }
  0x8a   : > { %973 = vrot.lane.b32.xlu1 %v968_v20, %s9337_s30  ;;  %971 = vrot.lane.b32.xlu0 %v7336_v0, %s9337_s30  ;;  %s9450_s30 = smov 109  }
  0x8e   : > { %922 = vrot.lane.b32.xlu1 %v917_v21, %s9358_s24  ;;  %920 = vrot.lane.b32.xlu0 %v7336_v0, %s9358_s24  ;;  %s9454_s24 = smov 126  }
  0x92   : > { %939 = vrot.lane.b32.xlu1 %v934_v23, %s9360_s23  ;;  %937 = vrot.lane.b32.xlu0 %v7336_v0, %s9360_s23  ;;  %s9455_s23 = smov 127  }
  0x96   : > { %1130 = vperm.xlu0 %6915, %v1126_v24   ;;  %1135 = vperm.xlu1 %6916, %v1127_v25  }
  0xa8   : > { %v904_v26 = vpop.permute.xlu1 %903  ;;  %v887_v27 = vpop.permute.xlu0 %886 }
  0xa9   : > { %v890_v28 = vrot.slane %v887_v27, 4  ;;  %v907_v31 = vrot.slane %v904_v26, 4 }
  0xac   : > { %v906_v29 = vpop.permute.xlu1 %905  ;;  %v889_v30 = vpop.permute.xlu0 %888 }
  0xad   : > { %v908_v32 = vrot.slane %v906_v29, 4  ;;  %915 = vst.msk [vmem:[#allocation10 + $0xbc] sm:$0xf] %vm658_vm0, %v906_v29  ;;  %v891_v33 = vrot.slane %v889_v30, 4  ;;  %898 = vst.msk [vmem:[#allocation10 + $0xb0] sm:$0xf] %vm658_vm0, %v889_v30 }
  0xaf   : > { %v909_v34 = vsel %vm670_vm2, %v907_v31, %v908_v32  ;;  %v892_v35 = vsel %vm670_vm2, %v890_v28, %v891_v33 }
  0xb0   : > { %v911_v36 = vsel %vm9347_vm3, %v904_v26, %v909_v34  ;;  %v894_v37 = vsel %vm9346_vm4, %v887_v27, %v892_v35  ;;  %v855_v38 = vpop.permute.xlu1 %854  ;;  %v853_v39 = vpop.permute.xlu0 %852  ;;  %vm1013_vm4 = vcmask 449536   ;;  %vm9352_vm3 = vcmask 580608  }
  0xb1   : > { %v857_v40 = vrot.slane %v855_v38, 4  ;;  %864 = vst.msk [vmem:[#allocation10 + $0x98] sm:$0xf] %vm658_vm0, %v855_v38  ;;  %v856_v41 = vrot.slane %v853_v39, 4  ;;  %v6437_v42 = vcombine.high %v894_v37, %v911_v36  ;;  %v6436_v43 = vcombine.low %v894_v37, %v911_v36 }
  0xb3   : > { %1361 = vmatprep.subr.bf16.mxu0 %v6437_v42  ;;  %v858_v47 = vsel %vm670_vm2, %v856_v41, %v857_v40 }
  0xb4   : > { %v872_v44 = vpop.permute.xlu1 %871  ;;  %v870_v45 = vpop.permute.xlu0 %869  ;;  %v6917_v46 = vld [vmem:[#allocation10 + $0xb0] ss:$12 sps:$4 sm:$0xff]   ;;  %1362 = vmatpush1.bf16.msra.mxu0 %v6436_v43  ;;  %v860_v51 = vsel %vm9344_vm5, %v853_v39, %v858_v47  ;;  %vm1049_vm5 = vcmask 433152  }
  0xb5   : > { %v874_v48 = vrot.slane %v872_v44, 4  ;;  %881 = vst.msk [vmem:[#allocation10 + $0xa4] sm:$0xf] %vm658_vm0, %v872_v44  ;;  %v873_v49 = vrot.slane %v870_v45, 4  ;;  %1405 = vmatpush1.bf16.msra.mxu1 %v6917_v46 }
  0xb6   : > { %1406 = vmatprep.subr.bf16.mxu1 %v9387_v1 }
  0xb7   : > { %v875_v50 = vsel %vm670_vm2, %v873_v49, %v874_v48 }
  0xb8   : > { %v877_v52 = vsel %vm9345_vm6, %v870_v45, %v875_v50  ;;  %v821_v53 = vpop.permute.xlu1 %820  ;;  %v819_v54 = vpop.permute.xlu0 %818  ;;  %vm9403_vm6 = vcmask 457728  }
  0xb9   : > { %v823_v55 = vrot.slane %v821_v53, 4  ;;  %830 = vst.msk [vmem:[#allocation10 + $0x80] sm:$0xf] %vm658_vm0, %v821_v53  ;;  %v822_v56 = vrot.slane %v819_v54, 4  ;;  %v6434_v57 = vcombine.high %v860_v51, %v877_v52  ;;  %v6433_v58 = vcombine.low %v860_v51, %v877_v52 }
  0xbb   : > { %1363 = vmatprep.subr.bf16.mxu0 %v6434_v57  ;;  %v824_v62 = vsel %vm670_vm2, %v822_v56, %v823_v55 }
  0xbc   : > { %v838_v59 = vpop.permute.xlu1 %837  ;;  %v836_v60 = vpop.permute.xlu0 %835  ;;  %v6918_v61 = vld [vmem:[#allocation10 + $0x98] ss:$12 sps:$4 sm:$0xff]   ;;  %1364 = vmatpush1.bf16.msra.mxu0 %v6433_v58  ;;  %v826_v4 = vsel %vm9342_vm7, %v819_v54, %v824_v62  ;;  %vm1067_vm7 = vcmask 424960  }
  0xbd   : > { %v840_v63 = vrot.slane %v838_v59, 4  ;;  %847 = vst.msk [vmem:[#allocation10 + $0x8c] sm:$0xf] %vm658_vm0, %v838_v59  ;;  %v839_v2 = vrot.slane %v836_v60, 4  ;;  %1407 = vmatpush1.bf16.msra.mxu1 %v6918_v61 }
  0xbe   : > { %1408 = vmatprep.subr.bf16.mxu1 %v9387_v1 }
  0xbf   : > { %v841_v3 = vsel %vm670_vm2, %v839_v2, %v840_v63 }
  0xc0   : > { %v843_v5 = vsel %vm9343_vm8, %v836_v60, %v841_v3  ;;  %v787_v6 = vpop.permute.xlu1 %786  ;;  %v785_v7 = vpop.permute.xlu0 %784  ;;  %vm1031_vm8 = vcmask 441344  }
  0xc1   : > { %v789_v8 = vrot.slane %v787_v6, 4  ;;  %796 = vst.msk [vmem:[#allocation10 + $0x68] sm:$0xf] %vm658_vm0, %v787_v6  ;;  %v788_v9 = vrot.slane %v785_v7, 4  ;;  %v6431_v10 = vcombine.high %v826_v4, %v843_v5  ;;  %v6430_v11 = vcombine.low %v826_v4, %v843_v5 }
  0xc3   : > { %1365 = vmatprep.subr.bf16.mxu0 %v6431_v10  ;;  %v790_v15 = vsel %vm670_vm2, %v788_v9, %v789_v8 }
  0xc4   : > { %v804_v12 = vpop.permute.xlu1 %803  ;;  %v802_v13 = vpop.permute.xlu0 %801  ;;  %v6919_v14 = vld [vmem:[#allocation10 + $0x80] ss:$12 sps:$4 sm:$0xff]   ;;  %1366 = vmatpush1.bf16.msra.mxu0 %v6430_v11  ;;  %v792_v19 = vsel %vm9340_vm9, %v785_v7, %v790_v15  ;;  %vm9354_vm9 = vcmask 1022976  }
  0xc5   : > { %v806_v16 = vrot.slane %v804_v12, 4  ;;  %813 = vst.msk [vmem:[#allocation10 + $0x74] sm:$0xf] %vm658_vm0, %v804_v12  ;;  %v805_v17 = vrot.slane %v802_v13, 4  ;;  %1409 = vmatpush1.bf16.msra.mxu1 %v6919_v14 }
  0xc6   : > { %1410 = vmatprep.subr.bf16.mxu1 %v9387_v1 }
  0xc7   : > { %v807_v18 = vsel %vm670_vm2, %v805_v17, %v806_v16 }
  0xc8   : > { %v809_v20 = vsel %vm9341_vm10, %v802_v13, %v807_v18  ;;  %v753_v21 = vpop.permute.xlu1 %752  ;;  %v751_v22 = vpop.permute.xlu0 %750  ;;  %vm9348_vm10 = vcmask 1039360  }
  0xc9   : > { %v755_v23 = vrot.slane %v753_v21, 4  ;;  %762 = vst.msk [vmem:[#allocation10 + $0x50] sm:$0xf] %vm658_vm0, %v753_v21  ;;  %v754_v24 = vrot.slane %v751_v22, 4  ;;  %v6428_v25 = vcombine.high %v792_v19, %v809_v20  ;;  %v6427_v26 = vcombine.low %v792_v19, %v809_v20 }
  0xcb   : > { %1367 = vmatprep.subr.bf16.mxu0 %v6428_v25  ;;  %v756_v30 = vsel %vm670_vm2, %v754_v24, %v755_v23 }
  0xcc   : > { %v770_v27 = vpop.permute.xlu1 %769  ;;  %v768_v28 = vpop.permute.xlu0 %767  ;;  %v6920_v29 = vld [vmem:[#allocation10 + $0x68] ss:$12 sps:$4 sm:$0xff]   ;;  %1368 = vmatpush1.bf16.msra.mxu0 %v6427_v26  ;;  %v758_v34 = vsel %vm757_vm11, %v751_v22, %v756_v30 }
  0xcd   : > { %v772_v31 = vrot.slane %v770_v27, 4  ;;  %779 = vst.msk [vmem:[#allocation10 + $0x5c] sm:$0xf] %vm658_vm0, %v770_v27  ;;  %v771_v32 = vrot.slane %v768_v28, 4  ;;  %1411 = vmatpush1.bf16.msra.mxu1 %v6920_v29 }
  0xce   : > { %1412 = vmatprep.subr.bf16.mxu1 %v9387_v1 }
  0xcf   : > { %v773_v33 = vsel %vm670_vm2, %v771_v32, %v772_v31 }
  0xd0   : > { %v775_v35 = vsel %vm774_vm12, %v768_v28, %v773_v33  ;;  %v719_v36 = vpop.permute.xlu1 %718  ;;  %v717_v37 = vpop.permute.xlu0 %716 }
  0xd1   : > { %v721_v38 = vrot.slane %v719_v36, 4  ;;  %728 = vst.msk [vmem:[#allocation10 + $0x38] sm:$0xf] %vm658_vm0, %v719_v36  ;;  %v720_v39 = vrot.slane %v717_v37, 4  ;;  %v6425_v40 = vcombine.high %v758_v34, %v775_v35  ;;  %v6424_v41 = vcombine.low %v758_v34, %v775_v35 }
  0xd3   : > { %1369 = vmatprep.subr.bf16.mxu0 %v6425_v40  ;;  %v722_v45 = vsel %vm670_vm2, %v720_v39, %v721_v38 }
  0xd4   : > { %v736_v42 = vpop.permute.xlu1 %735  ;;  %v734_v43 = vpop.permute.xlu0 %733  ;;  %v6921_v44 = vld [vmem:[#allocation10 + $0x50] ss:$12 sps:$4 sm:$0xff]   ;;  %1370 = vmatpush1.bf16.msra.mxu0 %v6424_v41  ;;  %v724_v49 = vsel %vm9355_vm13, %v717_v37, %v722_v45 }
  0xd5   : > { %v738_v46 = vrot.slane %v736_v42, 4  ;;  %745 = vst.msk [vmem:[#allocation10 + $0x44] sm:$0xf] %vm658_vm0, %v736_v42  ;;  %v737_v47 = vrot.slane %v734_v43, 4  ;;  %1413 = vmatpush1.bf16.msra.mxu1 %v6921_v44 }
  0xd6   : > { %1414 = vmatprep.subr.bf16.mxu1 %v9387_v1 }
  0xd7   : > { %v739_v48 = vsel %vm670_vm2, %v737_v47, %v738_v46 }
  0xd8   : > { %v741_v50 = vsel %vm740_vm14, %v734_v43, %v739_v48  ;;  %v685_v51 = vpop.permute.xlu1 %684  ;;  %v683_v52 = vpop.permute.xlu0 %682 }
  0xd9   : > { %v687_v53 = vrot.slane %v685_v51, 4  ;;  %694 = vst.msk [vmem:[#allocation10 + $0x20] sm:$0xf] %vm658_vm0, %v685_v51  ;;  %v686_v54 = vrot.slane %v683_v52, 4  ;;  %v6422_v55 = vcombine.high %v724_v49, %v741_v50  ;;  %v6421_v56 = vcombine.low %v724_v49, %v741_v50 }
  0xdb   : > { %1371 = vmatprep.subr.bf16.mxu0 %v6422_v55  ;;  %v688_v60 = vsel %vm670_vm2, %v686_v54, %v687_v53 }
  0xdc   : > { %v702_v57 = vpop.permute.xlu1 %701  ;;  %v700_v58 = vpop.permute.xlu0 %699  ;;  %v6922_v59 = vld [vmem:[#allocation10 + $0x38] ss:$12 sps:$4 sm:$0xff]   ;;  %1372 = vmatpush1.bf16.msra.mxu0 %v6421_v56  ;;  %v690_v2 = vsel %vm9349_vm15, %v683_v52, %v688_v60  ;;  %vm9350_vm15 = vcmask 596992  }
  0xdd   : > { %v704_v61 = vrot.slane %v702_v57, 4  ;;  %711 = vst.msk [vmem:[#allocation10 + $0x2c] sm:$0xf] %vm658_vm0, %v702_v57  ;;  %v703_v62 = vrot.slane %v700_v58, 4  ;;  %1415 = vmatpush1.bf16.msra.mxu1 %v6922_v59 }
  0xde   : > { %1416 = vmatprep.subr.bf16.mxu1 %v9387_v1 }
  0xdf   : > { %v705_v63 = vsel %vm670_vm2, %v703_v62, %v704_v61 }
  0xe0   : > { %v707_v3 = vsel %vm9354_vm9, %v700_v58, %v705_v63  ;;  %v667_v4 = vpop.permute.xlu1 %666  ;;  %v665_v5 = vpop.permute.xlu0 %664  ;;  %vm1514_vm9 = vcmask 1047556  }
  0xe1   : > { %v669_v6 = vrot.slane %v667_v4, 4  ;;  %677 = vst.msk [vmem:[#allocation10 + $0x14] sm:$0xf] %vm658_vm0, %v667_v4  ;;  %v668_v7 = vrot.slane %v665_v5, 4  ;;  %v6419_v8 = vcombine.high %v690_v2, %v707_v3  ;;  %v6418_v9 = vcombine.low %v690_v2, %v707_v3 }
  0xe3   : > { %v671_v10 = vsel %vm670_vm2, %v668_v7, %v669_v6  ;;  %1373 = vmatprep.subr.bf16.mxu0 %v6419_v8 }
  0xe4   : > { %v673_v11 = vsel %vm9348_vm10, %v665_v5, %v671_v10  ;;  %v1063_v12 = vpop.permute.xlu1 %1062  ;;  %v1061_v13 = vpop.permute.xlu0 %1060  ;;  %v6923_v14 = vld [vmem:[#allocation10 + $0x20] ss:$12 sps:$4 sm:$0xff]   ;;  %1374 = vmatpush1.bf16.msra.mxu0 %v6418_v9  ;;  %vm9353_vm10 = vcmask 572416  }
  0xe5   : > { %v1065_v15 = vrot.slane %v1063_v12, 4  ;;  %v1064_v16 = vrot.slane %v1061_v13, 4  ;;  %v6416_v17 = vcombine.high %v7336_v0, %v673_v11  ;;  %v6415_v18 = vcombine.low %v7336_v0, %v673_v11  ;;  %1417 = vmatpush1.bf16.msra.mxu1 %v6923_v14 }
  0xe6   : > { %1418 = vmatprep.subr.bf16.mxu1 %v9387_v1 }
  0xe7   : > { %v1069_v19 = vsel %vm1067_vm7, %v1063_v12, %v1065_v15  ;;  %v1066_v20 = vsel %vm670_vm2, %v1064_v16, %v1065_v15  ;;  %1375 = vmatprep.subr.bf16.mxu0 %v6416_v17 }
  0xe8   : > { %1073 = vst.msk [vmem:[#allocation10 + $0x128] sm:$0xf] %vm658_vm0, %v1069_v19  ;;  %v1068_v21 = vsel %vm1067_vm7, %v1061_v13, %v1066_v20  ;;  %v1027_v22 = vpop.permute.xlu1 %1026  ;;  %v1025_v23 = vpop.permute.xlu0 %1024  ;;  %v6924_v24 = vld [vmem:[#allocation10 + $0x8] ss:$12 sps:$4 sm:$0xff]   ;;  %1376 = vmatpush1.bf16.msra.mxu0 %v6415_v18 }
  0xe9   : > { %v1029_v25 = vrot.slane %v1027_v22, 4  ;;  %v1028_v26 = vrot.slane %v1025_v23, 4  ;;  %v6452_v0 = vcombine.high %v1068_v21, %v1068_v21  ;;  %v6451_v27 = vcombine.low %v1068_v21, %v1068_v21  ;;  %1419 = vmatpush1.bf16.msra.mxu1 %v6924_v24 }
  0xea   : > { %1426 = vmatprep.subr.bf16.mxu1 %v9387_v1 }
  0xeb   : > { %v1033_v28 = vsel %vm1031_vm8, %v1027_v22, %v1029_v25  ;;  %6454 = vmatprep.subr.msk.bf16.mxu0 %vm670_vm2, %v6452_v0  ;;  %v1353_v29 = vsel %vm670_vm2, %v6451_v27, 0  ;;  %v1030_v32 = vsel %vm670_vm2, %v1028_v26, %v1029_v25  ;;  %v6930_v27 = vld [vmem:[%s9438_s0] ss:$8 sps:$4 sm:$0xff]   ;;  %s9456_s0 = smov 53  }
  0xec   : > { %1037 = vst.msk [vmem:[#allocation10 + $0x110] sm:$0xf] %vm658_vm0, %v1033_v28  ;;  %v1045_v30 = vpop.permute.xlu1 %1044  ;;  %v1043_v31 = vpop.permute.xlu0 %1042  ;;  %1384 = vmatpush2.bf16.msra.mxu0 %v1353_v29  ;;  %v1032_v38 = vsel %vm1031_vm8, %v1025_v23, %v1030_v32  ;;  %v1454_v29 = vlaneseq }
  0xed   : > { %v1047_v33 = vrot.slane %v1045_v30, 4  ;;  %v1046_v34 = vrot.slane %v1043_v31, 4 }
  0xef   : > { %v1051_v35 = vsel %vm1049_vm5, %v1045_v30, %v1047_v33  ;;  %v1048_v36 = vsel %vm670_vm2, %v1046_v34, %v1047_v33  ;;  %v6925_v37 = vld [vmem:[#allocation10 + $0x128] ss:$0 sps:$4 sm:$0xff]   ;;  %v1451_v30 = vld [vmem:[%s9279_s11] sm:$0x7] }
  0xf0   : > { %1055 = vst.msk [vmem:[#allocation10 + $0x11c] sm:$0xf] %vm658_vm0, %v1051_v35  ;;  %v1050_v39 = vsel %vm1049_vm5, %v1043_v31, %v1048_v36  ;;  %v991_v40 = vpop.permute.xlu1 %990  ;;  %v989_v41 = vpop.permute.xlu0 %988  ;;  %v1359_v44 = vsel %vm670_vm2, %v6925_v37, 0  ;;  %v7546_v31 = vshrl.u32 %v1454_v29, 7 }
  0xf1   : > { %v993_v42 = vrot.slane %v991_v40, 4  ;;  %v992_v43 = vrot.slane %v989_v41, 4  ;;  %v6449_v45 = vcombine.high %v1032_v38, %v1050_v39  ;;  %1427 = vmatpush2.bf16.msra.mxu1 %v1359_v44  ;;  %v6448_v46 = vcombine.low %v1032_v38, %v1050_v39 }
  0xf2   : > { %1428 = vmatprep.subr.bf16.mxu1 %v9387_v1  ;;  %9439 = vst [vmem:[#allocation23_spill] sm:$0xff] %v7546_v31  ;;  %v9386_v32 = vsub.s32 2, %v7546_v31  ;;  %v7551_v35 = vsub.s32 0, %v7546_v31  ;;  %v7554_v36 = vsub.s32 1, %v7546_v31 }
  0xf3   : > { %v997_v47 = vsel %vm9403_vm6, %v991_v40, %v993_v42  ;;  %1385 = vmatprep.subr.bf16.mxu0 %v6449_v45  ;;  %v994_v50 = vsel %vm670_vm2, %v992_v43, %v993_v42 }
  0xf4   : > { %1001 = vst.msk [vmem:[#allocation10 + $0xf8] sm:$0xf] %vm658_vm0, %v997_v47  ;;  %v1009_v48 = vpop.permute.xlu1 %1008  ;;  %v1007_v49 = vpop.permute.xlu0 %1006  ;;  %1386 = vmatpush2.bf16.msra.mxu0 %v6448_v46  ;;  %v996_v56 = vsel %vm9403_vm6, %v989_v41, %v994_v50  ;;  %9440 = vst [vmem:[#allocation24_spill] sm:$0xff] %v7551_v35 }
  0xf5   : > { %v1011_v51 = vrot.slane %v1009_v48, 4  ;;  %v1010_v52 = vrot.slane %v1007_v49, 4  ;;  %9441 = vst [vmem:[#allocation25_spill] sm:$0xff] %v7554_v36 }
  0xf7   : > { %v1015_v53 = vsel %vm1013_vm4, %v1009_v48, %v1011_v51  ;;  %v1012_v54 = vsel %vm670_vm2, %v1010_v52, %v1011_v51  ;;  %v6926_v55 = vld [vmem:[#allocation10 + $0x110] ss:$12 sps:$4 sm:$0xff]  }
  0xf8   : > { %1019 = vst.msk [vmem:[#allocation10 + $0x104] sm:$0xf] %vm658_vm0, %v1015_v53  ;;  %v1014_v57 = vsel %vm1013_vm4, %v1007_v49, %v1012_v54  ;;  %v957_v58 = vpop.permute.xlu1 %956  ;;  %v955_v59 = vpop.permute.xlu0 %954  ;;  %1429 = vmatpush2.bf16.msra.mxu1 %v6926_v55 }
  0xf9   : > { %v959_v60 = vrot.slane %v957_v58, 4  ;;  %966 = vst.msk [vmem:[#allocation10 + $0xe0] sm:$0xf] %vm658_vm0, %v957_v58  ;;  %v958_v61 = vrot.slane %v955_v59, 4  ;;  %v6446_v62 = vcombine.high %v996_v56, %v1014_v57  ;;  %v6445_v63 = vcombine.low %v996_v56, %v1014_v57  ;;  %1430 = vmatprep.subr.bf16.mxu1 %v9387_v1 }
  0xfb   : > { %1387 = vmatprep.subr.bf16.mxu0 %v6446_v62  ;;  %v960_v4 = vsel %vm670_vm2, %v958_v61, %v959_v60 }
  0xfc   : > { %v974_v2 = vpop.permute.xlu1 %973  ;;  %v972_v3 = vpop.permute.xlu0 %971  ;;  %1388 = vmatpush2.bf16.msra.mxu0 %v6445_v63  ;;  %v962_v9 = vsel %vm9352_vm3, %v955_v59, %v960_v4 }
  0xfd   : > { %v976_v5 = vrot.slane %v974_v2, 4  ;;  %983 = vst.msk [vmem:[#allocation10 + $0xec] sm:$0xf] %vm658_vm0, %v974_v2  ;;  %v975_v6 = vrot.slane %v972_v3, 4 }
  0xff   : > { %v977_v7 = vsel %vm670_vm2, %v975_v6, %v976_v5  ;;  %v6927_v8 = vld [vmem:[#allocation10 + $0xf8] ss:$12 sps:$4 sm:$0xff]  }
 0x100   : > { %v979_v10 = vsel %vm9353_vm10, %v972_v3, %v977_v7  ;;  %v923_v11 = vpop.permute.xlu1 %922  ;;  %v921_v12 = vpop.permute.xlu0 %920  ;;  %1431 = vmatpush2.bf16.msra.mxu1 %v6927_v8  ;;  %vm1513_vm10 = vcmask 1043760  }
 0x101   : > { %v925_v13 = vrot.slane %v923_v11, 4  ;;  %932 = vst.msk [vmem:[#allocation10 + $0xc8] sm:$0xf] %vm658_vm0, %v923_v11  ;;  %v924_v14 = vrot.slane %v921_v12, 4  ;;  %v6443_v15 = vcombine.high %v962_v9, %v979_v10  ;;  %v6442_v16 = vcombine.low %v962_v9, %v979_v10  ;;  %1432 = vmatprep.subr.bf16.mxu1 %v9387_v1  ;;  %vm7586_vm13 = vmor %vm1514_vm9, %vm1513_vm10 }
 0x102   : > { %vm9476_vm9 = vcmask 1014784  }
 0x103   : > { %1389 = vmatprep.subr.bf16.mxu0 %v6443_v15  ;;  %v926_v20 = vsel %vm670_vm2, %v924_v14, %v925_v13  ;;  %v9446_v14 = vmov 0  ;;  %vm9477_vm10 = vmmov %vm9476_vm9 }
 0x104   : > { %v940_v17 = vpop.permute.xlu1 %939  ;;  %v938_v18 = vpop.permute.xlu0 %937  ;;  %v6928_v19 = vld [vmem:[#allocation10 + $0xe0] ss:$12 sps:$4 sm:$0xff]   ;;  %1390 = vmatpush2.bf16.msra.mxu0 %v6442_v16  ;;  %v928_v24 = vsel %vm9350_vm15, %v921_v12, %v926_v20  ;;  %vm1452_vm15 = vcmp.ne.f32.partialorder %v1451_v30, 0.0  ;;  %v9447_v14 = vsel %vm7586_vm13, 4294967295, %v9446_v14 }
 0x105   : > { %v942_v21 = vrot.slane %v940_v17, 4  ;;  %949 = vst.msk [vmem:[#allocation10 + $0xd4] sm:$0xf] %vm658_vm0, %v940_v17  ;;  %v941_v22 = vrot.slane %v938_v18, 4  ;;  %1433 = vmatpush2.bf16.msra.mxu1 %v6928_v19  ;;  %v1453_v33 = vsel %vm1452_vm15, 1, %v9387_v1  ;;  %9448 = vst [vmem:[#allocation26_spill] sm:$0xff] %v9447_v14 }
 0x106   : > { %1434 = vmatprep.subr.bf16.mxu1 %v9387_v1  ;;  %v1465_v37 = vrot.slane %v1453_v33, %v9386_v32  ;;  %v1457_v41 = vrot.slane %v1453_v33, %v7551_v35  ;;  %v1461_v43 = vrot.slane %v1453_v33, %v7554_v36 }
 0x107   : > { %v943_v23 = vsel %vm670_vm2, %v941_v22, %v942_v21 }
 0x108   : > { %v945_v25 = vsel %vm9351_vm1, %v938_v18, %v943_v23  ;;  %vm1475_vm1 = vcmask 306176   ;;  %vm1468_vm15 = vcmp.eq.s32.totalorder %v1465_v37, 1  ;;  %vm7564_vm3 = vcmp.eq.s32.totalorder %v1457_v41, 1 }
 0x109   : > { %v6440_v26 = vcombine.high %v928_v24, %v945_v25  ;;  %v6439_v0 = vcombine.low %v928_v24, %v945_v25  ;;  %1476 = vst.msk [vmem:[#allocation2] sm:$0xf] %vm1475_vm1, %v9387_v1  ;;  %1477 = vst.msk [vmem:[#allocation2 + $0x10] sm:$0xf] %vm1475_vm1, %v9387_v1 }
 0x10a   : > { %3045 = vst.msk [vmem:[#allocation3] sm:$0xf] %vm1475_vm1, %v9387_v1  ;;  %3046 = vst.msk [vmem:[#allocation3 + $0x10] sm:$0xf] %vm1475_vm1, %v9387_v1  ;;  %vm7568_vm1 = vcmp.eq.s32.totalorder %v1461_v43, 1 }
 0x10b   : > { %1391 = vmatprep.subr.bf16.mxu0 %v6440_v26 }
 0x10c   : > { %v6929_v28 = vld [vmem:[#allocation10 + $0xc8] ss:$12 sps:$4 sm:$0xff]   ;;  %1392 = vmatpush2.bf16.msra.mxu0 %v6439_v0 }
 0x10d   : > { %1435 = vmatpush2.bf16.msra.mxu1 %v6929_v28 }
 0x10f   : > { %1394 = vmatmul.mubr.bf16.vlgmr.msra.gmra.mxu0 %v6930_v27 }
 0x110   : > { %1437 = vmatmul.mubr.bf16.vlgmr.msra.gmra.mxu1 %v6930_v27 }
 0x111   : > { %v1131_v34 = vpop.permute.xlu0 %1130  ;;  %v1136_v45 = vpop.permute.xlu1 %1135 }
 0x1cf   : > { %v1395_v38 = vpop.f32.mrf.mxu0 }
 0x1d0   : > { %v1396_v39 = vadd.f32 %v1395_v38, %v1131_v34  ;;  %v1438_v40 = vpop.f32.mrf.mxu1 }
 0x1d1   : > { %v1397_v42 = vpop.f32.mrf.mxu0  ;;  %v1439_v44 = vadd.f32 %v1438_v40, %v1131_v34 }
 0x1d2   : > { %v1398_v46 = vadd.f32 %v1397_v42, %v1131_v34  ;;  %v1440_v47 = vpop.f32.mrf.mxu1  ;;  %v1445_v49 = vmax.f32 %v1396_v39, 0.0 }
 0x1d3   : > { %v1399_v48 = vpop.f32.mrf.mxu0  ;;  %v1447_v51 = vmax.f32 %v1439_v44, 0.0 }
 0x1d4   : > { %v1446_v50 = vmax.f32 %v1398_v46, 0.0  ;;  %v1441_v52 = vpop.f32.mrf.mxu1  ;;  %v1400_v57 = vadd.f32 %v1399_v48, %v1136_v45  ;;  %v1469_v63 = vsel %vm7564_vm3, %v1445_v49, 0.0 }
 0x1d5   : > { %v1401_v55 = vpop.f32.mrf.mxu0  ;;  %v1442_v56 = vadd.f32 %v1441_v52, %v1136_v45  ;;  %v1471_v58 = vsel %vm1468_vm15, %v1447_v51, 0.0 }
 0x1d6   : > { %v1443_v59 = vpop.f32.mrf.mxu1  ;;  %v6736_v60 = vpack.c.bf16 %v1471_v58, %v1471_v58  ;;  %v1402_v61 = vadd.f32 %v1401_v55, %v1136_v45  ;;  %v1470_v2 = vsel %vm7568_vm1, %v1446_v50, 0.0  ;;  %v1448_v5 = vmax.f32 %v1400_v57, 0.0 }
 0x1d7   : > { %v1450_v62 = vmax.f32 %v1442_v56, 0.0  ;;  %v6735_v7 = vpack.c.bf16 %v1470_v2, %v1469_v63 }
 0x1d8   : > { %1496 = vrot.lane.b32.xlu1 %v6736_v60, %s9356_s28  ;;  %v1449_v3 = vmax.f32 %v1402_v61, 0.0  ;;  %v1472_v9 = vsel %vm7564_vm3, %v1448_v5, 0.0  ;;  %vm2843_vm3 = vcmask 130048  }
 0x1d9   : > { %v1474_v4 = vsel %vm1468_vm15, %v1450_v62, 0.0  ;;  %vm1504_vm15 = vcmask 310272  }
 0x1da   : > { %v6738_v6 = vpack.c.bf16 %v1474_v4, %v1474_v4  ;;  %v1473_v8 = vsel %vm7568_vm1, %v1449_v3, 0.0  ;;  %vm1517_vm1 = vcmask 863232  }
 0x1db   : > { %v6737_v10 = vpack.c.bf16 %v1473_v8, %v1472_v9 }
 0x1dc   : > { %1500 = vrot.lane.b32.xlu0 %v6738_v6, %s9356_s28  ;;  %1494 = vrot.lane.b32.xlu1 %v6735_v7, %s9356_s28 }
 0x1e0   : > { %1498 = vrot.lane.b32.xlu0 %v6737_v10, %s9356_s28  ;;  %s9453_s28 = smov 125  }
 0x24a   : > { %v1497_v11 = vpop.permute.xlu1 %1496 }
 0x24e   : > { %v1501_v12 = vpop.permute.xlu0 %1500  ;;  %v1495_v13 = vpop.permute.xlu1 %1494 }
 0x24f   : > { %v1502_v15 = vrot.slane %v1495_v13, 4 }
 0x251   : > { %v1505_v16 = vsel %vm1504_vm15, %v1502_v15, %v1495_v13  ;;  %v1506_v17 = vsel %vm1504_vm15, %v1502_v15, %v1497_v11 }
 0x252   : > { %1516 = vst.msk [vmem:[#allocation2] sm:$0xff] %vm7586_vm13, %v1505_v16  ;;  %v1499_v18 = vpop.permute.xlu0 %1498 }
 0x253   : > { %1518 = vst.msk [vmem:[#allocation2 + $0x8] sm:$0xf] %vm1517_vm1, %v1506_v17  ;;  %v1503_v19 = vrot.slane %v1499_v18, 4 }
 0x255   : > { %v1507_v20 = vsel %vm1504_vm15, %v1503_v19, %v1499_v18  ;;  %v1508_v21 = vsel %vm1504_vm15, %v1503_v19, %v1501_v12 }
 0x256   : > { %1519 = vst.msk [vmem:[#allocation2 + $0x10] sm:$0xff] %vm7586_vm13, %v1507_v20 }
 0x257   : > { %1520 = vst.msk [vmem:[#allocation2 + $0x18] sm:$0xf] %vm1517_vm1, %v1508_v21 }
 0x259   : > { %v7600_v22 = vld [vmem:[#allocation2] sm:$0xff] }
 0x25a   : > { %v1522_v23 = vld [vmem:[#allocation2 + $0x8] sm:$0xf]  ;;  %1525 = vst [vmem:[#allocation10] sm:$0xff] %v7600_v22  ;;  %1729 = vrot.lane.b32.xlu1 %v7600_v22, %s9449_s26 }
 0x25b   : > { %v1722_v24 = vld [vmem:[#allocation2 + $0x8] sm:$0xf]  ;;  %1526 = vst.msk [vmem:[#allocation10 + $0x8] sm:$0xf] %vm658_vm0, %v1522_v23 }
 0x25c   : > { %1731 = vrot.lane.b32.xlu0 %v1722_v24, %s9449_s26  ;;  %v1690_v0 = vld [vmem:[#allocation2 + $0x8] sm:$0xf] }
 0x25d   : > { %v7607_v25 = vld [vmem:[#allocation2 + $0x10] sm:$0xff]  ;;  %v1658_v27 = vld [vmem:[#allocation2 + $0x8] sm:$0xf] }
 0x25e   : > { %v1524_v26 = vld [vmem:[#allocation2 + $0x18] sm:$0xf]  ;;  %1527 = vst [vmem:[#allocation10 + $0xc] sm:$0xff] %v7607_v25  ;;  %1697 = vrot.lane.b32.xlu1 %v7600_v22, %s9450_s30  ;;  %v1626_v28 = vld [vmem:[#allocation2 + $0x8] sm:$0xf] }
 0x25f   : > { %1528 = vst.msk [vmem:[#allocation10 + $0x14] sm:$0xf] %vm658_vm0, %v1524_v26  ;;  %v1594_v29 = vld [vmem:[#allocation2 + $0x8] sm:$0xf]  ;;  %v1724_v49 = vld [vmem:[#allocation2 + $0x18] sm:$0xf] }
 0x260   : > { %1699 = vrot.lane.b32.xlu0 %v1690_v0, %s9450_s30  ;;  %v1562_v30 = vld [vmem:[#allocation2 + $0x8] sm:$0xf]  ;;  %v1692_v50 = vld [vmem:[#allocation2 + $0x18] sm:$0xf] }
 0x261   : > { %v1530_v33 = vld [vmem:[#allocation2 + $0x8] sm:$0xf]  ;;  %v1660_v51 = vld [vmem:[#allocation2 + $0x18] sm:$0xf] }
 0x262   : > { %1665 = vrot.lane.b32.xlu1 %v7600_v22, %s9451_s4  ;;  %v2240_v34 = vld [vmem:[#allocation2 + $0x8] sm:$0xff]  ;;  %v1628_v52 = vld [vmem:[#allocation2 + $0x18] sm:$0xf] }
 0x263   : > { %v1978_v37 = vld [vmem:[#allocation2 + $0x8] sm:$0xf]  ;;  %v1596_v53 = vld [vmem:[#allocation2 + $0x18] sm:$0xf] }
 0x264   : > { %1667 = vrot.lane.b32.xlu0 %v1658_v27, %s9451_s4  ;;  %v1946_v38 = vld [vmem:[#allocation2 + $0x8] sm:$0xf]  ;;  %v1564_v56 = vld [vmem:[#allocation2 + $0x18] sm:$0xf] }
 0x265   : > { %v1914_v39 = vld [vmem:[#allocation2 + $0x8] sm:$0xf]  ;;  %v1532_v59 = vld [vmem:[#allocation2 + $0x18] sm:$0xf] }
 0x266   : > { %1633 = vrot.lane.b32.xlu1 %v7600_v22, %s9452_s1  ;;  %v2106_v40 = vld [vmem:[#allocation2 + $0x8] sm:$0xf]  ;;  %v7719_v62 = vld [vmem:[#allocation2 + $0x18] sm:$0xff] }
 0x267   : > { %v1882_v41 = vld [vmem:[#allocation2 + $0x8] sm:$0xf]  ;;  %v1980_v5 = vld [vmem:[#allocation2 + $0x18] sm:$0xf] }
 0x268   : > { %1635 = vrot.lane.b32.xlu0 %v1626_v28, %s9452_s1  ;;  %v2074_v42 = vld [vmem:[#allocation2 + $0x8] sm:$0xf]  ;;  %v1948_v10 = vld [vmem:[#allocation2 + $0x18] sm:$0xf] }
 0x269   : > { %v1850_v43 = vld [vmem:[#allocation2 + $0x8] sm:$0xf]  ;;  %v1916_v19 = vld [vmem:[#allocation2 + $0x18] sm:$0xf] }
 0x26a   : > { %1601 = vrot.lane.b32.xlu1 %v7600_v22, %s9453_s28  ;;  %v2042_v44 = vld [vmem:[#allocation2 + $0x8] sm:$0xf]  ;;  %v2108_v23 = vld [vmem:[#allocation2 + $0x18] sm:$0xf] }
 0x26b   : > { %v1818_v45 = vld [vmem:[#allocation2 + $0x8] sm:$0xf]  ;;  %v1884_v27 = vld [vmem:[#allocation2 + $0x18] sm:$0xf] }
 0x26c   : > { %1603 = vrot.lane.b32.xlu0 %v1594_v29, %s9453_s28  ;;  %v2010_v46 = vld [vmem:[#allocation2 + $0x8] sm:$0xf] }
 0x26d   : > { %v1786_v47 = vld [vmem:[#allocation2 + $0x8] sm:$0xf] }
 0x26e   : > { %1569 = vrot.lane.b32.xlu1 %v7600_v22, %s9454_s24  ;;  %v1754_v48 = vld [vmem:[#allocation2 + $0x8] sm:$0xf] }
 0x270   : > { %1571 = vrot.lane.b32.xlu0 %v1562_v30, %s9454_s24 }
 0x272   : > { %1537 = vrot.lane.b32.xlu1 %v7600_v22, %s9455_s23 }
 0x274   : > { %1539 = vrot.lane.b32.xlu0 %v1530_v33, %s9455_s23  ;;  %v2076_v33 = vld [vmem:[#allocation2 + $0x18] sm:$0xf] }
 0x276   : > { %2247 = vrot.lane.b32.xlu1 %v7600_v22, %s9456_s0 }
 0x278   : > { %2249 = vrot.lane.b32.xlu0 %v2240_v34, %s9456_s0 }
 0x27a   : > { %2213 = vrot.lane.b32.xlu1 %v7600_v22, %s9457_s29 }
 0x27c   : > { %2215 = vrot.lane.b32.xlu0 %v2240_v34, %s9457_s29 }
 0x27e   : > { %1985 = vrot.lane.b32.xlu1 %v7600_v22, %s9458_s22 }
 0x280   : > { %1987 = vrot.lane.b32.xlu0 %v1978_v37, %s9458_s22 }
 0x282   : > { %2179 = vrot.lane.b32.xlu1 %v7600_v22, %s9459_s2 }
 0x284   : > { %2181 = vrot.lane.b32.xlu0 %v2240_v34, %s9459_s2 }
 0x286   : > { %1953 = vrot.lane.b32.xlu1 %v7600_v22, %s9460_s27 }
 0x288   : > { %1955 = vrot.lane.b32.xlu0 %v1946_v38, %s9460_s27 }
 0x28a   : > { %2145 = vrot.lane.b32.xlu1 %v7600_v22, %s9461_s21 }
 0x28c   : > { %2147 = vrot.lane.b32.xlu0 %v2240_v34, %s9461_s21 }
 0x28e   : > { %1921 = vrot.lane.b32.xlu1 %v7600_v22, %s9462_s20 }
 0x290   : > { %1923 = vrot.lane.b32.xlu0 %v1914_v39, %s9462_s20  ;;  %v1852_v39 = vld [vmem:[#allocation2 + $0x18] sm:$0xf] }
 0x292   : > { %2113 = vrot.lane.b32.xlu1 %v7600_v22, %s9463_s5 }
 0x294   : > { %2115 = vrot.lane.b32.xlu0 %v2106_v40, %s9463_s5 }
 0x296   : > { %1889 = vrot.lane.b32.xlu1 %v7600_v22, %s9464_s3 }
 0x298   : > { %1891 = vrot.lane.b32.xlu0 %v1882_v41, %s9464_s3 }
 0x29a   : > { %2081 = vrot.lane.b32.xlu1 %v7600_v22, %s9465_s19 }
 0x29c   : > { %2083 = vrot.lane.b32.xlu0 %v2074_v42, %s9465_s19 }
 0x29e   : > { %1857 = vrot.lane.b32.xlu1 %v7600_v22, %s9466_s25 }
 0x2a0   : > { %1859 = vrot.lane.b32.xlu0 %v1850_v43, %s9466_s25  ;;  %v2044_v43 = vld [vmem:[#allocation2 + $0x18] sm:$0xf] }
 0x2a2   : > { %2049 = vrot.lane.b32.xlu1 %v7600_v22, %s9467_s18 }
 0x2a4   : > { %2051 = vrot.lane.b32.xlu0 %v2042_v44, %s9467_s18 }
 0x2a6   : > { %1825 = vrot.lane.b32.xlu1 %v7600_v22, %s9468_s9 }
 0x2a8   : > { %1827 = vrot.lane.b32.xlu0 %v1818_v45, %s9468_s9 }
 0x2aa   : > { %2017 = vrot.lane.b32.xlu1 %v7600_v22, %s9469_s14 }
 0x2ac   : > { %2019 = vrot.lane.b32.xlu0 %v2010_v46, %s9469_s14  ;;  %v1820_v46 = vld [vmem:[#allocation2 + $0x18] sm:$0xf] }
 0x2ae   : > { %1793 = vrot.lane.b32.xlu1 %v7600_v22, %s9470_s8 }
 0x2b0   : > { %1795 = vrot.lane.b32.xlu0 %v1786_v47, %s9470_s8 }
 0x2b2   : > { %2281 = vrot.lane.b32.xlu1 %v7600_v22, %s9471_s17 }
 0x2b4   : > { %2283 = vrot.lane.b32.xlu0 %v2240_v34, %s9471_s17 }
 0x2b6   : > { %1761 = vrot.lane.b32.xlu1 %v7600_v22, %s9472_s7 }
 0x2b8   : > { %1763 = vrot.lane.b32.xlu0 %v1754_v48, %s9472_s7 }
 0x2ba   : > { %1733 = vrot.lane.b32.xlu1 %v7607_v25, %s9449_s26 }
 0x2bc   : > { %1735 = vrot.lane.b32.xlu0 %v1724_v49, %s9449_s26  ;;  %v2012_v49 = vld [vmem:[#allocation2 + $0x18] sm:$0xf] }
 0x2be   : > { %1701 = vrot.lane.b32.xlu1 %v7607_v25, %s9450_s30 }
 0x2c0   : > { %1703 = vrot.lane.b32.xlu0 %v1692_v50, %s9450_s30 }
 0x2c2   : > { %1669 = vrot.lane.b32.xlu1 %v7607_v25, %s9451_s4 }
 0x2c4   : > { %1671 = vrot.lane.b32.xlu0 %v1660_v51, %s9451_s4 }
 0x2c6   : > { %1637 = vrot.lane.b32.xlu1 %v7607_v25, %s9452_s1 }
 0x2c8   : > { %1639 = vrot.lane.b32.xlu0 %v1628_v52, %s9452_s1  ;;  %v1788_v52 = vld [vmem:[#allocation2 + $0x18] sm:$0xf] }
 0x2ca   : > { %1605 = vrot.lane.b32.xlu1 %v7607_v25, %s9453_s28 }
 0x2cc   : > { %1607 = vrot.lane.b32.xlu0 %v1596_v53, %s9453_s28  ;;  %v7697_v55 = vpop.permute.xlu1 %1729 }
 0x2ce   : > { %v7695_v54 = vpop.permute.xlu0 %1731  ;;  %1573 = vrot.lane.b32.xlu1 %v7607_v25, %s9454_s24 }
 0x2cf   : > { %1750 = vst.msk [vmem:[#allocation10 + $0xb0] sm:$0xf] %vm658_vm0, %v7695_v54 }
 0x2d0   : > { %1575 = vrot.lane.b32.xlu0 %v1564_v56, %s9454_s24  ;;  %v7706_v58 = vpop.permute.xlu1 %1697 }
 0x2d2   : > { %v7704_v57 = vpop.permute.xlu0 %1699  ;;  %1541 = vrot.lane.b32.xlu1 %v7607_v25, %s9455_s23 }
 0x2d3   : > { %1718 = vst.msk [vmem:[#allocation10 + $0x98] sm:$0xf] %vm658_vm0, %v7704_v57  ;;  %v1706_v1 = vrot.slane %v7704_v57, 4 }
 0x2d4   : > { %1543 = vrot.lane.b32.xlu0 %v1532_v59, %s9455_s23  ;;  %v7715_v61 = vpop.permute.xlu1 %1665 }
 0x2d6   : > { %v7713_v60 = vpop.permute.xlu0 %1667  ;;  %2251 = vrot.lane.b32.xlu1 %v7607_v25, %s9456_s0 }
 0x2d7   : > { %1686 = vst.msk [vmem:[#allocation10 + $0x80] sm:$0xf] %vm658_vm0, %v7713_v60  ;;  %v1674_v31 = vrot.slane %v7713_v60, 4 }
 0x2d8   : > { %2253 = vrot.lane.b32.xlu0 %v7719_v62, %s9456_s0  ;;  %v7727_v2 = vpop.permute.xlu1 %1633 }
 0x2da   : > { %v7725_v63 = vpop.permute.xlu0 %1635  ;;  %2217 = vrot.lane.b32.xlu1 %v7607_v25, %s9457_s29 }
 0x2db   : > { %1654 = vst.msk [vmem:[#allocation10 + $0x68] sm:$0xf] %vm658_vm0, %v7725_v63  ;;  %v1642_v60 = vrot.slane %v7725_v63, 4 }
 0x2dc   : > { %2219 = vrot.lane.b32.xlu0 %v7719_v62, %s9457_s29  ;;  %v7737_v4 = vpop.permute.xlu1 %1601 }
 0x2de   : > { %v7735_v3 = vpop.permute.xlu0 %1603  ;;  %1989 = vrot.lane.b32.xlu1 %v7607_v25, %s9458_s22 }
 0x2df   : > { %1622 = vst.msk [vmem:[#allocation10 + $0x50] sm:$0xf] %vm658_vm0, %v7735_v3  ;;  %v1610_v63 = vrot.slane %v7735_v3, 4 }
 0x2e0   : > { %1991 = vrot.lane.b32.xlu0 %v1980_v5, %s9458_s22  ;;  %v7746_v7 = vpop.permute.xlu1 %1569 }
 0x2e2   : > { %v7744_v6 = vpop.permute.xlu0 %1571  ;;  %2183 = vrot.lane.b32.xlu1 %v7607_v25, %s9459_s2 }
 0x2e3   : > { %1590 = vst.msk [vmem:[#allocation10 + $0x38] sm:$0xf] %vm658_vm0, %v7744_v6 }
 0x2e4   : > { %2185 = vrot.lane.b32.xlu0 %v7719_v62, %s9459_s2  ;;  %v7756_v9 = vpop.permute.xlu1 %1537 }
 0x2e6   : > { %v7754_v8 = vpop.permute.xlu0 %1539  ;;  %1957 = vrot.lane.b32.xlu1 %v7607_v25, %s9460_s27 }
 0x2e7   : > { %1558 = vst.msk [vmem:[#allocation10 + $0x20] sm:$0xf] %vm658_vm0, %v7754_v8 }
 0x2e8   : > { %1959 = vrot.lane.b32.xlu0 %v1948_v10, %s9460_s27  ;;  %v7765_v12 = vpop.permute.xlu1 %2247  ;;  %v1756_v10 = vld [vmem:[#allocation2 + $0x18] sm:$0xf] }
 0x2ea   : > { %v7763_v11 = vpop.permute.xlu0 %2249  ;;  %2149 = vrot.lane.b32.xlu1 %v7607_v25, %s9461_s21 }
 0x2eb   : > { %v9393_v13 = vrot.slane %v7763_v11, 4 }
 0x2ec   : > { %2151 = vrot.lane.b32.xlu0 %v7719_v62, %s9461_s21  ;;  %v7779_v17 = vpop.permute.xlu1 %2213 }
 0x2ed   : > { %v2261_v15 = vsel %vm1049_vm5, %v7763_v11, %v9393_v13 }
 0x2ee   : > { %2270 = vst.msk [vmem:[#allocation10 + $0x230] sm:$0xf] %vm658_vm0, %v2261_v15  ;;  %v7777_v16 = vpop.permute.xlu0 %2215  ;;  %1925 = vrot.lane.b32.xlu1 %v7607_v25, %s9462_s20  ;;  %v7889_v15 = vld [vmem:[%s9473_s16 + $0xc] ss:$16 sps:$4 sm:$0xff]  }
 0x2ef   : > { %v9392_v18 = vrot.slane %v7777_v16, 4  ;;  %9474 = vst [vmem:[#allocation27_spill] sm:$0xff] %v7889_v15  ;;  %6542 = vmatprep.mubr.msk.bf16.mxu1 %vm2843_vm3, %v7889_v15 }
 0x2f0   : > { %1927 = vrot.lane.b32.xlu0 %v1916_v19, %s9462_s20  ;;  %v7792_v22 = vpop.permute.xlu1 %1985  ;;  %v6461_v19 = vld [vmem:[%s9278_s10 + $0x10] sm:$0xff] }
 0x2f1   : > { %v2227_v20 = vsel %vm1031_vm8, %v7777_v16, %v9392_v18 }
 0x2f2   : > { %2236 = vst.msk [vmem:[#allocation10 + $0x218] sm:$0xf] %vm658_vm0, %v2227_v20  ;;  %v7790_v21 = vpop.permute.xlu0 %1987  ;;  %2117 = vrot.lane.b32.xlu1 %v7607_v25, %s9463_s5  ;;  %v7905_v20 = vld [vmem:[%s9473_s16 + $0x4] ss:$16 sps:$4 sm:$0xff]  }
 0x2f3   : > { %2006 = vst.msk [vmem:[#allocation10 + $0x170] sm:$0xf] %vm658_vm0, %v7790_v21  ;;  %9475 = vst [vmem:[#allocation28_spill] sm:$0xff] %v7905_v20  ;;  %2879 = vmatprep.mubr.bf16.mxu0 %v7905_v20 }
 0x2f4   : > { %2119 = vrot.lane.b32.xlu0 %v2108_v23, %s9463_s5  ;;  %v7801_v26 = vpop.permute.xlu1 %2179 }
 0x2f6   : > { %v7799_v24 = vpop.permute.xlu0 %2181  ;;  %1893 = vrot.lane.b32.xlu1 %v7607_v25, %s9464_s3 }
 0x2f7   : > { %v9391_v0 = vrot.slane %v7799_v24, 4 }
 0x2f8   : > { %1895 = vrot.lane.b32.xlu0 %v1884_v27, %s9464_s3  ;;  %v7814_v30 = vpop.permute.xlu1 %1953 }
 0x2f9   : > { %v2193_v28 = vsel %vm1013_vm4, %v7799_v24, %v9391_v0 }
 0x2fa   : > { %2202 = vst.msk [vmem:[#allocation10 + $0x200] sm:$0xf] %vm658_vm0, %v2193_v28  ;;  %v7812_v29 = vpop.permute.xlu0 %1955  ;;  %2085 = vrot.lane.b32.xlu1 %v7607_v25, %s9465_s19 }
 0x2fb   : > { %1974 = vst.msk [vmem:[#allocation10 + $0x158] sm:$0xf] %vm658_vm0, %v7812_v29 }
 0x2fc   : > { %2087 = vrot.lane.b32.xlu0 %v2076_v33, %s9465_s19  ;;  %v7823_v37 = vpop.permute.xlu1 %2145 }
 0x2fe   : > { %v7821_v34 = vpop.permute.xlu0 %2147  ;;  %1861 = vrot.lane.b32.xlu1 %v7607_v25, %s9466_s25 }
 0x2ff   : > { %v9389_v38 = vrot.slane %v7821_v34, 4 }
 0x300   : > { %1863 = vrot.lane.b32.xlu0 %v1852_v39, %s9466_s25  ;;  %v7836_v42 = vpop.permute.xlu1 %1921 }
 0x301   : > { %v2159_v40 = vsel %vm9403_vm6, %v7821_v34, %v9389_v38  ;;  %v1705_v38 = vrot.slane %v7706_v58, 4 }
 0x302   : > { %2168 = vst.msk [vmem:[#allocation10 + $0x1e8] sm:$0xf] %vm658_vm0, %v2159_v40  ;;  %v7834_v41 = vpop.permute.xlu0 %1923  ;;  %2053 = vrot.lane.b32.xlu1 %v7607_v25, %s9467_s18 }
 0x303   : > { %1942 = vst.msk [vmem:[#allocation10 + $0x140] sm:$0xf] %vm658_vm0, %v7834_v41  ;;  %v1709_v14 = vsel %vm670_vm2, %v1705_v38, %v1706_v1 }
 0x304   : > { %2055 = vrot.lane.b32.xlu0 %v2044_v43, %s9467_s18  ;;  %v7845_v45 = vpop.permute.xlu1 %2113 }
 0x306   : > { %v7843_v44 = vpop.permute.xlu0 %2115  ;;  %1829 = vrot.lane.b32.xlu1 %v7607_v25, %s9468_s9 }
 0x307   : > { %2134 = vst.msk [vmem:[#allocation10 + $0x1d0] sm:$0xf] %vm658_vm0, %v7843_v44 }
 0x308   : > { %1831 = vrot.lane.b32.xlu0 %v1820_v46, %s9468_s9  ;;  %v7854_v48 = vpop.permute.xlu1 %1889 }
 0x30a   : > { %v7852_v47 = vpop.permute.xlu0 %1891  ;;  %2021 = vrot.lane.b32.xlu1 %v7607_v25, %s9469_s14 }
 0x30b   : > { %1910 = vst.msk [vmem:[#allocation10 + $0x128] sm:$0xf] %vm658_vm0, %v7852_v47 }
 0x30c   : > { %2023 = vrot.lane.b32.xlu0 %v2012_v49, %s9469_s14  ;;  %v7863_v51 = vpop.permute.xlu1 %2081  ;;  %s9522_s14 = smov 73  }
 0x30e   : > { %v7861_v50 = vpop.permute.xlu0 %2083  ;;  %1797 = vrot.lane.b32.xlu1 %v7607_v25, %s9470_s8 }
 0x30f   : > { %2102 = vst.msk [vmem:[#allocation10 + $0x1b8] sm:$0xf] %vm658_vm0, %v7861_v50 }
 0x310   : > { %1799 = vrot.lane.b32.xlu0 %v1788_v52, %s9470_s8  ;;  %v7872_v56 = vpop.permute.xlu1 %1857  ;;  %v1738_v52 = vrot.slane %v7695_v54, 4 }
 0x312   : > { %v7870_v53 = vpop.permute.xlu0 %1859  ;;  %2285 = vrot.lane.b32.xlu1 %v7607_v25, %s9471_s17 }
 0x313   : > { %1878 = vst.msk [vmem:[#allocation10 + $0x110] sm:$0xf] %vm658_vm0, %v7870_v53 }
 0x314   : > { %2287 = vrot.lane.b32.xlu0 %v7719_v62, %s9471_s17  ;;  %v7882_v5 = vpop.permute.xlu1 %2049  ;;  %v6462_v62 = vld [vmem:[%s9278_s10 + $0x18] sm:$0xff]  ;;  %s7166_s17 = smov 6  }
 0x316   : > { %v7880_v59 = vpop.permute.xlu0 %2051  ;;  %1765 = vrot.lane.b32.xlu1 %v7607_v25, %s9472_s7 }
 0x317   : > { %2070 = vst.msk [vmem:[#allocation10 + $0x1a0] sm:$0xf] %vm658_vm0, %v7880_v59 }
 0x318   : > { %1767 = vrot.lane.b32.xlu0 %v1756_v10, %s9472_s7  ;;  %v7909_v27 = vpop.permute.xlu1 %1825  ;;  %v1737_v10 = vrot.slane %v7697_v55, 4 }
 0x31a   : > { %v7907_v23 = vpop.permute.xlu0 %1827  ;;  %2416 = vperm.xlu1 %6916, %v6461_v19   ;;  %v1741_v32 = vsel %vm670_vm2, %v1737_v10, %v1738_v52  ;;  %v1673_v52 = vrot.slane %v7715_v61, 4 }
 0x31b   : > { %1846 = vst.msk [vmem:[#allocation10 + $0xf8] sm:$0xf] %vm658_vm0, %v7907_v23 }
 0x31c   : > { %2421 = vperm.xlu0 %6915, %v6462_v62   ;;  %v7916_v28 = vpop.permute.xlu1 %2017  ;;  %v1677_v1 = vsel %vm670_vm2, %v1673_v52, %v1674_v31 }
 0x31e   : > { %v7914_v25 = vpop.permute.xlu0 %2019 }
 0x31f   : > { %2038 = vst.msk [vmem:[#allocation10 + $0x188] sm:$0xf] %vm658_vm0, %v7914_v25 }
 0x320   : > { %v7922_v39 = vpop.permute.xlu1 %1793 }
 0x322   : > { %v7920_v33 = vpop.permute.xlu0 %1795 }
 0x323   : > { %1814 = vst.msk [vmem:[#allocation10 + $0xe0] sm:$0xf] %vm658_vm0, %v7920_v33 }
 0x324   : > { %v7928_v43 = vpop.permute.xlu1 %2281 }
 0x326   : > { %v7926_v40 = vpop.permute.xlu0 %2283 }
 0x327   : > { %v9390_v46 = vrot.slane %v7926_v40, 4 }
 0x328   : > { %v7940_v19 = vpop.permute.xlu1 %1761 }
 0x329   : > { %v2295_v49 = vsel %vm1067_vm7, %v7926_v40, %v9390_v46 }
 0x32a   : > { %2304 = vst.msk [vmem:[#allocation10 + $0x248] sm:$0xf] %vm658_vm0, %v2295_v49  ;;  %v7938_v62 = vpop.permute.xlu0 %1763  ;;  %v1742_v49 = vsel %vm774_vm12, %v7697_v55, %v1741_v32  ;;  %v1710_v32 = vsel %vm757_vm11, %v7706_v58, %v1709_v14 }
 0x32b   : > { %1782 = vst.msk [vmem:[#allocation10 + $0xc8] sm:$0xf] %vm658_vm0, %v7938_v62 }
 0x32c   : > { %v1734_v0 = vpop.permute.xlu1 %1733 }
 0x32d   : > { %v1739_v18 = vrot.slane %v1734_v0, 4 }
 0x32e   : > { %v1736_v46 = vpop.permute.xlu0 %1735 }
 0x32f   : > { %v1740_v54 = vrot.slane %v1736_v46, 4  ;;  %1752 = vst.msk [vmem:[#allocation10 + $0xbc] sm:$0xf] %vm658_vm0, %v1736_v46 }
 0x330   : > { %v1702_v36 = vpop.permute.xlu1 %1701 }
 0x331   : > { %v1743_v13 = vsel %vm670_vm2, %v1739_v18, %v1740_v54  ;;  %v1707_v46 = vrot.slane %v1702_v36, 4 }
 0x332   : > { %v1744_v57 = vsel %vm774_vm12, %v1734_v0, %v1743_v13  ;;  %v1704_v10 = vpop.permute.xlu0 %1703  ;;  %v1641_v13 = vrot.slane %v7727_v2, 4 }
 0x333   : > { %v1708_v35 = vrot.slane %v1704_v10, 4  ;;  %1720 = vst.msk [vmem:[#allocation10 + $0xa4] sm:$0xf] %vm658_vm0, %v1704_v10  ;;  %v6489_v15 = vcombine.high %v1742_v49, %v1744_v57  ;;  %v6488_v20 = vcombine.low %v1742_v49, %v1744_v57 }
 0x334   : > { %v1670_v38 = vpop.permute.xlu1 %1669  ;;  %v1645_v58 = vsel %vm670_vm2, %v1641_v13, %v1642_v60  ;;  %v1578_v60 = vrot.slane %v7744_v6, 4  ;;  %v1577_v13 = vrot.slane %v7746_v7, 4 }
 0x335   : > { %v1711_v55 = vsel %vm670_vm2, %v1707_v46, %v1708_v35  ;;  %2847 = vmatprep.subr.bf16.mxu0 %v6489_v15  ;;  %v1675_v49 = vrot.slane %v1670_v38, 4  ;;  %v1678_v35 = vsel %vm740_vm14, %v7715_v61, %v1677_v1 }
 0x336   : > { %v1712_v18 = vsel %vm757_vm11, %v1702_v36, %v1711_v55  ;;  %v1672_v0 = vpop.permute.xlu0 %1671  ;;  %2848 = vmatpush1.bf16.msra.mxu0 %v6488_v20  ;;  %v1609_v36 = vrot.slane %v7737_v4, 4  ;;  %v1646_v55 = vsel %vm9476_vm9, %v7727_v2, %v1645_v58  ;;  %vm9478_vm9 = vcmask 1022976  }
 0x337   : > { %v1676_v54 = vrot.slane %v1672_v0, 4  ;;  %1688 = vst.msk [vmem:[#allocation10 + $0x8c] sm:$0xf] %vm658_vm0, %v1672_v0  ;;  %v6486_v57 = vcombine.high %v1710_v32, %v1712_v18  ;;  %v6485_v14 = vcombine.low %v1710_v32, %v1712_v18  ;;  %v1581_v6 = vsel %vm670_vm2, %v1577_v13, %v1578_v60 }
 0x338   : > { %v1638_v52 = vpop.permute.xlu1 %1637  ;;  %v1613_v3 = vsel %vm670_vm2, %v1609_v36, %v1610_v63  ;;  %v1545_v58 = vrot.slane %v7756_v9, 4 }
 0x339   : > { %v1679_v31 = vsel %vm670_vm2, %v1675_v49, %v1676_v54  ;;  %2849 = vmatprep.subr.bf16.mxu0 %v6486_v57  ;;  %v1643_v46 = vrot.slane %v1638_v52, 4 }
 0x33a   : > { %v1680_v15 = vsel %vm740_vm14, %v1670_v38, %v1679_v31  ;;  %v1640_v20 = vpop.permute.xlu0 %1639  ;;  %2850 = vmatpush1.bf16.msra.mxu0 %v6485_v14  ;;  %v1614_v14 = vsel %vm9478_vm9, %v7737_v4, %v1613_v3  ;;  %v1546_v31 = vrot.slane %v7754_v8, 4 }
 0x33b   : > { %v1644_v10 = vrot.slane %v1640_v20, 4  ;;  %1656 = vst.msk [vmem:[#allocation10 + $0x74] sm:$0xf] %vm658_vm0, %v1640_v20  ;;  %v6483_v32 = vcombine.high %v1678_v35, %v1680_v15  ;;  %v6482_v61 = vcombine.low %v1678_v35, %v1680_v15 }
 0x33c   : > { %v1606_v38 = vpop.permute.xlu1 %1605  ;;  %v1549_v8 = vsel %vm670_vm2, %v1545_v58, %v1546_v31 }
 0x33d   : > { %v1647_v1 = vsel %vm670_vm2, %v1643_v46, %v1644_v10  ;;  %2851 = vmatprep.subr.bf16.mxu0 %v6483_v32  ;;  %v1611_v49 = vrot.slane %v1606_v38, 4 }
 0x33e   : > { %v1648_v18 = vsel %vm9477_vm10, %v1638_v52, %v1647_v1  ;;  %v1608_v0 = vpop.permute.xlu0 %1607  ;;  %2852 = vmatpush1.bf16.msra.mxu0 %v6482_v61  ;;  %vm9479_vm10 = vmmov %vm9478_vm9  ;;  %vm9480_vm9 = vcmask 1031168   ;;  %v2255_v61 = vrot.slane %v7765_v12, 4 }
 0x33f   : > { %v1612_v54 = vrot.slane %v1608_v0, 4  ;;  %1624 = vst.msk [vmem:[#allocation10 + $0x5c] sm:$0xf] %vm658_vm0, %v1608_v0  ;;  %v6480_v57 = vcombine.high %v1646_v55, %v1648_v18  ;;  %v6479_v2 = vcombine.low %v1646_v55, %v1648_v18  ;;  %v1582_v32 = vsel %vm9480_vm9, %v7746_v7, %v1581_v6 }
 0x340   : > { %v1574_v15 = vpop.permute.xlu1 %1573 }
 0x341   : > { %v1615_v35 = vsel %vm670_vm2, %v1611_v49, %v1612_v54  ;;  %2853 = vmatprep.subr.bf16.mxu0 %v6480_v57  ;;  %v1579_v52 = vrot.slane %v1574_v15, 4  ;;  %v9483_v54 = vrot.slane %v7763_v11, 4  ;;  %v2221_v57 = vrot.slane %v7779_v17, 4 }
 0x342   : > { %v1616_v63 = vsel %vm9479_vm10, %v1606_v38, %v1615_v35  ;;  %v1576_v36 = vpop.permute.xlu0 %1575  ;;  %2854 = vmatpush1.bf16.msra.mxu0 %v6479_v2  ;;  %vm9481_vm10 = vmmov %vm9480_vm9  ;;  %vm9482_vm9 = vcmask 1039360  }
 0x343   : > { %v1580_v20 = vrot.slane %v1576_v36, 4  ;;  %1592 = vst.msk [vmem:[#allocation10 + $0x44] sm:$0xf] %vm658_vm0, %v1576_v36  ;;  %v6477_v10 = vcombine.high %v1614_v14, %v1616_v63  ;;  %v6476_v4 = vcombine.low %v1614_v14, %v1616_v63  ;;  %v1550_v7 = vsel %vm9482_vm9, %v7756_v9, %v1549_v8 }
 0x344   : > { %v1542_v3 = vpop.permute.xlu1 %1541  ;;  %v2259_v49 = vsel %vm670_vm2, %v2255_v61, %v9483_v54 }
 0x345   : > { %v1583_v46 = vsel %vm670_vm2, %v1579_v52, %v1580_v20  ;;  %2855 = vmatprep.subr.bf16.mxu0 %v6477_v10  ;;  %v1547_v13 = vrot.slane %v1542_v3, 4  ;;  %v2260_v36 = vsel %vm1049_vm5, %v7765_v12, %v2259_v49  ;;  %v6933_v20 = vld [vmem:[#allocation10 + $0x4] ss:$12 sps:$4 sm:$0xff]   ;;  %v9485_v52 = vrot.slane %v7777_v16, 4 }
 0x346   : > { %v1584_v55 = vsel %vm9481_vm10, %v1574_v15, %v1583_v46  ;;  %v1544_v1 = vpop.permute.xlu0 %1543  ;;  %2856 = vmatpush1.bf16.msra.mxu0 %v6476_v4  ;;  %vm9484_vm10 = vmmov %vm9482_vm9  ;;  %v2313_v15 = vld [vmem:[#allocation10 + $0xc] sm:$0xff]  ;;  %v1994_v4 = vrot.slane %v7790_v21, 4  ;;  %v1993_v46 = vrot.slane %v7792_v22, 4  ;;  %vm9486_vm9 = vcmask 605184  }
 0x347   : > { %v1548_v60 = vrot.slane %v1544_v1, 4  ;;  %1560 = vst.msk [vmem:[#allocation10 + $0x2c] sm:$0xf] %vm658_vm0, %v1544_v1  ;;  %v6474_v18 = vcombine.high %v1582_v32, %v1584_v55  ;;  %v6473_v0 = vcombine.low %v1582_v32, %v1584_v55  ;;  %v2225_v10 = vsel %vm670_vm2, %v2221_v57, %v9485_v52  ;;  %v2311_v1 = vld [vmem:[#allocation10] sm:$0xff] }
 0x348   : > { %v2252_v35 = vpop.permute.xlu1 %2251  ;;  %v6467_v16 = vcombine.low %v2311_v1, %v2313_v15 }
 0x349   : > { %v1551_v38 = vsel %vm670_vm2, %v1547_v13, %v1548_v60  ;;  %2857 = vmatprep.subr.bf16.mxu0 %v6474_v18  ;;  %v2257_v31 = vrot.slane %v2252_v35, 4  ;;  %v2226_v18 = vsel %vm1031_vm8, %v7779_v17, %v2225_v10 }
 0x34a   : > { %v1552_v2 = vsel %vm9484_vm10, %v1542_v3, %v1551_v38  ;;  %v2254_v14 = vpop.permute.xlu0 %2253  ;;  %2858 = vmatpush1.bf16.msra.mxu0 %v6473_v0  ;;  %v1997_v0 = vsel %vm670_vm2, %v1993_v46, %v1994_v4  ;;  %v2187_v38 = vrot.slane %v7801_v26, 4  ;;  %vm9488_vm10 = vmmov %vm9486_vm9 }
 0x34b   : > { %v2258_v6 = vrot.slane %v2254_v14, 4  ;;  %v6471_v58 = vcombine.high %v1550_v7, %v1552_v2  ;;  %v6470_v63 = vcombine.low %v1550_v7, %v1552_v2  ;;  %v1998_v17 = vsel %vm9486_vm9, %v7792_v22, %v1997_v0 }
 0x34c   : > { %v2218_v8 = vpop.permute.xlu1 %2217  ;;  %vm9489_vm9 = vcmask 719872   ;;  %v1929_v0 = vrot.slane %v7836_v42, 4 }
 0x34d   : > { %v2264_v9 = vsel %vm1049_vm5, %v2254_v14, %v2258_v6  ;;  %v2262_v11 = vsel %vm670_vm2, %v2257_v31, %v2258_v6  ;;  %2859 = vmatprep.subr.bf16.mxu0 %v6471_v58  ;;  %v2223_v55 = vrot.slane %v2218_v8, 4  ;;  %v9487_v31 = vrot.slane %v7799_v24, 4 }
 0x34e   : > { %2272 = vst.msk [vmem:[#allocation10 + $0x23c] sm:$0xf] %vm658_vm0, %v2264_v9  ;;  %v2263_v32 = vsel %vm1049_vm5, %v2252_v35, %v2262_v11  ;;  %v2220_v12 = vpop.permute.xlu0 %2219  ;;  %2860 = vmatpush1.bf16.msra.mxu0 %v6470_v63  ;;  %v1962_v63 = vrot.slane %v7812_v29, 4 }
 0x34f   : > { %v2224_v61 = vrot.slane %v2220_v12, 4  ;;  %2861 = vmatprep.subr.bf16.mxu0 %v6933_v20  ;;  %v6537_v3 = vcombine.high %v2260_v36, %v2263_v32  ;;  %v6536_v60 = vcombine.low %v2260_v36, %v2263_v32  ;;  %v2191_v58 = vsel %vm670_vm2, %v2187_v38, %v9487_v31 }
 0x350   : > { %v1990_v49 = vpop.permute.xlu1 %1989  ;;  %v1961_v36 = vrot.slane %v7814_v30, 4  ;;  %v2192_v24 = vsel %vm1013_vm4, %v7801_v26, %v2191_v58  ;;  %v2153_v32 = vrot.slane %v7823_v37, 4 }
 0x351   : > { %v2230_v13 = vsel %vm1031_vm8, %v2220_v12, %v2224_v61  ;;  %v2228_v21 = vsel %vm670_vm2, %v2223_v55, %v2224_v61  ;;  %2890 = vmatprep.subr.bf16.mxu1 %v6537_v3  ;;  %v1995_v2 = vrot.slane %v1990_v49, 4 }
 0x352   : > { %2238 = vst.msk [vmem:[#allocation10 + $0x224] sm:$0xf] %vm658_vm0, %v2230_v13  ;;  %v2229_v7 = vsel %vm1031_vm8, %v2218_v8, %v2228_v21  ;;  %v1992_v54 = vpop.permute.xlu0 %1991  ;;  %2891 = vmatpush1.bf16.msra.mxu1 %v6536_v60  ;;  %2862 = vmatpush1.bf16.msra.mxu0 %v6467_v16  ;;  %v1965_v29 = vsel %vm670_vm2, %v1961_v36, %v1962_v63  ;;  %v9490_v13 = vrot.slane %v7821_v34, 4 }
 0x353   : > { %v1996_v57 = vrot.slane %v1992_v54, 4  ;;  %2008 = vst.msk [vmem:[#allocation10 + $0x17c] sm:$0xf] %vm658_vm0, %v1992_v54  ;;  %v6534_v14 = vcombine.high %v2226_v18, %v2229_v7  ;;  %v6533_v35 = vcombine.low %v2226_v18, %v2229_v7  ;;  %v1966_v26 = vsel %vm9489_vm9, %v7814_v30, %v1965_v29 }
 0x354   : > { %v2184_v15 = vpop.permute.xlu1 %2183  ;;  %v2157_v21 = vsel %vm670_vm2, %v2153_v32, %v9490_v13  ;;  %v1930_v18 = vrot.slane %v7834_v41, 4 }
 0x355   : > { %v1999_v6 = vsel %vm670_vm2, %v1995_v2, %v1996_v57  ;;  %2892 = vmatprep.subr.bf16.mxu1 %v6534_v14  ;;  %v2189_v52 = vrot.slane %v2184_v15, 4  ;;  %v2158_v14 = vsel %vm9403_vm6, %v7823_v37, %v2157_v21 }
 0x356   : > { %v2000_v9 = vsel %vm9488_vm10, %v1990_v49, %v1999_v6  ;;  %v2186_v11 = vpop.permute.xlu0 %2185  ;;  %2893 = vmatpush1.bf16.msra.mxu1 %v6533_v35  ;;  %vm9491_vm10 = vmmov %vm9489_vm9  ;;  %v1933_v41 = vsel %vm670_vm2, %v1929_v0, %v1930_v18  ;;  %v2121_v6 = vrot.slane %v7845_v45, 4  ;;  %vm9492_vm9 = vcmask 728064  }
 0x357   : > { %v2190_v20 = vrot.slane %v2186_v11, 4  ;;  %v6513_v10 = vcombine.high %v1998_v17, %v2000_v9  ;;  %v6512_v22 = vcombine.low %v1998_v17, %v2000_v9  ;;  %v2122_v17 = vrot.slane %v7843_v44, 4 }
 0x358   : > { %v1958_v61 = vpop.permute.xlu1 %1957  ;;  %v1866_v0 = vrot.slane %v7870_v53, 4 }
 0x359   : > { %v2196_v4 = vsel %vm1013_vm4, %v2186_v11, %v2190_v20  ;;  %v2194_v46 = vsel %vm670_vm2, %v2189_v52, %v2190_v20  ;;  %2863 = vmatprep.subr.bf16.mxu0 %v6513_v10  ;;  %v1963_v1 = vrot.slane %v1958_v61, 4  ;;  %v2125_v20 = vsel %vm670_vm2, %v2121_v6, %v2122_v17 }
 0x35a   : > { %2204 = vst.msk [vmem:[#allocation10 + $0x20c] sm:$0xf] %vm658_vm0, %v2196_v4  ;;  %v2195_v12 = vsel %vm1013_vm4, %v2184_v15, %v2194_v46  ;;  %v1960_v8 = vpop.permute.xlu0 %1959  ;;  %2864 = vmatpush2.bf16.msra.mxu0 %v6512_v22  ;;  %v1934_v15 = vsel %vm9492_vm9, %v7836_v42, %v1933_v41  ;;  %v1898_v52 = vrot.slane %v7852_v47, 4  ;;  %v1897_v10 = vrot.slane %v7854_v48, 4 }
 0x35b   : > { %v1964_v55 = vrot.slane %v1960_v8, 4  ;;  %1976 = vst.msk [vmem:[#allocation10 + $0x164] sm:$0xf] %vm658_vm0, %v1960_v8  ;;  %v6531_v3 = vcombine.high %v2192_v24, %v2195_v12  ;;  %v6530_v60 = vcombine.low %v2192_v24, %v2195_v12  ;;  %v2057_v41 = vrot.slane %v7882_v5, 4 }
 0x35c   : > { %v2150_v54 = vpop.permute.xlu1 %2149  ;;  %v1901_v47 = vsel %vm670_vm2, %v1897_v10, %v1898_v52 }
 0x35d   : > { %v1967_v16 = vsel %vm670_vm2, %v1963_v1, %v1964_v55  ;;  %2894 = vmatprep.subr.bf16.mxu1 %v6531_v3  ;;  %v2155_v57 = vrot.slane %v2150_v54, 4  ;;  %v2089_v55 = vrot.slane %v7863_v51, 4 }
 0x35e   : > { %v1968_v38 = vsel %vm9491_vm10, %v1958_v61, %v1967_v16  ;;  %v2152_v7 = vpop.permute.xlu0 %2151  ;;  %2895 = vmatpush1.bf16.msra.mxu1 %v6530_v60  ;;  %vm9493_vm10 = vmmov %vm9492_vm9  ;;  %vm9494_vm9 = vcmask 572416   ;;  %v2090_v61 = vrot.slane %v7861_v50, 4 }
 0x35f   : > { %v2156_v49 = vrot.slane %v2152_v7, 4  ;;  %v6510_v2 = vcombine.high %v1966_v26, %v1968_v38  ;;  %v6509_v30 = vcombine.low %v1966_v26, %v1968_v38  ;;  %v2126_v12 = vsel %vm9494_vm9, %v7845_v45, %v2125_v20 }
 0x360   : > { %v1926_v63 = vpop.permute.xlu1 %1925  ;;  %v2093_v50 = vsel %vm670_vm2, %v2089_v55, %v2090_v61  ;;  %v1865_v38 = vrot.slane %v7872_v56, 4 }
 0x361   : > { %v2162_v34 = vsel %vm9403_vm6, %v2152_v7, %v2156_v49  ;;  %v2160_v35 = vsel %vm670_vm2, %v2155_v57, %v2156_v49  ;;  %2865 = vmatprep.subr.bf16.mxu0 %v6510_v2  ;;  %v1931_v37 = vrot.slane %v1926_v63, 4 }
 0x362   : > { %2170 = vst.msk [vmem:[#allocation10 + $0x1f4] sm:$0xf] %vm658_vm0, %v2162_v34  ;;  %v2161_v31 = vsel %vm9403_vm6, %v2150_v54, %v2160_v35  ;;  %v1928_v58 = vpop.permute.xlu0 %1927  ;;  %2866 = vmatpush2.bf16.msra.mxu0 %v6509_v30  ;;  %v1869_v53 = vsel %vm670_vm2, %v1865_v38, %v1866_v0  ;;  %v2058_v35 = vrot.slane %v7880_v59, 4  ;;  %vm9508_vm6 = vcmask 867328  }
 0x363   : > { %v1932_v36 = vrot.slane %v1928_v58, 4  ;;  %1944 = vst.msk [vmem:[#allocation10 + $0x14c] sm:$0xf] %vm658_vm0, %v1928_v58  ;;  %v6528_v9 = vcombine.high %v2158_v14, %v2161_v31  ;;  %v6527_v11 = vcombine.low %v2158_v14, %v2161_v31 }
 0x364   : > { %v2118_v46 = vpop.permute.xlu1 %2117  ;;  %v2061_v59 = vsel %vm670_vm2, %v2057_v41, %v2058_v35  ;;  %v1770_v41 = vrot.slane %v7938_v62, 4 }
 0x365   : > { %v1935_v44 = vsel %vm670_vm2, %v1931_v37, %v1932_v36  ;;  %2896 = vmatprep.subr.bf16.mxu1 %v6528_v9  ;;  %v2123_v29 = vrot.slane %v2118_v46, 4 }
 0x366   : > { %v1936_v22 = vsel %vm9493_vm10, %v1926_v63, %v1935_v44  ;;  %v2120_v4 = vpop.permute.xlu0 %2119  ;;  %2897 = vmatpush1.bf16.msra.mxu1 %v6527_v11  ;;  %vm9495_vm10 = vmmov %vm9494_vm9  ;;  %vm9496_vm9 = vcmask 736256   ;;  %v1834_v11 = vrot.slane %v7907_v23, 4 }
 0x367   : > { %v2124_v24 = vrot.slane %v2120_v4, 4  ;;  %2136 = vst.msk [vmem:[#allocation10 + $0x1dc] sm:$0xf] %vm658_vm0, %v2120_v4  ;;  %v6507_v32 = vcombine.high %v1934_v15, %v1936_v22  ;;  %v6506_v42 = vcombine.low %v1934_v15, %v1936_v22  ;;  %v1902_v21 = vsel %vm9496_vm9, %v7854_v48, %v1901_v47 }
 0x368   : > { %v1894_v60 = vpop.permute.xlu1 %1893  ;;  %v1833_v15 = vrot.slane %v7909_v27, 4 }
 0x369   : > { %v2127_v8 = vsel %vm670_vm2, %v2123_v29, %v2124_v24  ;;  %2867 = vmatprep.subr.bf16.mxu0 %v6507_v32  ;;  %v1899_v16 = vrot.slane %v1894_v60, 4  ;;  %v2026_v29 = vrot.slane %v7914_v25, 4  ;;  %v2025_v32 = vrot.slane %v7916_v28, 4 }
 0x36a   : > { %v2128_v1 = vsel %vm9495_vm10, %v2118_v46, %v2127_v8  ;;  %v1896_v3 = vpop.permute.xlu0 %1895  ;;  %2868 = vmatpush2.bf16.msra.mxu0 %v6506_v42  ;;  %vm9497_vm10 = vmmov %vm9496_vm9  ;;  %vm9498_vm9 = vcmask 580608   ;;  %v1837_v23 = vsel %vm670_vm2, %v1833_v15, %v1834_v11 }
 0x36b   : > { %v1900_v26 = vrot.slane %v1896_v3, 4  ;;  %1912 = vst.msk [vmem:[#allocation10 + $0x134] sm:$0xf] %vm658_vm0, %v1896_v3  ;;  %v6525_v13 = vcombine.high %v2126_v12, %v2128_v1  ;;  %v6524_v45 = vcombine.low %v2126_v12, %v2128_v1  ;;  %v2094_v14 = vsel %vm9498_vm9, %v7863_v51, %v2093_v50 }
 0x36c   : > { %v2086_v49 = vpop.permute.xlu1 %2085  ;;  %v2029_v25 = vsel %vm670_vm2, %v2025_v32, %v2026_v29  ;;  %v6939_v29 = vld [vmem:[#allocation10 + $0xb0] ss:$12 sps:$4 sm:$0xff]   ;;  %v6940_v32 = vld [vmem:[#allocation10 + $0x158] ss:$12 sps:$4 sm:$0xff]  }
 0x36d   : > { %v1903_v18 = vsel %vm670_vm2, %v1899_v16, %v1900_v26  ;;  %2898 = vmatprep.subr.bf16.mxu1 %v6525_v13  ;;  %v2091_v2 = vrot.slane %v2086_v49, 4  ;;  %v1801_v26 = vrot.slane %v7922_v39, 4 }
 0x36e   : > { %v1904_v7 = vsel %vm9497_vm10, %v1894_v60, %v1903_v18  ;;  %v2088_v54 = vpop.permute.xlu0 %2087  ;;  %2899 = vmatpush1.bf16.msra.mxu1 %v6524_v45  ;;  %vm9499_vm10 = vmmov %vm9498_vm9  ;;  %vm9500_vm9 = vcmask 744448   ;;  %v1802_v60 = vrot.slane %v7920_v33, 4 }
 0x36f   : > { %v2092_v57 = vrot.slane %v2088_v54, 4  ;;  %2104 = vst.msk [vmem:[#allocation10 + $0x1c4] sm:$0xf] %vm658_vm0, %v2088_v54  ;;  %v6504_v30 = vcombine.high %v1902_v21, %v1904_v7  ;;  %v6503_v48 = vcombine.low %v1902_v21, %v1904_v7  ;;  %v1870_v37 = vsel %vm9500_vm9, %v7872_v56, %v1869_v53 }
 0x370   : > { %v1862_v31 = vpop.permute.xlu1 %1861  ;;  %v1805_v33 = vsel %vm670_vm2, %v1801_v26, %v1802_v60  ;;  %v2289_v7 = vrot.slane %v7928_v43, 4  ;;  %v9509_v53 = vrot.slane %v7926_v40, 4  ;;  %v6951_v60 = vld [vmem:[#allocation10 + $0x200] ss:$12 sps:$4 sm:$0xff]  }
 0x371   : > { %v2095_v34 = vsel %vm670_vm2, %v2091_v2, %v2092_v57  ;;  %2869 = vmatprep.subr.bf16.mxu0 %v6504_v30  ;;  %v1867_v63 = vrot.slane %v1862_v31, 4 }
 0x372   : > { %v2096_v17 = vsel %vm9499_vm10, %v2086_v49, %v2095_v34  ;;  %v1864_v6 = vpop.permute.xlu0 %1863  ;;  %2870 = vmatpush2.bf16.msra.mxu0 %v6503_v48  ;;  %vm9501_vm10 = vmmov %vm9500_vm9  ;;  %vm9502_vm9 = vcmask 588800   ;;  %v1806_v34 = vsel %vm9508_vm6, %v7922_v39, %v1805_v33  ;;  %v2293_v35 = vsel %vm670_vm2, %v2289_v7, %v9509_v53  ;;  %v6962_v33 = vld [vmem:[#allocation10 + $0x8] ss:$12 sps:$4 sm:$0xff]  }
 0x373   : > { %v1868_v58 = vrot.slane %v1864_v6, 4  ;;  %1880 = vst.msk [vmem:[#allocation10 + $0x11c] sm:$0xf] %vm658_vm0, %v1864_v6  ;;  %v6522_v36 = vcombine.high %v2094_v14, %v2096_v17  ;;  %v6521_v51 = vcombine.low %v2094_v14, %v2096_v17  ;;  %v2062_v46 = vsel %vm9502_vm9, %v7882_v5, %v2061_v59  ;;  %v9516_v53 = vld [vmem:[#allocation24_spill] sm:$0xff] }
 0x374   : > { %v2054_v52 = vpop.permute.xlu1 %2053  ;;  %v1769_v17 = vrot.slane %v7940_v19, 4  ;;  %v2294_v40 = vsel %vm1067_vm7, %v7928_v43, %v2293_v35  ;;  %v8144_v43 = vld [vmem:[%s9473_s16 + $0x8] ss:$16 sps:$4 sm:$0xff]  }
 0x375   : > { %v1871_v9 = vsel %vm670_vm2, %v1867_v63, %v1868_v58  ;;  %2900 = vmatprep.subr.bf16.mxu1 %v6522_v36  ;;  %v2059_v22 = vrot.slane %v2054_v52, 4 }
 0x376   : > { %v1872_v44 = vsel %vm9501_vm10, %v1862_v31, %v1871_v9  ;;  %v2056_v20 = vpop.permute.xlu0 %2055  ;;  %2901 = vmatpush1.bf16.msra.mxu1 %v6521_v51  ;;  %vm9503_vm10 = vmmov %vm9502_vm9  ;;  %vm9504_vm9 = vcmask 752640   ;;  %v1773_v62 = vsel %vm670_vm2, %v1769_v17, %v1770_v41  ;;  %v9517_v17 = vld [vmem:[#allocation25_spill] sm:$0xff] }
 0x377   : > { %v2060_v10 = vrot.slane %v2056_v20, 4  ;;  %2072 = vst.msk [vmem:[#allocation10 + $0x1ac] sm:$0xf] %vm658_vm0, %v2056_v20  ;;  %v6501_v4 = vcombine.high %v1870_v37, %v1872_v44  ;;  %v6500_v56 = vcombine.low %v1870_v37, %v1872_v44  ;;  %v1838_v1 = vsel %vm9504_vm9, %v7909_v27, %v1837_v23 }
 0x378   : > { %v1830_v8 = vpop.permute.xlu1 %1829 }
 0x379   : > { %v2063_v24 = vsel %vm670_vm2, %v2059_v22, %v2060_v10  ;;  %2871 = vmatprep.subr.bf16.mxu0 %v6501_v4  ;;  %v1835_v61 = vrot.slane %v1830_v8, 4  ;;  %v6935_v4 = vld [vmem:[#allocation10 + $0x170] ss:$12 sps:$4 sm:$0xff]  }
 0x37a   : > { %v2064_v42 = vsel %vm9503_vm10, %v2054_v52, %v2063_v24  ;;  %v1832_v12 = vpop.permute.xlu0 %1831  ;;  %2872 = vmatpush2.bf16.msra.mxu0 %v6500_v56  ;;  %vm9505_vm10 = vmmov %vm9504_vm9  ;;  %vm9506_vm9 = vcmask 596992   ;;  %v6952_v26 = vld [vmem:[#allocation10 + $0x110] ss:$12 sps:$4 sm:$0xff]  }
 0x37b   : > { %v1836_v47 = vrot.slane %v1832_v12, 4  ;;  %1848 = vst.msk [vmem:[#allocation10 + $0x104] sm:$0xf] %vm658_vm0, %v1832_v12  ;;  %v6519_v55 = vcombine.high %v2062_v46, %v2064_v42  ;;  %v6518_v5 = vcombine.low %v2062_v46, %v2064_v42  ;;  %v2030_v38 = vsel %vm9506_vm9, %v7916_v28, %v2029_v25  ;;  %v6941_v42 = vld [vmem:[%s9473_s16] ss:$16 sps:$4 sm:$0xff]  }
 0x37c   : > { %v2022_v45 = vpop.permute.xlu1 %2021  ;;  %v9513_v12 = vmov 0   ;;  %v6950_v25 = vld [vmem:[#allocation10 + $0x68] ss:$12 sps:$4 sm:$0xff]  }
 0x37d   : > { %v1839_v3 = vsel %vm670_vm2, %v1835_v61, %v1836_v47  ;;  %2902 = vmatprep.subr.bf16.mxu1 %v6519_v55  ;;  %v2027_v18 = vrot.slane %v2022_v45, 4  ;;  %v9514_v47 = vld [vmem:[#allocation28_spill] sm:$0xff] }
 0x37e   : > { %v1840_v16 = vsel %vm9505_vm10, %v1830_v8, %v1839_v3  ;;  %v2024_v13 = vpop.permute.xlu0 %2023  ;;  %2903 = vmatpush1.bf16.msra.mxu1 %v6518_v5  ;;  %vm9507_vm10 = vmmov %vm9506_vm9  ;;  %v6945_v8 = vld [vmem:[#allocation10 + $0x230] ss:$12 sps:$4 sm:$0xff]   ;;  %v6946_v61 = vld [vmem:[#allocation10 + $0x140] ss:$12 sps:$4 sm:$0xff]  }
 0x37f   : > { %v2028_v21 = vrot.slane %v2024_v13, 4  ;;  %2040 = vst.msk [vmem:[#allocation10 + $0x194] sm:$0xf] %vm658_vm0, %v2024_v13  ;;  %v6498_v50 = vcombine.high %v1838_v1, %v1840_v16  ;;  %v6497_v27 = vcombine.low %v1838_v1, %v1840_v16  ;;  %vm9510_vm9 = vmmov %vm9508_vm6  ;;  %vm9511_vm6 = vcmask 875520   ;;  %v6947_v55 = vld [vmem:[#allocation10 + $0x80] ss:$12 sps:$4 sm:$0xff]  }
 0x380   : > { %v1798_v57 = vpop.permute.xlu1 %1797  ;;  %v1774_v56 = vsel %vm9511_vm6, %v7940_v19, %v1773_v62  ;;  %v6944_v19 = vld [vmem:[#allocation10 + $0x98] ss:$12 sps:$4 sm:$0xff]   ;;  %v6949_v3 = vld [vmem:[#allocation10 + $0x128] ss:$12 sps:$4 sm:$0xff]   ;;  %v6953_v16 = vld [vmem:[#allocation10 + $0x50] ss:$12 sps:$4 sm:$0xff]  }
 0x381   : > { %v2031_v0 = vsel %vm670_vm2, %v2027_v18, %v2028_v21  ;;  %2873 = vmatprep.subr.bf16.mxu0 %v6498_v50  ;;  %v1803_v30 = vrot.slane %v1798_v57, 4  ;;  %v6948_v5 = vld [vmem:[#allocation10 + $0x218] ss:$12 sps:$4 sm:$0xff]   ;;  %v6954_v13 = vld [vmem:[#allocation10 + $0x1e8] ss:$12 sps:$4 sm:$0xff]  }
 0x382   : > { %v2032_v54 = vsel %vm9507_vm10, %v2022_v45, %v2031_v0  ;;  %v1800_v49 = vpop.permute.xlu0 %1799  ;;  %2874 = vmatpush2.bf16.msra.mxu0 %v6497_v27  ;;  %vm9512_vm10 = vmmov %vm9511_vm6  ;;  %v9515_v1 = vld [vmem:[#allocation27_spill] sm:$0xff] }
 0x383   : > { %v1804_v2 = vrot.slane %v1800_v49, 4  ;;  %1816 = vst.msk [vmem:[#allocation10 + $0xec] sm:$0xf] %vm658_vm0, %v1800_v49  ;;  %v6516_v48 = vcombine.high %v2030_v38, %v2032_v54  ;;  %v6515_v14 = vcombine.low %v2030_v38, %v2032_v54  ;;  %v6955_v45 = vld [vmem:[#allocation10 + $0xf8] ss:$12 sps:$4 sm:$0xff]  }
 0x384   : > { %v2286_v58 = vpop.permute.xlu1 %2285  ;;  %v6956_v21 = vld [vmem:[#allocation10 + $0x38] ss:$12 sps:$4 sm:$0xff]   ;;  %v6957_v18 = vld [vmem:[#allocation10 + $0x1d0] ss:$12 sps:$4 sm:$0xff]   ;;  %v6959_v27 = vld [vmem:[#allocation10 + $0x20] ss:$12 sps:$4 sm:$0xff]  }
 0x385   : > { %v1807_v28 = vsel %vm670_vm2, %v1803_v30, %v1804_v2  ;;  %2904 = vmatprep.subr.bf16.mxu1 %v6516_v48  ;;  %v2291_v36 = vrot.slane %v2286_v58, 4  ;;  %v6960_v0 = vld [vmem:[#allocation10 + $0x1b8] ss:$12 sps:$4 sm:$0xff]   ;;  %v6963_v7 = vld [vmem:[#allocation10 + $0x1a0] ss:$12 sps:$4 sm:$0xff]  }
 0x386   : > { %v1808_v6 = vsel %vm9510_vm9, %v1798_v57, %v1807_v28  ;;  %v2288_v31 = vpop.permute.xlu0 %2287  ;;  %2905 = vmatpush1.bf16.msra.mxu1 %v6515_v14  ;;  %v6964_v54 = vld [vmem:[#allocation10 + $0x188] ss:$12 sps:$4 sm:$0xff]   ;;  %v3021_v57 = vld [vmem:[%s9279_s11] sm:$0x7] }
 0x387   : > { %v2292_v63 = vrot.slane %v2288_v31, 4  ;;  %v6495_v51 = vcombine.high %v1806_v34, %v1808_v6  ;;  %v6494_v39 = vcombine.low %v1806_v34, %v1808_v6  ;;  %vm3022_vm9 = vcmp.ne.f32.partialorder %v3021_v57, 0.0 }
 0x388   : > { %v1766_v15 = vpop.permute.xlu1 %1765  ;;  %v3023_v48 = vsel %vm3022_vm9, 1, %v9513_v12 }
 0x389   : > { %v2298_v37 = vsel %vm1067_vm7, %v2288_v31, %v2292_v63  ;;  %v2296_v9 = vsel %vm670_vm2, %v2291_v36, %v2292_v63  ;;  %2875 = vmatprep.subr.bf16.mxu0 %v6495_v51  ;;  %v1771_v20 = vrot.slane %v1766_v15, 4  ;;  %v3027_v35 = vrot.slane %v3023_v48, %v9516_v53 }
 0x38a   : > { %2306 = vst.msk [vmem:[#allocation10 + $0x254] sm:$0xf] %vm658_vm0, %v2298_v37  ;;  %v2297_v59 = vsel %vm1067_vm7, %v2286_v58, %v2296_v9  ;;  %v1768_v11 = vpop.permute.xlu0 %1767  ;;  %2876 = vmatpush2.bf16.msra.mxu0 %v6494_v39  ;;  %v6958_v50 = vld [vmem:[#allocation10 + $0xe0] ss:$12 sps:$4 sm:$0xff]   ;;  %v3031_v6 = vrot.slane %v3023_v48, %v9517_v17 }
 0x38b   : > { %v1772_v44 = vrot.slane %v1768_v11, 4  ;;  %1784 = vst.msk [vmem:[#allocation10 + $0xd4] sm:$0xf] %vm658_vm0, %v1768_v11  ;;  %v6540_v52 = vcombine.high %v2294_v40, %v2297_v59  ;;  %v6539_v10 = vcombine.low %v2294_v40, %v2297_v59  ;;  %vm3036_vm6 = vcmp.eq.s32.totalorder %v3027_v35, 1 }
 0x38d   : > { %v1775_v22 = vsel %vm670_vm2, %v1771_v20, %v1772_v44  ;;  %2920 = vmatprep.subr.bf16.mxu1 %v6540_v52 }
 0x38e   : > { %v1776_v46 = vsel %vm9512_vm10, %v1766_v15, %v1775_v22  ;;  %2921 = vmatpush2.bf16.msra.mxu1 %v6539_v10  ;;  %vm3037_vm10 = vcmp.eq.s32.totalorder %v3031_v6, 1 }
 0x38f   : > { %6755 = vmatprep.subr.bf16.mxu1 %v6935_v4  ;;  %v6492_v24 = vcombine.high %v1774_v56, %v1776_v46  ;;  %v6491_v23 = vcombine.low %v1774_v56, %v1776_v46 }
 0x391   : > { %2877 = vmatprep.subr.bf16.mxu0 %v6492_v24  ;;  %2923 = vmatmul.mubr.bf16.vlgmr.msra.gmra.mxu1 %v8144_v43  ;;  %v6965_v49 = vld [vmem:[#allocation10 + $0x248] ss:$12 sps:$4 sm:$0xff]  }
 0x392   : > { %2878 = vmatpush2.bf16.msra.mxu0 %v6491_v23  ;;  %6756 = vmatpush3.bf16.msra.mxu1 %v6939_v29  ;;  %v6961_v38 = vld [vmem:[#allocation10 + $0xc8] ss:$12 sps:$4 sm:$0xff]  }
 0x393   : > { %6757 = vmatprep.subr.bf16.mxu1 %v6940_v32  ;;  %2974 = vmatprep.subr.bf16.mxu0 %v9513_v12 }
 0x394   : > { %2965 = vmatprep.mubr.bf16.mxu1 %v9514_v47 }
 0x395   : > { %2880 = vmatmul.mubr.bf16.vlgmr.msra.gmra.mxu0 %v6941_v42  ;;  %v2417_v30 = vpop.permute.xlu1 %2416 }
 0x396   : > { %6758 = vmatpush3.bf16.msra.mxu1 %v6944_v19  ;;  %2975 = vmatpush1.bf16.msra.mxu0 %v6945_v8  ;;  %v9519_v19 = vld [vmem:[#allocation23_spill] sm:$0xff] }
 0x397   : > { %6759 = vmatprep.subr.bf16.mxu1 %v6946_v61  ;;  %2976 = vmatprep.subr.bf16.mxu0 %v9513_v12  ;;  %v2422_v31 = vpop.permute.xlu0 %2421  ;;  %v9520_v8 = vsub.s32 2, %v9519_v19 }
 0x398   : > { %6543 = vmatprep.mubr.msk.bf16.mxu0 %vm2843_vm3, %v9515_v1 }
 0x399   : > { %v3035_v47 = vrot.slane %v3023_v48, %v9520_v8 }
 0x39a   : > { %6760 = vmatpush3.bf16.msra.mxu1 %v6947_v55  ;;  %2977 = vmatpush1.bf16.msra.mxu0 %v6948_v5 }
 0x39b   : > { %6761 = vmatprep.subr.bf16.mxu1 %v6949_v3  ;;  %2978 = vmatprep.subr.bf16.mxu0 %v9513_v12  ;;  %vm3038_vm9 = vcmp.eq.s32.totalorder %v3035_v47, 1 }
 0x39e   : > { %6762 = vmatpush3.bf16.msra.mxu1 %v6950_v25  ;;  %2979 = vmatpush1.bf16.msra.mxu0 %v6951_v60 }
 0x39f   : > { %6763 = vmatprep.subr.bf16.mxu1 %v6952_v26  ;;  %2980 = vmatprep.subr.bf16.mxu0 %v9513_v12 }
 0x3a2   : > { %6764 = vmatpush3.bf16.msra.mxu1 %v6953_v16  ;;  %2981 = vmatpush1.bf16.msra.mxu0 %v6954_v13 }
 0x3a3   : > { %6765 = vmatprep.subr.bf16.mxu1 %v6955_v45  ;;  %2982 = vmatprep.subr.bf16.mxu0 %v9513_v12 }
 0x3a6   : > { %6766 = vmatpush3.bf16.msra.mxu1 %v6956_v21  ;;  %2983 = vmatpush1.bf16.msra.mxu0 %v6957_v18 }
 0x3a7   : > { %6767 = vmatprep.subr.bf16.mxu1 %v6958_v50  ;;  %2984 = vmatprep.subr.bf16.mxu0 %v9513_v12 }
 0x3aa   : > { %6768 = vmatpush3.bf16.msra.mxu1 %v6959_v27  ;;  %2985 = vmatpush1.bf16.msra.mxu0 %v6960_v0 }
 0x3ab   : > { %6769 = vmatprep.subr.bf16.mxu1 %v6961_v38  ;;  %2986 = vmatprep.subr.bf16.mxu0 %v9513_v12 }
 0x3ae   : > { %6770 = vmatpush3.bf16.msra.mxu1 %v6962_v33  ;;  %2987 = vmatpush1.bf16.msra.mxu0 %v6963_v7 }
 0x3af   : > { %2988 = vmatprep.subr.bf16.mxu0 %v9513_v12 }
 0x3b1   : > { %2966 = vmatmul.mubr.bf16.vlgmr.msra.gmra.mxu1 %v6941_v42 }
 0x3b2   : > { %2989 = vmatpush1.bf16.msra.mxu0 %v6964_v54 }
 0x3b3   : > { %3004 = vmatprep.subr.bf16.mxu0 %v9513_v12 }
 0x3b6   : > { %3005 = vmatpush2.bf16.msra.mxu0 %v6965_v49 }
 0x3b9   : > { %3007 = vmatmul.mubr.bf16.vlgmr.msra.gmra.mxu0 %v8144_v43 }
 0x451   : > { %v2924_v2 = vpop.f32.mrf.mxu1 }
 0x453   : > { %v2926_v14 = vpop.f32.mrf.mxu1 }
 0x455   : > { %v2881_v34 = vpop.f32.mrf.mxu0  ;;  %v2928_v36 = vpop.f32.mrf.mxu1 }
 0x456   : > { %v2882_v28 = vadd.f32 %v2881_v34, %v2417_v30 }
 0x457   : > { %v2883_v41 = vpop.f32.mrf.mxu0  ;;  %v2930_v15 = vpop.f32.mrf.mxu1 }
 0x458   : > { %v2925_v58 = vadd.f32 %v2924_v2, %v2882_v28  ;;  %v2884_v63 = vadd.f32 %v2883_v41, %v2417_v30 }
 0x459   : > { %v2885_v51 = vpop.f32.mrf.mxu0 }
 0x45a   : > { %v3015_v39 = vmax.f32 %v2925_v58, 0.0  ;;  %v2927_v37 = vadd.f32 %v2926_v14, %v2884_v63  ;;  %v2886_v9 = vadd.f32 %v2885_v51, %v2422_v31 }
 0x45b   : > { %v2887_v40 = vpop.f32.mrf.mxu0 }
 0x45c   : > { %v3016_v62 = vmax.f32 %v2927_v37, 0.0  ;;  %v2929_v59 = vadd.f32 %v2928_v36, %v2886_v9  ;;  %v2888_v11 = vadd.f32 %v2887_v40, %v2422_v31  ;;  %v3039_v44 = vsel %vm3036_vm6, %v3015_v39, 0.0 }
 0x45e   : > { %v3040_v20 = vsel %vm3037_vm10, %v3016_v62, 0.0  ;;  %v3018_v52 = vmax.f32 %v2929_v59, 0.0  ;;  %v2931_v10 = vadd.f32 %v2930_v15, %v2888_v11 }
 0x45f   : > { %v6739_v22 = vpack.c.bf16 %v3040_v20, %v3039_v44 }
 0x460   : > { %v3019_v4 = vmax.f32 %v2931_v10, 0.0  ;;  %v3042_v43 = vsel %vm3036_vm6, %v3018_v52, 0.0  ;;  %vm9527_vm6 = vcmask 1039360  }
 0x461   : > { %3063 = vrot.lane.b32.xlu1 %v6739_v22, %s9518_s12 }
 0x462   : > { %v3043_v56 = vsel %vm3037_vm10, %v3019_v4, 0.0  ;;  %vm9528_vm10 = vcmask 605184  }
 0x463   : > { %v6741_v46 = vpack.c.bf16 %v3043_v56, %v3042_v43 }
 0x465   : > { %3067 = vrot.lane.b32.xlu0 %v6741_v46, %s9518_s12 }
 0x471   : > { %v6771_v24 = vpop.f32.mrf.mxu1 }
 0x473   : > { %v6772_v23 = vpop.f32.mrf.mxu1 }
 0x474   : > { %v6773_v29 = vadd.f32 %v6772_v23, %v6771_v24 }
 0x475   : > { %v6774_v32 = vpop.f32.mrf.mxu1 }
 0x476   : > { %v2968_v55 = vadd.f32 %v6773_v29, %v2417_v30 }
 0x477   : > { %v6775_v42 = vpop.f32.mrf.mxu1 }
 0x478   : > { %v6776_v61 = vadd.f32 %v6775_v42, %v6774_v32 }
 0x479   : > { %v3008_v5 = vpop.f32.mrf.mxu0 }
 0x47a   : > { %v3009_v1 = vadd.f32 %v3008_v5, %v2968_v55  ;;  %v2971_v60 = vadd.f32 %v6776_v61, %v2422_v31 }
 0x47b   : > { %v3010_v3 = vpop.f32.mrf.mxu0 }
 0x47c   : > { %v3017_v25 = vmax.f32 %v3009_v1, 0.0 }
 0x47d   : > { %v3011_v26 = vpop.f32.mrf.mxu0 }
 0x47e   : > { %v3041_v16 = vsel %vm3038_vm9, %v3017_v25, 0.0  ;;  %v3012_v13 = vadd.f32 %v3011_v26, %v2971_v60 }
 0x47f   : > { %v6740_v45 = vpack.c.bf16 %v3041_v16, %v3041_v16  ;;  %v3013_v21 = vpop.f32.mrf.mxu0 }
 0x480   : > { %v3020_v18 = vmax.f32 %v3012_v13, 0.0 }
 0x481   : > { %3065 = vrot.lane.b32.xlu1 %v6740_v45, %s9518_s12 }
 0x482   : > { %v3044_v50 = vsel %vm3038_vm9, %v3020_v18, 0.0  ;;  %vm9529_vm9 = vcmask 719872  }
 0x483   : > { %v6742_v27 = vpack.c.bf16 %v3044_v50, %v3044_v50 }
 0x485   : > { %3069 = vrot.lane.b32.xlu0 %v6742_v27, %s9518_s12  ;;  %s9566_s12 = sld [smem:[#allocation43_spill]] }
 0x4d3   : > { %v3064_v0 = vpop.permute.xlu1 %3063 }
 0x4d4   : > { %v3071_v38 = vrot.slane %v3064_v0, 4 }
 0x4d6   : > { %v3073_v33 = vsel %vm1504_vm15, %v3071_v38, %v3064_v0 }
 0x4d7   : > { %3081 = vst.msk [vmem:[#allocation3] sm:$0xff] %vm7586_vm13, %v3073_v33  ;;  %v3068_v54 = vpop.permute.xlu0 %3067 }
 0x4d8   : > { %v3072_v49 = vrot.slane %v3068_v54, 4 }
 0x4da   : > { %v3075_v57 = vsel %vm1504_vm15, %v3072_v49, %v3068_v54 }
 0x4db   : > { %3083 = vst.msk [vmem:[#allocation3 + $0x10] sm:$0xff] %vm7586_vm13, %v3075_v57  ;;  %vm9524_vm13 = vcmask 1014784  }
 0x4de   : > { %v8184_v2 = vld [vmem:[#allocation3] sm:$0xff] }
 0x4df   : > { %3089 = vst [vmem:[#allocation10] sm:$0xff] %v8184_v2  ;;  %3293 = vrot.lane.b32.xlu1 %v8184_v2, %s9449_s26 }
 0x4e2   : > { %v8189_v30 = vld [vmem:[#allocation3 + $0x10] sm:$0xff] }
 0x4e3   : > { %3091 = vst [vmem:[#allocation10 + $0xc] sm:$0xff] %v8189_v30  ;;  %3261 = vrot.lane.b32.xlu1 %v8184_v2, %s9450_s30 }
 0x4e7   : > { %3229 = vrot.lane.b32.xlu1 %v8184_v2, %s9451_s4 }
 0x4eb   : > { %3197 = vrot.lane.b32.xlu1 %v8184_v2, %s9452_s1 }
 0x4ef   : > { %3165 = vrot.lane.b32.xlu1 %v8184_v2, %s9453_s28 }
 0x4f3   : > { %3133 = vrot.lane.b32.xlu1 %v8184_v2, %s9454_s24  ;;  %v3066_v48 = vpop.permute.xlu1 %3065 }
 0x4f4   : > { %v3074_v14 = vsel %vm1504_vm15, %v3071_v38, %v3066_v48 }
 0x4f5   : > { %3082 = vst.msk [vmem:[#allocation3 + $0x8] sm:$0xf] %vm1517_vm1, %v3074_v14 }
 0x4f7   : > { %v3070_v34 = vpop.permute.xlu0 %3069  ;;  %3101 = vrot.lane.b32.xlu1 %v8184_v2, %s9455_s23 }
 0x4f8   : > { %v3076_v28 = vsel %vm1504_vm15, %v3072_v49, %v3070_v34  ;;  %vm9525_vm15 = vcmask 1022976  }
 0x4f9   : > { %3084 = vst.msk [vmem:[#allocation3 + $0x18] sm:$0xf] %vm1517_vm1, %v3076_v28  ;;  %vm9526_vm1 = vcmask 1031168  }
 0x4fb   : > { %3811 = vrot.lane.b32.xlu1 %v8184_v2, %s9456_s0 }
 0x4fc   : > { %v3086_v35 = vld [vmem:[#allocation3 + $0x8] sm:$0xf] }
 0x4fd   : > { %v3286_v41 = vld [vmem:[#allocation3 + $0x8] sm:$0xf]  ;;  %3090 = vst.msk [vmem:[#allocation10 + $0x8] sm:$0xf] %vm658_vm0, %v3086_v35 }
 0x4fe   : > { %3295 = vrot.lane.b32.xlu0 %v3286_v41, %s9449_s26  ;;  %v3254_v31 = vld [vmem:[#allocation3 + $0x8] sm:$0xf] }
 0x4ff   : > { %3549 = vrot.lane.b32.xlu1 %v8184_v2, %s9458_s22  ;;  %v3222_v58 = vld [vmem:[#allocation3 + $0x8] sm:$0xf] }
 0x500   : > { %v3088_v6 = vld [vmem:[#allocation3 + $0x18] sm:$0xf]  ;;  %v3190_v63 = vld [vmem:[#allocation3 + $0x8] sm:$0xf] }
 0x501   : > { %3092 = vst.msk [vmem:[#allocation10 + $0x14] sm:$0xf] %vm658_vm0, %v3088_v6  ;;  %v3158_v36 = vld [vmem:[#allocation3 + $0x8] sm:$0xf]  ;;  %v3288_v24 = vld [vmem:[#allocation3 + $0x18] sm:$0xf] }
 0x502   : > { %3263 = vrot.lane.b32.xlu0 %v3254_v31, %s9450_s30  ;;  %v3126_v51 = vld [vmem:[#allocation3 + $0x8] sm:$0xf]  ;;  %v3256_v29 = vld [vmem:[#allocation3 + $0x18] sm:$0xf] }
 0x503   : > { %3777 = vrot.lane.b32.xlu1 %v8184_v2, %s9457_s29  ;;  %v3094_v39 = vld [vmem:[#allocation3 + $0x8] sm:$0xf]  ;;  %v3224_v42 = vld [vmem:[#allocation3 + $0x18] sm:$0xf] }
 0x504   : > { %v3804_v37 = vld [vmem:[#allocation3 + $0x8] sm:$0xff]  ;;  %v3192_v8 = vld [vmem:[#allocation3 + $0x18] sm:$0xf] }
 0x505   : > { %v3542_v9 = vld [vmem:[#allocation3 + $0x8] sm:$0xf]  ;;  %v3160_v61 = vld [vmem:[#allocation3 + $0x18] sm:$0xf] }
 0x506   : > { %3231 = vrot.lane.b32.xlu0 %v3222_v58, %s9451_s4  ;;  %v3510_v40 = vld [vmem:[#allocation3 + $0x8] sm:$0xf]  ;;  %v3128_v25 = vld [vmem:[#allocation3 + $0x18] sm:$0xf] }
 0x507   : > { %3517 = vrot.lane.b32.xlu1 %v8184_v2, %s9460_s27  ;;  %v3478_v62 = vld [vmem:[#allocation3 + $0x8] sm:$0xf]  ;;  %v3096_v18 = vld [vmem:[#allocation3 + $0x18] sm:$0xf] }
 0x508   : > { %v3446_v59 = vld [vmem:[#allocation3 + $0x8] sm:$0xf]  ;;  %v8330_v54 = vld [vmem:[#allocation3 + $0x18] sm:$0xff] }
 0x509   : > { %v3670_v11 = vld [vmem:[#allocation3 + $0x8] sm:$0xf]  ;;  %v3544_v28 = vld [vmem:[#allocation3 + $0x18] sm:$0xf] }
 0x50a   : > { %3199 = vrot.lane.b32.xlu0 %v3190_v63, %s9452_s1  ;;  %v3414_v15 = vld [vmem:[#allocation3 + $0x8] sm:$0xf] }
 0x50b   : > { %3743 = vrot.lane.b32.xlu1 %v8184_v2, %s9459_s2  ;;  %v3638_v44 = vld [vmem:[#allocation3 + $0x8] sm:$0xf] }
 0x50c   : > { %v3382_v20 = vld [vmem:[#allocation3 + $0x8] sm:$0xf] }
 0x50d   : > { %v3606_v52 = vld [vmem:[#allocation3 + $0x8] sm:$0xf] }
 0x50e   : > { %3167 = vrot.lane.b32.xlu0 %v3158_v36, %s9453_s28  ;;  %v3350_v10 = vld [vmem:[#allocation3 + $0x8] sm:$0xf] }
 0x50f   : > { %3485 = vrot.lane.b32.xlu1 %v8184_v2, %s9462_s20  ;;  %v3574_v22 = vld [vmem:[#allocation3 + $0x8] sm:$0xf] }
 0x510   : > { %v3318_v43 = vld [vmem:[#allocation3 + $0x8] sm:$0xf] }
 0x512   : > { %3135 = vrot.lane.b32.xlu0 %v3126_v51, %s9454_s24 }
 0x513   : > { %3709 = vrot.lane.b32.xlu1 %v8184_v2, %s9461_s21 }
 0x516   : > { %3103 = vrot.lane.b32.xlu0 %v3094_v39, %s9455_s23 }
 0x517   : > { %3453 = vrot.lane.b32.xlu1 %v8184_v2, %s9464_s3 }
 0x51a   : > { %3813 = vrot.lane.b32.xlu0 %v3804_v37, %s9456_s0 }
 0x51b   : > { %3677 = vrot.lane.b32.xlu1 %v8184_v2, %s9463_s5 }
 0x51e   : > { %3551 = vrot.lane.b32.xlu0 %v3542_v9, %s9458_s22 }
 0x51f   : > { %3421 = vrot.lane.b32.xlu1 %v8184_v2, %s9466_s25 }
 0x522   : > { %3779 = vrot.lane.b32.xlu0 %v3804_v37, %s9457_s29 }
 0x523   : > { %3645 = vrot.lane.b32.xlu1 %v8184_v2, %s9465_s19 }
 0x526   : > { %3519 = vrot.lane.b32.xlu0 %v3510_v40, %s9460_s27 }
 0x527   : > { %3389 = vrot.lane.b32.xlu1 %v8184_v2, %s9468_s9 }
 0x52a   : > { %3745 = vrot.lane.b32.xlu0 %v3804_v37, %s9459_s2 }
 0x52b   : > { %3613 = vrot.lane.b32.xlu1 %v8184_v2, %s9467_s18 }
 0x52e   : > { %3487 = vrot.lane.b32.xlu0 %v3478_v62, %s9462_s20  ;;  %v3512_v62 = vld [vmem:[#allocation3 + $0x18] sm:$0xf] }
 0x52f   : > { %3357 = vrot.lane.b32.xlu1 %v8184_v2, %s9470_s8 }
 0x532   : > { %3711 = vrot.lane.b32.xlu0 %v3804_v37, %s9461_s21 }
 0x533   : > { %3581 = vrot.lane.b32.xlu1 %v8184_v2, %s9522_s14 }
 0x536   : > { %3455 = vrot.lane.b32.xlu0 %v3446_v59, %s9464_s3 }
 0x537   : > { %3325 = vrot.lane.b32.xlu1 %v8184_v2, %s9472_s7 }
 0x53a   : > { %3679 = vrot.lane.b32.xlu0 %v3670_v11, %s9463_s5 }
 0x53b   : > { %3845 = vrot.lane.b32.xlu1 %v8184_v2, %s9523_s15 }
 0x53e   : > { %3423 = vrot.lane.b32.xlu0 %v3414_v15, %s9466_s25 }
 0x53f   : > { %3297 = vrot.lane.b32.xlu1 %v8189_v30, %s9449_s26 }
 0x542   : > { %3647 = vrot.lane.b32.xlu0 %v3638_v44, %s9465_s19 }
 0x543   : > { %3265 = vrot.lane.b32.xlu1 %v8189_v30, %s9450_s30 }
 0x546   : > { %3391 = vrot.lane.b32.xlu0 %v3382_v20, %s9468_s9 }
 0x547   : > { %3233 = vrot.lane.b32.xlu1 %v8189_v30, %s9451_s4 }
 0x54a   : > { %3615 = vrot.lane.b32.xlu0 %v3606_v52, %s9467_s18 }
 0x54b   : > { %3201 = vrot.lane.b32.xlu1 %v8189_v30, %s9452_s1 }
 0x54e   : > { %3359 = vrot.lane.b32.xlu0 %v3350_v10, %s9470_s8 }
 0x54f   : > { %3169 = vrot.lane.b32.xlu1 %v8189_v30, %s9453_s28 }
 0x551   : > { %v3294_v4 = vpop.permute.xlu1 %3293 }
 0x552   : > { %3583 = vrot.lane.b32.xlu0 %v3574_v22, %s9522_s14  ;;  %v3301_v1 = vrot.slane %v3294_v4, 4 }
 0x553   : > { %3137 = vrot.lane.b32.xlu1 %v8189_v30, %s9454_s24 }
 0x555   : > { %v3262_v56 = vpop.permute.xlu1 %3261 }
 0x556   : > { %3327 = vrot.lane.b32.xlu0 %v3318_v43, %s9472_s7  ;;  %v3269_v45 = vrot.slane %v3262_v56, 4 }
 0x557   : > { %3105 = vrot.lane.b32.xlu1 %v8189_v30, %s9455_s23 }
 0x559   : > { %v3230_v46 = vpop.permute.xlu1 %3229 }
 0x55a   : > { %3847 = vrot.lane.b32.xlu0 %v3804_v37, %s9523_s15  ;;  %v3237_v33 = vrot.slane %v3230_v46, 4 }
 0x55b   : > { %3815 = vrot.lane.b32.xlu1 %v8189_v30, %s9456_s0 }
 0x55d   : > { %v3198_v23 = vpop.permute.xlu1 %3197 }
 0x55e   : > { %3299 = vrot.lane.b32.xlu0 %v3288_v24, %s9449_s26  ;;  %v3205_v14 = vrot.slane %v3198_v23, 4  ;;  %v3480_v24 = vld [vmem:[#allocation3 + $0x18] sm:$0xf] }
 0x55f   : > { %3553 = vrot.lane.b32.xlu1 %v8189_v30, %s9458_s22 }
 0x561   : > { %v8288_v32 = vpop.permute.xlu1 %3165 }
 0x562   : > { %3267 = vrot.lane.b32.xlu0 %v3256_v29, %s9450_s30  ;;  %v3173_v58 = vrot.slane %v8288_v32, 4 }
 0x563   : > { %3781 = vrot.lane.b32.xlu1 %v8189_v30, %s9457_s29 }
 0x565   : > { %v8293_v19 = vpop.permute.xlu1 %3133 }
 0x566   : > { %3235 = vrot.lane.b32.xlu0 %v3224_v42, %s9451_s4  ;;  %v3141_v9 = vrot.slane %v8293_v19, 4 }
 0x567   : > { %3521 = vrot.lane.b32.xlu1 %v8189_v30, %s9460_s27 }
 0x569   : > { %v8298_v47 = vpop.permute.xlu1 %3101 }
 0x56a   : > { %3203 = vrot.lane.b32.xlu0 %v3192_v8, %s9452_s1  ;;  %v3109_v20 = vrot.slane %v8298_v47, 4 }
 0x56b   : > { %3747 = vrot.lane.b32.xlu1 %v8189_v30, %s9459_s2 }
 0x56d   : > { %v8303_v55 = vpop.permute.xlu1 %3811 }
 0x56e   : > { %3171 = vrot.lane.b32.xlu0 %v3160_v61, %s9453_s28 }
 0x56f   : > { %3489 = vrot.lane.b32.xlu1 %v8189_v30, %s9462_s20 }
 0x570   : > { %v3296_v5 = vpop.permute.xlu0 %3295 }
 0x571   : > { %v3302_v3 = vrot.slane %v3296_v5, 4  ;;  %3314 = vst.msk [vmem:[#allocation10 + $0xb0] sm:$0xf] %vm658_vm0, %v3296_v5  ;;  %v8309_v60 = vpop.permute.xlu1 %3549 }
 0x572   : > { %3139 = vrot.lane.b32.xlu0 %v3128_v25, %s9454_s24  ;;  %v3557_v8 = vrot.slane %v8309_v60, 4 }
 0x573   : > { %v3305_v26 = vsel %vm670_vm2, %v3301_v1, %v3302_v3  ;;  %3713 = vrot.lane.b32.xlu1 %v8189_v30, %s9461_s21 }
 0x574   : > { %v8313_v16 = vsel %vm774_vm12, %v3294_v4, %v3305_v26  ;;  %v3264_v13 = vpop.permute.xlu0 %3263  ;;  %v3448_v26 = vld [vmem:[#allocation3 + $0x18] sm:$0xf] }
 0x575   : > { %3313 = vst [vmem:[#allocation10 + $0xa8] sm:$0xff] %v8313_v16  ;;  %v3270_v21 = vrot.slane %v3264_v13, 4  ;;  %3282 = vst.msk [vmem:[#allocation10 + $0x98] sm:$0xf] %vm658_vm0, %v3264_v13  ;;  %v8320_v50 = vpop.permute.xlu1 %3777 }
 0x576   : > { %3107 = vrot.lane.b32.xlu0 %v3096_v18, %s9455_s23  ;;  %v3785_v3 = vrot.slane %v8320_v50, 4 }
 0x577   : > { %v3273_v27 = vsel %vm670_vm2, %v3269_v45, %v3270_v21  ;;  %3457 = vrot.lane.b32.xlu1 %v8189_v30, %s9464_s3 }
 0x578   : > { %v8324_v0 = vsel %vm757_vm11, %v3262_v56, %v3273_v27  ;;  %v3232_v38 = vpop.permute.xlu0 %3231  ;;  %v3819_v56 = vrot.slane %v8303_v55, 4 }
 0x579   : > { %3281 = vst [vmem:[#allocation10 + $0x90] sm:$0xff] %v8324_v0  ;;  %v3238_v7 = vrot.slane %v3232_v38, 4  ;;  %3250 = vst.msk [vmem:[#allocation10 + $0x80] sm:$0xf] %vm658_vm0, %v3232_v38  ;;  %v8334_v49 = vpop.permute.xlu1 %3517 }
 0x57a   : > { %3817 = vrot.lane.b32.xlu0 %v8330_v54, %s9456_s0  ;;  %v3525_v27 = vrot.slane %v8334_v49, 4  ;;  %s7165_s0 = smov 116  }
 0x57b   : > { %v3241_v57 = vsel %vm670_vm2, %v3237_v33, %v3238_v7  ;;  %3681 = vrot.lane.b32.xlu1 %v8189_v30, %s9463_s5  ;;  %v3672_v33 = vld [vmem:[#allocation3 + $0x18] sm:$0xf] }
 0x57c   : > { %v8338_v2 = vsel %vm740_vm14, %v3230_v46, %v3241_v57  ;;  %v3200_v48 = vpop.permute.xlu0 %3199 }
 0x57d   : > { %3249 = vst [vmem:[#allocation10 + $0x78] sm:$0xff] %v8338_v2  ;;  %v3206_v34 = vrot.slane %v3200_v48, 4  ;;  %3218 = vst.msk [vmem:[#allocation10 + $0x68] sm:$0xf] %vm658_vm0, %v3200_v48  ;;  %v8345_v35 = vpop.permute.xlu1 %3743 }
 0x57e   : > { %3555 = vrot.lane.b32.xlu0 %v3544_v28, %s9458_s22  ;;  %v3416_v28 = vld [vmem:[#allocation3 + $0x18] sm:$0xf]  ;;  %s7164_s22 = smov 123  }
 0x57f   : > { %v3209_v41 = vsel %vm670_vm2, %v3205_v14, %v3206_v34  ;;  %3425 = vrot.lane.b32.xlu1 %v8189_v30, %s9466_s25  ;;  %v3751_v14 = vrot.slane %v8345_v35, 4 }
 0x580   : > { %v8349_v6 = vsel %vm9524_vm13, %v3198_v23, %v3209_v41  ;;  %v3168_v31 = vpop.permute.xlu0 %3167  ;;  %v6548_v41 = vld [vmem:[%s9278_s10 + $0x20] sm:$0xff]  ;;  %vm9530_vm13 = vcmask 728064  }
 0x581   : > { %3217 = vst [vmem:[#allocation10 + $0x60] sm:$0xff] %v8349_v6  ;;  %v3174_v63 = vrot.slane %v3168_v31, 4  ;;  %3186 = vst.msk [vmem:[#allocation10 + $0x50] sm:$0xf] %vm658_vm0, %v3168_v31  ;;  %v8358_v36 = vpop.permute.xlu1 %3485 }
 0x582   : > { %3783 = vrot.lane.b32.xlu0 %v8330_v54, %s9457_s29  ;;  %s9561_s29 = sld [smem:[#allocation42_spill]] }
 0x583   : > { %v3177_v51 = vsel %vm670_vm2, %v3173_v58, %v3174_v63  ;;  %3649 = vrot.lane.b32.xlu1 %v8189_v30, %s9465_s19 }
 0x584   : > { %v8363_v39 = vsel %vm9525_vm15, %v8288_v32, %v3177_v51  ;;  %v3136_v37 = vpop.permute.xlu0 %3135  ;;  %v3493_v51 = vrot.slane %v8358_v36, 4  ;;  %vm9531_vm15 = vcmask 457728  }
 0x585   : > { %3185 = vst [vmem:[#allocation10 + $0x48] sm:$0xff] %v8363_v39  ;;  %v3142_v40 = vrot.slane %v3136_v37, 4  ;;  %3154 = vst.msk [vmem:[#allocation10 + $0x38] sm:$0xf] %vm658_vm0, %v3136_v37  ;;  %v8371_v59 = vpop.permute.xlu1 %3709 }
 0x586   : > { %3523 = vrot.lane.b32.xlu0 %v3512_v62, %s9460_s27  ;;  %s7155_s27 = smov 117  }
 0x587   : > { %v3145_v11 = vsel %vm670_vm2, %v3141_v9, %v3142_v40  ;;  %3393 = vrot.lane.b32.xlu1 %v8189_v30, %s9468_s9  ;;  %v3640_v9 = vld [vmem:[#allocation3 + $0x18] sm:$0xf] }
 0x588   : > { %v8376_v15 = vsel %vm9526_vm1, %v8293_v19, %v3145_v11  ;;  %v3104_v44 = vpop.permute.xlu0 %3103  ;;  %vm9532_vm1 = vmmov %vm9531_vm15 }
 0x589   : > { %3153 = vst [vmem:[#allocation10 + $0x30] sm:$0xff] %v8376_v15  ;;  %v3110_v52 = vrot.slane %v3104_v44, 4  ;;  %3122 = vst.msk [vmem:[#allocation10 + $0x20] sm:$0xf] %vm658_vm0, %v3104_v44  ;;  %v8385_v10 = vpop.permute.xlu1 %3453  ;;  %v3717_v44 = vrot.slane %v8371_v59, 4 }
 0x58a   : > { %3749 = vrot.lane.b32.xlu0 %v8330_v54, %s9459_s2  ;;  %s7162_s2 = smov 121  }
 0x58b   : > { %v3113_v22 = vsel %vm670_vm2, %v3109_v20, %v3110_v52  ;;  %3617 = vrot.lane.b32.xlu1 %v8189_v30, %s9467_s18  ;;  %v3384_v52 = vld [vmem:[#allocation3 + $0x18] sm:$0xf] }
 0x58c   : > { %v8390_v4 = vsel %vm9527_vm6, %v8298_v47, %v3113_v22  ;;  %v3814_v43 = vpop.permute.xlu0 %3813  ;;  %vm9533_vm6 = vcmask 736256  }
 0x58d   : > { %3121 = vst [vmem:[#allocation10 + $0x18] sm:$0xff] %v8390_v4  ;;  %v3820_v46 = vrot.slane %v3814_v43, 4  ;;  %v8397_v23 = vpop.permute.xlu1 %3677 }
 0x58e   : > { %3491 = vrot.lane.b32.xlu0 %v3480_v24, %s9462_s20  ;;  %v3461_v24 = vrot.slane %v8385_v10, 4  ;;  %s9577_s20 = sld [smem:[#allocation18_spill]] }
 0x58f   : > { %v3823_v29 = vsel %vm670_vm2, %v3819_v56, %v3820_v46  ;;  %v3825_v32 = vsel %vm1049_vm5, %v3814_v43, %v3820_v46  ;;  %3361 = vrot.lane.b32.xlu1 %v8189_v30, %s9470_s8 }
 0x590   : > { %v8403_v42 = vsel %vm1049_vm5, %v8303_v55, %v3823_v29  ;;  %3834 = vst.msk [vmem:[#allocation10 + $0x230] sm:$0xf] %vm658_vm0, %v3825_v32  ;;  %v3552_v19 = vpop.permute.xlu0 %3551  ;;  %v3608_v32 = vld [vmem:[#allocation3 + $0x18] sm:$0xf] }
 0x591   : > { %v3558_v47 = vrot.slane %v3552_v19, 4  ;;  %3570 = vst.msk [vmem:[#allocation10 + $0x170] sm:$0xf] %vm658_vm0, %v3552_v19  ;;  %v8412_v61 = vpop.permute.xlu1 %3421 }
 0x592   : > { %3715 = vrot.lane.b32.xlu0 %v8330_v54, %s9461_s21  ;;  %s7169_s21 = smov [#allocation11]  }
 0x593   : > { %v3561_v5 = vsel %vm670_vm2, %v3557_v8, %v3558_v47  ;;  %3585 = vrot.lane.b32.xlu1 %v8189_v30, %s9522_s14 }
 0x594   : > { %v8417_v55 = vsel %vm9528_vm10, %v8309_v60, %v3561_v5  ;;  %v3780_v1 = vpop.permute.xlu0 %3779  ;;  %v3685_v5 = vrot.slane %v8397_v23, 4  ;;  %vm9534_vm10 = vcmask 572416  }
 0x595   : > { %v3786_v25 = vrot.slane %v3780_v1, 4  ;;  %v8423_v13 = vpop.permute.xlu1 %3645 }
 0x596   : > { %3459 = vrot.lane.b32.xlu0 %v3448_v26, %s9464_s3  ;;  %s7156_s3 = smov 118  }
 0x597   : > { %v3789_v45 = vsel %vm670_vm2, %v3785_v3, %v3786_v25  ;;  %v3791_v21 = vsel %vm1031_vm8, %v3780_v1, %v3786_v25  ;;  %3329 = vrot.lane.b32.xlu1 %v8189_v30, %s9472_s7  ;;  %v3352_v3 = vld [vmem:[#allocation3 + $0x18] sm:$0xf] }
 0x598   : > { %v8429_v60 = vsel %vm1031_vm8, %v8320_v50, %v3789_v45  ;;  %3800 = vst.msk [vmem:[#allocation10 + $0x218] sm:$0xf] %vm658_vm0, %v3791_v21  ;;  %v3520_v18 = vpop.permute.xlu0 %3519 }
 0x599   : > { %v3526_v38 = vrot.slane %v3520_v18, 4  ;;  %3538 = vst.msk [vmem:[#allocation10 + $0x158] sm:$0xf] %vm658_vm0, %v3520_v18  ;;  %v8437_v7 = vpop.permute.xlu1 %3389 }
 0x59a   : > { %3683 = vrot.lane.b32.xlu0 %v3672_v33, %s9463_s5  ;;  %s7157_s5 = smov 119  }
 0x59b   : > { %v3529_v57 = vsel %vm670_vm2, %v3525_v27, %v3526_v38  ;;  %3849 = vrot.lane.b32.xlu1 %v8189_v30, %s9523_s15  ;;  %v3576_v27 = vld [vmem:[#allocation3 + $0x18] sm:$0xf] }
 0x59c   : > { %v8442_v50 = vsel %vm9529_vm9, %v8334_v49, %v3529_v57  ;;  %v3746_v48 = vpop.permute.xlu0 %3745  ;;  %vm9535_vm9 = vcmask 744448  }
 0x59d   : > { %v3752_v34 = vrot.slane %v3746_v48, 4  ;;  %v8451_v31 = vpop.permute.xlu1 %3613 }
 0x59e   : > { %3427 = vrot.lane.b32.xlu0 %v3416_v28, %s9466_s25  ;;  %s9564_s25 = sld [smem:[#allocation34_spill]] }
 0x59f   : > { %v3755_v58 = vsel %vm670_vm2, %v3751_v14, %v3752_v34  ;;  %v3757_v49 = vsel %vm1013_vm4, %v3746_v48, %v3752_v34  ;;  %3930 = vperm.xlu1 %6916, %v6548_v41   ;;  %v3320_v34 = vld [vmem:[#allocation3 + $0x18] sm:$0xf] }
 0x5a0   : > { %v8457_v30 = vsel %vm1013_vm4, %v8345_v35, %v3755_v58  ;;  %3766 = vst.msk [vmem:[#allocation10 + $0x200] sm:$0xf] %vm658_vm0, %v3757_v49  ;;  %v3488_v63 = vpop.permute.xlu0 %3487 }
 0x5a1   : > { %v3494_v37 = vrot.slane %v3488_v63, 4  ;;  %3506 = vst.msk [vmem:[#allocation10 + $0x140] sm:$0xf] %vm658_vm0, %v3488_v63  ;;  %v8463_v40 = vpop.permute.xlu1 %3357 }
 0x5a2   : > { %3651 = vrot.lane.b32.xlu0 %v3640_v9, %s9465_s19  ;;  %s9568_s19 = sld [smem:[#allocation40_spill]] }
 0x5a3   : > { %v3497_v62 = vsel %vm670_vm2, %v3493_v51, %v3494_v37 }
 0x5a4   : > { %v8468_v35 = vsel %vm9530_vm13, %v8358_v36, %v3497_v62  ;;  %v3712_v11 = vpop.permute.xlu0 %3711  ;;  %vm9536_vm13 = vcmask 580608   ;;  %v6549_v62 = vld [vmem:[%s9278_s10 + $0x28] sm:$0xff] }
 0x5a5   : > { %v3718_v20 = vrot.slane %v3712_v11, 4  ;;  %v8472_v22 = vpop.permute.xlu1 %3581 }
 0x5a6   : > { %3395 = vrot.lane.b32.xlu0 %v3384_v52, %s9468_s9  ;;  %s9563_s9 = sld [smem:[#allocation39_spill]] }
 0x5a7   : > { %v3721_v43 = vsel %vm670_vm2, %v3717_v44, %v3718_v20  ;;  %v3723_v56 = vsel %vm9531_vm15, %v3712_v11, %v3718_v20  ;;  %vm9538_vm15 = vcmask 752640  }
 0x5a8   : > { %v8478_v46 = vsel %vm9532_vm1, %v8371_v59, %v3721_v43  ;;  %3732 = vst.msk [vmem:[#allocation10 + $0x1e8] sm:$0xf] %vm658_vm0, %v3723_v56  ;;  %v3456_v36 = vpop.permute.xlu0 %3455  ;;  %vm9539_vm1 = vcmask 588800  }
 0x5a9   : > { %v3462_v29 = vrot.slane %v3456_v36, 4  ;;  %3474 = vst.msk [vmem:[#allocation10 + $0x128] sm:$0xf] %vm658_vm0, %v3456_v36  ;;  %v8484_v19 = vpop.permute.xlu1 %3325 }
 0x5aa   : > { %3619 = vrot.lane.b32.xlu0 %v3608_v32, %s9467_s18  ;;  %s9537_s18 = sld [smem:[#allocation32_spill]] }
 0x5ab   : > { %v3465_v8 = vsel %vm670_vm2, %v3461_v24, %v3462_v29 }
 0x5ac   : > { %v8489_v47 = vsel %vm9533_vm6, %v8385_v10, %v3465_v8  ;;  %v3680_v59 = vpop.permute.xlu0 %3679  ;;  %v3429_v10 = vrot.slane %v8412_v61, 4  ;;  %vm9540_vm6 = vcmask 867328  }
 0x5ad   : > { %v3686_v1 = vrot.slane %v3680_v59, 4  ;;  %3698 = vst.msk [vmem:[#allocation10 + $0x1d0] sm:$0xf] %vm658_vm0, %v3680_v59  ;;  %v8494_v25 = vpop.permute.xlu1 %3845 }
 0x5ae   : > { %3363 = vrot.lane.b32.xlu0 %v3352_v3, %s9470_s8  ;;  %s7071_s8 = sshll.u32 %s7169_s21, 4  ;;  %s7072_s8 = int_to_ptr.vmem [resolvable:$false] %s7071_s8 }
 0x5af   : > { %v3689_v26 = vsel %vm670_vm2, %v3685_v5, %v3686_v1  ;;  %v3589_v5 = vrot.slane %v8472_v22, 4 }
 0x5b0   : > { %v8499_v45 = vsel %vm9534_vm10, %v8397_v23, %v3689_v26  ;;  %v3424_v21 = vpop.permute.xlu0 %3423  ;;  %v3653_v23 = vrot.slane %v8423_v13, 4  ;;  %v6970_v51 = vld [vmem:[%s9537_s18 + $0x4] ss:$16 sps:$4 sm:$0xff]   ;;  %vm9541_vm10 = vcmask 596992  }
 0x5b1   : > { %v3430_v18 = vrot.slane %v3424_v21, 4  ;;  %3442 = vst.msk [vmem:[#allocation10 + $0x110] sm:$0xf] %vm658_vm0, %v3424_v21  ;;  %v8504_v38 = vpop.permute.xlu1 %3297  ;;  %4242 = vmatprep.mubr.bf16.mxu1 %v6970_v51 }
 0x5b2   : > { %3587 = vrot.lane.b32.xlu0 %v3576_v27, %s9522_s14  ;;  %s9569_s14 = sld [smem:[#allocation36_spill]] }
 0x5b3   : > { %v3433_v33 = vsel %vm670_vm2, %v3429_v10, %v3430_v18  ;;  %v3333_v10 = vrot.slane %v8484_v19, 4 }
 0x5b4   : > { %v8509_v57 = vsel %vm9535_vm9, %v8412_v61, %v3433_v33  ;;  %v3648_v48 = vpop.permute.xlu0 %3647  ;;  %v3397_v61 = vrot.slane %v8437_v7, 4  ;;  %vm9542_vm9 = vcmask 875520  }
 0x5b5   : > { %v3654_v14 = vrot.slane %v3648_v48, 4  ;;  %3666 = vst.msk [vmem:[#allocation10 + $0x1b8] sm:$0xf] %vm658_vm0, %v3648_v48  ;;  %v8514_v28 = vpop.permute.xlu1 %3265 }
 0x5b6   : > { %3331 = vrot.lane.b32.xlu0 %v3320_v34, %s9472_s7  ;;  %s7158_s7 = smov 10  }
 0x5b7   : > { %v3657_v41 = vsel %vm670_vm2, %v3653_v23, %v3654_v14  ;;  %v3853_v23 = vrot.slane %v8494_v25, 4 }
 0x5b8   : > { %v8519_v58 = vsel %vm9536_vm13, %v8423_v13, %v3657_v41  ;;  %v3392_v49 = vpop.permute.xlu0 %3391  ;;  %v6971_v13 = vld [vmem:[%s9537_s18 + $0xc] ss:$16 sps:$4 sm:$0xff]   ;;  %vm9546_vm13 = vcmask 1039360  }
 0x5b9   : > { %v3398_v63 = vrot.slane %v3392_v49, 4  ;;  %3410 = vst.msk [vmem:[#allocation10 + $0xf8] sm:$0xf] %vm658_vm0, %v3392_v49  ;;  %v8528_v37 = vpop.permute.xlu1 %3233  ;;  %6604 = vmatprep.mubr.msk.bf16.mxu0 %vm2843_vm3, %v6971_v13 }
 0x5ba   : > { %3851 = vrot.lane.b32.xlu0 %v8330_v54, %s9523_s15  ;;  %v3621_v54 = vrot.slane %v8451_v31, 4  ;;  %s9567_s15 = sld [smem:[#allocation35_spill]] }
 0x5bb   : > { %v3401_v9 = vsel %vm670_vm2, %v3397_v61, %v3398_v63  ;;  %v3303_v61 = vrot.slane %v8504_v38, 4 }
 0x5bc   : > { %v8539_v11 = vsel %vm9538_vm15, %v8437_v7, %v3401_v9  ;;  %v3616_v44 = vpop.permute.xlu0 %3615  ;;  %v3365_v7 = vrot.slane %v8463_v40, 4  ;;  %vm9548_vm15 = vcmask 719872  }
 0x5bd   : > { %v3622_v20 = vrot.slane %v3616_v44, 4  ;;  %3634 = vst.msk [vmem:[#allocation10 + $0x1a0] sm:$0xf] %vm658_vm0, %v3616_v44  ;;  %v8544_v52 = vpop.permute.xlu1 %3201  ;;  %v3271_v44 = vrot.slane %v8514_v28, 4 }
 0x5be   : > { %3935 = vperm.xlu0 %6915, %v6549_v62  }
 0x5bf   : > { %v3625_v43 = vsel %vm670_vm2, %v3621_v54, %v3622_v20 }
 0x5c0   : > { %v8549_v56 = vsel %vm9539_vm1, %v8451_v31, %v3625_v43  ;;  %v3360_v36 = vpop.permute.xlu0 %3359 }
 0x5c1   : > { %v3366_v24 = vrot.slane %v3360_v36, 4  ;;  %3378 = vst.msk [vmem:[#allocation10 + $0xe0] sm:$0xf] %vm658_vm0, %v3360_v36  ;;  %v8553_v29 = vpop.permute.xlu1 %3169 }
 0x5c3   : > { %v3369_v32 = vsel %vm670_vm2, %v3365_v7, %v3366_v24  ;;  %v3239_v24 = vrot.slane %v8528_v37, 4 }
 0x5c4   : > { %v8558_v8 = vsel %vm9540_vm6, %v8463_v40, %v3369_v32  ;;  %v3584_v59 = vpop.permute.xlu0 %3583  ;;  %vm9552_vm6 = vcmask 736256  }
 0x5c5   : > { %v3590_v1 = vrot.slane %v3584_v59, 4  ;;  %3602 = vst.msk [vmem:[#allocation10 + $0x188] sm:$0xf] %vm658_vm0, %v3584_v59  ;;  %v8562_v31 = vpop.permute.xlu1 %3137 }
 0x5c7   : > { %v3593_v3 = vsel %vm670_vm2, %v3589_v5, %v3590_v1 }
 0x5c8   : > { %v8567_v26 = vsel %vm9541_vm10, %v8472_v22, %v3593_v3  ;;  %v3328_v21 = vpop.permute.xlu0 %3327  ;;  %vm9553_vm10 = vcmask 572416  }
 0x5c9   : > { %v3334_v18 = vrot.slane %v3328_v21, 4  ;;  %3346 = vst.msk [vmem:[#allocation10 + $0xc8] sm:$0xf] %vm658_vm0, %v3328_v21  ;;  %v8571_v40 = vpop.permute.xlu1 %3105  ;;  %v3207_v21 = vrot.slane %v8544_v52, 4 }
 0x5cb   : > { %v3337_v27 = vsel %vm670_vm2, %v3333_v10, %v3334_v18 }
 0x5cc   : > { %v8576_v33 = vsel %vm9542_vm9, %v8484_v19, %v3337_v27  ;;  %v3848_v48 = vpop.permute.xlu0 %3847  ;;  %vm9554_vm9 = vcmask 744448  }
 0x5cd   : > { %3345 = vst [vmem:[#allocation10 + $0xc0] sm:$0xff] %v8576_v33  ;;  %v3854_v22 = vrot.slane %v3848_v48, 4  ;;  %v8580_v14 = vpop.permute.xlu1 %3815 }
 0x5cf   : > { %v3857_v34 = vsel %vm670_vm2, %v3853_v23, %v3854_v22  ;;  %v3859_v41 = vsel %vm1067_vm7, %v3848_v48, %v3854_v22  ;;  %v3175_v23 = vrot.slane %v8553_v29, 4 }
 0x5d0   : > { %v8586_v49 = vsel %vm1067_vm7, %v8494_v25, %v3857_v34  ;;  %3868 = vst.msk [vmem:[#allocation10 + $0x248] sm:$0xf] %vm658_vm0, %v3859_v41  ;;  %v3300_v19 = vpop.permute.xlu0 %3299 }
 0x5d1   : > { %v3304_v63 = vrot.slane %v3300_v19, 4  ;;  %3316 = vst.msk [vmem:[#allocation10 + $0xbc] sm:$0xf] %vm658_vm0, %v3300_v19  ;;  %v8591_v51 = vpop.permute.xlu1 %3553 }
 0x5d3   : > { %v3307_v13 = vsel %vm670_vm2, %v3303_v61, %v3304_v63  ;;  %v3143_v63 = vrot.slane %v8562_v31, 4 }
 0x5d4   : > { %v3308_v9 = vsel %vm774_vm12, %v8504_v38, %v3307_v13  ;;  %v3268_v62 = vpop.permute.xlu0 %3267  ;;  %vm9544_vm12 = vcmask 1022976  }
 0x5d5   : > { %3315 = vst [vmem:[#allocation10 + $0xb4] sm:$0xff] %v3308_v9  ;;  %v3272_v25 = vrot.slane %v3268_v62, 4  ;;  %3284 = vst.msk [vmem:[#allocation10 + $0xa4] sm:$0xf] %vm658_vm0, %v3268_v62  ;;  %v6569_v54 = vcombine.high %v8313_v16, %v3308_v9  ;;  %v6568_v20 = vcombine.low %v8313_v16, %v3308_v9  ;;  %v8600_v43 = vpop.permute.xlu1 %3781 }
 0x5d7   : > { %v3275_v36 = vsel %vm670_vm2, %v3271_v44, %v3272_v25  ;;  %4210 = vmatprep.subr.bf16.mxu1 %v6569_v54  ;;  %v3111_v54 = vrot.slane %v8571_v40, 4 }
 0x5d8   : > { %v3276_v7 = vsel %vm757_vm11, %v8514_v28, %v3275_v36  ;;  %v3236_v38 = vpop.permute.xlu0 %3235  ;;  %4211 = vmatpush1.bf16.msra.mxu1 %v6568_v20  ;;  %vm9543_vm11 = vcmask 1014784  }
 0x5d9   : > { %3283 = vst [vmem:[#allocation10 + $0x9c] sm:$0xff] %v3276_v7  ;;  %v3240_v32 = vrot.slane %v3236_v38, 4  ;;  %3252 = vst.msk [vmem:[#allocation10 + $0x8c] sm:$0xf] %vm658_vm0, %v3236_v38  ;;  %v6567_v59 = vcombine.high %v8324_v0, %v3276_v7  ;;  %v6566_v16 = vcombine.low %v8324_v0, %v3276_v7  ;;  %v8612_v3 = vpop.permute.xlu1 %3521 }
 0x5db   : > { %v3243_v5 = vsel %vm670_vm2, %v3239_v24, %v3240_v32  ;;  %4212 = vmatprep.subr.bf16.mxu1 %v6567_v59 }
 0x5dc   : > { %v3244_v1 = vsel %vm740_vm14, %v8528_v37, %v3243_v5  ;;  %v3204_v28 = vpop.permute.xlu0 %3203  ;;  %4213 = vmatpush1.bf16.msra.mxu1 %v6566_v16  ;;  %vm9545_vm14 = vcmask 1031168  }
 0x5dd   : > { %3251 = vst [vmem:[#allocation10 + $0x84] sm:$0xff] %v3244_v1  ;;  %v3208_v10 = vrot.slane %v3204_v28, 4  ;;  %3220 = vst.msk [vmem:[#allocation10 + $0x74] sm:$0xf] %vm658_vm0, %v3204_v28  ;;  %v6565_v18 = vcombine.high %v8338_v2, %v3244_v1  ;;  %v6564_v0 = vcombine.low %v8338_v2, %v3244_v1  ;;  %v8625_v19 = vpop.permute.xlu1 %3747  ;;  %v3876_v28 = vld [vmem:[#allocation10 + $0xc] sm:$0xff] }
 0x5df   : > { %v3211_v27 = vsel %vm670_vm2, %v3207_v21, %v3208_v10  ;;  %4214 = vmatprep.subr.bf16.mxu1 %v6565_v18  ;;  %v6966_v21 = vld [vmem:[#allocation10 + $0x4] ss:$12 sps:$4 sm:$0xff]   ;;  %v3559_v18 = vrot.slane %v8591_v51, 4 }
 0x5e0   : > { %v3212_v37 = vsel %vm9543_vm11, %v8544_v52, %v3211_v27  ;;  %v3172_v48 = vpop.permute.xlu0 %3171  ;;  %4215 = vmatpush1.bf16.msra.mxu1 %v6564_v0  ;;  %vm9555_vm11 = vcmask 580608  }
 0x5e1   : > { %3219 = vst [vmem:[#allocation10 + $0x6c] sm:$0xff] %v3212_v37  ;;  %v3176_v22 = vrot.slane %v3172_v48, 4  ;;  %3188 = vst.msk [vmem:[#allocation10 + $0x5c] sm:$0xf] %vm658_vm0, %v3172_v48  ;;  %v6563_v34 = vcombine.high %v8349_v6, %v3212_v37  ;;  %v6562_v41 = vcombine.low %v8349_v6, %v3212_v37  ;;  %v8635_v44 = vpop.permute.xlu1 %3489 }
 0x5e3   : > { %v3179_v2 = vsel %vm670_vm2, %v3175_v23, %v3176_v22  ;;  %4216 = vmatprep.subr.bf16.mxu1 %v6563_v34 }
 0x5e4   : > { %v3180_v52 = vsel %vm9544_vm12, %v8553_v29, %v3179_v2  ;;  %v3140_v61 = vpop.permute.xlu0 %3139  ;;  %4217 = vmatpush1.bf16.msra.mxu1 %v6562_v41  ;;  %v3787_v41 = vrot.slane %v8600_v43, 4  ;;  %vm9556_vm12 = vcmask 752640  }
 0x5e5   : > { %3187 = vst [vmem:[#allocation10 + $0x54] sm:$0xff] %v3180_v52  ;;  %v3144_v13 = vrot.slane %v3140_v61, 4  ;;  %3156 = vst.msk [vmem:[#allocation10 + $0x44] sm:$0xf] %vm658_vm0, %v3140_v61  ;;  %v6561_v9 = vcombine.high %v8363_v39, %v3180_v52  ;;  %v6560_v6 = vcombine.low %v8363_v39, %v3180_v52  ;;  %v8649_v5 = vpop.permute.xlu1 %3713 }
 0x5e7   : > { %v3147_v62 = vsel %vm670_vm2, %v3143_v63, %v3144_v13  ;;  %4218 = vmatprep.subr.bf16.mxu1 %v6561_v9  ;;  %v3527_v9 = vrot.slane %v8612_v3, 4 }
 0x5e8   : > { %v3148_v29 = vsel %vm9545_vm14, %v8562_v31, %v3147_v62  ;;  %v3108_v25 = vpop.permute.xlu0 %3107  ;;  %4219 = vmatpush1.bf16.msra.mxu1 %v6560_v6  ;;  %v3821_v31 = vrot.slane %v8580_v14, 4  ;;  %vm9557_vm14 = vcmask 588800  }
 0x5e9   : > { %3155 = vst [vmem:[#allocation10 + $0x3c] sm:$0xff] %v3148_v29  ;;  %v3112_v20 = vrot.slane %v3108_v25, 4  ;;  %3124 = vst.msk [vmem:[#allocation10 + $0x2c] sm:$0xf] %vm658_vm0, %v3108_v25  ;;  %v6559_v36 = vcombine.high %v8376_v15, %v3148_v29  ;;  %v6558_v39 = vcombine.low %v8376_v15, %v3148_v29 }
 0x5eb   : > { %v3115_v7 = vsel %vm670_vm2, %v3111_v54, %v3112_v20  ;;  %4220 = vmatprep.subr.bf16.mxu1 %v6559_v36  ;;  %v3753_v20 = vrot.slane %v8625_v19, 4 }
 0x5ec   : > { %v3116_v38 = vsel %vm9546_vm13, %v8571_v40, %v3115_v7  ;;  %v3818_v24 = vpop.permute.xlu0 %3817  ;;  %4221 = vmatpush1.bf16.msra.mxu1 %v6558_v39  ;;  %vm9558_vm13 = vcmask 867328  }
 0x5ed   : > { %3123 = vst [vmem:[#allocation10 + $0x24] sm:$0xff] %v3116_v38  ;;  %v3822_v32 = vrot.slane %v3818_v24, 4  ;;  %v6557_v59 = vcombine.high %v8390_v4, %v3116_v38  ;;  %v6556_v16 = vcombine.low %v8390_v4, %v3116_v38  ;;  %v3875_v4 = vld [vmem:[#allocation10] sm:$0xff] }
 0x5ee   : > { %v6554_v48 = vcombine.low %v3875_v4, %v3876_v28  ;;  %v3719_v28 = vrot.slane %v8649_v5, 4 }
 0x5ef   : > { %v3826_v15 = vsel %vm670_vm2, %v3821_v31, %v3822_v32  ;;  %v3828_v1 = vsel %vm1049_vm5, %v3818_v24, %v3822_v32  ;;  %4222 = vmatprep.subr.bf16.mxu1 %v6557_v59  ;;  %v3495_v32 = vrot.slane %v8635_v44, 4 }
 0x5f0   : > { %v3827_v40 = vsel %vm1049_vm5, %v8580_v14, %v3826_v15  ;;  %3836 = vst.msk [vmem:[#allocation10 + $0x23c] sm:$0xf] %vm658_vm0, %v3828_v1  ;;  %v3556_v10 = vpop.permute.xlu0 %3555  ;;  %4223 = vmatpush1.bf16.msra.mxu1 %v6556_v16  ;;  %v8661_v14 = vpop.permute.xlu1 %3457  ;;  %vm9547_vm5 = vcmask 605184  }
 0x5f1   : > { %v3560_v0 = vrot.slane %v3556_v10, 4  ;;  %3572 = vst.msk [vmem:[#allocation10 + $0x17c] sm:$0xf] %vm658_vm0, %v3556_v10  ;;  %4224 = vmatprep.subr.bf16.mxu1 %v6966_v21  ;;  %v6600_v27 = vcombine.low %v8403_v42, %v3827_v40  ;;  %v6601_v37 = vcombine.high %v8403_v42, %v3827_v40 }
 0x5f3   : > { %v3563_v23 = vsel %vm670_vm2, %v3559_v18, %v3560_v0  ;;  %4253 = vmatprep.subr.bf16.mxu0 %v6601_v37 }
 0x5f4   : > { %v3564_v22 = vsel %vm9547_vm5, %v8591_v51, %v3563_v23  ;;  %v3784_v34 = vpop.permute.xlu0 %3783  ;;  %4225 = vmatpush1.bf16.msra.mxu1 %v6554_v48  ;;  %4254 = vmatpush1.bf16.msra.mxu0 %v6600_v27  ;;  %v3682_v29 = vpop.permute.xlu1 %3681  ;;  %v3463_v27 = vrot.slane %v8661_v14, 4  ;;  %vm9559_vm5 = vcmask 596992  }
 0x5f5   : > { %v3788_v2 = vrot.slane %v3784_v34, 4  ;;  %v6584_v52 = vcombine.low %v8417_v55, %v3564_v22  ;;  %v6585_v61 = vcombine.high %v8417_v55, %v3564_v22 }
 0x5f7   : > { %v3792_v42 = vsel %vm670_vm2, %v3787_v41, %v3788_v2  ;;  %v3794_v63 = vsel %vm1031_vm8, %v3784_v34, %v3788_v2  ;;  %4226 = vmatprep.subr.bf16.mxu1 %v6585_v61  ;;  %v3687_v41 = vrot.slane %v3682_v29, 4 }
 0x5f8   : > { %v3793_v13 = vsel %vm1031_vm8, %v8600_v43, %v3792_v42  ;;  %3802 = vst.msk [vmem:[#allocation10 + $0x224] sm:$0xf] %vm658_vm0, %v3794_v63  ;;  %v3524_v51 = vpop.permute.xlu0 %3523  ;;  %4227 = vmatpush2.bf16.msra.mxu1 %v6584_v52  ;;  %v3426_v24 = vpop.permute.xlu1 %3425  ;;  %vm9549_vm8 = vcmask 728064  }
 0x5f9   : > { %v3528_v6 = vrot.slane %v3524_v51, 4  ;;  %3540 = vst.msk [vmem:[#allocation10 + $0x164] sm:$0xf] %vm658_vm0, %v3524_v51  ;;  %v6598_v62 = vcombine.low %v8429_v60, %v3793_v13  ;;  %v6599_v55 = vcombine.high %v8429_v60, %v3793_v13  ;;  %v3431_v13 = vrot.slane %v3426_v24, 4 }
 0x5fb   : > { %v3531_v25 = vsel %vm670_vm2, %v3527_v9, %v3528_v6  ;;  %4255 = vmatprep.subr.bf16.mxu0 %v6599_v55 }
 0x5fc   : > { %v3532_v43 = vsel %vm9548_vm15, %v8612_v3, %v3531_v25  ;;  %v3750_v54 = vpop.permute.xlu0 %3749  ;;  %4256 = vmatpush1.bf16.msra.mxu0 %v6598_v62  ;;  %v3650_v18 = vpop.permute.xlu1 %3649  ;;  %vm9560_vm15 = vcmask 875520  }
 0x5fd   : > { %v3754_v36 = vrot.slane %v3750_v54, 4  ;;  %v6582_v39 = vcombine.low %v8442_v50, %v3532_v43  ;;  %v6583_v7 = vcombine.high %v8442_v50, %v3532_v43  ;;  %v3655_v25 = vrot.slane %v3650_v18, 4 }
 0x5ff   : > { %v3758_v38 = vsel %vm670_vm2, %v3753_v20, %v3754_v36  ;;  %v3760_v60 = vsel %vm1013_vm4, %v3750_v54, %v3754_v36  ;;  %4228 = vmatprep.subr.bf16.mxu1 %v6583_v7 }
 0x600   : > { %v3759_v31 = vsel %vm1013_vm4, %v8625_v19, %v3758_v38  ;;  %3768 = vst.msk [vmem:[#allocation10 + $0x20c] sm:$0xf] %vm658_vm0, %v3760_v60  ;;  %v3492_v3 = vpop.permute.xlu0 %3491  ;;  %4229 = vmatpush2.bf16.msra.mxu1 %v6582_v39  ;;  %vm9550_vm4 = vcmask 457728   ;;  %v3394_v22 = vpop.permute.xlu1 %3393 }
 0x601   : > { %v3496_v59 = vrot.slane %v3492_v3, 4  ;;  %3508 = vst.msk [vmem:[#allocation10 + $0x14c] sm:$0xf] %vm658_vm0, %v3492_v3  ;;  %v6596_v50 = vcombine.low %v8457_v30, %v3759_v31  ;;  %v6597_v16 = vcombine.high %v8457_v30, %v3759_v31  ;;  %vm9551_vm1 = vmmov %vm9550_vm4  ;;  %v3399_v7 = vrot.slane %v3394_v22, 4 }
 0x603   : > { %v3499_v15 = vsel %vm670_vm2, %v3495_v32, %v3496_v59  ;;  %4257 = vmatprep.subr.bf16.mxu0 %v6597_v16 }
 0x604   : > { %v3500_v1 = vsel %vm9549_vm8, %v8635_v44, %v3499_v15  ;;  %v3716_v19 = vpop.permute.xlu0 %3715  ;;  %4258 = vmatpush1.bf16.msra.mxu0 %v6596_v50  ;;  %v3618_v6 = vpop.permute.xlu1 %3617  ;;  %vm4443_vm8 = vcmask 982016  }
 0x605   : > { %v3720_v21 = vrot.slane %v3716_v19, 4  ;;  %v6580_v40 = vcombine.low %v8468_v35, %v3500_v1  ;;  %v6581_v10 = vcombine.high %v8468_v35, %v3500_v1  ;;  %v3623_v32 = vrot.slane %v3618_v6, 4 }
 0x607   : > { %v3724_v0 = vsel %vm670_vm2, %v3719_v28, %v3720_v21  ;;  %v3726_v30 = vsel %vm9550_vm4, %v3716_v19, %v3720_v21  ;;  %4230 = vmatprep.subr.bf16.mxu1 %v6581_v10 }
 0x608   : > { %v3725_v4 = vsel %vm9551_vm1, %v8649_v5, %v3724_v0  ;;  %3734 = vst.msk [vmem:[#allocation10 + $0x1f4] sm:$0xf] %vm658_vm0, %v3726_v30  ;;  %v3460_v44 = vpop.permute.xlu0 %3459  ;;  %4231 = vmatpush2.bf16.msra.mxu1 %v6580_v40  ;;  %vm4499_vm1 = vcmask 822272  }
 0x609   : > { %v3464_v37 = vrot.slane %v3460_v44, 4  ;;  %3476 = vst.msk [vmem:[#allocation10 + $0x134] sm:$0xf] %vm658_vm0, %v3460_v44  ;;  %v6594_v35 = vcombine.low %v8478_v46, %v3725_v4  ;;  %v6595_v48 = vcombine.high %v8478_v46, %v3725_v4 }
 0x60b   : > { %v3467_v23 = vsel %vm670_vm2, %v3463_v27, %v3464_v37  ;;  %4259 = vmatprep.subr.bf16.mxu0 %v6595_v48 }
 0x60c   : > { %v3468_v5 = vsel %vm9552_vm6, %v8661_v14, %v3467_v23  ;;  %v3684_v34 = vpop.permute.xlu0 %3683  ;;  %4260 = vmatpush1.bf16.msra.mxu0 %v6594_v35  ;;  %vm4504_vm6 = vcmask 658432  }
 0x60d   : > { %v3688_v2 = vrot.slane %v3684_v34, 4  ;;  %3700 = vst.msk [vmem:[#allocation10 + $0x1dc] sm:$0xf] %vm658_vm0, %v3684_v34  ;;  %v6578_v52 = vcombine.low %v8489_v47, %v3468_v5  ;;  %v6579_v61 = vcombine.high %v8489_v47, %v3468_v5 }
 0x60f   : > { %v3691_v42 = vsel %vm670_vm2, %v3687_v41, %v3688_v2  ;;  %4232 = vmatprep.subr.bf16.mxu1 %v6579_v61 }
 0x610   : > { %v3692_v46 = vsel %vm9553_vm10, %v3682_v29, %v3691_v42  ;;  %v3428_v63 = vpop.permute.xlu0 %3427  ;;  %4233 = vmatpush2.bf16.msra.mxu1 %v6578_v52  ;;  %vm4755_vm10 = vcmask 76800  }
 0x611   : > { %v3432_v51 = vrot.slane %v3428_v63, 4  ;;  %3444 = vst.msk [vmem:[#allocation10 + $0x11c] sm:$0xf] %vm658_vm0, %v3428_v63  ;;  %v6592_v14 = vcombine.low %v8499_v45, %v3692_v46  ;;  %v6593_v9 = vcombine.high %v8499_v45, %v3692_v46  ;;  %v3362_v45 = vpop.permute.xlu1 %3361 }
 0x612   : > { %v3367_v28 = vrot.slane %v3362_v45, 4  ;;  %4756 = vst.msk [vmem:[#allocation5] sm:$0xf] %vm4755_vm10, %v9513_v12  ;;  %4757 = vst.msk [vmem:[#allocation5 + $0x4] sm:$0xf] %vm4755_vm10, %v9513_v12  ;;  %vm5388_vm10 = vcmask 248880  }
 0x613   : > { %v3435_v62 = vsel %vm670_vm2, %v3431_v13, %v3432_v51  ;;  %4261 = vmatprep.subr.bf16.mxu0 %v6593_v9  ;;  %v6974_v13 = vld [vmem:[%s9561_s29 + $0x78] ss:$0 sps:$4 sm:$0xff]  }
 0x614   : > { %v3436_v47 = vsel %vm9554_vm9, %v3426_v24, %v3435_v62  ;;  %v3652_v55 = vpop.permute.xlu0 %3651  ;;  %4262 = vmatpush1.bf16.msra.mxu0 %v6592_v14  ;;  %v6968_v14 = vld [vmem:[%s9537_s18] ss:$16 sps:$4 sm:$0xff]  }
 0x615   : > { %v3656_v29 = vrot.slane %v3652_v55, 4  ;;  %3668 = vst.msk [vmem:[#allocation10 + $0x1c4] sm:$0xf] %vm658_vm0, %v3652_v55  ;;  %v6576_v43 = vcombine.low %v8509_v57, %v3436_v47  ;;  %v6577_v54 = vcombine.high %v8509_v57, %v3436_v47  ;;  %v3586_v15 = vpop.permute.xlu1 %3585  ;;  %v6976_v47 = vld [vmem:[%s9561_s29 + $0x70] sm:$0xff]   ;;  %v6973_v55 = vld [vmem:[%s9537_s18 + $0x8] ss:$16 sps:$4 sm:$0xff]  }
 0x616   : > { %v3591_v4 = vrot.slane %v3586_v15, 4 }
 0x617   : > { %v3659_v20 = vsel %vm670_vm2, %v3655_v25, %v3656_v29  ;;  %4234 = vmatprep.subr.bf16.mxu1 %v6577_v54  ;;  %v6977_v25 = vld [vmem:[%s9561_s29 + $0x30] sm:$0xff]   ;;  %v6979_v29 = vld [vmem:[%s9561_s29 + $0x28] sm:$0xff]   ;;  %v6981_v54 = vld [vmem:[%s9561_s29 + $0x20] sm:$0xff]  }
 0x618   : > { %v3660_v36 = vsel %vm9555_vm11, %v3650_v18, %v3659_v20  ;;  %v3396_v39 = vpop.permute.xlu0 %3395  ;;  %4235 = vmatpush2.bf16.msra.mxu1 %v6576_v43  ;;  %v6980_v43 = vld [vmem:[%s9561_s29 + $0x60] sm:$0xff]   ;;  %v6982_v20 = vld [vmem:[%s9561_s29 + $0x58] sm:$0xff]  }
 0x619   : > { %v3400_v38 = vrot.slane %v3396_v39, 4  ;;  %3412 = vst.msk [vmem:[#allocation10 + $0x104] sm:$0xf] %vm658_vm0, %v3396_v39  ;;  %v6590_v60 = vcombine.low %v8519_v58, %v3660_v36  ;;  %v6591_v24 = vcombine.high %v8519_v58, %v3660_v36  ;;  %v6984_v36 = vld [vmem:[%s9561_s29 + $0x50] sm:$0xff]  }
 0x61a   : > { %v6985_v39 = vld [vmem:[%s9561_s29 + $0x10] sm:$0xff]  }
 0x61b   : > { %v3403_v31 = vsel %vm670_vm2, %v3399_v7, %v3400_v38  ;;  %4263 = vmatprep.subr.bf16.mxu0 %v6591_v24  ;;  %v6986_v7 = vld [vmem:[%s9561_s29 + $0x48] sm:$0xff]   ;;  %v6989_v24 = vld [vmem:[%s9561_s29] sm:$0xff]  }
 0x61c   : > { %v3404_v57 = vsel %vm9556_vm12, %v3394_v22, %v3403_v31  ;;  %v3620_v3 = vpop.permute.xlu0 %3619  ;;  %4264 = vmatpush1.bf16.msra.mxu0 %v6590_v60  ;;  %v6987_v38 = vld [vmem:[%s9561_s29 + $0x8] sm:$0xff]   ;;  %v6988_v60 = vld [vmem:[%s9561_s29 + $0x40] sm:$0xff]   ;;  %vm4770_vm12 = vcmask 740432  }
 0x61d   : > { %v3624_v59 = vrot.slane %v3620_v3, 4  ;;  %3636 = vst.msk [vmem:[#allocation10 + $0x1ac] sm:$0xf] %vm658_vm0, %v3620_v3  ;;  %v6574_v50 = vcombine.low %v8539_v11, %v3404_v57  ;;  %v6575_v16 = vcombine.high %v8539_v11, %v3404_v57  ;;  %v3330_v11 = vpop.permute.xlu1 %3329  ;;  %v4300_v31 = vld [vmem:[%s9279_s11] sm:$0x7] }
 0x61e   : > { %v3335_v23 = vrot.slane %v3330_v11, 4 }
 0x61f   : > { %v3627_v1 = vsel %vm670_vm2, %v3623_v32, %v3624_v59  ;;  %4236 = vmatprep.subr.bf16.mxu1 %v6575_v16 }
 0x620   : > { %v3628_v58 = vsel %vm9557_vm14, %v3618_v6, %v3627_v1  ;;  %v3364_v19 = vpop.permute.xlu0 %3363  ;;  %4237 = vmatpush2.bf16.msra.mxu1 %v6574_v50  ;;  %vm5061_vm14 = vcmask 1045504  }
 0x621   : > { %v3368_v21 = vrot.slane %v3364_v19, 4  ;;  %3380 = vst.msk [vmem:[#allocation10 + $0xec] sm:$0xf] %vm658_vm0, %v3364_v19  ;;  %v6588_v40 = vcombine.low %v8549_v56, %v3628_v58  ;;  %v6589_v10 = vcombine.high %v8549_v56, %v3628_v58  ;;  %v3850_v41 = vpop.permute.xlu1 %3849 }
 0x622   : > { %v3855_v61 = vrot.slane %v3850_v41, 4 }
 0x623   : > { %v3371_v18 = vsel %vm670_vm2, %v3367_v28, %v3368_v21  ;;  %4265 = vmatprep.subr.bf16.mxu0 %v6589_v10 }
 0x624   : > { %v3372_v0 = vsel %vm9558_vm13, %v3362_v45, %v3371_v18  ;;  %v3588_v30 = vpop.permute.xlu0 %3587  ;;  %4266 = vmatpush1.bf16.msra.mxu0 %v6588_v40  ;;  %v6983_v45 = vld [vmem:[%s9561_s29 + $0x18] sm:$0xff]   ;;  %vm5062_vm13 = vcmask 1046528  }
 0x625   : > { %v3592_v44 = vrot.slane %v3588_v30, 4  ;;  %3604 = vst.msk [vmem:[#allocation10 + $0x194] sm:$0xf] %vm658_vm0, %v3588_v30  ;;  %v6572_v27 = vcombine.low %v8558_v8, %v3372_v0  ;;  %v6573_v37 = vcombine.high %v8558_v8, %v3372_v0  ;;  %v3931_v32 = vpop.permute.xlu1 %3930 }
 0x627   : > { %v3595_v35 = vsel %vm670_vm2, %v3591_v4, %v3592_v44  ;;  %4238 = vmatprep.subr.bf16.mxu1 %v6573_v37 }
 0x628   : > { %v3596_v56 = vsel %vm9559_vm5, %v3586_v15, %v3595_v35  ;;  %v3332_v48 = vpop.permute.xlu0 %3331  ;;  %4239 = vmatpush2.bf16.msra.mxu1 %v6572_v27  ;;  %vm7161_vm5 = vmmov 0  }
 0x629   : > { %v3336_v22 = vrot.slane %v3332_v48, 4  ;;  %3348 = vst.msk [vmem:[#allocation10 + $0xd4] sm:$0xf] %vm658_vm0, %v3332_v48  ;;  %v6586_v5 = vcombine.low %v8567_v26, %v3596_v56  ;;  %v6587_v34 = vcombine.high %v8567_v26, %v3596_v56 }
 0x62b   : > { %v3339_v2 = vsel %vm670_vm2, %v3335_v23, %v3336_v22  ;;  %4267 = vmatprep.subr.bf16.mxu0 %v6587_v34 }
 0x62c   : > { %v3340_v8 = vsel %vm9560_vm15, %v3330_v11, %v3339_v2  ;;  %v3852_v52 = vpop.permute.xlu0 %3851  ;;  %4268 = vmatpush1.bf16.msra.mxu0 %v6586_v5 }
 0x62d   : > { %3347 = vst [vmem:[#allocation10 + $0xcc] sm:$0xff] %v3340_v8  ;;  %v3856_v42 = vrot.slane %v3852_v52, 4  ;;  %v6571_v46 = vcombine.high %v8576_v33, %v3340_v8  ;;  %v6570_v63 = vcombine.low %v8576_v33, %v3340_v8  ;;  %v6975_v33 = vld [vmem:[%s9561_s29 + $0x38] sm:$0xff]  }
 0x62f   : > { %v3860_v26 = vsel %vm670_vm2, %v3855_v61, %v3856_v42  ;;  %v3862_v51 = vsel %vm1067_vm7, %v3852_v52, %v3856_v42  ;;  %4240 = vmatprep.subr.bf16.mxu1 %v6571_v46 }
 0x630   : > { %v3861_v9 = vsel %vm1067_vm7, %v3850_v41, %v3860_v26  ;;  %3870 = vst.msk [vmem:[#allocation10 + $0x254] sm:$0xf] %vm658_vm0, %v3862_v51  ;;  %4241 = vmatpush2.bf16.msra.mxu1 %v6570_v63  ;;  %vm4301_vm0 = vcmp.ne.f32.partialorder %v4300_v31, 0.0 }
 0x631   : > { %v6602_v6 = vcombine.low %v8586_v49, %v3861_v9  ;;  %v6603_v62 = vcombine.high %v8586_v49, %v3861_v9  ;;  %6835 = vmatprep.subr.msk.bf16.mxu1 %vm670_vm2, %v6974_v13  ;;  %v6978_v49 = vld [vmem:[%s9561_s29 + $0x68] sm:$0xff]   ;;  %v4302_v1 = vsel %vm4301_vm0, 1, %v9513_v12 }
 0x632   : > { %v4310_v40 = vrot.slane %v4302_v1, %v9517_v17  ;;  %v4306_v30 = vrot.slane %v4302_v1, %v9516_v53 }
 0x633   : > { %4243 = vmatmul.mubr.bf16.vlgmr.msra.gmra.mxu1 %v6968_v14  ;;  %4283 = vmatprep.subr.bf16.mxu0 %v6603_v62 }
 0x634   : > { %4284 = vmatpush2.bf16.msra.mxu0 %v6602_v6  ;;  %6778 = vmatpush3.bf16.msra.mxu1 %v6975_v33  ;;  %vm4312_vm2 = vcmp.eq.s32.totalorder %v4310_v40, 1  ;;  %vm4311_vm7 = vcmp.eq.s32.totalorder %v4306_v30, 1 }
 0x635   : > { %6779 = vmatprep.subr.bf16.mxu1 %v6976_v47  ;;  %4702 = vmatprep.subr.bf16.mxu0 %v9513_v12  ;;  %vm6622_vm4 = vmpackc.low %vm4311_vm7, %vm4311_vm7  ;;  %vm5117_vm7 = vcmask 297984  }
 0x637   : > { %4286 = vmatmul.mubr.bf16.vlgmr.msra.gmra.mxu0 %v6973_v55 }
 0x638   : > { %6780 = vmatpush3.bf16.msra.mxu1 %v6977_v25 }
 0x639   : > { %6781 = vmatprep.subr.bf16.mxu1 %v6978_v49  ;;  %v3936_v16 = vpop.permute.xlu0 %3935 }
 0x63c   : > { %6782 = vmatpush3.bf16.msra.mxu1 %v6979_v29 }
 0x63d   : > { %6783 = vmatprep.subr.bf16.mxu1 %v6980_v43 }
 0x640   : > { %6784 = vmatpush3.bf16.msra.mxu1 %v6981_v54 }
 0x641   : > { %6785 = vmatprep.subr.bf16.mxu1 %v6982_v20 }
 0x644   : > { %6786 = vmatpush3.bf16.msra.mxu1 %v6983_v45  ;;  %v6627_v45 = vld [vmem:[%s9278_s10 + $0x30] sm:$0xff] }
 0x645   : > { %6787 = vmatprep.subr.bf16.mxu1 %v6984_v36 }
 0x648   : > { %6788 = vmatpush3.bf16.msra.mxu1 %v6985_v39  ;;  %v6999_v39 = vld [vmem:[%s9562_s13 + $0x4] ss:$8 sps:$4 sm:$0xff]  }
 0x649   : > { %6789 = vmatprep.subr.bf16.mxu1 %v6986_v7  ;;  %v6628_v7 = vld [vmem:[%s9278_s10 + $0x38] sm:$0xff]  ;;  %6640 = vmatprep.mubr.msk.bf16.mxu0 %vm2843_vm3, %v6999_v39 }
 0x64c   : > { %6790 = vmatpush3.bf16.msra.mxu1 %v6987_v38 }
 0x64d   : > { %6791 = vmatprep.subr.bf16.mxu1 %v6988_v60 }
 0x650   : > { %6792 = vmatpush3.bf16.msra.mxu1 %v6989_v24 }
 0x651   : > { %4972 = vmatprep.subr.bf16.mxu1 %v9513_v12 }
 0x6f3   : > { %v4244_v57 = vpop.f32.mrf.mxu1 }
 0x6f4   : > { %v4245_v18 = vadd.f32 %v4244_v57, %v3931_v32 }
 0x6f5   : > { %v4246_v3 = vpop.f32.mrf.mxu1 }
 0x6f6   : > { %v4247_v15 = vadd.f32 %v4246_v3, %v3931_v32 }
 0x6f7   : > { %v4248_v59 = vpop.f32.mrf.mxu1  ;;  %v4287_v50 = vpop.f32.mrf.mxu0 }
 0x6f8   : > { %v4249_v28 = vadd.f32 %v4248_v59, %v3936_v16  ;;  %v4288_v44 = vadd.f32 %v4287_v50, %v4245_v18 }
 0x6f9   : > { %v4250_v58 = vpop.f32.mrf.mxu1  ;;  %v4289_v19 = vpop.f32.mrf.mxu0 }
 0x6fa   : > { %v4290_v21 = vadd.f32 %v4289_v19, %v4247_v15  ;;  %v4251_v11 = vadd.f32 %v4250_v58, %v3936_v16  ;;  %v4296_v48 = vmax.f32 %v4288_v44, 0.0 }
 0x6fb   : > { %v4291_v10 = vpop.f32.mrf.mxu0 }
 0x6fc   : > { %v4292_v0 = vadd.f32 %v4291_v10, %v4249_v28  ;;  %v4297_v27 = vmax.f32 %v4290_v21, 0.0 }
 0x6fd   : > { %v4293_v4 = vpop.f32.mrf.mxu0 }
 0x6fe   : > { %v4294_v37 = vadd.f32 %v4293_v4, %v4251_v11  ;;  %v4298_v35 = vmax.f32 %v4292_v0, 0.0  ;;  %v4314_v23 = vsel %vm4312_vm2, %v4297_v27, 0.0 }
 0x700   : > { %v4299_v56 = vmax.f32 %v4294_v37, 0.0  ;;  %v6623_v17 = vpack.c.bf16 %v4298_v35, %v4296_v48  ;;  %v7001_v37 = vld [vmem:[%s9562_s13] ss:$8 sps:$4 sm:$0xff]  }
 0x701   : > { %v4745_v35 = vld [vmem:[%s9563_s9] sm:$0x1] }
 0x702   : > { %v4316_v22 = vsel %vm4312_vm2, %v4299_v56, 0.0  ;;  %vm4746_vm9 = vcmp.ne.f32.partialorder %v4745_v35, 0.0  ;;  %vm5057_vm2 = vcmask 498688  }
 0x703   : > { %v4318_v5 = vpack.c.bf16 %v4316_v22, %v4314_v23  ;;  %v4747_v56 = vsel %vm4746_vm9, 1, %v9513_v12 }
 0x704   : > { %v4751_v48 = vrot.slane %v4747_v56, %v9516_v53 }
 0x705   : > { %6621 = vmatprep.mubr.msk.bf16.mxu1 %vm4443_vm8, %v4318_v5  ;;  %vm5122_vm8 = vcmask 199680  }
 0x706   : > { %6624 = vmatmul.mubr.msk.bf16.vlgmr.msra.gmra.mxu1 %vm6622_vm4, %v6623_v17  ;;  %vm4752_vm11 = vcmp.eq.s32.totalorder %v4751_v48, 1  ;;  %vm5373_vm4 = vcmask 44032  }
 0x707   : > { %5374 = vst.msk [vmem:[#allocation7] sm:$0xf] %vm5373_vm4, %v9513_v12  ;;  %5375 = vst.msk [vmem:[#allocation7 + $0x4] sm:$0xf] %vm5373_vm4, %v9513_v12  ;;  %vm6235_vm4 = vcmask 72704  }
 0x7c6   : > { %v6793_v34 = vpop.f32.mrf.mxu1 }
 0x7c8   : > { %v6794_v41 = vpop.f32.mrf.mxu1 }
 0x7c9   : > { %v6795_v2 = vadd.f32 %v6794_v41, %v6793_v34 }
 0x7ca   : > { %v6796_v8 = vpop.f32.mrf.mxu1 }
 0x7cb   : > { %v6743_v52 = vpack.c.bf16 %v6795_v2, %v6795_v2 }
 0x7cc   : > { %v6797_v61 = vpop.f32.mrf.mxu1 }
 0x7cd   : > { %4500 = vst.msk [vmem:[#allocation4] sm:$0xf] %vm4499_vm1, %v6743_v52  ;;  %v6798_v42 = vadd.f32 %v6797_v61, %v6796_v8 }
 0x7cf   : > { %v6744_v46 = vpack.c.bf16 %v6798_v42, %v6798_v42 }
 0x7d1   : > { %4501 = vst.msk [vmem:[#allocation4 + $0x4] sm:$0xf] %vm4499_vm1, %v6744_v46 }
 0x7d4   : > { %v4502_v63 = vld [vmem:[#allocation4] sm:$0xf] }
 0x7d5   : > { %v4579_v13 = vld [vmem:[#allocation4] sm:$0xf]  ;;  %4505 = vst.msk [vmem:[#allocation10] sm:$0xf] %vm4504_vm6, %v4502_v63 }
 0x7d6   : > { %4583 = vrot.lane.b32.xlu1 %v4579_v13, %s9450_s30  ;;  %v4567_v14 = vld [vmem:[#allocation4] sm:$0xf] }
 0x7d7   : > { %v4555_v33 = vld [vmem:[#allocation4] sm:$0xf] }
 0x7d8   : > { %v4503_v26 = vld [vmem:[#allocation4 + $0x4] sm:$0xf]  ;;  %v4543_v62 = vld [vmem:[#allocation4] sm:$0xf] }
 0x7d9   : > { %v4580_v51 = vld [vmem:[#allocation4 + $0x4] sm:$0xf]  ;;  %4506 = vst.msk [vmem:[#allocation10 + $0xc] sm:$0xf] %vm4504_vm6, %v4503_v26  ;;  %v4531_v55 = vld [vmem:[#allocation4] sm:$0xf] }
 0x7da   : > { %4585 = vrot.lane.b32.xlu0 %v4580_v51, %s9450_s30  ;;  %4571 = vrot.lane.b32.xlu1 %v4567_v14, %s9451_s4  ;;  %v4568_v9 = vld [vmem:[#allocation4 + $0x4] sm:$0xf]  ;;  %v4519_v49 = vld [vmem:[#allocation4] sm:$0xf] }
 0x7db   : > { %v4556_v6 = vld [vmem:[#allocation4 + $0x4] sm:$0xf]  ;;  %v4507_v43 = vld [vmem:[#allocation4] sm:$0xf] }
 0x7dc   : > { %v4544_v47 = vld [vmem:[#allocation4 + $0x4] sm:$0xf]  ;;  %v4591_v20 = vld [vmem:[#allocation4] sm:$0xf] }
 0x7dd   : > { %v4532_v25 = vld [vmem:[#allocation4 + $0x4] sm:$0xf] }
 0x7de   : > { %4573 = vrot.lane.b32.xlu0 %v4568_v9, %s9451_s4  ;;  %4559 = vrot.lane.b32.xlu1 %v4555_v33, %s7155_s27  ;;  %v4520_v29 = vld [vmem:[#allocation4 + $0x4] sm:$0xf] }
 0x7df   : > { %v4508_v54 = vld [vmem:[#allocation4 + $0x4] sm:$0xf] }
 0x7e0   : > { %v4592_v36 = vld [vmem:[#allocation4 + $0x4] sm:$0xf]  ;;  %v6997_v44 = vld [vmem:[#allocation10] ss:$12 sps:$4 sm:$0xff]  }
 0x7e2   : > { %4561 = vrot.lane.b32.xlu0 %v4556_v6, %s7155_s27  ;;  %4547 = vrot.lane.b32.xlu1 %v4543_v62, %s7156_s3 }
 0x7e6   : > { %4549 = vrot.lane.b32.xlu0 %v4544_v47, %s7156_s3  ;;  %4535 = vrot.lane.b32.xlu1 %v4531_v55, %s7157_s5 }
 0x7ea   : > { %4537 = vrot.lane.b32.xlu0 %v4532_v25, %s7157_s5  ;;  %4523 = vrot.lane.b32.xlu1 %v4519_v49, %s9454_s24 }
 0x7ee   : > { %4525 = vrot.lane.b32.xlu0 %v4520_v29, %s9454_s24  ;;  %4511 = vrot.lane.b32.xlu1 %v4507_v43, %s9455_s23 }
 0x7f2   : > { %4513 = vrot.lane.b32.xlu0 %v4508_v54, %s9455_s23  ;;  %4595 = vrot.lane.b32.xlu1 %v4591_v20, %s9449_s26 }
 0x7f6   : > { %4597 = vrot.lane.b32.xlu0 %v4592_v36, %s9449_s26  ;;  %4628 = vperm.xlu1 %6916, %v6627_v45  }
 0x7fa   : > { %4633 = vperm.xlu0 %6915, %v6628_v7  }
 0x848   : > { %v4584_v38 = vpop.permute.xlu1 %4583 }
 0x849   : > { %4589 = vst.msk [vmem:[#allocation10 + $0xa8] sm:$0xf] %vm4504_vm6, %v4584_v38  ;;  %v6643_v38 = vld [vmem:[%s9278_s10 + $0x40] sm:$0xff] }
 0x84c   : > { %v4586_v60 = vpop.permute.xlu0 %4585  ;;  %v4572_v24 = vpop.permute.xlu1 %4571 }
 0x84d   : > { %4590 = vst.msk [vmem:[#allocation10 + $0xb4] sm:$0xf] %vm4504_vm6, %v4586_v60  ;;  %4577 = vst.msk [vmem:[#allocation10 + $0x90] sm:$0xf] %vm4504_vm6, %v4572_v24  ;;  %v7011_v24 = vld [vmem:[%s9564_s25 + $0x4] ss:$8 sps:$4 sm:$0xff]  }
 0x84e   : > { %6656 = vmatprep.mubr.msk.bf16.mxu1 %vm2843_vm3, %v7011_v24 }
 0x850   : > { %v4574_v31 = vpop.permute.xlu0 %4573  ;;  %v4560_v57 = vpop.permute.xlu1 %4559 }
 0x851   : > { %4578 = vst.msk [vmem:[#allocation10 + $0x9c] sm:$0xf] %vm4504_vm6, %v4574_v31  ;;  %4565 = vst.msk [vmem:[#allocation10 + $0x78] sm:$0xf] %vm4504_vm6, %v4560_v57  ;;  %v6644_v31 = vld [vmem:[%s9278_s10 + $0x48] sm:$0xff] }
 0x852   : > { %v7014_v57 = vld [vmem:[%s9566_s12 + $0x18] sm:$0x7f]  }
 0x854   : > { %v4562_v3 = vpop.permute.xlu0 %4561  ;;  %v4548_v32 = vpop.permute.xlu1 %4547  ;;  %v6990_v59 = vld [vmem:[#allocation10 + $0xa8] ss:$12 sps:$4 sm:$0xff]  }
 0x855   : > { %4566 = vst.msk [vmem:[#allocation10 + $0x84] sm:$0xf] %vm4504_vm6, %v4562_v3  ;;  %4553 = vst.msk [vmem:[#allocation10 + $0x60] sm:$0xf] %vm4504_vm6, %v4548_v32  ;;  %4703 = vmatpush1.bf16.msra.mxu0 %v6990_v59  ;;  %v7159_v3 = vmov 0.0   ;;  %v7160_v32 = vmov 65535  }
 0x856   : > { %4704 = vmatprep.subr.bf16.mxu0 %v9513_v12  ;;  %v5063_v59 = vsel %vm5061_vm14, 4294967295, %v7160_v32  ;;  %vm5707_vm14 = vcmask 134144  }
 0x858   : > { %v4550_v50 = vpop.permute.xlu0 %4549  ;;  %v4536_v16 = vpop.permute.xlu1 %4535  ;;  %v6991_v15 = vld [vmem:[#allocation10 + $0x90] ss:$12 sps:$4 sm:$0xff]  }
 0x859   : > { %4554 = vst.msk [vmem:[#allocation10 + $0x6c] sm:$0xf] %vm4504_vm6, %v4550_v50  ;;  %4541 = vst.msk [vmem:[#allocation10 + $0x48] sm:$0xf] %vm4504_vm6, %v4536_v16  ;;  %4705 = vmatpush1.bf16.msra.mxu0 %v6991_v15  ;;  %v8915_v50 = vsel %vm5062_vm13, %v5063_v59, 0  ;;  %vm5712_vm13 = vcmask 68608  }
 0x85a   : > { %4706 = vmatprep.subr.bf16.mxu0 %v9513_v12  ;;  %v5066_v16 = vand.u32 %v7014_v57, %v8915_v50 }
 0x85c   : > { %v4538_v1 = vpop.permute.xlu0 %4537  ;;  %v4524_v58 = vpop.permute.xlu1 %4523  ;;  %v6992_v19 = vld [vmem:[#allocation10 + $0x78] ss:$12 sps:$4 sm:$0xff]  }
 0x85d   : > { %4542 = vst.msk [vmem:[#allocation10 + $0x54] sm:$0xf] %vm4504_vm6, %v4538_v1  ;;  %4529 = vst.msk [vmem:[#allocation10 + $0x30] sm:$0xf] %vm4504_vm6, %v4524_v58  ;;  %4707 = vmatpush1.bf16.msra.mxu0 %v6992_v19 }
 0x85e   : > { %4708 = vmatprep.subr.bf16.mxu0 %v9513_v12 }
 0x860   : > { %v4526_v28 = vpop.permute.xlu0 %4525  ;;  %v4512_v21 = vpop.permute.xlu1 %4511  ;;  %v6993_v40 = vld [vmem:[#allocation10 + $0x60] ss:$12 sps:$4 sm:$0xff]  }
 0x861   : > { %4530 = vst.msk [vmem:[#allocation10 + $0x3c] sm:$0xf] %vm4504_vm6, %v4526_v28  ;;  %4517 = vst.msk [vmem:[#allocation10 + $0x18] sm:$0xf] %vm4504_vm6, %v4512_v21  ;;  %4709 = vmatpush1.bf16.msra.mxu0 %v6993_v40 }
 0x862   : > { %4710 = vmatprep.subr.bf16.mxu0 %v9513_v12 }
 0x864   : > { %v4514_v10 = vpop.permute.xlu0 %4513  ;;  %v4596_v18 = vpop.permute.xlu1 %4595  ;;  %v6994_v11 = vld [vmem:[#allocation10 + $0x48] ss:$12 sps:$4 sm:$0xff]  }
 0x865   : > { %4518 = vst.msk [vmem:[#allocation10 + $0x24] sm:$0xf] %vm4504_vm6, %v4514_v10  ;;  %4601 = vst.msk [vmem:[#allocation10 + $0xc0] sm:$0xf] %vm4504_vm6, %v4596_v18  ;;  %4711 = vmatpush1.bf16.msra.mxu0 %v6994_v11 }
 0x866   : > { %4712 = vmatprep.subr.bf16.mxu0 %v9513_v12 }
 0x868   : > { %v4598_v0 = vpop.permute.xlu0 %4597  ;;  %v6995_v30 = vld [vmem:[#allocation10 + $0x30] ss:$12 sps:$4 sm:$0xff]  }
 0x869   : > { %4602 = vst.msk [vmem:[#allocation10 + $0xcc] sm:$0xf] %vm4504_vm6, %v4598_v0  ;;  %4713 = vmatpush1.bf16.msra.mxu0 %v6995_v30 }
 0x86a   : > { %4714 = vmatprep.subr.bf16.mxu0 %v9513_v12 }
 0x86c   : > { %v6996_v4 = vld [vmem:[#allocation10 + $0x18] ss:$12 sps:$4 sm:$0xff]  }
 0x86d   : > { %4715 = vmatpush1.bf16.msra.mxu0 %v6996_v4 }
 0x86e   : > { %4716 = vmatprep.subr.bf16.mxu0 %v9513_v12 }
 0x870   : > { %v6998_v27 = vld [vmem:[#allocation10 + $0xc0] ss:$12 sps:$4 sm:$0xff]  }
 0x871   : > { %4717 = vmatpush1.bf16.msra.mxu0 %v6997_v44  ;;  %v4629_v23 = vpop.permute.xlu1 %4628 }
 0x872   : > { %4732 = vmatprep.subr.bf16.mxu0 %v9513_v12 }
 0x875   : > { %4733 = vmatpush2.bf16.msra.mxu0 %v6998_v27  ;;  %v4634_v41 = vpop.permute.xlu0 %4633 }
 0x876   : > { %6810 = vmatprep.subr.bf16.mxu0 %v7159_v3 }
 0x878   : > { %4735 = vmatmul.mubr.bf16.vlgmr.msra.gmra.mxu0 %v7001_v37 }
 0x879   : > { %6811 = vmatpush3.bf16.msra.mxu0 %v5066_v16  ;;  %6818 = vmatprep.mubr.msk.bf16.mxu0 %vm7161_vm5, %v7159_v3 }
 0x87a   : > { %6812 = vmatprep.subr.bf16.mxu0 %v7159_v3 }
 0x938   : > { %v4736_v22 = vpop.f32.mrf.mxu0 }
 0x939   : > { %v4737_v5 = vadd.f32 %v4736_v22, %v4629_v23 }
 0x93a   : > { %v4738_v17 = vpop.f32.mrf.mxu0 }
 0x93b   : > { %v4743_v34 = vmax.f32 %v4737_v5, 0.0 }
 0x93c   : > { %v4739_v2 = vpop.f32.mrf.mxu0 }
 0x93d   : > { %v4753_v8 = vsel %vm4752_vm11, %v4743_v34, 0.0  ;;  %v4740_v52 = vadd.f32 %v4739_v2, %v4634_v41 }
 0x93e   : > { %v6745_v61 = vpack.c.bf16 %v4753_v8, %v4753_v8  ;;  %v4741_v42 = vpop.f32.mrf.mxu0  ;;  %v7015_v8 = vld [vmem:[%s9566_s12 + $0x10] sm:$0xff]  }
 0x93f   : > { %v4744_v46 = vmax.f32 %v4740_v52, 0.0  ;;  %6813 = vmatpush3.bf16.msra.mxu0 %v7015_v8  ;;  %v7016_v52 = vld [vmem:[%s9566_s12 + $0x8] sm:$0xff]   ;;  %v5015_v42 = vld [vmem:[%s9563_s9] sm:$0x1] }
 0x940   : > { %4764 = vrot.lane.b32.xlu1 %v6745_v61, %s7158_s7  ;;  %6814 = vmatprep.subr.bf16.mxu0 %v7159_v3  ;;  %v7017_v61 = vld [vmem:[%s9566_s12] sm:$0xff]   ;;  %vm5016_vm15 = vcmp.ne.f32.partialorder %v5015_v42, 0.0 }
 0x941   : > { %v4754_v63 = vsel %vm4752_vm11, %v4744_v46, 0.0  ;;  %v5017_v46 = vsel %vm5016_vm15, 1, %v9513_v12 }
 0x942   : > { %v6746_v13 = vpack.c.bf16 %v4754_v63, %v4754_v63 }
 0x943   : > { %6815 = vmatpush3.bf16.msra.mxu0 %v7016_v52 }
 0x944   : > { %4766 = vrot.lane.b32.xlu0 %v6746_v13, %s7158_s7  ;;  %6816 = vmatprep.subr.bf16.mxu0 %v7159_v3  ;;  %s9574_s7 = sld [smem:[#allocation45_spill]] }
 0x947   : > { %6817 = vmatpush3.bf16.msra.mxu0 %v7017_v61 }
 0x948   : > { %5320 = vmatprep.subr.bf16.mxu0 %v9513_v12 }
 0x9b2   : > { %v4765_v26 = vpop.permute.xlu1 %4764 }
 0x9b3   : > { %4771 = vst.msk [vmem:[#allocation5] sm:$0xf] %vm4770_vm12, %v4765_v26 }
 0x9b6   : > { %v4767_v51 = vpop.permute.xlu0 %4766 }
 0x9b7   : > { %4772 = vst.msk [vmem:[#allocation5 + $0x4] sm:$0xf] %vm4770_vm12, %v4767_v51  ;;  %v5021_v51 = vrot.slane %v5017_v46, %v9516_v53  ;;  %vm5651_vm12 = vcmask 105472  }
 0x9b9   : > { %vm5022_vm0 = vcmp.eq.s32.totalorder %v5021_v51, 1 }
 0x9ba   : > { %v4773_v14 = vld [vmem:[#allocation5] sm:$0xf] }
 0x9bb   : > { %v4849_v9 = vld [vmem:[#allocation5] sm:$0xf]  ;;  %4775 = vst.msk [vmem:[#allocation10] sm:$0xf] %vm4504_vm6, %v4773_v14 }
 0x9bc   : > { %4853 = vrot.lane.b32.xlu1 %v4849_v9, %s9450_s30  ;;  %v4837_v62 = vld [vmem:[#allocation5] sm:$0xf] }
 0x9bd   : > { %v4825_v55 = vld [vmem:[#allocation5] sm:$0xf] }
 0x9be   : > { %v4774_v33 = vld [vmem:[#allocation5 + $0x4] sm:$0xf]  ;;  %v4813_v49 = vld [vmem:[#allocation5] sm:$0xf] }
 0x9bf   : > { %v4850_v6 = vld [vmem:[#allocation5 + $0x4] sm:$0xf]  ;;  %4776 = vst.msk [vmem:[#allocation10 + $0xc] sm:$0xf] %vm4504_vm6, %v4774_v33  ;;  %v4801_v43 = vld [vmem:[#allocation5] sm:$0xf] }
 0x9c0   : > { %4855 = vrot.lane.b32.xlu0 %v4850_v6, %s9450_s30  ;;  %4841 = vrot.lane.b32.xlu1 %v4837_v62, %s9451_s4  ;;  %v4838_v47 = vld [vmem:[#allocation5 + $0x4] sm:$0xf]  ;;  %v4789_v20 = vld [vmem:[#allocation5] sm:$0xf]  ;;  %s9579_s30 = sld [smem:[#allocation47_spill]] }
 0x9c1   : > { %v4826_v25 = vld [vmem:[#allocation5 + $0x4] sm:$0xf]  ;;  %v4777_v36 = vld [vmem:[#allocation5] sm:$0xf] }
 0x9c2   : > { %v4814_v29 = vld [vmem:[#allocation5 + $0x4] sm:$0xf]  ;;  %v4861_v7 = vld [vmem:[#allocation5] sm:$0xf] }
 0x9c3   : > { %v4802_v54 = vld [vmem:[#allocation5 + $0x4] sm:$0xf] }
 0x9c4   : > { %4843 = vrot.lane.b32.xlu0 %v4838_v47, %s9451_s4  ;;  %4829 = vrot.lane.b32.xlu1 %v4825_v55, %s7155_s27  ;;  %v4790_v45 = vld [vmem:[#allocation5 + $0x4] sm:$0xf]  ;;  %s9570_s4 = sld [smem:[#allocation44_spill]] }
 0x9c5   : > { %v4778_v39 = vld [vmem:[#allocation5 + $0x4] sm:$0xf] }
 0x9c6   : > { %v4862_v60 = vld [vmem:[#allocation5 + $0x4] sm:$0xf]  ;;  %v7009_v34 = vld [vmem:[#allocation10] ss:$12 sps:$4 sm:$0xff]  }
 0x9c8   : > { %4831 = vrot.lane.b32.xlu0 %v4826_v25, %s7155_s27  ;;  %4817 = vrot.lane.b32.xlu1 %v4813_v49, %s7156_s3 }
 0x9cc   : > { %4819 = vrot.lane.b32.xlu0 %v4814_v29, %s7156_s3  ;;  %4805 = vrot.lane.b32.xlu1 %v4801_v43, %s7157_s5 }
 0x9d0   : > { %4807 = vrot.lane.b32.xlu0 %v4802_v54, %s7157_s5  ;;  %4793 = vrot.lane.b32.xlu1 %v4789_v20, %s9454_s24  ;;  %s9565_s5 = smov %s9564_s25  ;;  %s7163_s25 = smov 122  }
 0x9d1   : > { %v7013_v2 = vld [vmem:[%s9565_s5] ss:$8 sps:$4 sm:$0xff]  }
 0x9d4   : > { %4795 = vrot.lane.b32.xlu0 %v4790_v45, %s9454_s24  ;;  %4781 = vrot.lane.b32.xlu1 %v4777_v36, %s9455_s23 }
 0x9d8   : > { %4783 = vrot.lane.b32.xlu0 %v4778_v39, %s9455_s23  ;;  %4865 = vrot.lane.b32.xlu1 %v4861_v7, %s9449_s26 }
 0x9dc   : > { %4867 = vrot.lane.b32.xlu0 %v4862_v60, %s9449_s26  ;;  %4898 = vperm.xlu1 %6916, %v6643_v38   ;;  %s7168_s26 = smov 4  }
 0x9e0   : > { %4903 = vperm.xlu0 %6915, %v6644_v31  }
 0xa2e   : > { %v4854_v15 = vpop.permute.xlu1 %4853 }
 0xa2f   : > { %4859 = vst.msk [vmem:[#allocation10 + $0xa8] sm:$0xf] %vm4504_vm6, %v4854_v15 }
 0xa32   : > { %v4856_v1 = vpop.permute.xlu0 %4855  ;;  %v4842_v58 = vpop.permute.xlu1 %4841 }
 0xa33   : > { %4860 = vst.msk [vmem:[#allocation10 + $0xb4] sm:$0xf] %vm4504_vm6, %v4856_v1  ;;  %4847 = vst.msk [vmem:[#allocation10 + $0x90] sm:$0xf] %vm4504_vm6, %v4842_v58 }
 0xa36   : > { %v4844_v19 = vpop.permute.xlu0 %4843  ;;  %v4830_v28 = vpop.permute.xlu1 %4829 }
 0xa37   : > { %4848 = vst.msk [vmem:[#allocation10 + $0x9c] sm:$0xf] %vm4504_vm6, %v4844_v19  ;;  %4835 = vst.msk [vmem:[#allocation10 + $0x78] sm:$0xf] %vm4504_vm6, %v4830_v28 }
 0xa3a   : > { %v4832_v21 = vpop.permute.xlu0 %4831  ;;  %v4818_v40 = vpop.permute.xlu1 %4817  ;;  %v7002_v10 = vld [vmem:[#allocation10 + $0xa8] ss:$12 sps:$4 sm:$0xff]  }
 0xa3b   : > { %4836 = vst.msk [vmem:[#allocation10 + $0x84] sm:$0xf] %vm4504_vm6, %v4832_v21  ;;  %4823 = vst.msk [vmem:[#allocation10 + $0x60] sm:$0xf] %vm4504_vm6, %v4818_v40  ;;  %4973 = vmatpush1.bf16.msra.mxu1 %v7002_v10 }
 0xa3c   : > { %4974 = vmatprep.subr.bf16.mxu1 %v9513_v12 }
 0xa3e   : > { %v4820_v18 = vpop.permute.xlu0 %4819  ;;  %v4806_v11 = vpop.permute.xlu1 %4805  ;;  %v7003_v0 = vld [vmem:[#allocation10 + $0x90] ss:$12 sps:$4 sm:$0xff]  }
 0xa3f   : > { %4824 = vst.msk [vmem:[#allocation10 + $0x6c] sm:$0xf] %vm4504_vm6, %v4820_v18  ;;  %4811 = vst.msk [vmem:[#allocation10 + $0x48] sm:$0xf] %vm4504_vm6, %v4806_v11  ;;  %4975 = vmatpush1.bf16.msra.mxu1 %v7003_v0  ;;  %v6664_v18 = vld [vmem:[%s9278_s10 + $0x50] sm:$0xff] }
 0xa40   : > { %4976 = vmatprep.subr.bf16.mxu1 %v9513_v12  ;;  %v7027_v0 = vld [vmem:[%s9567_s15 + $0x4] ss:$8 sps:$4 sm:$0xff]  }
 0xa42   : > { %v4808_v30 = vpop.permute.xlu0 %4807  ;;  %v4794_v4 = vpop.permute.xlu1 %4793  ;;  %v7004_v44 = vld [vmem:[#allocation10 + $0x78] ss:$12 sps:$4 sm:$0xff]  }
 0xa43   : > { %4812 = vst.msk [vmem:[#allocation10 + $0x54] sm:$0xf] %vm4504_vm6, %v4808_v30  ;;  %4799 = vst.msk [vmem:[#allocation10 + $0x30] sm:$0xf] %vm4504_vm6, %v4794_v4  ;;  %4977 = vmatpush1.bf16.msra.mxu1 %v7004_v44  ;;  %v6665_v30 = vld [vmem:[%s9278_s10 + $0x58] sm:$0xff] }
 0xa44   : > { %4978 = vmatprep.subr.bf16.mxu1 %v9513_v12 }
 0xa46   : > { %v4796_v27 = vpop.permute.xlu0 %4795  ;;  %v4782_v37 = vpop.permute.xlu1 %4781  ;;  %v7005_v35 = vld [vmem:[#allocation10 + $0x60] ss:$12 sps:$4 sm:$0xff]  }
 0xa47   : > { %4800 = vst.msk [vmem:[#allocation10 + $0x3c] sm:$0xf] %vm4504_vm6, %v4796_v27  ;;  %4787 = vst.msk [vmem:[#allocation10 + $0x18] sm:$0xf] %vm4504_vm6, %v4782_v37  ;;  %4979 = vmatpush1.bf16.msra.mxu1 %v7005_v35 }
 0xa48   : > { %4980 = vmatprep.subr.bf16.mxu1 %v9513_v12 }
 0xa4a   : > { %v4784_v56 = vpop.permute.xlu0 %4783  ;;  %v4866_v48 = vpop.permute.xlu1 %4865  ;;  %v7006_v23 = vld [vmem:[#allocation10 + $0x48] ss:$12 sps:$4 sm:$0xff]  }
 0xa4b   : > { %4788 = vst.msk [vmem:[#allocation10 + $0x24] sm:$0xf] %vm4504_vm6, %v4784_v56  ;;  %4871 = vst.msk [vmem:[#allocation10 + $0xc0] sm:$0xf] %vm4504_vm6, %v4866_v48  ;;  %4981 = vmatpush1.bf16.msra.mxu1 %v7006_v23 }
 0xa4c   : > { %4982 = vmatprep.subr.bf16.mxu1 %v9513_v12 }
 0xa4e   : > { %v4868_v22 = vpop.permute.xlu0 %4867  ;;  %v7007_v5 = vld [vmem:[#allocation10 + $0x30] ss:$12 sps:$4 sm:$0xff]  }
 0xa4f   : > { %4872 = vst.msk [vmem:[#allocation10 + $0xcc] sm:$0xf] %vm4504_vm6, %v4868_v22  ;;  %4983 = vmatpush1.bf16.msra.mxu1 %v7007_v5 }
 0xa50   : > { %4984 = vmatprep.subr.bf16.mxu1 %v9513_v12 }
 0xa52   : > { %v7008_v17 = vld [vmem:[#allocation10 + $0x18] ss:$12 sps:$4 sm:$0xff]  }
 0xa53   : > { %4985 = vmatpush1.bf16.msra.mxu1 %v7008_v17 }
 0xa54   : > { %4986 = vmatprep.subr.bf16.mxu1 %v9513_v12 }
 0xa56   : > { %v7010_v41 = vld [vmem:[#allocation10 + $0xc0] ss:$12 sps:$4 sm:$0xff]  }
 0xa57   : > { %4987 = vmatpush1.bf16.msra.mxu1 %v7009_v34  ;;  %v4899_v63 = vpop.permute.xlu1 %4898 }
 0xa58   : > { %5002 = vmatprep.subr.bf16.mxu1 %v9513_v12 }
 0xa5b   : > { %5003 = vmatpush2.bf16.msra.mxu1 %v7010_v41  ;;  %v4904_v9 = vpop.permute.xlu0 %4903 }
 0xa5c   : > { %5590 = vmatprep.subr.bf16.mxu1 %v9513_v12 }
 0xa5e   : > { %5005 = vmatmul.mubr.bf16.vlgmr.msra.gmra.mxu1 %v7013_v2 }
 0xb1e   : > { %v5006_v13 = vpop.f32.mrf.mxu1 }
 0xb1f   : > { %v5007_v26 = vadd.f32 %v5006_v13, %v4899_v63 }
 0xb20   : > { %v5008_v14 = vpop.f32.mrf.mxu1 }
 0xb21   : > { %v5013_v6 = vmax.f32 %v5007_v26, 0.0 }
 0xb22   : > { %v5009_v33 = vpop.f32.mrf.mxu1 }
 0xb23   : > { %v5010_v62 = vadd.f32 %v5009_v33, %v4904_v9  ;;  %v5023_v25 = vsel %vm5022_vm0, %v5013_v6, 0.0  ;;  %v7029_v33 = vld [vmem:[%s9567_s15] ss:$8 sps:$4 sm:$0xff]  }
 0xb24   : > { %v5011_v47 = vpop.f32.mrf.mxu1  ;;  %v5363_v6 = vld [vmem:[%s9568_s19] sm:$0x1] }
 0xb25   : > { %v5014_v55 = vmax.f32 %v5010_v62, 0.0  ;;  %vm5364_vm1 = vcmp.ne.f32.partialorder %v5363_v6, 0.0 }
 0xb26   : > { %v5365_v62 = vsel %vm5364_vm1, 1, %v9513_v12  ;;  %vm6325_vm1 = vcmask 64512  }
 0xb27   : > { %v5024_v49 = vsel %vm5022_vm0, %v5014_v55, 0.0  ;;  %v5369_v47 = vrot.slane %v5365_v62, %v9516_v53 }
 0xb28   : > { %v5025_v29 = vpack.c.bf16 %v5024_v49, %v5023_v25 }
 0xb29   : > { %vm5370_vm6 = vcmp.eq.s32.totalorder %v5369_v47, 1 }
 0xb2a   : > { %6819 = vmatmul.mubr.msk.bf16.vlgmr.msra.gmra.mxu0 %vm5057_vm2, %v5025_v29  ;;  %vm5978_vm2 = vcmask 101408  }
 0xb2b   : > { %6677 = vmatprep.mubr.msk.bf16.mxu0 %vm2843_vm3, %v7027_v0 }
 0xbea   : > { %v5102_v43 = vpop.f32.mrf.mxu0 }
 0xbeb   : > { %v6747_v54 = vpack.c.bf16 %v5102_v43, %v5102_v43 }
 0xbec   : > { %v6820_v20 = vpop.f32.mrf.mxu0 }
 0xbed   : > { %5118 = vst.msk [vmem:[#allocation6] sm:$0xf] %vm5117_vm7, %v6747_v54 }
 0xbee   : > { %v5105_v45 = vpop.f32.mrf.mxu0 }
 0xbef   : > { %v6748_v36 = vpack.c.bf16 %v5105_v45, %v5105_v45 }
 0xbf0   : > { %v6821_v39 = vpop.f32.mrf.mxu0 }
 0xbf1   : > { %5119 = vst.msk [vmem:[#allocation6 + $0x4] sm:$0xf] %vm5117_vm7, %v6748_v36 }
 0xbf4   : > { %v5120_v7 = vld [vmem:[#allocation6] sm:$0xf] }
 0xbf5   : > { %v5197_v38 = vld [vmem:[#allocation6] sm:$0xf]  ;;  %5123 = vst.msk [vmem:[#allocation10] sm:$0xf] %vm5122_vm8, %v5120_v7 }
 0xbf6   : > { %5201 = vrot.lane.b32.xlu1 %v5197_v38, %s7155_s27  ;;  %v5185_v24 = vld [vmem:[#allocation6] sm:$0xf] }
 0xbf7   : > { %v5173_v57 = vld [vmem:[#allocation6] sm:$0xf] }
 0xbf8   : > { %v5121_v60 = vld [vmem:[#allocation6 + $0x4] sm:$0xf]  ;;  %v5161_v59 = vld [vmem:[#allocation6] sm:$0xf] }
 0xbf9   : > { %v5198_v31 = vld [vmem:[#allocation6 + $0x4] sm:$0xf]  ;;  %5124 = vst.msk [vmem:[#allocation10 + $0xc] sm:$0xf] %vm5122_vm8, %v5121_v60  ;;  %v5149_v15 = vld [vmem:[#allocation6] sm:$0xf] }
 0xbfa   : > { %5189 = vrot.lane.b32.xlu1 %v5185_v24, %s7156_s3  ;;  %5203 = vrot.lane.b32.xlu0 %v5198_v31, %s7155_s27  ;;  %v5186_v32 = vld [vmem:[#allocation6 + $0x4] sm:$0xf]  ;;  %v5137_v58 = vld [vmem:[#allocation6] sm:$0xf] }
 0xbfb   : > { %v5174_v16 = vld [vmem:[#allocation6 + $0x4] sm:$0xf]  ;;  %v5125_v28 = vld [vmem:[#allocation6] sm:$0xf] }
 0xbfc   : > { %v5162_v1 = vld [vmem:[#allocation6 + $0x4] sm:$0xf]  ;;  %v5209_v40 = vld [vmem:[#allocation6] sm:$0xf] }
 0xbfd   : > { %v5150_v19 = vld [vmem:[#allocation6 + $0x4] sm:$0xf] }
 0xbfe   : > { %5177 = vrot.lane.b32.xlu1 %v5173_v57, %s7162_s2  ;;  %5191 = vrot.lane.b32.xlu0 %v5186_v32, %s7156_s3  ;;  %v5138_v21 = vld [vmem:[#allocation6 + $0x4] sm:$0xf] }
 0xbff   : > { %v5126_v10 = vld [vmem:[#allocation6 + $0x4] sm:$0xf] }
 0xc00   : > { %v5210_v11 = vld [vmem:[#allocation6 + $0x4] sm:$0xf]  ;;  %v7025_v14 = vld [vmem:[#allocation10] ss:$12 sps:$4 sm:$0xff]  }
 0xc02   : > { %5165 = vrot.lane.b32.xlu1 %v5161_v59, %s7163_s25  ;;  %5179 = vrot.lane.b32.xlu0 %v5174_v16, %s7162_s2 }
 0xc06   : > { %5153 = vrot.lane.b32.xlu1 %v5149_v15, %s7164_s22  ;;  %5167 = vrot.lane.b32.xlu0 %v5162_v1, %s7163_s25 }
 0xc0a   : > { %5141 = vrot.lane.b32.xlu1 %v5137_v58, %s9454_s24  ;;  %5155 = vrot.lane.b32.xlu0 %v5150_v19, %s7164_s22 }
 0xc0e   : > { %5129 = vrot.lane.b32.xlu1 %v5125_v28, %s9455_s23  ;;  %5143 = vrot.lane.b32.xlu0 %v5138_v21, %s9454_s24 }
 0xc12   : > { %5213 = vrot.lane.b32.xlu1 %v5209_v40, %s7165_s0  ;;  %5131 = vrot.lane.b32.xlu0 %v5126_v10, %s9455_s23 }
 0xc16   : > { %5246 = vperm.xlu1 %6916, %v6664_v18   ;;  %5215 = vrot.lane.b32.xlu0 %v5210_v11, %s7165_s0 }
 0xc1a   : > { %5251 = vperm.xlu0 %6915, %v6665_v30  }
 0xc68   : > { %v5202_v4 = vpop.permute.xlu1 %5201 }
 0xc69   : > { %5207 = vst.msk [vmem:[#allocation10 + $0xa8] sm:$0xf] %vm5122_vm8, %v5202_v4 }
 0xc6c   : > { %v5190_v44 = vpop.permute.xlu1 %5189  ;;  %v5204_v27 = vpop.permute.xlu0 %5203 }
 0xc6d   : > { %5195 = vst.msk [vmem:[#allocation10 + $0x90] sm:$0xf] %vm5122_vm8, %v5190_v44  ;;  %5208 = vst.msk [vmem:[#allocation10 + $0xb4] sm:$0xf] %vm5122_vm8, %v5204_v27  ;;  %v6680_v44 = vld [vmem:[%s9278_s10 + $0x60] sm:$0xff] }
 0xc70   : > { %v5178_v37 = vpop.permute.xlu1 %5177  ;;  %v5192_v35 = vpop.permute.xlu0 %5191 }
 0xc71   : > { %5183 = vst.msk [vmem:[#allocation10 + $0x78] sm:$0xf] %vm5122_vm8, %v5178_v37  ;;  %5196 = vst.msk [vmem:[#allocation10 + $0x9c] sm:$0xf] %vm5122_vm8, %v5192_v35  ;;  %v7039_v37 = vld [vmem:[%s9569_s14 + $0x4] ss:$8 sps:$4 sm:$0xff]  }
 0xc72   : > { %v6681_v35 = vld [vmem:[%s9278_s10 + $0x68] sm:$0xff]  ;;  %6693 = vmatprep.mubr.msk.bf16.mxu1 %vm2843_vm3, %v7039_v37 }
 0xc74   : > { %v5166_v56 = vpop.permute.xlu1 %5165  ;;  %v5180_v48 = vpop.permute.xlu0 %5179  ;;  %v7018_v23 = vld [vmem:[#allocation10 + $0xa8] ss:$12 sps:$4 sm:$0xff]  }
 0xc75   : > { %5171 = vst.msk [vmem:[#allocation10 + $0x60] sm:$0xf] %vm5122_vm8, %v5166_v56  ;;  %5184 = vst.msk [vmem:[#allocation10 + $0x84] sm:$0xf] %vm5122_vm8, %v5180_v48  ;;  %5321 = vmatpush1.bf16.msra.mxu0 %v7018_v23 }
 0xc76   : > { %5322 = vmatprep.subr.bf16.mxu0 %v9513_v12 }
 0xc78   : > { %v5154_v22 = vpop.permute.xlu1 %5153  ;;  %v5168_v5 = vpop.permute.xlu0 %5167  ;;  %v7019_v17 = vld [vmem:[#allocation10 + $0x90] ss:$12 sps:$4 sm:$0xff]  }
 0xc79   : > { %5159 = vst.msk [vmem:[#allocation10 + $0x48] sm:$0xf] %vm5122_vm8, %v5154_v22  ;;  %5172 = vst.msk [vmem:[#allocation10 + $0x6c] sm:$0xf] %vm5122_vm8, %v5168_v5  ;;  %5323 = vmatpush1.bf16.msra.mxu0 %v7019_v17 }
 0xc7a   : > { %5324 = vmatprep.subr.bf16.mxu0 %v9513_v12 }
 0xc7c   : > { %v5142_v34 = vpop.permute.xlu1 %5141  ;;  %v5156_v41 = vpop.permute.xlu0 %5155  ;;  %v7020_v2 = vld [vmem:[#allocation10 + $0x78] ss:$12 sps:$4 sm:$0xff]  }
 0xc7d   : > { %5147 = vst.msk [vmem:[#allocation10 + $0x30] sm:$0xf] %vm5122_vm8, %v5142_v34  ;;  %5160 = vst.msk [vmem:[#allocation10 + $0x54] sm:$0xf] %vm5122_vm8, %v5156_v41  ;;  %5325 = vmatpush1.bf16.msra.mxu0 %v7020_v2 }
 0xc7e   : > { %5326 = vmatprep.subr.bf16.mxu0 %v9513_v12 }
 0xc80   : > { %v5130_v8 = vpop.permute.xlu1 %5129  ;;  %v5144_v52 = vpop.permute.xlu0 %5143  ;;  %v7021_v61 = vld [vmem:[#allocation10 + $0x60] ss:$12 sps:$4 sm:$0xff]  }
 0xc81   : > { %5135 = vst.msk [vmem:[#allocation10 + $0x18] sm:$0xf] %vm5122_vm8, %v5130_v8  ;;  %5148 = vst.msk [vmem:[#allocation10 + $0x3c] sm:$0xf] %vm5122_vm8, %v5144_v52  ;;  %5327 = vmatpush1.bf16.msra.mxu0 %v7021_v61 }
 0xc82   : > { %5328 = vmatprep.subr.bf16.mxu0 %v9513_v12 }
 0xc84   : > { %v5214_v42 = vpop.permute.xlu1 %5213  ;;  %v5132_v46 = vpop.permute.xlu0 %5131  ;;  %v7022_v63 = vld [vmem:[#allocation10 + $0x48] ss:$12 sps:$4 sm:$0xff]  }
 0xc85   : > { %5219 = vst.msk [vmem:[#allocation10 + $0xc0] sm:$0xf] %vm5122_vm8, %v5214_v42  ;;  %5136 = vst.msk [vmem:[#allocation10 + $0x24] sm:$0xf] %vm5122_vm8, %v5132_v46  ;;  %5329 = vmatpush1.bf16.msra.mxu0 %v7022_v63 }
 0xc86   : > { %5330 = vmatprep.subr.bf16.mxu0 %v9513_v12 }
 0xc88   : > { %v5216_v13 = vpop.permute.xlu0 %5215  ;;  %v7023_v26 = vld [vmem:[#allocation10 + $0x30] ss:$12 sps:$4 sm:$0xff]  }
 0xc89   : > { %5220 = vst.msk [vmem:[#allocation10 + $0xcc] sm:$0xf] %vm5122_vm8, %v5216_v13  ;;  %5331 = vmatpush1.bf16.msra.mxu0 %v7023_v26 }
 0xc8a   : > { %5332 = vmatprep.subr.bf16.mxu0 %v9513_v12 }
 0xc8c   : > { %v7024_v51 = vld [vmem:[#allocation10 + $0x18] ss:$12 sps:$4 sm:$0xff]  }
 0xc8d   : > { %5333 = vmatpush1.bf16.msra.mxu0 %v7024_v51 }
 0xc8e   : > { %5334 = vmatprep.subr.bf16.mxu0 %v9513_v12 }
 0xc90   : > { %v7026_v9 = vld [vmem:[#allocation10 + $0xc0] ss:$12 sps:$4 sm:$0xff]  }
 0xc91   : > { %5335 = vmatpush1.bf16.msra.mxu0 %v7025_v14  ;;  %v5247_v55 = vpop.permute.xlu1 %5246 }
 0xc92   : > { %5350 = vmatprep.subr.bf16.mxu0 %v9513_v12 }
 0xc95   : > { %5351 = vmatpush2.bf16.msra.mxu0 %v7026_v9  ;;  %v5252_v43 = vpop.permute.xlu0 %5251 }
 0xc96   : > { %6822 = vmatprep.subr.bf16.mxu0 %v7159_v3 }
 0xc98   : > { %5353 = vmatmul.mubr.bf16.vlgmr.msra.gmra.mxu0 %v7029_v33 }
 0xc99   : > { %6824 = vmatprep.mubr.msk.bf16.mxu0 %vm7161_vm5, %v7159_v3  ;;  %vm5963_vm5 = vcmask 27648  }
 0xc9a   : > { %5964 = vst.msk [vmem:[#allocation9] sm:$0xf] %vm5963_vm5, %v9513_v12  ;;  %5965 = vst.msk [vmem:[#allocation9 + $0x4] sm:$0xf] %vm5963_vm5, %v9513_v12 }
 0xd58   : > { %v5354_v25 = vpop.f32.mrf.mxu0 }
 0xd59   : > { %v5355_v49 = vadd.f32 %v5354_v25, %v5247_v55  ;;  %v7041_v25 = vld [vmem:[%s9569_s14] ss:$8 sps:$4 sm:$0xff]  }
 0xd5a   : > { %v5356_v29 = vpop.f32.mrf.mxu0 }
 0xd5b   : > { %v5361_v3 = vmax.f32 %v5355_v49, 0.0  ;;  %v7042_v49 = vld [vmem:[%s9570_s4] sm:$0x7f]   ;;  %s6731_s4 = sshll.u32 %s9577_s20, 4  ;;  %s7073_s20 = scalar_lea.vmem %s7072_s8, 32 }
 0xd5c   : > { %v5357_v54 = vpop.f32.mrf.mxu0  ;;  %v5656_v29 = vand.u32 %v7042_v49, %v8915_v50 }
 0xd5d   : > { %v5371_v20 = vsel %vm5370_vm6, %v5361_v3, 0.0  ;;  %v5358_v45 = vadd.f32 %v5357_v54, %v5252_v43  ;;  %v5633_v3 = vld [vmem:[%s9568_s19] sm:$0x1] }
 0xd5e   : > { %v6749_v36 = vpack.c.bf16 %v5371_v20, %v5371_v20  ;;  %v5359_v39 = vpop.f32.mrf.mxu0  ;;  %6823 = vmatpush3.bf16.msra.mxu0 %v5656_v29  ;;  %vm5634_vm9 = vcmp.ne.f32.partialorder %v5633_v3, 0.0 }
 0xd5f   : > { %v5362_v7 = vmax.f32 %v5358_v45, 0.0  ;;  %5910 = vmatprep.subr.bf16.mxu0 %v9513_v12  ;;  %v5635_v43 = vsel %vm5634_vm9, 1, %v9513_v12 }
 0xd60   : > { %5382 = vrot.lane.b32.xlu1 %v6749_v36, %s7166_s17  ;;  %v5639_v36 = vrot.slane %v5635_v43, %v9516_v53 }
 0xd61   : > { %v5372_v38 = vsel %vm5370_vm6, %v5362_v7, 0.0  ;;  %vm6337_vm6 = vcmask 57344  }
 0xd62   : > { %v6750_v60 = vpack.c.bf16 %v5372_v38, %v5372_v38  ;;  %vm5640_vm11 = vcmp.eq.s32.totalorder %v5639_v36, 1 }
 0xd64   : > { %5384 = vrot.lane.b32.xlu0 %v6750_v60, %s7166_s17 }
 0xdd2   : > { %v5383_v24 = vpop.permute.xlu1 %5382 }
 0xdd3   : > { %5389 = vst.msk [vmem:[#allocation7] sm:$0xf] %vm5388_vm10, %v5383_v24 }
 0xdd6   : > { %v5385_v31 = vpop.permute.xlu0 %5384 }
 0xdd7   : > { %5390 = vst.msk [vmem:[#allocation7 + $0x4] sm:$0xf] %vm5388_vm10, %v5385_v31 }
 0xdda   : > { %v5391_v57 = vld [vmem:[#allocation7] sm:$0xf] }
 0xddb   : > { %v5467_v32 = vld [vmem:[#allocation7] sm:$0xf]  ;;  %5393 = vst.msk [vmem:[#allocation10] sm:$0xf] %vm5122_vm8, %v5391_v57 }
 0xddc   : > { %5471 = vrot.lane.b32.xlu1 %v5467_v32, %s7155_s27  ;;  %v5455_v15 = vld [vmem:[#allocation7] sm:$0xf] }
 0xddd   : > { %v5443_v58 = vld [vmem:[#allocation7] sm:$0xf] }
 0xdde   : > { %v5392_v59 = vld [vmem:[#allocation7 + $0x4] sm:$0xf]  ;;  %v5431_v28 = vld [vmem:[#allocation7] sm:$0xf] }
 0xddf   : > { %v5468_v16 = vld [vmem:[#allocation7 + $0x4] sm:$0xf]  ;;  %5394 = vst.msk [vmem:[#allocation10 + $0xc] sm:$0xf] %vm5122_vm8, %v5392_v59  ;;  %v5419_v40 = vld [vmem:[#allocation7] sm:$0xf] }
 0xde0   : > { %5473 = vrot.lane.b32.xlu0 %v5468_v16, %s7155_s27  ;;  %5459 = vrot.lane.b32.xlu1 %v5455_v15, %s7156_s3  ;;  %v5456_v1 = vld [vmem:[#allocation7 + $0x4] sm:$0xf]  ;;  %v5407_v18 = vld [vmem:[#allocation7] sm:$0xf] }
 0xde1   : > { %v5444_v19 = vld [vmem:[#allocation7 + $0x4] sm:$0xf]  ;;  %v5395_v0 = vld [vmem:[#allocation7] sm:$0xf] }
 0xde2   : > { %v5432_v21 = vld [vmem:[#allocation7 + $0x4] sm:$0xf]  ;;  %v5479_v4 = vld [vmem:[#allocation7] sm:$0xf] }
 0xde3   : > { %v5420_v10 = vld [vmem:[#allocation7 + $0x4] sm:$0xf] }
 0xde4   : > { %5461 = vrot.lane.b32.xlu0 %v5456_v1, %s7156_s3  ;;  %5447 = vrot.lane.b32.xlu1 %v5443_v58, %s7162_s2  ;;  %v5408_v11 = vld [vmem:[#allocation7 + $0x4] sm:$0xf]  ;;  %s7167_s3 = smov 120  }
 0xde5   : > { %v5396_v30 = vld [vmem:[#allocation7 + $0x4] sm:$0xf] }
 0xde6   : > { %v5480_v27 = vld [vmem:[#allocation7 + $0x4] sm:$0xf] }
 0xde7   : > { %v7037_v47 = vld [vmem:[#allocation10] ss:$12 sps:$4 sm:$0xff]  }
 0xde8   : > { %5449 = vrot.lane.b32.xlu0 %v5444_v19, %s7162_s2  ;;  %5435 = vrot.lane.b32.xlu1 %v5431_v28, %s7163_s25 }
 0xdec   : > { %5437 = vrot.lane.b32.xlu0 %v5432_v21, %s7163_s25  ;;  %5423 = vrot.lane.b32.xlu1 %v5419_v40, %s7164_s22 }
 0xdf0   : > { %5425 = vrot.lane.b32.xlu0 %v5420_v10, %s7164_s22  ;;  %5411 = vrot.lane.b32.xlu1 %v5407_v18, %s9454_s24 }
 0xdf4   : > { %5413 = vrot.lane.b32.xlu0 %v5408_v11, %s9454_s24  ;;  %5399 = vrot.lane.b32.xlu1 %v5395_v0, %s9455_s23 }
 0xdf8   : > { %5401 = vrot.lane.b32.xlu0 %v5396_v30, %s9455_s23  ;;  %5483 = vrot.lane.b32.xlu1 %v5479_v4, %s7165_s0 }
 0xdfc   : > { %5485 = vrot.lane.b32.xlu0 %v5480_v27, %s7165_s0  ;;  %5516 = vperm.xlu1 %6916, %v6680_v44   ;;  %s9571_s0 = sld [smem:[#allocation37_spill]] }
 0xe00   : > { %5521 = vperm.xlu0 %6915, %v6681_v35  }
 0xe4e   : > { %v5472_v56 = vpop.permute.xlu1 %5471 }
 0xe4f   : > { %5477 = vst.msk [vmem:[#allocation10 + $0xa8] sm:$0xf] %vm5122_vm8, %v5472_v56 }
 0xe52   : > { %v5474_v48 = vpop.permute.xlu0 %5473  ;;  %v5460_v23 = vpop.permute.xlu1 %5459 }
 0xe53   : > { %5478 = vst.msk [vmem:[#allocation10 + $0xb4] sm:$0xf] %vm5122_vm8, %v5474_v48  ;;  %5465 = vst.msk [vmem:[#allocation10 + $0x90] sm:$0xf] %vm5122_vm8, %v5460_v23 }
 0xe56   : > { %v5462_v22 = vpop.permute.xlu0 %5461  ;;  %v5448_v5 = vpop.permute.xlu1 %5447 }
 0xe57   : > { %5466 = vst.msk [vmem:[#allocation10 + $0x9c] sm:$0xf] %vm5122_vm8, %v5462_v22  ;;  %5453 = vst.msk [vmem:[#allocation10 + $0x78] sm:$0xf] %vm5122_vm8, %v5448_v5 }
 0xe5a   : > { %v5450_v17 = vpop.permute.xlu0 %5449  ;;  %v5436_v34 = vpop.permute.xlu1 %5435  ;;  %v7030_v41 = vld [vmem:[#allocation10 + $0xa8] ss:$12 sps:$4 sm:$0xff]  }
 0xe5b   : > { %5454 = vst.msk [vmem:[#allocation10 + $0x84] sm:$0xf] %vm5122_vm8, %v5450_v17  ;;  %5441 = vst.msk [vmem:[#allocation10 + $0x60] sm:$0xf] %vm5122_vm8, %v5436_v34  ;;  %5591 = vmatpush1.bf16.msra.mxu1 %v7030_v41  ;;  %v6698_v17 = vld [vmem:[%s9278_s10 + $0x70] sm:$0xff] }
 0xe5c   : > { %5592 = vmatprep.subr.bf16.mxu1 %v9513_v12  ;;  %v7052_v41 = vld [vmem:[%s9571_s0 + $0x4] ss:$8 sps:$4 sm:$0xff]  }
 0xe5e   : > { %v5438_v2 = vpop.permute.xlu0 %5437  ;;  %v5424_v8 = vpop.permute.xlu1 %5423  ;;  %v7031_v52 = vld [vmem:[#allocation10 + $0x90] ss:$12 sps:$4 sm:$0xff]  }
 0xe5f   : > { %5442 = vst.msk [vmem:[#allocation10 + $0x6c] sm:$0xf] %vm5122_vm8, %v5438_v2  ;;  %5429 = vst.msk [vmem:[#allocation10 + $0x48] sm:$0xf] %vm5122_vm8, %v5424_v8  ;;  %5593 = vmatpush1.bf16.msra.mxu1 %v7031_v52  ;;  %v6699_v2 = vld [vmem:[%s9278_s10 + $0x78] sm:$0xff] }
 0xe60   : > { %5594 = vmatprep.subr.bf16.mxu1 %v9513_v12 }
 0xe62   : > { %v5426_v61 = vpop.permute.xlu0 %5425  ;;  %v5412_v42 = vpop.permute.xlu1 %5411  ;;  %v7032_v46 = vld [vmem:[#allocation10 + $0x78] ss:$12 sps:$4 sm:$0xff]  }
 0xe63   : > { %5430 = vst.msk [vmem:[#allocation10 + $0x54] sm:$0xf] %vm5122_vm8, %v5426_v61  ;;  %5417 = vst.msk [vmem:[#allocation10 + $0x30] sm:$0xf] %vm5122_vm8, %v5412_v42  ;;  %5595 = vmatpush1.bf16.msra.mxu1 %v7032_v46 }
 0xe64   : > { %5596 = vmatprep.subr.bf16.mxu1 %v9513_v12 }
 0xe66   : > { %v5414_v63 = vpop.permute.xlu0 %5413  ;;  %v5400_v13 = vpop.permute.xlu1 %5399  ;;  %v7033_v26 = vld [vmem:[#allocation10 + $0x60] ss:$12 sps:$4 sm:$0xff]  }
 0xe67   : > { %5418 = vst.msk [vmem:[#allocation10 + $0x3c] sm:$0xf] %vm5122_vm8, %v5414_v63  ;;  %5405 = vst.msk [vmem:[#allocation10 + $0x18] sm:$0xf] %vm5122_vm8, %v5400_v13  ;;  %5597 = vmatpush1.bf16.msra.mxu1 %v7033_v26 }
 0xe68   : > { %5598 = vmatprep.subr.bf16.mxu1 %v9513_v12 }
 0xe6a   : > { %v5402_v51 = vpop.permute.xlu0 %5401  ;;  %v5484_v14 = vpop.permute.xlu1 %5483  ;;  %v7034_v9 = vld [vmem:[#allocation10 + $0x48] ss:$12 sps:$4 sm:$0xff]  }
 0xe6b   : > { %5406 = vst.msk [vmem:[#allocation10 + $0x24] sm:$0xf] %vm5122_vm8, %v5402_v51  ;;  %5489 = vst.msk [vmem:[#allocation10 + $0xc0] sm:$0xf] %vm5122_vm8, %v5484_v14  ;;  %5599 = vmatpush1.bf16.msra.mxu1 %v7034_v9 }
 0xe6c   : > { %5600 = vmatprep.subr.bf16.mxu1 %v9513_v12 }
 0xe6e   : > { %v5486_v33 = vpop.permute.xlu0 %5485  ;;  %v7035_v6 = vld [vmem:[#allocation10 + $0x30] ss:$12 sps:$4 sm:$0xff]  }
 0xe6f   : > { %5490 = vst.msk [vmem:[#allocation10 + $0xcc] sm:$0xf] %vm5122_vm8, %v5486_v33  ;;  %5601 = vmatpush1.bf16.msra.mxu1 %v7035_v6 }
 0xe70   : > { %5602 = vmatprep.subr.bf16.mxu1 %v9513_v12 }
 0xe72   : > { %v7036_v62 = vld [vmem:[#allocation10 + $0x18] ss:$12 sps:$4 sm:$0xff]  }
 0xe73   : > { %5603 = vmatpush1.bf16.msra.mxu1 %v7036_v62 }
 0xe74   : > { %5604 = vmatprep.subr.bf16.mxu1 %v9513_v12 }
 0xe76   : > { %v7038_v55 = vld [vmem:[#allocation10 + $0xc0] ss:$12 sps:$4 sm:$0xff]  }
 0xe77   : > { %5605 = vmatpush1.bf16.msra.mxu1 %v7037_v47  ;;  %v5517_v54 = vpop.permute.xlu1 %5516 }
 0xe78   : > { %5620 = vmatprep.subr.bf16.mxu1 %v9513_v12 }
 0xe7b   : > { %5621 = vmatpush2.bf16.msra.mxu1 %v7038_v55  ;;  %v5522_v7 = vpop.permute.xlu0 %5521 }
 0xe7c   : > { %6180 = vmatprep.subr.bf16.mxu1 %v9513_v12 }
 0xe7e   : > { %5623 = vmatmul.mubr.bf16.vlgmr.msra.gmra.mxu1 %v7041_v25 }
 0xf3e   : > { %v5624_v20 = vpop.f32.mrf.mxu1 }
 0xf3f   : > { %v5625_v45 = vadd.f32 %v5624_v20, %v5517_v54 }
 0xf40   : > { %v5626_v39 = vpop.f32.mrf.mxu1 }
 0xf41   : > { %v5631_v60 = vmax.f32 %v5625_v45, 0.0  ;;  %v7054_v39 = vld [vmem:[%s9571_s0] ss:$8 sps:$4 sm:$0xff]  }
 0xf42   : > { %v5627_v38 = vpop.f32.mrf.mxu1 }
 0xf43   : > { %v5628_v50 = vadd.f32 %v5627_v38, %v5522_v7  ;;  %v5641_v57 = vsel %vm5640_vm11, %v5631_v60, 0.0  ;;  %v5953_v7 = vld [vmem:[%s9572_s6] sm:$0x1] }
 0xf44   : > { %v5629_v24 = vpop.f32.mrf.mxu1  ;;  %vm5954_vm15 = vcmp.ne.f32.partialorder %v5953_v7, 0.0 }
 0xf45   : > { %v5632_v31 = vmax.f32 %v5628_v50, 0.0  ;;  %v5955_v38 = vsel %vm5954_vm15, 1, %v9513_v12 }
 0xf46   : > { %v5959_v60 = vrot.slane %v5955_v38, %v9516_v53 }
 0xf47   : > { %v5642_v32 = vsel %vm5640_vm11, %v5632_v31, 0.0 }
 0xf48   : > { %v5643_v59 = vpack.c.bf16 %v5642_v32, %v5641_v57  ;;  %vm5960_vm0 = vcmp.eq.s32.totalorder %v5959_v60, 1 }
 0xf4a   : > { %6825 = vmatmul.mubr.msk.bf16.vlgmr.msra.gmra.mxu0 %vm5651_vm12, %v5643_v59 }
 0xf4b   : > { %6711 = vmatprep.mubr.msk.bf16.mxu0 %vm2843_vm3, %v7052_v41 }
0x100a   : > { %v5692_v16 = vpop.f32.mrf.mxu0 }
0x100b   : > { %v6751_v15 = vpack.c.bf16 %v5692_v16, %v5692_v16 }
0x100c   : > { %v6826_v1 = vpop.f32.mrf.mxu0 }
0x100d   : > { %5708 = vst.msk [vmem:[#allocation8] sm:$0xf] %vm5707_vm14, %v6751_v15 }
0x100e   : > { %v5695_v58 = vpop.f32.mrf.mxu0 }
0x100f   : > { %v6752_v19 = vpack.c.bf16 %v5695_v58, %v5695_v58 }
0x1010   : > { %v6827_v28 = vpop.f32.mrf.mxu0 }
0x1011   : > { %5709 = vst.msk [vmem:[#allocation8 + $0x4] sm:$0xf] %vm5707_vm14, %v6752_v19 }
0x1014   : > { %v5710_v21 = vld [vmem:[#allocation8] sm:$0xf] }
0x1015   : > { %v5787_v40 = vld [vmem:[#allocation8] sm:$0xf]  ;;  %5713 = vst.msk [vmem:[#allocation10] sm:$0xf] %vm5712_vm13, %v5710_v21 }
0x1016   : > { %5791 = vrot.lane.b32.xlu1 %v5787_v40, %s7162_s2  ;;  %v5775_v18 = vld [vmem:[#allocation8] sm:$0xf] }
0x1017   : > { %v5763_v0 = vld [vmem:[#allocation8] sm:$0xf] }
0x1018   : > { %v5711_v10 = vld [vmem:[#allocation8 + $0x4] sm:$0xf]  ;;  %v5751_v4 = vld [vmem:[#allocation8] sm:$0xf] }
0x1019   : > { %v5788_v11 = vld [vmem:[#allocation8 + $0x4] sm:$0xf]  ;;  %5714 = vst.msk [vmem:[#allocation10 + $0xc] sm:$0xf] %vm5712_vm13, %v5711_v10  ;;  %v5739_v27 = vld [vmem:[#allocation8] sm:$0xf] }
0x101a   : > { %5779 = vrot.lane.b32.xlu1 %v5775_v18, %s7163_s25  ;;  %5793 = vrot.lane.b32.xlu0 %v5788_v11, %s7162_s2  ;;  %v5776_v30 = vld [vmem:[#allocation8 + $0x4] sm:$0xf]  ;;  %v5727_v35 = vld [vmem:[#allocation8] sm:$0xf] }
0x101b   : > { %v5764_v44 = vld [vmem:[#allocation8 + $0x4] sm:$0xf]  ;;  %v5715_v48 = vld [vmem:[#allocation8] sm:$0xf] }
0x101c   : > { %v5752_v37 = vld [vmem:[#allocation8 + $0x4] sm:$0xf]  ;;  %v5799_v22 = vld [vmem:[#allocation8] sm:$0xf] }
0x101d   : > { %v5740_v56 = vld [vmem:[#allocation8 + $0x4] sm:$0xf] }
0x101e   : > { %5767 = vrot.lane.b32.xlu1 %v5763_v0, %s7164_s22  ;;  %5781 = vrot.lane.b32.xlu0 %v5776_v30, %s7163_s25  ;;  %v5728_v23 = vld [vmem:[#allocation8 + $0x4] sm:$0xf] }
0x101f   : > { %v5716_v5 = vld [vmem:[#allocation8 + $0x4] sm:$0xf] }
0x1020   : > { %v5800_v34 = vld [vmem:[#allocation8 + $0x4] sm:$0xf]  ;;  %v7050_v45 = vld [vmem:[#allocation10] ss:$12 sps:$4 sm:$0xff]  }
0x1022   : > { %5755 = vrot.lane.b32.xlu1 %v5751_v4, %s9452_s1  ;;  %5769 = vrot.lane.b32.xlu0 %v5764_v44, %s7164_s22 }
0x1026   : > { %5743 = vrot.lane.b32.xlu1 %v5739_v27, %s9453_s28  ;;  %5757 = vrot.lane.b32.xlu0 %v5752_v37, %s9452_s1 }
0x102a   : > { %5731 = vrot.lane.b32.xlu1 %v5727_v35, %s9454_s24  ;;  %5745 = vrot.lane.b32.xlu0 %v5740_v56, %s9453_s28 }
0x102e   : > { %5719 = vrot.lane.b32.xlu1 %v5715_v48, %s9455_s23  ;;  %5733 = vrot.lane.b32.xlu0 %v5728_v23, %s9454_s24 }
0x1032   : > { %5803 = vrot.lane.b32.xlu1 %v5799_v22, %s7167_s3  ;;  %5721 = vrot.lane.b32.xlu0 %v5716_v5, %s9455_s23 }
0x1036   : > { %5836 = vperm.xlu1 %6916, %v6698_v17   ;;  %5805 = vrot.lane.b32.xlu0 %v5800_v34, %s7167_s3 }
0x103a   : > { %5841 = vperm.xlu0 %6915, %v6699_v2  }
0x1088   : > { %v5792_v8 = vpop.permute.xlu1 %5791 }
0x1089   : > { %5797 = vst.msk [vmem:[#allocation10 + $0xa8] sm:$0xf] %vm5712_vm13, %v5792_v8  ;;  %v6714_v8 = vld [vmem:[%s9278_s10 + $0x80] sm:$0xff] }
0x108c   : > { %v5780_v52 = vpop.permute.xlu1 %5779  ;;  %v5794_v61 = vpop.permute.xlu0 %5793 }
0x108d   : > { %5785 = vst.msk [vmem:[#allocation10 + $0x90] sm:$0xf] %vm5712_vm13, %v5780_v52  ;;  %5798 = vst.msk [vmem:[#allocation10 + $0xb4] sm:$0xf] %vm5712_vm13, %v5794_v61 }
0x1090   : > { %v5768_v42 = vpop.permute.xlu1 %5767  ;;  %v5782_v46 = vpop.permute.xlu0 %5781 }
0x1091   : > { %5773 = vst.msk [vmem:[#allocation10 + $0x78] sm:$0xf] %vm5712_vm13, %v5768_v42  ;;  %5786 = vst.msk [vmem:[#allocation10 + $0x9c] sm:$0xf] %vm5712_vm13, %v5782_v46  ;;  %v6715_v42 = vld [vmem:[%s9278_s10 + $0x88] sm:$0xff] }
0x1094   : > { %v5756_v63 = vpop.permute.xlu1 %5755  ;;  %v5770_v13 = vpop.permute.xlu0 %5769  ;;  %v7043_v26 = vld [vmem:[#allocation10 + $0xa8] ss:$12 sps:$4 sm:$0xff]  }
0x1095   : > { %5761 = vst.msk [vmem:[#allocation10 + $0x60] sm:$0xf] %vm5712_vm13, %v5756_v63  ;;  %5774 = vst.msk [vmem:[#allocation10 + $0x84] sm:$0xf] %vm5712_vm13, %v5770_v13  ;;  %5911 = vmatpush1.bf16.msra.mxu0 %v7043_v26 }
0x1096   : > { %5912 = vmatprep.subr.bf16.mxu0 %v9513_v12 }
0x1098   : > { %v5744_v51 = vpop.permute.xlu1 %5743  ;;  %v5758_v14 = vpop.permute.xlu0 %5757  ;;  %v7044_v9 = vld [vmem:[#allocation10 + $0x90] ss:$12 sps:$4 sm:$0xff]  }
0x1099   : > { %5749 = vst.msk [vmem:[#allocation10 + $0x48] sm:$0xf] %vm5712_vm13, %v5744_v51  ;;  %5762 = vst.msk [vmem:[#allocation10 + $0x6c] sm:$0xf] %vm5712_vm13, %v5758_v14  ;;  %5913 = vmatpush1.bf16.msra.mxu0 %v7044_v9 }
0x109a   : > { %5914 = vmatprep.subr.bf16.mxu0 %v9513_v12 }
0x109c   : > { %v5732_v33 = vpop.permute.xlu1 %5731  ;;  %v5746_v6 = vpop.permute.xlu0 %5745  ;;  %v7045_v62 = vld [vmem:[#allocation10 + $0x78] ss:$12 sps:$4 sm:$0xff]  }
0x109d   : > { %5737 = vst.msk [vmem:[#allocation10 + $0x30] sm:$0xf] %vm5712_vm13, %v5732_v33  ;;  %5750 = vst.msk [vmem:[#allocation10 + $0x54] sm:$0xf] %vm5712_vm13, %v5746_v6  ;;  %5915 = vmatpush1.bf16.msra.mxu0 %v7045_v62 }
0x109e   : > { %5916 = vmatprep.subr.bf16.mxu0 %v9513_v12 }
0x10a0   : > { %v5720_v47 = vpop.permute.xlu1 %5719  ;;  %v5734_v55 = vpop.permute.xlu0 %5733  ;;  %v7046_v25 = vld [vmem:[#allocation10 + $0x60] ss:$12 sps:$4 sm:$0xff]  }
0x10a1   : > { %5725 = vst.msk [vmem:[#allocation10 + $0x18] sm:$0xf] %vm5712_vm13, %v5720_v47  ;;  %5738 = vst.msk [vmem:[#allocation10 + $0x3c] sm:$0xf] %vm5712_vm13, %v5734_v55  ;;  %5917 = vmatpush1.bf16.msra.mxu0 %v7046_v25 }
0x10a2   : > { %5918 = vmatprep.subr.bf16.mxu0 %v9513_v12 }
0x10a4   : > { %v5804_v49 = vpop.permute.xlu1 %5803  ;;  %v5722_v29 = vpop.permute.xlu0 %5721  ;;  %v7047_v3 = vld [vmem:[#allocation10 + $0x48] ss:$12 sps:$4 sm:$0xff]  }
0x10a5   : > { %5809 = vst.msk [vmem:[#allocation10 + $0xc0] sm:$0xf] %vm5712_vm13, %v5804_v49  ;;  %5726 = vst.msk [vmem:[#allocation10 + $0x24] sm:$0xf] %vm5712_vm13, %v5722_v29  ;;  %5919 = vmatpush1.bf16.msra.mxu0 %v7047_v3 }
0x10a6   : > { %5920 = vmatprep.subr.bf16.mxu0 %v9513_v12 }
0x10a8   : > { %v5806_v43 = vpop.permute.xlu0 %5805  ;;  %v7048_v54 = vld [vmem:[#allocation10 + $0x30] ss:$12 sps:$4 sm:$0xff]  }
0x10a9   : > { %5810 = vst.msk [vmem:[#allocation10 + $0xcc] sm:$0xf] %vm5712_vm13, %v5806_v43  ;;  %5921 = vmatpush1.bf16.msra.mxu0 %v7048_v54 }
0x10aa   : > { %5922 = vmatprep.subr.bf16.mxu0 %v9513_v12 }
0x10ac   : > { %v7049_v20 = vld [vmem:[#allocation10 + $0x18] ss:$12 sps:$4 sm:$0xff]  }
0x10ad   : > { %5923 = vmatpush1.bf16.msra.mxu0 %v7049_v20 }
0x10ae   : > { %5924 = vmatprep.subr.bf16.mxu0 %v9513_v12 }
0x10b0   : > { %v7051_v36 = vld [vmem:[#allocation10 + $0xc0] ss:$12 sps:$4 sm:$0xff]  }
0x10b1   : > { %5925 = vmatpush1.bf16.msra.mxu0 %v7050_v45  ;;  %v5837_v50 = vpop.permute.xlu1 %5836 }
0x10b2   : > { %5940 = vmatprep.subr.bf16.mxu0 %v9513_v12 }
0x10b5   : > { %5941 = vmatpush2.bf16.msra.mxu0 %v7051_v36  ;;  %v5842_v59 = vpop.permute.xlu0 %5841 }
0x10b8   : > { %5943 = vmatmul.mubr.bf16.vlgmr.msra.gmra.mxu0 %v7054_v39 }
0x1178   : > { %v5944_v24 = vpop.f32.mrf.mxu0 }
0x1179   : > { %v5945_v31 = vadd.f32 %v5944_v24, %v5837_v50  ;;  %v6234_v24 = vld [vmem:[%s9574_s7 + $0x8] sm:$0x1] }
0x117a   : > { %v5946_v57 = vpop.f32.mrf.mxu0 }
0x117b   : > { %v5951_v32 = vmax.f32 %v5945_v31, 0.0  ;;  %v6233_v31 = vld [vmem:[%s9574_s7] sm:$0xff] }
0x117c   : > { %v5947_v16 = vpop.f32.mrf.mxu0  ;;  %v6223_v57 = vld [vmem:[%s9572_s6] sm:$0x1] }
0x117d   : > { %v5961_v15 = vsel %vm5960_vm0, %v5951_v32, 0.0  ;;  %v5948_v1 = vadd.f32 %v5947_v16, %v5842_v59  ;;  %vm6224_vm7 = vcmp.ne.f32.partialorder %v6223_v57, 0.0 }
0x117e   : > { %v6753_v58 = vpack.c.bf16 %v5961_v15, %v5961_v15  ;;  %v5949_v19 = vpop.f32.mrf.mxu0  ;;  %v6225_v32 = vsel %vm6224_vm7, 1, %v9513_v12 }
0x117f   : > { %v5952_v28 = vmax.f32 %v5948_v1, 0.0  ;;  %v6229_v59 = vrot.slane %v6225_v32, %v9516_v53 }
0x1180   : > { %5972 = vrot.lane.b32.xlu1 %v6753_v58, %s7168_s26 }
0x1181   : > { %v5962_v21 = vsel %vm5960_vm0, %v5952_v28, 0.0  ;;  %vm6230_vm8 = vcmp.eq.s32.totalorder %v6229_v59, 1 }
0x1182   : > { %v6754_v40 = vpack.c.bf16 %v5962_v21, %v5962_v21 }
0x1184   : > { %5974 = vrot.lane.b32.xlu0 %v6754_v40, %s7168_s26  ;;  %s9575_s26 = sld [smem:[#allocation15_spill]] }
0x11f2   : > { %v5973_v10 = vpop.permute.xlu1 %5972 }
0x11f3   : > { %5979 = vst.msk [vmem:[#allocation9] sm:$0xf] %vm5978_vm2, %v5973_v10 }
0x11f6   : > { %v5975_v18 = vpop.permute.xlu0 %5974 }
0x11f7   : > { %5980 = vst.msk [vmem:[#allocation9 + $0x4] sm:$0xf] %vm5978_vm2, %v5975_v18 }
0x11fa   : > { %v5981_v11 = vld [vmem:[#allocation9] sm:$0xf] }
0x11fb   : > { %v6057_v0 = vld [vmem:[#allocation9] sm:$0xf]  ;;  %5983 = vst.msk [vmem:[#allocation10] sm:$0xf] %vm5712_vm13, %v5981_v11 }
0x11fc   : > { %6061 = vrot.lane.b32.xlu1 %v6057_v0, %s7162_s2  ;;  %v6045_v44 = vld [vmem:[#allocation9] sm:$0xf] }
0x11fd   : > { %v6033_v37 = vld [vmem:[#allocation9] sm:$0xf] }
0x11fe   : > { %v5982_v30 = vld [vmem:[#allocation9 + $0x4] sm:$0xf]  ;;  %v6021_v56 = vld [vmem:[#allocation9] sm:$0xf] }
0x11ff   : > { %v6058_v4 = vld [vmem:[#allocation9 + $0x4] sm:$0xf]  ;;  %5984 = vst.msk [vmem:[#allocation10 + $0xc] sm:$0xf] %vm5712_vm13, %v5982_v30  ;;  %v6009_v23 = vld [vmem:[#allocation9] sm:$0xf] }
0x1200   : > { %6063 = vrot.lane.b32.xlu0 %v6058_v4, %s7162_s2  ;;  %6049 = vrot.lane.b32.xlu1 %v6045_v44, %s7163_s25  ;;  %v6046_v27 = vld [vmem:[#allocation9 + $0x4] sm:$0xf]  ;;  %v5997_v5 = vld [vmem:[#allocation9] sm:$0xf] }
0x1201   : > { %v6034_v35 = vld [vmem:[#allocation9 + $0x4] sm:$0xf]  ;;  %v5985_v34 = vld [vmem:[#allocation9] sm:$0xf] }
0x1202   : > { %v6022_v48 = vld [vmem:[#allocation9 + $0x4] sm:$0xf]  ;;  %v6069_v2 = vld [vmem:[#allocation9] sm:$0xf] }
0x1203   : > { %v6010_v22 = vld [vmem:[#allocation9 + $0x4] sm:$0xf] }
0x1204   : > { %6051 = vrot.lane.b32.xlu0 %v6046_v27, %s7163_s25  ;;  %6037 = vrot.lane.b32.xlu1 %v6033_v37, %s7164_s22  ;;  %v5998_v17 = vld [vmem:[#allocation9 + $0x4] sm:$0xf]  ;;  %s9580_s25 = sld [smem:[#allocation48_spill]] }
0x1205   : > { %v5986_v41 = vld [vmem:[#allocation9 + $0x4] sm:$0xf] }
0x1206   : > { %v6070_v52 = vld [vmem:[#allocation9 + $0x4] sm:$0xf]  ;;  %v7062_v38 = vld [vmem:[#allocation10] ss:$12 sps:$4 sm:$0xff]  }
0x1208   : > { %6039 = vrot.lane.b32.xlu0 %v6034_v35, %s7164_s22  ;;  %6025 = vrot.lane.b32.xlu1 %v6021_v56, %s9452_s1  ;;  %s9573_s22 = sld [smem:[#allocation38_spill]] }
0x120a   : > { %s6350_s0 = scalar_lea.hbm %s9580_s25, %s6731_s4 }
0x120c   : > { %6027 = vrot.lane.b32.xlu0 %v6022_v48, %s9452_s1  ;;  %6013 = vrot.lane.b32.xlu1 %v6009_v23, %s9453_s28 }
0x120e   : > { %v7064_v61 = vld [vmem:[%s9573_s22 + $0x4] ss:$8 sps:$4 sm:$0xff]   ;;  %v7066_v50 = vld [vmem:[%s9573_s22] ss:$8 sps:$4 sm:$0xff]  }
0x120f   : > { %6727 = vmatprep.mubr.msk.bf16.mxu1 %vm2843_vm3, %v7064_v61  ;;  %vm6242_vm3 = vcmask 1040384  }
0x1210   : > { %6015 = vrot.lane.b32.xlu0 %v6010_v22, %s9453_s28  ;;  %6001 = vrot.lane.b32.xlu1 %v5997_v5, %s9454_s24  ;;  %s9576_s28 = sld [smem:[#allocation46_spill]] }
0x1211   : > { %6828 = vmatprep.subr.msk.mxu0 %vm6242_vm3, %v6234_v24 }
0x1212   : > { %6829 = vmatpush3.msk.msra.mxu0 %vm6242_vm3, %v6234_v24 }
0x1213   : > { %6830 = vmatprep.subr.mxu0 %v6233_v31 }
0x1214   : > { %6003 = vrot.lane.b32.xlu0 %v5998_v17, %s9454_s24  ;;  %5989 = vrot.lane.b32.xlu1 %v5985_v34, %s9455_s23  ;;  %v6335_v34 = vld [vmem:[%s9579_s30] sm:$0x1]  ;;  %s9581_s24 = smov %s9580_s25 }
0x1215   : > { %6831 = vmatpush3.msra.mxu0 %v6233_v31 }
0x1216   : > { %v6321_v30 = vld [vmem:[%s9576_s28] sm:$0xff] }
0x1218   : > { %5991 = vrot.lane.b32.xlu0 %v5986_v41, %s9455_s23  ;;  %6073 = vrot.lane.b32.xlu1 %v6069_v2, %s7167_s3  ;;  %s647_s23 = sand.u32 1, %s9575_s26  }
0x1219   : > { %s648_s17 = scalar_lea.vmem [#allocation11], %s647_s23  ;;  %s6340_s26 = scalar_lea.sflag [#allocation12], %s647_s23 }
0x121a   : > { %s6352_s27 = sshll.u32 %s648_s17, 4  ;;  %s6353_s27 = int_to_ptr.vmem [resolvable:$true] %s6352_s27 }
0x121b   : > { %s7067_s5 = scalar_lea.vmem %s6353_s27, 16  ;;  %p7074_p0 = scmp.lt.s32.totalorder %s6353_s27, %s7072_s8 }
0x121c   : > { %6075 = vrot.lane.b32.xlu0 %v6070_v52, %s7167_s3  ;;  %6106 = vperm.xlu1 %6916, %v6714_v8   ;;  %p7068_p11 = scmp.ne.s32.totalorder %s6353_s27, %s7067_s5  ;;  %p7075_p1 = scmp.lt.s32.totalorder %s7073_s20, %s7067_s5 }
0x121e   : > { %p7069_p12 = pnand %p7068_p11, %p7318_p5  ;;  %p7076_p2 = por %p7075_p1, %p7074_p0 }
0x1220   : > { %6111 = vperm.xlu0 %6915, %v6715_v42   ;;  %p7070_p13 = pneg %p7069_p12 }
0x1222   : > { %p7077_p3 = pnand %p7076_p2, %p7070_p13 }
0x126e   : > { %v6062_v46 = vpop.permute.xlu1 %6061 }
0x126f   : > { %6067 = vst.msk [vmem:[#allocation10 + $0xa8] sm:$0xf] %vm5712_vm13, %v6062_v46 }
0x1272   : > { %v6064_v63 = vpop.permute.xlu0 %6063  ;;  %v6050_v13 = vpop.permute.xlu1 %6049 }
0x1273   : > { %6068 = vst.msk [vmem:[#allocation10 + $0xb4] sm:$0xf] %vm5712_vm13, %v6064_v63  ;;  %6055 = vst.msk [vmem:[#allocation10 + $0x90] sm:$0xf] %vm5712_vm13, %v6050_v13 }
0x1276   : > { %v6052_v26 = vpop.permute.xlu0 %6051  ;;  %v6038_v51 = vpop.permute.xlu1 %6037 }
0x1277   : > { %6056 = vst.msk [vmem:[#allocation10 + $0x9c] sm:$0xf] %vm5712_vm13, %v6052_v26  ;;  %6043 = vst.msk [vmem:[#allocation10 + $0x78] sm:$0xf] %vm5712_vm13, %v6038_v51 }
0x127a   : > { %v6040_v14 = vpop.permute.xlu0 %6039  ;;  %v6026_v9 = vpop.permute.xlu1 %6025  ;;  %v7055_v33 = vld [vmem:[#allocation10 + $0xa8] ss:$12 sps:$4 sm:$0xff]  }
0x127b   : > { %6044 = vst.msk [vmem:[#allocation10 + $0x84] sm:$0xf] %vm5712_vm13, %v6040_v14  ;;  %6031 = vst.msk [vmem:[#allocation10 + $0x60] sm:$0xf] %vm5712_vm13, %v6026_v9  ;;  %6181 = vmatpush1.bf16.msra.mxu1 %v7055_v33 }
0x127c   : > { %6182 = vmatprep.subr.bf16.mxu1 %v9513_v12 }
0x127e   : > { %v6028_v6 = vpop.permute.xlu0 %6027  ;;  %v6014_v62 = vpop.permute.xlu1 %6013  ;;  %v7056_v47 = vld [vmem:[#allocation10 + $0x90] ss:$12 sps:$4 sm:$0xff]  }
0x127f   : > { %6032 = vst.msk [vmem:[#allocation10 + $0x6c] sm:$0xf] %vm5712_vm13, %v6028_v6  ;;  %6019 = vst.msk [vmem:[#allocation10 + $0x48] sm:$0xf] %vm5712_vm13, %v6014_v62  ;;  %6183 = vmatpush1.bf16.msra.mxu1 %v7056_v47 }
0x1280   : > { %6184 = vmatprep.subr.bf16.mxu1 %v9513_v12 }
0x1282   : > { %v6016_v55 = vpop.permute.xlu0 %6015  ;;  %v6002_v25 = vpop.permute.xlu1 %6001  ;;  %v7057_v49 = vld [vmem:[#allocation10 + $0x78] ss:$12 sps:$4 sm:$0xff]  }
0x1283   : > { %6020 = vst.msk [vmem:[#allocation10 + $0x54] sm:$0xf] %vm5712_vm13, %v6016_v55  ;;  %6007 = vst.msk [vmem:[#allocation10 + $0x30] sm:$0xf] %vm5712_vm13, %v6002_v25  ;;  %6185 = vmatpush1.bf16.msra.mxu1 %v7057_v49 }
0x1284   : > { %6186 = vmatprep.subr.bf16.mxu1 %v9513_v12 }
0x1286   : > { %v6004_v29 = vpop.permute.xlu0 %6003  ;;  %v5990_v3 = vpop.permute.xlu1 %5989  ;;  %v7058_v43 = vld [vmem:[#allocation10 + $0x60] ss:$12 sps:$4 sm:$0xff]  }
0x1287   : > { %6008 = vst.msk [vmem:[#allocation10 + $0x3c] sm:$0xf] %vm5712_vm13, %v6004_v29  ;;  %5995 = vst.msk [vmem:[#allocation10 + $0x18] sm:$0xf] %vm5712_vm13, %v5990_v3  ;;  %6187 = vmatpush1.bf16.msra.mxu1 %v7058_v43 }
0x1288   : > { %6188 = vmatprep.subr.bf16.mxu1 %v9513_v12 }
0x128a   : > { %v5992_v54 = vpop.permute.xlu0 %5991  ;;  %v6074_v20 = vpop.permute.xlu1 %6073  ;;  %v7059_v45 = vld [vmem:[#allocation10 + $0x48] ss:$12 sps:$4 sm:$0xff]  }
0x128b   : > { %5996 = vst.msk [vmem:[#allocation10 + $0x24] sm:$0xf] %vm5712_vm13, %v5992_v54  ;;  %6079 = vst.msk [vmem:[#allocation10 + $0xc0] sm:$0xf] %vm5712_vm13, %v6074_v20  ;;  %6189 = vmatpush1.bf16.msra.mxu1 %v7059_v45 }
0x128c   : > { %6190 = vmatprep.subr.bf16.mxu1 %v9513_v12 }
0x128e   : > { %v6076_v36 = vpop.permute.xlu0 %6075  ;;  %v7060_v39 = vld [vmem:[#allocation10 + $0x30] ss:$12 sps:$4 sm:$0xff]  }
0x128f   : > { %6080 = vst.msk [vmem:[#allocation10 + $0xcc] sm:$0xf] %vm5712_vm13, %v6076_v36  ;;  %6191 = vmatpush1.bf16.msra.mxu1 %v7060_v39 }
0x1290   : > { %6192 = vmatprep.subr.bf16.mxu1 %v9513_v12 }
0x1292   : > { %v7061_v7 = vld [vmem:[#allocation10 + $0x18] ss:$12 sps:$4 sm:$0xff]  }
0x1293   : > { %6193 = vmatpush1.bf16.msra.mxu1 %v7061_v7 }
0x1294   : > { %6194 = vmatprep.subr.bf16.mxu1 %v9513_v12 }
0x1296   : > { %v7063_v60 = vld [vmem:[#allocation10 + $0xc0] ss:$12 sps:$4 sm:$0xff]  }
0x1297   : > { %6195 = vmatpush1.bf16.msra.mxu1 %v7062_v38  ;;  %v6107_v16 = vpop.permute.xlu1 %6106 }
0x1298   : > { %6210 = vmatprep.subr.bf16.mxu1 %v9513_v12  ;;  %v6322_v12 = vld [vmem:[%s9576_s28 + $0x8] sm:$0xff] }
0x129b   : > { %6211 = vmatpush2.bf16.msra.mxu1 %v7063_v60  ;;  %v6112_v28 = vpop.permute.xlu0 %6111 }
0x129e   : > { %6213 = vmatmul.mubr.bf16.vlgmr.msra.gmra.mxu1 %v7066_v50 }
0x135e   : > { %v6214_v15 = vpop.f32.mrf.mxu1 }
0x135f   : > { %v6215_v1 = vadd.f32 %v6214_v15, %v6107_v16 }
0x1360   : > { %v6216_v58 = vpop.f32.mrf.mxu1 }
0x1361   : > { %v6221_v19 = vmax.f32 %v6215_v1, 0.0 }
0x1362   : > { %v6217_v21 = vpop.f32.mrf.mxu1 }
0x1363   : > { %v6231_v40 = vsel %vm6230_vm8, %v6221_v19, 0.0  ;;  %v6218_v10 = vadd.f32 %v6217_v21, %v6112_v28 }
0x1364   : > { %v6219_v18 = vpop.f32.mrf.mxu1  ;;  %6832 = vmatprep.mubr.msk.f32.mxu0 %vm6235_vm4, %v6231_v40 }
0x1365   : > { %v6222_v11 = vmax.f32 %v6218_v10, 0.0 }
0x1367   : > { %v6232_v0 = vsel %vm6230_vm8, %v6222_v11, 0.0 }
0x1368   : > { %6833 = vmatmul.mubr.msk.f32.vlgmr.msra.gmra.mxu0 %vm6235_vm4, %v6232_v0 }
0x1428   : > { %v6834_v53 = vpop.f32.mrf.mxu0 }
0x1429   : > { %v6324_v4 = vmul.f32 %v6834_v53, %v6322_v12 }
0x142a   : > { %v6312_v44 = vpop.f32.mrf.mxu0 }
0x142b   : > { %v6323_v27 = vmul.f32 %v6321_v30, %v6312_v44  ;;  %v6327_v37 = vsel %vm6325_vm1, %v6324_v4, 0.0 }
0x142d   : > { %v6326_v35 = vsel %vm6325_vm1, %v6323_v27, 0.0 }
0x142e   : > { %v6328_v56 = vadd.f32 %v6327_v37, %v6326_v35 }
0x1430   : > { %v6329_v48 = vrot.slane %v6328_v56, 4 }
0x1432   : > { %v6330_v23 = vadd.f32 %v6329_v48, %v6328_v56 }
0x1434   : > { %v6331_v22 = vrot.slane %v6330_v23, 2 }
0x1436   : > { %v6332_v5 = vadd.f32 %v6331_v22, %v6330_v23 }
0x1438   : > { %v6333_v17 = vrot.slane %v6332_v5, 1 }
0x143a   : > { %v6334_v41 = vadd.f32 %v6333_v17, %v6332_v5 }
0x143c   : > { %v6336_v2 = vadd.f32 %v6335_v34, %v6334_v41 }
0x143e   : > { %6338 = vst.msk [vmem:[%s648_s17] sm:$0x1] %vm6337_vm6, %v6336_v2 }
0x143f   : > { %7080 = shalt.err (!%p7077_p3)
}
0x1440   : > { %s7081_s30 = scalar_lea.hbm %s6350_s0, 16  ;;  %s7085_s17 = scalar_lea.hbm %s9581_s24, 32 }
0x1441   : > { %p7082_p4 = scmp.ne.s32.totalorder %s6350_s0, %s7081_s30  ;;  %p7086_p9 = scmp.lt.s32.totalorder %s6350_s0, %s9581_s24 }
0x1442   : > { %p7087_p10 = scmp.lt.s32.totalorder %s7085_s17, %s7081_s30 }
0x1443   : > { %p7083_p7 = pnand %p7082_p4, %p7318_p5 }
0x1444   : > { %p7088_p11 = por %p7087_p10, %p7086_p9 }
0x1445   : > { %p7084_p8 = pneg %p7083_p7 }
0x1447   : > { %p7089_p12 = pnand %p7088_p11, %p7084_p8 }
0x1449   : > { %7092 = shalt.err (!%p7089_p12)
}
0x144a   : > { %6836 = dma.vmem_to_hbm [thread:$0]  (%p7318_p5), %s6353_s27, 16, %s6350_s0, %s6340_s26  }
0x144b PF: > { %s9582_s5 = sld [smem:[#allocation17_spill]] }
0x144c   : > { %s9583_s25 = sld [smem:[#allocation14_spill]] }
0x1451   : > { %p6842_p13 = scmp.ge.s32.totalorder %s9582_s5, 2 }
0x1452   : > { %s6364_s8 = sand.u32 1, %s9583_s25  }
0x1453   : > { %p6839_p0 = pnand %p6842_p13, %p7322_p6  ;;  %s6365_s20 = scalar_lea.sflag [#allocation12], %s6364_s8 }
0x1455   : > { %p6840_p1 = pneg %p6839_p0 }
0x1457   : > { %7110 = dma.done.wait (%p6840_p1), %s6365_s20, 16  }
0x1458   : > { %7112 = vsyncadd (%p6840_p1), %s6365_s20, 4294967280  ;;  %s9585_s27 = sld [smem:[#allocation19_spill]] }
0x1459   : > { %s9586_s2 = sld [smem:[#allocation15_spill]] }
0x145a   : > { %s9587_s25 = sld [smem:[#allocation16_spill]] }
0x145b   : > { %s9588_s26 = sld [smem:[#allocation20_spill]] }
0x145e   : > { %p31_p2 = scmp.ge.s32.totalorder %s9585_s27, 4  }
0x1460   :  { %33 = sbr.rel (!%p31_p2) target bundleno = 24 (0x18), region = 147 }
0x1465   :  { %6369 = vsyncpa [#allocation12], 1 }
0x1466   :  { %6371 = vsyncpa [#allocation12 + $0x1], 1 }

</bundles_post_ra>
